<compile_context>
chip_gen: v5e
topology: v5e:2x2
jax: 0.10.0
libtpu: 0.0.40
codegen_flags: <defaults>
</compile_context>

<pallas_src>
import jax
import jax.numpy as jnp
from jax.experimental import pallas as pl
from jax.experimental.pallas import tpu as pltpu


def _round_up(x, m):
    return (x + m - 1) // m * m


# ----------------------------------------------------------------------------
# Pallas kernel: transposed conv GEMM   out = relu(W @ patches + b)
#   W:(Cout,Kp) bf16, patches:(Kp,tm) bf16, b:(Cout,1) f32 -> out:(Cout,tm) bf16
# ----------------------------------------------------------------------------
def _conv_gemm_kernel(w_ref, x_ref, b_ref, o_ref):
    acc = jnp.dot(w_ref[...], x_ref[...], preferred_element_type=jnp.float32)
    acc = jnp.maximum(acc + b_ref[...], 0.0)
    o_ref[...] = acc.astype(o_ref.dtype)


def _conv_gemm(w_mat, patches, b_col, *, tm):
    Cout, Kp = w_mat.shape
    Kp2, Mp = patches.shape
    assert Kp == Kp2 and Mp % tm == 0
    cost = pl.CostEstimate(
        flops=2 * Cout * Kp * Mp,
        transcendentals=0,
        bytes_accessed=(w_mat.size + patches.size + Cout * Mp) * 2
        + b_col.size * 4,
    )
    return pl.pallas_call(
        _conv_gemm_kernel,
        out_shape=jax.ShapeDtypeStruct((Cout, Mp), jnp.bfloat16),
        grid=(Mp // tm,),
        in_specs=[
            pl.BlockSpec((Cout, Kp), lambda i: (0, 0)),   # weights (constant block)
            pl.BlockSpec((Kp, tm), lambda i: (0, i)),     # patches: march along M
            pl.BlockSpec((Cout, 1), lambda i: (0, 0)),    # per-channel bias
        ],
        out_specs=pl.BlockSpec((Cout, tm), lambda i: (0, i)),
        compiler_params=pltpu.CompilerParams(
            dimension_semantics=("parallel",)),
        cost_estimate=cost,
    )(w_mat, patches, b_col)


# ----------------------------------------------------------------------------
# im2col from channel-major (C, N, H, W) activations, transposed + padded.
#   patch row index  = c*k*k + kh*k + kw  (matches torch weight flattening)
#   patch col index  = n*Ho*Wo + ho*Wo + wo
# ----------------------------------------------------------------------------
def _im2col_t(x, k, s, Kp, Mp):
    C, N, H, W = x.shape
    Ho = (H - k) // s + 1
    Wo = (W - k) // s + 1
    taps = []
    for di in range(k):
        for dj in range(k):
            taps.append(x[:, :, di:di + s * Ho:s, dj:dj + s * Wo:s])  # (C,N,Ho,Wo)
    p = jnp.stack(taps, axis=1)                       # (C, k*k, N, Ho, Wo)
    p = p.reshape(C * k * k, N * Ho * Wo)
    p = jnp.pad(p, ((0, Kp - C * k * k), (0, Mp - N * Ho * Wo)))
    return p


def conv2d_relu(x_cnhw, w_mat, b_col, *, k, stride, tm_max=512):
    """x: (Cin, N, H, W) bf16; w_mat: (Cout, Kp) bf16; b_col: (Cout, 1) f32.
    Returns channel-major activation (Cout, N, Ho, Wo) bf16."""
    C, N, H, W = x_cnhw.shape
    Cout, Kp = w_mat.shape
    Ho = (H - k) // stride + 1
    Wo = (W - k) // stride + 1
    M = N * Ho * Wo
    tm = min(tm_max, _round_up(M, 128))
    Mp = _round_up(M, tm)
    patches = _im2col_t(x_cnhw, k, stride, Kp, Mp)    # (Kp, Mp) bf16
    out = _conv_gemm(w_mat, patches, b_col, tm=tm)    # (Cout, Mp) bf16
    return out[:, :M].reshape(Cout, N, Ho, Wo)


# ----------------------------------------------------------------------------
# Fused MLP head: out = (relu(x @ W4 + b4)) @ W5 + b5   (single pallas_call)
#   x:(N,Kp) bf16, W4:(Kp,512) bf16, W5:(512,128) bf16 (zero-padded cols)
# ----------------------------------------------------------------------------
def _mlp_head_kernel(x_ref, w4_ref, b4_ref, w5_ref, b5_ref, o_ref):
    h = jnp.dot(x_ref[...], w4_ref[...], preferred_element_type=jnp.float32)
    h = jnp.maximum(h + b4_ref[...], 0.0)                       # (N, 512) f32
    o = jnp.dot(h.astype(jnp.bfloat16), w5_ref[...],
                preferred_element_type=jnp.float32)
    o_ref[...] = o + b5_ref[...]


def mlp_head(x, w4, b4, w5, b5):
    N, Kp = x.shape
    Kp2, Hdim = w4.shape
    Hdim2, Np = w5.shape
    assert Kp == Kp2 and Hdim == Hdim2
    cost = pl.CostEstimate(
        flops=2 * N * Kp * Hdim + 2 * N * Hdim * Np,
        transcendentals=0,
        bytes_accessed=(x.size + w4.size + w5.size) * 2
        + (b4.size + b5.size + N * Np) * 4,
    )
    return pl.pallas_call(
        _mlp_head_kernel,
        out_shape=jax.ShapeDtypeStruct((N, Np), jnp.float32),
        grid=(1,),
        in_specs=[
            pl.BlockSpec((N, Kp), lambda i: (0, 0)),
            pl.BlockSpec((Kp, Hdim), lambda i: (0, 0)),
            pl.BlockSpec((1, Hdim), lambda i: (0, 0)),
            pl.BlockSpec((Hdim, Np), lambda i: (0, 0)),
            pl.BlockSpec((1, Np), lambda i: (0, 0)),
        ],
        out_specs=pl.BlockSpec((N, Np), lambda i: (0, 0)),
        compiler_params=pltpu.CompilerParams(
            dimension_semantics=("arbitrary",)),
        cost_estimate=cost,
    )(x, w4, b4, w5, b5)


# ----------------------------------------------------------------------------
# Parameters (deterministic, PyTorch-default-style uniform init) + one-time
# conversion to GEMM-native bf16 layout.
# ----------------------------------------------------------------------------
def _uniform(key, shape, fan_in):
    bound = 1.0 / jnp.sqrt(jnp.float32(fan_in))
    return jax.random.uniform(key, shape, jnp.float32, -bound, bound)


def init_params(key):
    ks = jax.random.split(key, 10)
    p = {}
    p["w1"] = _uniform(ks[0], (32, 4, 8, 8), 4 * 8 * 8)
    p["b1"] = _uniform(ks[1], (32,), 4 * 8 * 8)
    p["w2"] = _uniform(ks[2], (64, 32, 4, 4), 32 * 4 * 4)
    p["b2"] = _uniform(ks[3], (64,), 32 * 4 * 4)
    p["w3"] = _uniform(ks[4], (64, 64, 3, 3), 64 * 3 * 3)
    p["b3"] = _uniform(ks[5], (64,), 64 * 3 * 3)
    p["w4"] = _uniform(ks[6], (7 * 7 * 64, 512), 7 * 7 * 64)   # stored (K, N)
    p["b4"] = _uniform(ks[7], (512,), 7 * 7 * 64)
    p["w5"] = _uniform(ks[8], (512, 4), 512)                   # stored (K, N)
    p["b5"] = _uniform(ks[9], (4,), 512)
    return p


def prepare_params(p):
    """One-time prep: flatten conv weights to (Cout, Kp), zero-pad K (and the
    final logit dim) to 128-multiples, cast weights to bf16, biases to f32."""
    prep = {}
    for wn, bn in (("w1", "b1"), ("w2", "b2"), ("w3", "b3")):
        w = p[wn]
        cout = w.shape[0]
        kdim = w.shape[1] * w.shape[2] * w.shape[3]
        kp = _round_up(kdim, 128)
        wm = jnp.pad(w.reshape(cout, kdim), ((0, 0), (0, kp - kdim)))
        prep[wn] = wm.astype(jnp.bfloat16)
        prep[bn] = p[bn].reshape(cout, 1).astype(jnp.float32)
    kdim, hdim = p["w4"].shape
    kp = _round_up(kdim, 128)
    prep["w4"] = jnp.pad(p["w4"], ((0, kp - kdim), (0, 0))).astype(jnp.bfloat16)
    prep["b4"] = p["b4"].reshape(1, hdim).astype(jnp.float32)
    hdim2, nout = p["w5"].shape
    npad = _round_up(nout, 128)
    prep["w5"] = jnp.pad(p["w5"], ((0, 0), (0, npad - nout))).astype(jnp.bfloat16)
    prep["b5"] = jnp.pad(p["b5"], (0, npad - nout)).reshape(1, npad).astype(jnp.float32)
    return prep


# ----------------------------------------------------------------------------
# Forward pass == CNN_Compress.forward
# ----------------------------------------------------------------------------
NUM_ACTIONS = 4
FLAT_FEATURES = 7 * 7 * 64


def cnn_compress_forward(prep, x_nchw):
    # x_nchw: (N, 4, 84, 84) float32, PyTorch-native layout
    n = x_nchw.shape[0]
    x = x_nchw.astype(jnp.bfloat16).transpose(1, 0, 2, 3)          # (C, N, H, W)
    h = conv2d_relu(x, prep["w1"], prep["b1"], k=8, stride=4)      # (32, N, 20, 20)
    h = conv2d_relu(h, prep["w2"], prep["b2"], k=4, stride=2)      # (64, N, 9, 9)
    h = conv2d_relu(h, prep["w3"], prep["b3"], k=3, stride=1)      # (64, N, 7, 7)
    # Flatten in torch view(N, -1) order on NCHW: col = c*49 + h*7 + w
    xf = h.transpose(1, 0, 2, 3).reshape(n, FLAT_FEATURES)
    xf = jnp.pad(xf, ((0, 0), (0, prep["w4"].shape[0] - FLAT_FEATURES)))
    out = mlp_head(xf, prep["w4"], prep["b4"], prep["w5"], prep["b5"])  # (N, 128)
    return out[:, :NUM_ACTIONS]


if __name__ == "__main__":
    key = jax.random.PRNGKey(0)
    k_param, k_x = jax.random.split(key)
    params = init_params(k_param)
    prep = prepare_params(params)   # one-time weight prep, outside the jit
    # Spatial size 84 is required by the Linear(7*7*64, 512) layer; batch=2.
    x = jax.random.normal(k_x, (2, 4, 84, 84), jnp.float32)

    fwd = jax.jit(cnn_compress_forward)
    out = jax.block_until_ready(fwd(prep, x))
    assert out.shape == (2, NUM_ACTIONS) and out.dtype == jnp.float32
    assert bool(jnp.isfinite(out).all())
    print("KERNEL_OK")
</pallas_src>

<mosaic_0001>
module attributes {stable_mosaic.version = 11 : i64} {
  func.func @_conv_gemm_kernel(%arg0: i32, %arg1: memref<32x256xbf16, #tpu.memory_space<vmem>>, %arg2: memref<256x512xbf16, #tpu.memory_space<vmem>>, %arg3: memref<32x1xf32, #tpu.memory_space<vmem>>, %arg4: memref<32x512xbf16, #tpu.memory_space<vmem>>) attributes {dimension_semantics = [#tpu.dimension_semantics<parallel>], iteration_bounds = array<i64: 2>, scalar_prefetch = 0 : i64, scratch_operands = 0 : i64, tpu.core_type = #tpu.core_type<tc>, window_params = [{pipeline_mode = #tpu.pipeline_mode<synchronous>, transform_indices = @transform_0, window_bounds = array<i64: 32, 256>}, {transform_indices = @transform_1, window_bounds = array<i64: 256, 512>}, {pipeline_mode = #tpu.pipeline_mode<synchronous>, transform_indices = @transform_2, window_bounds = array<i64: 32, 1>}, {transform_indices = @transform_3, window_bounds = array<i64: 32, 512>}]} {
    %c0 = arith.constant 0 : index
    %c0_0 = arith.constant 0 : index
    %0 = vector.load %arg1[%c0, %c0_0] : memref<32x256xbf16, #tpu.memory_space<vmem>>, vector<32x256xbf16>
    %c0_1 = arith.constant 0 : index
    %c0_2 = arith.constant 0 : index
    %1 = vector.load %arg2[%c0_1, %c0_2] : memref<256x512xbf16, #tpu.memory_space<vmem>>, vector<256x512xbf16>
    %cst = arith.constant dense<0.000000e+00> : vector<32x512xf32>
    %2 = tpu.matmul %0, %1, %cst {dimension_numbers = #tpu.dot_dimension_numbers<[1], [0], [0], [1], [0, 0, 1, 1], [], []>} : vector<32x256xbf16>, vector<256x512xbf16>, vector<32x512xf32> -> vector<32x512xf32>
    %c0_3 = arith.constant 0 : index
    %c0_4 = arith.constant 0 : index
    %3 = vector.load %arg3[%c0_3, %c0_4] : memref<32x1xf32, #tpu.memory_space<vmem>>, vector<32x1xf32>
    %4 = vector.broadcast %3 : vector<32x1xf32> to vector<32x512xf32>
    %5 = arith.addf %2, %4 : vector<32x512xf32>
    %cst_5 = arith.constant 0.000000e+00 : f32
    %6 = vector.broadcast %cst_5 : f32 to vector<32x512xf32>
    %7 = arith.maximumf %5, %6 : vector<32x512xf32>
    %8 = arith.truncf %7 : vector<32x512xf32> to vector<32x512xbf16>
    %c0_6 = arith.constant 0 : index
    %c0_7 = arith.constant 0 : index
    %9 = vector.load %arg4[%c0_6, %c0_7] : memref<32x512xbf16, #tpu.memory_space<vmem>>, vector<32x512xbf16>
    tpu.vector_store %arg4[%c0_6, %c0_7], %8 {strides = array<i32>} : memref<32x512xbf16, #tpu.memory_space<vmem>>, vector<32x512xbf16>,
    return
  }
  func.func @transform_0(%arg0: i32) -> (i32, i32) {
    %c0_i32 = arith.constant 0 : i32
    %c0_i32_0 = arith.constant 0 : i32
    %c0_i32_1 = arith.constant 0 : i32
    return %c0_i32, %c0_i32_0 : i32, i32
  }
  func.func @transform_1(%arg0: i32) -> (i32, i32) {
    %c0_i32 = arith.constant 0 : i32
    %c0_i32_0 = arith.constant 0 : i32
    return %c0_i32, %arg0 : i32, i32
  }
  func.func @transform_2(%arg0: i32) -> (i32, i32) {
    %c0_i32 = arith.constant 0 : i32
    %c0_i32_0 = arith.constant 0 : i32
    %c0_i32_1 = arith.constant 0 : i32
    return %c0_i32, %c0_i32_0 : i32, i32
  }
  func.func @transform_3(%arg0: i32) -> (i32, i32) {
    %c0_i32 = arith.constant 0 : i32
    %c0_i32_0 = arith.constant 0 : i32
    return %c0_i32, %arg0 : i32, i32
  }
}

module attributes {stable_mosaic.version = 11 : i64} {
  func.func @_conv_gemm_kernel(%arg0: i32, %arg1: memref<64x512xbf16, #tpu.memory_space<vmem>>, %arg2: memref<512x256xbf16, #tpu.memory_space<vmem>>, %arg3: memref<64x1xf32, #tpu.memory_space<vmem>>, %arg4: memref<64x256xbf16, #tpu.memory_space<vmem>>) attributes {dimension_semantics = [#tpu.dimension_semantics<parallel>], iteration_bounds = array<i64: 1>, scalar_prefetch = 0 : i64, scratch_operands = 0 : i64, tpu.core_type = #tpu.core_type<tc>, window_params = [{pipeline_mode = #tpu.pipeline_mode<synchronous>, transform_indices = @transform_0, window_bounds = array<i64: 64, 512>}, {transform_indices = @transform_1, window_bounds = array<i64: 512, 256>}, {pipeline_mode = #tpu.pipeline_mode<synchronous>, transform_indices = @transform_2, window_bounds = array<i64: 64, 1>}, {transform_indices = @transform_3, window_bounds = array<i64: 64, 256>}]} {
    %c0 = arith.constant 0 : index
    %c0_0 = arith.constant 0 : index
    %0 = vector.load %arg1[%c0, %c0_0] : memref<64x512xbf16, #tpu.memory_space<vmem>>, vector<64x512xbf16>
    %c0_1 = arith.constant 0 : index
    %c0_2 = arith.constant 0 : index
    %1 = vector.load %arg2[%c0_1, %c0_2] : memref<512x256xbf16, #tpu.memory_space<vmem>>, vector<512x256xbf16>
    %cst = arith.constant dense<0.000000e+00> : vector<64x256xf32>
    %2 = tpu.matmul %0, %1, %cst {dimension_numbers = #tpu.dot_dimension_numbers<[1], [0], [0], [1], [0, 0, 1, 1], [], []>} : vector<64x512xbf16>, vector<512x256xbf16>, vector<64x256xf32> -> vector<64x256xf32>
    %c0_3 = arith.constant 0 : index
    %c0_4 = arith.constant 0 : index
    %3 = vector.load %arg3[%c0_3, %c0_4] : memref<64x1xf32, #tpu.memory_space<vmem>>, vector<64x1xf32>
    %4 = vector.broadcast %3 : vector<64x1xf32> to vector<64x256xf32>
    %5 = arith.addf %2, %4 : vector<64x256xf32>
    %cst_5 = arith.constant 0.000000e+00 : f32
    %6 = vector.broadcast %cst_5 : f32 to vector<64x256xf32>
    %7 = arith.maximumf %5, %6 : vector<64x256xf32>
    %8 = arith.truncf %7 : vector<64x256xf32> to vector<64x256xbf16>
    %c0_6 = arith.constant 0 : index
    %c0_7 = arith.constant 0 : index
    %9 = vector.load %arg4[%c0_6, %c0_7] : memref<64x256xbf16, #tpu.memory_space<vmem>>, vector<64x256xbf16>
    tpu.vector_store %arg4[%c0_6, %c0_7], %8 {strides = array<i32>} : memref<64x256xbf16, #tpu.memory_space<vmem>>, vector<64x256xbf16>,
    return
  }
  func.func @transform_0(%arg0: i32) -> (i32, i32) {
    %c0_i32 = arith.constant 0 : i32
    %c0_i32_0 = arith.constant 0 : i32
    %c0_i32_1 = arith.constant 0 : i32
    return %c0_i32, %c0_i32_0 : i32, i32
  }
  func.func @transform_1(%arg0: i32) -> (i32, i32) {
    %c0_i32 = arith.constant 0 : i32
    %c0_i32_0 = arith.constant 0 : i32
    return %c0_i32, %arg0 : i32, i32
  }
  func.func @transform_2(%arg0: i32) -> (i32, i32) {
    %c0_i32 = arith.constant 0 : i32
    %c0_i32_0 = arith.constant 0 : i32
    %c0_i32_1 = arith.constant 0 : i32
    return %c0_i32, %c0_i32_0 : i32, i32
  }
  func.func @transform_3(%arg0: i32) -> (i32, i32) {
    %c0_i32 = arith.constant 0 : i32
    %c0_i32_0 = arith.constant 0 : i32
    return %c0_i32, %arg0 : i32, i32
  }
}

module attributes {stable_mosaic.version = 11 : i64} {
  func.func @_conv_gemm_kernel(%arg0: i32, %arg1: memref<64x640xbf16, #tpu.memory_space<vmem>>, %arg2: memref<640x128xbf16, #tpu.memory_space<vmem>>, %arg3: memref<64x1xf32, #tpu.memory_space<vmem>>, %arg4: memref<64x128xbf16, #tpu.memory_space<vmem>>) attributes {dimension_semantics = [#tpu.dimension_semantics<parallel>], iteration_bounds = array<i64: 1>, scalar_prefetch = 0 : i64, scratch_operands = 0 : i64, tpu.core_type = #tpu.core_type<tc>, window_params = [{pipeline_mode = #tpu.pipeline_mode<synchronous>, transform_indices = @transform_0, window_bounds = array<i64: 64, 640>}, {transform_indices = @transform_1, window_bounds = array<i64: 640, 128>}, {pipeline_mode = #tpu.pipeline_mode<synchronous>, transform_indices = @transform_2, window_bounds = array<i64: 64, 1>}, {transform_indices = @transform_3, window_bounds = array<i64: 64, 128>}]} {
    %c0 = arith.constant 0 : index
    %c0_0 = arith.constant 0 : index
    %0 = vector.load %arg1[%c0, %c0_0] : memref<64x640xbf16, #tpu.memory_space<vmem>>, vector<64x640xbf16>
    %c0_1 = arith.constant 0 : index
    %c0_2 = arith.constant 0 : index
    %1 = vector.load %arg2[%c0_1, %c0_2] : memref<640x128xbf16, #tpu.memory_space<vmem>>, vector<640x128xbf16>
    %cst = arith.constant dense<0.000000e+00> : vector<64x128xf32>
    %2 = tpu.matmul %0, %1, %cst {dimension_numbers = #tpu.dot_dimension_numbers<[1], [0], [0], [1], [0, 0, 1, 1], [], []>} : vector<64x640xbf16>, vector<640x128xbf16>, vector<64x128xf32> -> vector<64x128xf32>
    %c0_3 = arith.constant 0 : index
    %c0_4 = arith.constant 0 : index
    %3 = vector.load %arg3[%c0_3, %c0_4] : memref<64x1xf32, #tpu.memory_space<vmem>>, vector<64x1xf32>
    %4 = vector.broadcast %3 : vector<64x1xf32> to vector<64x128xf32>
    %5 = arith.addf %2, %4 : vector<64x128xf32>
    %cst_5 = arith.constant 0.000000e+00 : f32
    %6 = vector.broadcast %cst_5 : f32 to vector<64x128xf32>
    %7 = arith.maximumf %5, %6 : vector<64x128xf32>
    %8 = arith.truncf %7 : vector<64x128xf32> to vector<64x128xbf16>
    %c0_6 = arith.constant 0 : index
    %c0_7 = arith.constant 0 : index
    %9 = vector.load %arg4[%c0_6, %c0_7] : memref<64x128xbf16, #tpu.memory_space<vmem>>, vector<64x128xbf16>
    tpu.vector_store %arg4[%c0_6, %c0_7], %8 {strides = array<i32>} : memref<64x128xbf16, #tpu.memory_space<vmem>>, vector<64x128xbf16>,
    return
  }
  func.func @transform_0(%arg0: i32) -> (i32, i32) {
    %c0_i32 = arith.constant 0 : i32
    %c0_i32_0 = arith.constant 0 : i32
    %c0_i32_1 = arith.constant 0 : i32
    return %c0_i32, %c0_i32_0 : i32, i32
  }
  func.func @transform_1(%arg0: i32) -> (i32, i32) {
    %c0_i32 = arith.constant 0 : i32
    %c0_i32_0 = arith.constant 0 : i32
    return %c0_i32, %arg0 : i32, i32
  }
  func.func @transform_2(%arg0: i32) -> (i32, i32) {
    %c0_i32 = arith.constant 0 : i32
    %c0_i32_0 = arith.constant 0 : i32
    %c0_i32_1 = arith.constant 0 : i32
    return %c0_i32, %c0_i32_0 : i32, i32
  }
  func.func @transform_3(%arg0: i32) -> (i32, i32) {
    %c0_i32 = arith.constant 0 : i32
    %c0_i32_0 = arith.constant 0 : i32
    return %c0_i32, %arg0 : i32, i32
  }
}

module attributes {stable_mosaic.version = 11 : i64} {
  func.func @_mlp_head_kernel(%arg0: i32, %arg1: memref<2x3200xbf16, #tpu.memory_space<vmem>>, %arg2: memref<3200x512xbf16, #tpu.memory_space<vmem>>, %arg3: memref<1x512xf32, #tpu.memory_space<vmem>>, %arg4: memref<512x128xbf16, #tpu.memory_space<vmem>>, %arg5: memref<1x128xf32, #tpu.memory_space<vmem>>, %arg6: memref<2x128xf32, #tpu.memory_space<vmem>>) attributes {dimension_semantics = [#tpu.dimension_semantics<arbitrary>], iteration_bounds = array<i64: 1>, scalar_prefetch = 0 : i64, scratch_operands = 0 : i64, tpu.core_type = #tpu.core_type<tc>, window_params = [{pipeline_mode = #tpu.pipeline_mode<synchronous>, transform_indices = @transform_0, window_bounds = array<i64: 2, 3200>}, {pipeline_mode = #tpu.pipeline_mode<synchronous>, transform_indices = @transform_1, window_bounds = array<i64: 3200, 512>}, {pipeline_mode = #tpu.pipeline_mode<synchronous>, transform_indices = @transform_2, window_bounds = array<i64: 1, 512>}, {pipeline_mode = #tpu.pipeline_mode<synchronous>, transform_indices = @transform_3, window_bounds = array<i64: 512, 128>}, {pipeline_mode = #tpu.pipeline_mode<synchronous>, transform_indices = @transform_4, window_bounds = array<i64: 1, 128>}, {pipeline_mode = #tpu.pipeline_mode<synchronous>, transform_indices = @transform_5, window_bounds = array<i64: 2, 128>}]} {
    %c0 = arith.constant 0 : index
    %c0_0 = arith.constant 0 : index
    %0 = vector.load %arg1[%c0, %c0_0] : memref<2x3200xbf16, #tpu.memory_space<vmem>>, vector<2x3200xbf16>
    %c0_1 = arith.constant 0 : index
    %c0_2 = arith.constant 0 : index
    %1 = vector.load %arg2[%c0_1, %c0_2] : memref<3200x512xbf16, #tpu.memory_space<vmem>>, vector<3200x512xbf16>
    %cst = arith.constant dense<0.000000e+00> : vector<2x512xf32>
    %2 = tpu.matmul %0, %1, %cst {dimension_numbers = #tpu.dot_dimension_numbers<[1], [0], [0], [1], [0, 0, 1, 1], [], []>} : vector<2x3200xbf16>, vector<3200x512xbf16>, vector<2x512xf32> -> vector<2x512xf32>
    %c0_3 = arith.constant 0 : index
    %c0_4 = arith.constant 0 : index
    %3 = vector.load %arg3[%c0_3, %c0_4] : memref<1x512xf32, #tpu.memory_space<vmem>>, vector<1x512xf32>
    %4 = vector.broadcast %3 : vector<1x512xf32> to vector<2x512xf32>
    %5 = arith.addf %2, %4 : vector<2x512xf32>
    %cst_5 = arith.constant 0.000000e+00 : f32
    %6 = vector.broadcast %cst_5 : f32 to vector<2x512xf32>
    %7 = arith.maximumf %5, %6 : vector<2x512xf32>
    %8 = arith.truncf %7 : vector<2x512xf32> to vector<2x512xbf16>
    %c0_6 = arith.constant 0 : index
    %c0_7 = arith.constant 0 : index
    %9 = vector.load %arg4[%c0_6, %c0_7] : memref<512x128xbf16, #tpu.memory_space<vmem>>, vector<512x128xbf16>
    %cst_8 = arith.constant dense<0.000000e+00> : vector<2x128xf32>
    %10 = tpu.matmul %8, %9, %cst_8 {dimension_numbers = #tpu.dot_dimension_numbers<[1], [0], [0], [1], [0, 0, 1, 1], [], []>} : vector<2x512xbf16>, vector<512x128xbf16>, vector<2x128xf32> -> vector<2x128xf32>
    %c0_9 = arith.constant 0 : index
    %c0_10 = arith.constant 0 : index
    %11 = vector.load %arg5[%c0_9, %c0_10] : memref<1x128xf32, #tpu.memory_space<vmem>>, vector<1x128xf32>
    %12 = vector.broadcast %11 : vector<1x128xf32> to vector<2x128xf32>
    %13 = arith.addf %10, %12 : vector<2x128xf32>
    %c0_11 = arith.constant 0 : index
    %c0_12 = arith.constant 0 : index
    %14 = vector.load %arg6[%c0_11, %c0_12] : memref<2x128xf32, #tpu.memory_space<vmem>>, vector<2x128xf32>
    tpu.vector_store %arg6[%c0_11, %c0_12], %13 {strides = array<i32>} : memref<2x128xf32, #tpu.memory_space<vmem>>, vector<2x128xf32>,
    return
  }
  func.func @transform_0(%arg0: i32) -> (i32, i32) {
    %c0_i32 = arith.constant 0 : i32
    %c0_i32_0 = arith.constant 0 : i32
    %c0_i32_1 = arith.constant 0 : i32
    return %c0_i32, %c0_i32_0 : i32, i32
  }
  func.func @transform_1(%arg0: i32) -> (i32, i32) {
    %c0_i32 = arith.constant 0 : i32
    %c0_i32_0 = arith.constant 0 : i32
    %c0_i32_1 = arith.constant 0 : i32
    return %c0_i32, %c0_i32_0 : i32, i32
  }
  func.func @transform_2(%arg0: i32) -> (i32, i32) {
    %c0_i32 = arith.constant 0 : i32
    %c0_i32_0 = arith.constant 0 : i32
    %c0_i32_1 = arith.constant 0 : i32
    return %c0_i32, %c0_i32_0 : i32, i32
  }
  func.func @transform_3(%arg0: i32) -> (i32, i32) {
    %c0_i32 = arith.constant 0 : i32
    %c0_i32_0 = arith.constant 0 : i32
    %c0_i32_1 = arith.constant 0 : i32
    return %c0_i32, %c0_i32_0 : i32, i32
  }
  func.func @transform_4(%arg0: i32) -> (i32, i32) {
    %c0_i32 = arith.constant 0 : i32
    %c0_i32_0 = arith.constant 0 : i32
    %c0_i32_1 = arith.constant 0 : i32
    return %c0_i32, %c0_i32_0 : i32, i32
  }
  func.func @transform_5(%arg0: i32) -> (i32, i32) {
    %c0_i32 = arith.constant 0 : i32
    %c0_i32_0 = arith.constant 0 : i32
    %c0_i32_1 = arith.constant 0 : i32
    return %c0_i32, %c0_i32_0 : i32, i32
  }
}

</mosaic_0001>

<bundles_post_ra>
// kernel: cnn_compress_forward.4
= control target key start
LH: loop header
LB: loop body
LE: loop exit
PB: predicated region body
PF: predicated region fallthrough
CT: control target
= control target key end

     0   :  { %s1455_s12 = smov 0   ;;  %s1457_s13 = smov 0   ;;  %s1871_s0 = inlined_call_operand.vmem [shape: bf16[32,256], index: 0, kind: input, shape index: {}]   ;;  %s1872_s1 = inlined_call_operand.vmem [shape: bf16[256,1024], index: 1, kind: input, shape index: {}]   ;;  %s1873_s2 = inlined_call_operand.vmem [shape: f32[32,1], index: 2, kind: input, shape index: {}]   ;;  %s1874_s3 = inlined_call_operand.vmem [shape: bf16[32,1024], index: 3, kind: output, shape index: {}]  }
   0x1   :  { %s1459_s14 = smov 0  }
   0x2 LB: > { %s1026_s15 = sadd.s32 4294967295, %s1432_s14   ;;  %s1472_s16 = sadd.s32 1, %s1432_s14   ;;  %s1432_s14 = sphi %s1459_s14, %s1878_s14   ;;  %s1428_s13 = sphi %s1457_s13, %s1877_s13   ;;  %s1424_s12 = sphi %s1455_s12, %s1876_s12  }
   0x3   : > { %s38_s17 = ssub.s32 %s1432_s14, %s1472_s16  ;;  %s41_s18 = sadd.s32 1, %s1428_s13 }
   0x4   : > { %p39_p0 = scmp.eq.s32.totalorder %s38_s17, 0  ;;  %p48_p1 = scmp.ne.s32.totalorder %s1428_s13, %s1424_s12 }
   0x5   : > { %p49_p2 = scmp.eq.s32.totalorder %s1432_s14, 0  ;;  %p99_p3 = scmp.eq.s32.totalorder %s1026_s15, 1 }
   0x6   : > { %s1483_s19 = scalar_select %p39_p0, %s1428_s13, %s41_s18  }
   0x7   : > { %p50_p4 = por %p49_p2, %p48_p1  ;;  %p1485_p5 = por %p99_p3, %p48_p1 }
   0x8   : > { %p1029_p6 = scmp.ge.s32.totalorder %s1432_s14, 2 }
   0xa   : > { %127 = sbr.rel (%p1029_p6) target bundleno = 83 (0x53), region = 24 }
   0xf   : > { %130 = sbr.rel (!%p50_p4) target bundleno = 83 (0x53), region = 28  ;;  %s132_s21 = sand.u32 (%p50_p4), 1, %s1428_s13  }
  0x10   : > { %s1313_s22 = sshll.u32 (%p50_p4), %s1432_s14, 4  ;;  %s1030_s23 = sshll.u32 (%p50_p4), %s132_s21, 9 }
  0x11   : > { %s1495_s26 = scalar_lea.vmem (%p50_p4), %s1872_s1, %s1313_s22  ;;  %s1500_s27 = scalar_lea.vmem (%p50_p4), [#allocation2], %s1030_s23 }
  0x12   : > { %v150_v0 = vld [vmem:[%s1495_s26] sm:$0xff] (%p50_p4)  ;;  %v152_v1 = vld [vmem:[%s1495_s26 + $0x8] sm:$0xff] (%p50_p4) }
  0x13   : > { %v154_v2 = vld [vmem:[%s1495_s26 + $0x20] sm:$0xff] (%p50_p4)  ;;  %151 = vst [vmem:[%s1500_s27] sm:$0xff] (%p50_p4), %v150_v0  ;;  %v156_v3 = vld [vmem:[%s1495_s26 + $0x28] sm:$0xff] (%p50_p4) }
  0x14   : > { %153 = vst [vmem:[%s1500_s27 + $0x8] sm:$0xff] %v152_v1  ;;  %v158_v4 = vld [vmem:[%s1495_s26 + $0x40] sm:$0xff]  ;;  %v160_v5 = vld [vmem:[%s1495_s26 + $0x48] sm:$0xff] }
  0x15   : > { %155 = vst [vmem:[%s1500_s27 + $0x10] sm:$0xff] %v154_v2  ;;  %v162_v6 = vld [vmem:[%s1495_s26 + $0x60] sm:$0xff]  ;;  %v164_v7 = vld [vmem:[%s1495_s26 + $0x68] sm:$0xff] }
  0x16   : > { %157 = vst [vmem:[%s1500_s27 + $0x18] sm:$0xff] %v156_v3  ;;  %v166_v8 = vld [vmem:[%s1495_s26 + $0x80] sm:$0xff]  ;;  %v168_v9 = vld [vmem:[%s1495_s26 + $0x88] sm:$0xff] }
  0x17   : > { %159 = vst [vmem:[%s1500_s27 + $0x20] sm:$0xff] %v158_v4  ;;  %v170_v10 = vld [vmem:[%s1495_s26 + $0xa0] sm:$0xff]  ;;  %v172_v11 = vld [vmem:[%s1495_s26 + $0xa8] sm:$0xff] }
  0x18   : > { %161 = vst [vmem:[%s1500_s27 + $0x28] sm:$0xff] %v160_v5  ;;  %v174_v12 = vld [vmem:[%s1495_s26 + $0xc0] sm:$0xff]  ;;  %v176_v13 = vld [vmem:[%s1495_s26 + $0xc8] sm:$0xff] }
  0x19   : > { %163 = vst [vmem:[%s1500_s27 + $0x30] sm:$0xff] %v162_v6  ;;  %v178_v14 = vld [vmem:[%s1495_s26 + $0xe0] sm:$0xff]  ;;  %v180_v15 = vld [vmem:[%s1495_s26 + $0xe8] sm:$0xff] }
  0x1a   : > { %165 = vst [vmem:[%s1500_s27 + $0x38] sm:$0xff] %v164_v7  ;;  %v182_v16 = vld [vmem:[%s1495_s26 + $0x100] sm:$0xff]  ;;  %v184_v17 = vld [vmem:[%s1495_s26 + $0x108] sm:$0xff] }
  0x1b   : > { %167 = vst [vmem:[%s1500_s27 + $0x40] sm:$0xff] %v166_v8  ;;  %v186_v18 = vld [vmem:[%s1495_s26 + $0x120] sm:$0xff]  ;;  %v188_v19 = vld [vmem:[%s1495_s26 + $0x128] sm:$0xff] }
  0x1c   : > { %169 = vst [vmem:[%s1500_s27 + $0x48] sm:$0xff] %v168_v9  ;;  %v190_v20 = vld [vmem:[%s1495_s26 + $0x140] sm:$0xff]  ;;  %v192_v21 = vld [vmem:[%s1495_s26 + $0x148] sm:$0xff] }
  0x1d   : > { %171 = vst [vmem:[%s1500_s27 + $0x50] sm:$0xff] %v170_v10  ;;  %v194_v22 = vld [vmem:[%s1495_s26 + $0x160] sm:$0xff]  ;;  %v196_v23 = vld [vmem:[%s1495_s26 + $0x168] sm:$0xff] }
  0x1e   : > { %173 = vst [vmem:[%s1500_s27 + $0x58] sm:$0xff] %v172_v11  ;;  %v198_v24 = vld [vmem:[%s1495_s26 + $0x180] sm:$0xff]  ;;  %v200_v25 = vld [vmem:[%s1495_s26 + $0x188] sm:$0xff] }
  0x1f   : > { %175 = vst [vmem:[%s1500_s27 + $0x60] sm:$0xff] %v174_v12  ;;  %v202_v26 = vld [vmem:[%s1495_s26 + $0x1a0] sm:$0xff]  ;;  %v204_v27 = vld [vmem:[%s1495_s26 + $0x1a8] sm:$0xff] }
  0x20   : > { %177 = vst [vmem:[%s1500_s27 + $0x68] sm:$0xff] %v176_v13  ;;  %v206_v28 = vld [vmem:[%s1495_s26 + $0x1c0] sm:$0xff]  ;;  %v208_v29 = vld [vmem:[%s1495_s26 + $0x1c8] sm:$0xff] }
  0x21   : > { %179 = vst [vmem:[%s1500_s27 + $0x70] sm:$0xff] %v178_v14  ;;  %v210_v30 = vld [vmem:[%s1495_s26 + $0x1e0] sm:$0xff]  ;;  %v212_v31 = vld [vmem:[%s1495_s26 + $0x1e8] sm:$0xff] }
  0x22   : > { %181 = vst [vmem:[%s1500_s27 + $0x78] sm:$0xff] %v180_v15  ;;  %v214_v32 = vld [vmem:[%s1495_s26 + $0x200] sm:$0xff]  ;;  %v216_v33 = vld [vmem:[%s1495_s26 + $0x208] sm:$0xff] }
  0x23   : > { %183 = vst [vmem:[%s1500_s27 + $0x80] sm:$0xff] %v182_v16  ;;  %v218_v34 = vld [vmem:[%s1495_s26 + $0x220] sm:$0xff]  ;;  %v220_v35 = vld [vmem:[%s1495_s26 + $0x228] sm:$0xff] }
  0x24   : > { %185 = vst [vmem:[%s1500_s27 + $0x88] sm:$0xff] %v184_v17  ;;  %v222_v36 = vld [vmem:[%s1495_s26 + $0x240] sm:$0xff]  ;;  %v224_v37 = vld [vmem:[%s1495_s26 + $0x248] sm:$0xff] }
  0x25   : > { %187 = vst [vmem:[%s1500_s27 + $0x90] sm:$0xff] %v186_v18  ;;  %v226_v38 = vld [vmem:[%s1495_s26 + $0x260] sm:$0xff]  ;;  %v228_v39 = vld [vmem:[%s1495_s26 + $0x268] sm:$0xff] }
  0x26   : > { %189 = vst [vmem:[%s1500_s27 + $0x98] sm:$0xff] %v188_v19  ;;  %v230_v40 = vld [vmem:[%s1495_s26 + $0x280] sm:$0xff]  ;;  %v232_v41 = vld [vmem:[%s1495_s26 + $0x288] sm:$0xff] }
  0x27   : > { %191 = vst [vmem:[%s1500_s27 + $0xa0] sm:$0xff] %v190_v20  ;;  %v234_v42 = vld [vmem:[%s1495_s26 + $0x2a0] sm:$0xff]  ;;  %v236_v43 = vld [vmem:[%s1495_s26 + $0x2a8] sm:$0xff] }
  0x28   : > { %193 = vst [vmem:[%s1500_s27 + $0xa8] sm:$0xff] %v192_v21  ;;  %v238_v44 = vld [vmem:[%s1495_s26 + $0x2c0] sm:$0xff]  ;;  %v240_v45 = vld [vmem:[%s1495_s26 + $0x2c8] sm:$0xff] }
  0x29   : > { %195 = vst [vmem:[%s1500_s27 + $0xb0] sm:$0xff] %v194_v22  ;;  %v242_v46 = vld [vmem:[%s1495_s26 + $0x2e0] sm:$0xff]  ;;  %v244_v47 = vld [vmem:[%s1495_s26 + $0x2e8] sm:$0xff] }
  0x2a   : > { %197 = vst [vmem:[%s1500_s27 + $0xb8] sm:$0xff] %v196_v23  ;;  %v246_v48 = vld [vmem:[%s1495_s26 + $0x300] sm:$0xff]  ;;  %v248_v49 = vld [vmem:[%s1495_s26 + $0x308] sm:$0xff] }
  0x2b   : > { %199 = vst [vmem:[%s1500_s27 + $0xc0] sm:$0xff] %v198_v24  ;;  %v250_v50 = vld [vmem:[%s1495_s26 + $0x320] sm:$0xff]  ;;  %v252_v51 = vld [vmem:[%s1495_s26 + $0x328] sm:$0xff] }
  0x2c   : > { %201 = vst [vmem:[%s1500_s27 + $0xc8] sm:$0xff] %v200_v25  ;;  %v254_v52 = vld [vmem:[%s1495_s26 + $0x340] sm:$0xff]  ;;  %v256_v53 = vld [vmem:[%s1495_s26 + $0x348] sm:$0xff] }
  0x2d   : > { %203 = vst [vmem:[%s1500_s27 + $0xd0] sm:$0xff] %v202_v26  ;;  %v258_v54 = vld [vmem:[%s1495_s26 + $0x360] sm:$0xff]  ;;  %v260_v55 = vld [vmem:[%s1495_s26 + $0x368] sm:$0xff] }
  0x2e   : > { %205 = vst [vmem:[%s1500_s27 + $0xd8] sm:$0xff] %v204_v27  ;;  %v262_v56 = vld [vmem:[%s1495_s26 + $0x380] sm:$0xff]  ;;  %v264_v57 = vld [vmem:[%s1495_s26 + $0x388] sm:$0xff] }
  0x2f   : > { %207 = vst [vmem:[%s1500_s27 + $0xe0] sm:$0xff] %v206_v28  ;;  %v266_v58 = vld [vmem:[%s1495_s26 + $0x3a0] sm:$0xff]  ;;  %v268_v59 = vld [vmem:[%s1495_s26 + $0x3a8] sm:$0xff] }
  0x30   : > { %209 = vst [vmem:[%s1500_s27 + $0xe8] sm:$0xff] %v208_v29  ;;  %v270_v60 = vld [vmem:[%s1495_s26 + $0x3c0] sm:$0xff]  ;;  %v272_v61 = vld [vmem:[%s1495_s26 + $0x3c8] sm:$0xff] }
  0x31   : > { %211 = vst [vmem:[%s1500_s27 + $0xf0] sm:$0xff] %v210_v30  ;;  %v274_v62 = vld [vmem:[%s1495_s26 + $0x3e0] sm:$0xff]  ;;  %v276_v63 = vld [vmem:[%s1495_s26 + $0x3e8] sm:$0xff] }
  0x32   : > { %213 = vst [vmem:[%s1500_s27 + $0xf8] sm:$0xff] %v212_v31 }
  0x33   : > { %215 = vst [vmem:[%s1500_s27 + $0x100] sm:$0xff] %v214_v32 }
  0x34   : > { %217 = vst [vmem:[%s1500_s27 + $0x108] sm:$0xff] %v216_v33 }
  0x35   : > { %219 = vst [vmem:[%s1500_s27 + $0x110] sm:$0xff] %v218_v34 }
  0x36   : > { %221 = vst [vmem:[%s1500_s27 + $0x118] sm:$0xff] %v220_v35 }
  0x37   : > { %223 = vst [vmem:[%s1500_s27 + $0x120] sm:$0xff] %v222_v36 }
  0x38   : > { %225 = vst [vmem:[%s1500_s27 + $0x128] sm:$0xff] %v224_v37 }
  0x39   : > { %227 = vst [vmem:[%s1500_s27 + $0x130] sm:$0xff] %v226_v38 }
  0x3a   : > { %229 = vst [vmem:[%s1500_s27 + $0x138] sm:$0xff] %v228_v39 }
  0x3b   : > { %231 = vst [vmem:[%s1500_s27 + $0x140] sm:$0xff] %v230_v40 }
  0x3c   : > { %233 = vst [vmem:[%s1500_s27 + $0x148] sm:$0xff] %v232_v41 }
  0x3d   : > { %235 = vst [vmem:[%s1500_s27 + $0x150] sm:$0xff] %v234_v42 }
  0x3e   : > { %237 = vst [vmem:[%s1500_s27 + $0x158] sm:$0xff] %v236_v43 }
  0x3f   : > { %239 = vst [vmem:[%s1500_s27 + $0x160] sm:$0xff] %v238_v44 }
  0x40   : > { %241 = vst [vmem:[%s1500_s27 + $0x168] sm:$0xff] %v240_v45 }
  0x41   : > { %243 = vst [vmem:[%s1500_s27 + $0x170] sm:$0xff] %v242_v46 }
  0x42   : > { %245 = vst [vmem:[%s1500_s27 + $0x178] sm:$0xff] %v244_v47 }
  0x43   : > { %247 = vst [vmem:[%s1500_s27 + $0x180] sm:$0xff] %v246_v48 }
  0x44   : > { %249 = vst [vmem:[%s1500_s27 + $0x188] sm:$0xff] %v248_v49 }
  0x45   : > { %251 = vst [vmem:[%s1500_s27 + $0x190] sm:$0xff] %v250_v50 }
  0x46   : > { %253 = vst [vmem:[%s1500_s27 + $0x198] sm:$0xff] %v252_v51 }
  0x47   : > { %255 = vst [vmem:[%s1500_s27 + $0x1a0] sm:$0xff] %v254_v52 }
  0x48   : > { %257 = vst [vmem:[%s1500_s27 + $0x1a8] sm:$0xff] %v256_v53 }
  0x49   : > { %259 = vst [vmem:[%s1500_s27 + $0x1b0] sm:$0xff] %v258_v54 }
  0x4a   : > { %261 = vst [vmem:[%s1500_s27 + $0x1b8] sm:$0xff] %v260_v55 }
  0x4b   : > { %263 = vst [vmem:[%s1500_s27 + $0x1c0] sm:$0xff] %v262_v56 }
  0x4c   : > { %265 = vst [vmem:[%s1500_s27 + $0x1c8] sm:$0xff] %v264_v57 }
  0x4d   : > { %267 = vst [vmem:[%s1500_s27 + $0x1d0] sm:$0xff] %v266_v58 }
  0x4e   : > { %269 = vst [vmem:[%s1500_s27 + $0x1d8] sm:$0xff] %v268_v59 }
  0x4f   : > { %271 = vst [vmem:[%s1500_s27 + $0x1e0] sm:$0xff] %v270_v60 }
  0x50   : > { %273 = vst [vmem:[%s1500_s27 + $0x1e8] sm:$0xff] %v272_v61 }
  0x51   : > { %275 = vst [vmem:[%s1500_s27 + $0x1f0] sm:$0xff] %v274_v62 }
  0x52   : > { %277 = vst [vmem:[%s1500_s27 + $0x1f8] sm:$0xff] %v276_v63 }
  0x53 PF: > { %p1033_p7 = scmp.ge.s32.totalorder %s1432_s14, 1  ;;  %p282_p8 = scmp.lt.s32.totalorder %s1432_s14, 3 }
  0x55   : > { %p283_p9 = pnand %p1033_p7, %p282_p8 }
  0x56   : > { %s289_s28 = sand.u32 (!%p283_p9), 1, %s1424_s12  }
  0x57   : > { %286 = sbr.rel (%p283_p9) target bundleno = 332 (0x14c), region = 51  ;;  %s1034_s29 = sshll.u32 (!%p283_p9), %s289_s28, 9 }
  0x58   : > { %s1632_s30 = scalar_lea.vmem (!%p283_p9), [#allocation2], %s1034_s29 }
  0x5c   : > { %v1166_v0 = vld [vmem:[%s1632_s30 + $0xe0] sm:$0xf]  ;;  %v1348_v1 = vld [vmem:[%s1632_s30 + $0xec] sm:$0xf0]  ;;  %v1346_v5 = vld [vmem:[%s1632_s30 + $0xe4] sm:$0xf] }
  0x5d   : > { %v1294_v2 = vld [vmem:[%s1632_s30 + $0x1e0] sm:$0xf]  ;;  %v1167_v3 = vor.u32 %v1348_v1, %v1166_v0  ;;  %v1380_v4 = vld [vmem:[%s1632_s30 + $0x1ec] sm:$0xf0]  ;;  %v1168_v6 = vld [vmem:[%s1632_s30 + $0xf0] sm:$0xf0] }
  0x5e   : > { %v1295_v7 = vor.u32 %v1380_v4, %v1294_v2  ;;  %v1171_v8 = vor.u32 %v1346_v5, %v1168_v6  ;;  %v1378_v9 = vld [vmem:[%s1632_s30 + $0x1e4] sm:$0xf]  ;;  %v1296_v10 = vld [vmem:[%s1632_s30 + $0x1f0] sm:$0xf0]  ;;  %v1150_v11 = vld [vmem:[%s1632_s30 + $0xc0] sm:$0xf] }
  0x5f   : > { %745 = vmatpush.bf16.msra.mxu0 %v1167_v3  ;;  %v1299_v12 = vor.u32 %v1378_v9, %v1296_v10  ;;  %v1344_v13 = vld [vmem:[%s1632_s30 + $0xcc] sm:$0xf0]  ;;  %v1278_v14 = vld [vmem:[%s1632_s30 + $0x1c0] sm:$0xf]  ;;  %v1342_v18 = vld [vmem:[%s1632_s30 + $0xc4] sm:$0xf] }
  0x60   : > { %v1376_v15 = vld [vmem:[%s1632_s30 + $0x1cc] sm:$0xf0]  ;;  %764 = vmatpush.bf16.msra.mxu1 %v1295_v7  ;;  %783 = vmatpush.bf16.msra.mxu2 %v1171_v8  ;;  %v1151_v16 = vor.u32 %v1344_v13, %v1150_v11  ;;  %v1152_v19 = vld [vmem:[%s1632_s30 + $0xd0] sm:$0xf0]  ;;  %v1374_v20 = vld [vmem:[%s1632_s30 + $0x1c4] sm:$0xf] }
  0x61   : > { %v1279_v17 = vor.u32 %v1376_v15, %v1278_v14  ;;  %802 = vmatpush.bf16.msra.mxu3 %v1299_v12  ;;  %v1155_v21 = vor.u32 %v1342_v18, %v1152_v19  ;;  %v1280_v22 = vld [vmem:[%s1632_s30 + $0x1d0] sm:$0xf0]  ;;  %v1134_v23 = vld [vmem:[%s1632_s30 + $0xa0] sm:$0xf]  ;;  %v1340_v24 = vld [vmem:[%s1632_s30 + $0xac] sm:$0xf0] }
  0x62   : > { %v1283_v25 = vor.u32 %v1374_v20, %v1280_v22  ;;  %v1262_v26 = vld [vmem:[%s1632_s30 + $0x1a0] sm:$0xf]  ;;  %v1372_v27 = vld [vmem:[%s1632_s30 + $0x1ac] sm:$0xf0]  ;;  %v1338_v28 = vld [vmem:[%s1632_s30 + $0xa4] sm:$0xf]  ;;  %v1135_v29 = vor.u32 %v1340_v24, %v1134_v23 }
  0x63   : > { %746 = vmatpush.bf16.msra.mxu0 %v1151_v16  ;;  %v1136_v30 = vld [vmem:[%s1632_s30 + $0xb0] sm:$0xf0]  ;;  %v1370_v31 = vld [vmem:[%s1632_s30 + $0x1a4] sm:$0xf]  ;;  %v1263_v33 = vor.u32 %v1372_v27, %v1262_v26  ;;  %v1118_v35 = vld [vmem:[%s1632_s30 + $0x80] sm:$0xf] }
  0x64   : > { %v1264_v32 = vld [vmem:[%s1632_s30 + $0x1b0] sm:$0xf0]  ;;  %765 = vmatpush.bf16.msra.mxu1 %v1279_v17  ;;  %784 = vmatpush.bf16.msra.mxu2 %v1155_v21  ;;  %v1139_v34 = vor.u32 %v1338_v28, %v1136_v30  ;;  %v1336_v36 = vld [vmem:[%s1632_s30 + $0x8c] sm:$0xf0]  ;;  %v1246_v37 = vld [vmem:[%s1632_s30 + $0x180] sm:$0xf] }
  0x65   : > { %803 = vmatpush.bf16.msra.mxu3 %v1283_v25  ;;  %v1267_v38 = vor.u32 %v1370_v31, %v1264_v32  ;;  %v1368_v39 = vld [vmem:[%s1632_s30 + $0x18c] sm:$0xf0]  ;;  %v1334_v40 = vld [vmem:[%s1632_s30 + $0x84] sm:$0xf]  ;;  %v1120_v41 = vld [vmem:[%s1632_s30 + $0x90] sm:$0xf0]  ;;  %v1119_v44 = vor.u32 %v1336_v36, %v1118_v35 }
  0x66   : > { %v1366_v42 = vld [vmem:[%s1632_s30 + $0x184] sm:$0xf]  ;;  %v1248_v43 = vld [vmem:[%s1632_s30 + $0x190] sm:$0xf0]  ;;  %v1247_v45 = vor.u32 %v1368_v39, %v1246_v37  ;;  %v1123_v46 = vor.u32 %v1334_v40, %v1120_v41  ;;  %v1102_v47 = vld [vmem:[%s1632_s30 + $0x60] sm:$0xf] }
  0x67   : > { %747 = vmatpush.bf16.msra.mxu0 %v1135_v29  ;;  %v1332_v48 = vld [vmem:[%s1632_s30 + $0x6c] sm:$0xf0]  ;;  %v1230_v49 = vld [vmem:[%s1632_s30 + $0x160] sm:$0xf]  ;;  %v1251_v50 = vor.u32 %v1366_v42, %v1248_v43  ;;  %v1330_v52 = vld [vmem:[%s1632_s30 + $0x64] sm:$0xf] }
  0x68   : > { %766 = vmatpush.bf16.msra.mxu1 %v1263_v33  ;;  %785 = vmatpush.bf16.msra.mxu2 %v1139_v34  ;;  %v1364_v51 = vld [vmem:[%s1632_s30 + $0x16c] sm:$0xf0]  ;;  %v1104_v53 = vld [vmem:[%s1632_s30 + $0x70] sm:$0xf0]  ;;  %v1362_v54 = vld [vmem:[%s1632_s30 + $0x164] sm:$0xf]  ;;  %v1103_v56 = vor.u32 %v1332_v48, %v1102_v47 }
  0x69   : > { %804 = vmatpush.bf16.msra.mxu3 %v1267_v38  ;;  %v1232_v55 = vld [vmem:[%s1632_s30 + $0x170] sm:$0xf0]  ;;  %v1231_v57 = vor.u32 %v1364_v51, %v1230_v49  ;;  %v1107_v58 = vor.u32 %v1330_v52, %v1104_v53  ;;  %v1086_v59 = vld [vmem:[%s1632_s30 + $0x40] sm:$0xf]  ;;  %v1328_v60 = vld [vmem:[%s1632_s30 + $0x4c] sm:$0xf0] }
  0x6a   : > { %v1214_v61 = vld [vmem:[%s1632_s30 + $0x140] sm:$0xf]  ;;  %v1235_v62 = vor.u32 %v1362_v54, %v1232_v55  ;;  %v1360_v63 = vld [vmem:[%s1632_s30 + $0x14c] sm:$0xf0]  ;;  %v1326_v0 = vld [vmem:[%s1632_s30 + $0x44] sm:$0xf]  ;;  %v1087_v4 = vor.u32 %v1328_v60, %v1086_v59 }
  0x6b   : > { %748 = vmatpush.bf16.msra.mxu0 %v1119_v44  ;;  %v1088_v1 = vld [vmem:[%s1632_s30 + $0x50] sm:$0xf0]  ;;  %v1358_v2 = vld [vmem:[%s1632_s30 + $0x144] sm:$0xf]  ;;  %v1215_v5 = vor.u32 %v1360_v63, %v1214_v61  ;;  %v1070_v7 = vld [vmem:[%s1632_s30 + $0x20] sm:$0xf] }
  0x6c   : > { %767 = vmatpush.bf16.msra.mxu1 %v1247_v45  ;;  %786 = vmatpush.bf16.msra.mxu2 %v1123_v46  ;;  %v1216_v3 = vld [vmem:[%s1632_s30 + $0x150] sm:$0xf0]  ;;  %v1091_v6 = vor.u32 %v1326_v0, %v1088_v1  ;;  %v1324_v8 = vld [vmem:[%s1632_s30 + $0x2c] sm:$0xf0]  ;;  %v1198_v9 = vld [vmem:[%s1632_s30 + $0x120] sm:$0xf] }
  0x6d   : > { %805 = vmatpush.bf16.msra.mxu3 %v1251_v50  ;;  %v1219_v10 = vor.u32 %v1358_v2, %v1216_v3  ;;  %v1356_v11 = vld [vmem:[%s1632_s30 + $0x12c] sm:$0xf0]  ;;  %v1322_v12 = vld [vmem:[%s1632_s30 + $0x24] sm:$0xf]  ;;  %v1072_v13 = vld [vmem:[%s1632_s30 + $0x30] sm:$0xf0]  ;;  %v1071_v16 = vor.u32 %v1324_v8, %v1070_v7 }
  0x6e   : > { %v1354_v14 = vld [vmem:[%s1632_s30 + $0x124] sm:$0xf]  ;;  %v1200_v15 = vld [vmem:[%s1632_s30 + $0x130] sm:$0xf0]  ;;  %v1054_v17 = vld [vmem:[%s1632_s30] sm:$0xf]  ;;  %v1199_v19 = vor.u32 %v1356_v11, %v1198_v9  ;;  %v1075_v20 = vor.u32 %v1322_v12, %v1072_v13 }
  0x6f   : > { %749 = vmatpush.bf16.msra.mxu0 %v1103_v56  ;;  %v1320_v18 = vld [vmem:[%s1632_s30 + $0xc] sm:$0xf0]  ;;  %v1182_v21 = vld [vmem:[%s1632_s30 + $0x100] sm:$0xf]  ;;  %v1318_v23 = vld [vmem:[%s1632_s30 + $0x4] sm:$0xf]  ;;  %v1203_v24 = vor.u32 %v1354_v14, %v1200_v15 }
  0x70   : > { %768 = vmatpush.bf16.msra.mxu1 %v1231_v57  ;;  %787 = vmatpush.bf16.msra.mxu2 %v1107_v58  ;;  %v1352_v22 = vld [vmem:[%s1632_s30 + $0x10c] sm:$0xf0]  ;;  %v1056_v25 = vld [vmem:[%s1632_s30 + $0x10] sm:$0xf0]  ;;  %v1350_v26 = vld [vmem:[%s1632_s30 + $0x104] sm:$0xf]  ;;  %v1055_v31 = vor.u32 %v1320_v18, %v1054_v17 }
  0x71   : > { %806 = vmatpush.bf16.msra.mxu3 %v1235_v62  ;;  %v1184_v27 = vld [vmem:[%s1632_s30 + $0x110] sm:$0xf0]  ;;  %v1038_v28 = vld [vmem:[%s1871_s0] sm:$0xf]  ;;  %v1347_v29 = vld [vmem:[%s1632_s30 + $0xec] sm:$0xf]  ;;  %v1183_v35 = vor.u32 %v1352_v22, %v1182_v21  ;;  %v1059_v36 = vor.u32 %v1318_v23, %v1056_v25 }
  0x72   : > { %v1176_v30 = vld [vmem:[%s1632_s30 + $0xf8] sm:$0xf0]  ;;  %v1315_v32 = vld [vmem:[%s1871_s0 + $0x4] sm:$0xf0]  ;;  %v1381_v34 = vld [vmem:[%s1632_s30 + $0x1f4] sm:$0xf0]  ;;  %v1187_v40 = vor.u32 %v1350_v26, %v1184_v27 }
  0x73   : > { %750 = vmatpush.bf16.msra.mxu0 %v1087_v4  ;;  %v1302_v33 = vld [vmem:[%s1632_s30 + $0x1e8] sm:$0xf]  ;;  %v1314_v37 = vld [vmem:[%s1871_s0 + $0x4] sm:$0xf]  ;;  %v1040_v38 = vld [vmem:[%s1871_s0 + $0x8] sm:$0xf0]  ;;  %v1179_v41 = vor.u32 %v1347_v29, %v1176_v30  ;;  %v1718_v45 = vor.u32 %v1315_v32, %v1038_v28 }
  0x74   : > { %769 = vmatpush.bf16.msra.mxu1 %v1215_v5  ;;  %788 = vmatpush.bf16.msra.mxu2 %v1091_v6  ;;  %v1174_v39 = vld [vmem:[%s1632_s30 + $0xe8] sm:$0xf]  ;;  %v1349_v42 = vld [vmem:[%s1632_s30 + $0xf4] sm:$0xf0]  ;;  %v1379_v43 = vld [vmem:[%s1632_s30 + $0x1ec] sm:$0xf]  ;;  %v1303_v46 = vor.u32 %v1381_v34, %v1302_v33  ;;  %v1722_v49 = vor.u32 %v1314_v37, %v1040_v38 }
  0x75   : > { %807 = vmatpush.bf16.msra.mxu3 %v1219_v10  ;;  %v1304_v44 = vld [vmem:[%s1632_s30 + $0x1f8] sm:$0xf0]  ;;  %v1343_v47 = vld [vmem:[%s1632_s30 + $0xcc] sm:$0xf]  ;;  %v1286_v50 = vld [vmem:[%s1632_s30 + $0x1c8] sm:$0xf]  ;;  %v1175_v53 = vor.u32 %v1349_v42, %v1174_v39 }
  0x76   : > { %v1160_v48 = vld [vmem:[%s1632_s30 + $0xd8] sm:$0xf0]  ;;  %v1377_v51 = vld [vmem:[%s1632_s30 + $0x1d4] sm:$0xf0]  ;;  %v1434_v52 = vmov 0   ;;  %v1307_v54 = vor.u32 %v1379_v43, %v1304_v44  ;;  %v381_v1 = vld [vmem:[%s1873_s2] sm:$0xff] }
  0x77   : > { %751 = vmatpush.bf16.msra.mxu0 %v1071_v16  ;;  %1408 = vset.pattern.permute.xlu0 %v1434_v52  ;;  %v1163_v55 = vor.u32 %v1343_v47, %v1160_v48  ;;  %v1158_v56 = vld [vmem:[%s1632_s30 + $0xc8] sm:$0xf]  ;;  %v1345_v57 = vld [vmem:[%s1632_s30 + $0xd4] sm:$0xf0]  ;;  %v1375_v58 = vld [vmem:[%s1632_s30 + $0x1cc] sm:$0xf]  ;;  %v1287_v59 = vor.u32 %v1377_v51, %v1286_v50 }
  0x78   : > { %770 = vmatpush.bf16.msra.mxu1 %v1199_v19  ;;  %789 = vmatpush.bf16.msra.mxu2 %v1075_v20  ;;  %v1288_v60 = vld [vmem:[%s1632_s30 + $0x1d8] sm:$0xf0]  ;;  %v1339_v61 = vld [vmem:[%s1632_s30 + $0xac] sm:$0xf]  ;;  %v1270_v63 = vld [vmem:[%s1632_s30 + $0x1a8] sm:$0xf]  ;;  %v1159_v2 = vor.u32 %v1345_v57, %v1158_v56 }
  0x79   : > { %808 = vmatpush.bf16.msra.mxu3 %v1203_v24  ;;  %v1144_v62 = vld [vmem:[%s1632_s30 + $0xb8] sm:$0xf0]  ;;  %v1373_v0 = vld [vmem:[%s1632_s30 + $0x1b4] sm:$0xf0]  ;;  %v1291_v3 = vor.u32 %v1375_v58, %v1288_v60  ;;  %v1142_v5 = vld [vmem:[%s1632_s30 + $0xa8] sm:$0xf]  ;;  %387 = vperm.xlu0 %1408, %v381_v1  }
  0x7a   : > { %v1147_v4 = vor.u32 %v1339_v61, %v1144_v62  ;;  %v1341_v6 = vld [vmem:[%s1632_s30 + $0xb4] sm:$0xf0]  ;;  %v1371_v7 = vld [vmem:[%s1632_s30 + $0x1ac] sm:$0xf]  ;;  %v1271_v8 = vor.u32 %v1373_v0, %v1270_v63  ;;  %v1272_v9 = vld [vmem:[%s1632_s30 + $0x1b8] sm:$0xf0]  ;;  %1409 = vset.pattern.permute.xlu1 %v1434_v52 }
  0x7b   : > { %752 = vmatpush.bf16.msra.mxu0 %v1055_v31  ;;  %v1335_v10 = vld [vmem:[%s1632_s30 + $0x8c] sm:$0xf]  ;;  %v1128_v11 = vld [vmem:[%s1632_s30 + $0x98] sm:$0xf0]  ;;  %v1254_v12 = vld [vmem:[%s1632_s30 + $0x188] sm:$0xf]  ;;  %v1143_v14 = vor.u32 %v1341_v6, %v1142_v5  ;;  %v1275_v18 = vor.u32 %v1371_v7, %v1272_v9 }
  0x7c   : > { %771 = vmatpush.bf16.msra.mxu1 %v1183_v35  ;;  %790 = vmatpush.bf16.msra.mxu2 %v1059_v36  ;;  %v1369_v13 = vld [vmem:[%s1632_s30 + $0x194] sm:$0xf0]  ;;  %v1126_v15 = vld [vmem:[%s1632_s30 + $0x88] sm:$0xf]  ;;  %v1367_v17 = vld [vmem:[%s1632_s30 + $0x18c] sm:$0xf]  ;;  %v1131_v19 = vor.u32 %v1335_v10, %v1128_v11 }
  0x7d   : > { %809 = vmatpush.bf16.msra.mxu3 %v1187_v40  ;;  %v1337_v16 = vld [vmem:[%s1632_s30 + $0x94] sm:$0xf0]  ;;  %v1256_v20 = vld [vmem:[%s1632_s30 + $0x198] sm:$0xf0]  ;;  %v1046_v21 = vld [vmem:[%s1871_s0 + $0x10] sm:$0xf]  ;;  %v1255_v23 = vor.u32 %v1369_v13, %v1254_v12 }
  0x7e   : > { %753 = vmatmul.bf16.vlgmr.msra.gmra.mxu0 %v1718_v45  ;;  %v1317_v22 = vld [vmem:[%s1871_s0 + $0x14] sm:$0xf0]  ;;  %v1331_v24 = vld [vmem:[%s1632_s30 + $0x6c] sm:$0xf]  ;;  %v1112_v25 = vld [vmem:[%s1632_s30 + $0x78] sm:$0xf0]  ;;  %v1127_v30 = vor.u32 %v1337_v16, %v1126_v15  ;;  %v1259_v33 = vor.u32 %v1367_v17, %v1256_v20 }
  0x7f   : > { %772 = vmatmul.bf16.vlgmr.msra.gmra.mxu1 %v1722_v49  ;;  %791 = vmatmul.bf16.vlgmr.msra.gmra.mxu2 %v1718_v45  ;;  %v1238_v26 = vld [vmem:[%s1632_s30 + $0x168] sm:$0xf]  ;;  %v1365_v27 = vld [vmem:[%s1632_s30 + $0x174] sm:$0xf0]  ;;  %v383_v29 = vld [vmem:[%s1873_s2 + $0x10] sm:$0xff]  ;;  %v1115_v34 = vor.u32 %v1331_v24, %v1112_v25  ;;  %v1778_v38 = vor.u32 %v1317_v22, %v1046_v21  ;;  %s1382_s12 = sshll.u32 (%p1485_p5), %s1026_s15, 4 }
  0x80   : > { %859 = vmatpush.bf16.msrb.mxu2 %v1179_v41  ;;  %840 = vmatpush.bf16.msrb.mxu1 %v1303_v46  ;;  %v382_v28 = vld [vmem:[%s1873_s2 + $0x8] sm:$0xff]  ;;  %v1316_v31 = vld [vmem:[%s1871_s0 + $0x14] sm:$0xf]  ;;  %v1048_v32 = vld [vmem:[%s1871_s0 + $0x18] sm:$0xf0]  ;;  %v1239_v39 = vor.u32 %v1365_v27, %v1238_v26  ;;  %s938_s17 = scalar_lea.vmem (%p1485_p5), %s1874_s3, %s1382_s12 }
  0x81   : > { %810 = vmatmul.bf16.vlgmr.msra.gmra.mxu3 %v1722_v49  ;;  %821 = vmatpush.bf16.msrb.mxu0 %v1175_v53  ;;  %v1110_v35 = vld [vmem:[%s1632_s30 + $0x68] sm:$0xf]  ;;  %v1333_v36 = vld [vmem:[%s1632_s30 + $0x74] sm:$0xf0]  ;;  %v1363_v37 = vld [vmem:[%s1632_s30 + $0x16c] sm:$0xf]  ;;  %v1783_v43 = vor.u32 %v1316_v31, %v1048_v32 }
  0x82   : > { %878 = vmatpush.bf16.msrb.mxu3 %v1307_v54  ;;  %397 = vperm.xlu1 %1409, %v383_v29   ;;  %v1240_v40 = vld [vmem:[%s1632_s30 + $0x178] sm:$0xf0]  ;;  %v1327_v41 = vld [vmem:[%s1632_s30 + $0x4c] sm:$0xf]  ;;  %v1222_v44 = vld [vmem:[%s1632_s30 + $0x148] sm:$0xf]  ;;  %v1111_v47 = vor.u32 %v1333_v36, %v1110_v35 }
  0x83   : > { %392 = vperm.xlu0 %1408, %v382_v28   ;;  %v1096_v42 = vld [vmem:[%s1632_s30 + $0x58] sm:$0xf0]  ;;  %v1361_v46 = vld [vmem:[%s1632_s30 + $0x154] sm:$0xf0]  ;;  %v1243_v48 = vor.u32 %v1363_v37, %v1240_v40  ;;  %v1094_v51 = vld [vmem:[%s1632_s30 + $0x48] sm:$0xf] }
  0x84   : > { %860 = vmatpush.bf16.msrb.mxu2 %v1163_v55  ;;  %841 = vmatpush.bf16.msrb.mxu1 %v1287_v59  ;;  %v1099_v50 = vor.u32 %v1327_v41, %v1096_v42  ;;  %v1329_v52 = vld [vmem:[%s1632_s30 + $0x54] sm:$0xf0]  ;;  %v1359_v53 = vld [vmem:[%s1632_s30 + $0x14c] sm:$0xf]  ;;  %v1223_v54 = vor.u32 %v1361_v46, %v1222_v44  ;;  %v1224_v55 = vld [vmem:[%s1632_s30 + $0x158] sm:$0xf0] }
  0x85   : > { %822 = vmatpush.bf16.msrb.mxu0 %v1159_v2  ;;  %v1323_v56 = vld [vmem:[%s1632_s30 + $0x2c] sm:$0xf]  ;;  %v1080_v57 = vld [vmem:[%s1632_s30 + $0x38] sm:$0xf0]  ;;  %v1206_v58 = vld [vmem:[%s1632_s30 + $0x128] sm:$0xf]  ;;  %v1095_v61 = vor.u32 %v1329_v52, %v1094_v51  ;;  %v1227_v62 = vor.u32 %v1359_v53, %v1224_v55 }
  0x86   : > { %879 = vmatpush.bf16.msrb.mxu3 %v1291_v3  ;;  %v1357_v59 = vld [vmem:[%s1632_s30 + $0x134] sm:$0xf0]  ;;  %v1083_v63 = vor.u32 %v1323_v56, %v1080_v57  ;;  %v1078_v0 = vld [vmem:[%s1632_s30 + $0x28] sm:$0xf]  ;;  %v1355_v2 = vld [vmem:[%s1632_s30 + $0x12c] sm:$0xf] }
  0x87   : > { %v384_v60 = vld [vmem:[%s1873_s2 + $0x18] sm:$0xff]  ;;  %v1207_v3 = vor.u32 %v1357_v59, %v1206_v58  ;;  %v1319_v5 = vld [vmem:[%s1632_s30 + $0xc] sm:$0xf]  ;;  %v1190_v7 = vld [vmem:[%s1632_s30 + $0x108] sm:$0xf] }
  0x88   : > { %861 = vmatpush.bf16.msrb.mxu2 %v1147_v4  ;;  %842 = vmatpush.bf16.msrb.mxu1 %v1271_v8  ;;  %v1325_v1 = vld [vmem:[%s1632_s30 + $0x34] sm:$0xf0]  ;;  %v1208_v4 = vld [vmem:[%s1632_s30 + $0x138] sm:$0xf0]  ;;  %v1062_v12 = vld [vmem:[%s1632_s30 + $0x8] sm:$0xf] }
  0x89   : > { %823 = vmatpush.bf16.msrb.mxu0 %v1143_v14  ;;  %v1064_v6 = vld [vmem:[%s1632_s30 + $0x18] sm:$0xf0]  ;;  %v1353_v8 = vld [vmem:[%s1632_s30 + $0x114] sm:$0xf0]  ;;  %v1079_v9 = vor.u32 %v1325_v1, %v1078_v0  ;;  %v1211_v10 = vor.u32 %v1355_v2, %v1208_v4  ;;  %v1351_v15 = vld [vmem:[%s1632_s30 + $0x10c] sm:$0xf] }
  0x8a   : > { %880 = vmatpush.bf16.msrb.mxu3 %v1275_v18  ;;  %402 = vperm.xlu1 %1409, %v384_v60   ;;  %v1067_v11 = vor.u32 %v1319_v5, %v1064_v6  ;;  %v1321_v13 = vld [vmem:[%s1632_s30 + $0x14] sm:$0xf0]  ;;  %v1191_v14 = vor.u32 %v1353_v8, %v1190_v7  ;;  %v1192_v16 = vld [vmem:[%s1632_s30 + $0x118] sm:$0xf0]  ;;  %s1035_s30 = sshll.u32 %s289_s28, 6 }
  0x8b   : > { %v1063_v17 = vor.u32 %v1321_v13, %v1062_v12  ;;  %v1195_v18 = vor.u32 %v1351_v15, %v1192_v16  ;;  %s1829_s10 = scalar_lea.vmem [#allocation3], %s1035_s30 }
  0x8c   : > { %862 = vmatpush.bf16.msrb.mxu2 %v1131_v19  ;;  %843 = vmatpush.bf16.msrb.mxu1 %v1255_v23 }
  0x8d   : > { %824 = vmatpush.bf16.msrb.mxu0 %v1127_v30 }
  0x8e   : > { %881 = vmatpush.bf16.msrb.mxu3 %v1259_v33  ;;  %758 = vmatmul.bf16.gmra.mxu0 %v1778_v38 }
  0x8f   : > { %777 = vmatmul.bf16.gmra.mxu1 %v1783_v43  ;;  %796 = vmatmul.bf16.gmra.mxu2 %v1778_v38 }
  0x90   : > { %863 = vmatpush.bf16.msrb.mxu2 %v1115_v34  ;;  %844 = vmatpush.bf16.msrb.mxu1 %v1239_v39 }
  0x91   : > { %815 = vmatmul.bf16.gmra.mxu3 %v1783_v43  ;;  %825 = vmatpush.bf16.msrb.mxu0 %v1111_v47 }
  0x92   : > { %882 = vmatpush.bf16.msrb.mxu3 %v1243_v48 }
  0x94   : > { %864 = vmatpush.bf16.msrb.mxu2 %v1099_v50  ;;  %845 = vmatpush.bf16.msrb.mxu1 %v1223_v54 }
  0x95   : > { %826 = vmatpush.bf16.msrb.mxu0 %v1095_v61 }
  0x96   : > { %883 = vmatpush.bf16.msrb.mxu3 %v1227_v62 }
  0x98   : > { %865 = vmatpush.bf16.msrb.mxu2 %v1083_v63  ;;  %846 = vmatpush.bf16.msrb.mxu1 %v1207_v3 }
  0x99   : > { %827 = vmatpush.bf16.msrb.mxu0 %v1079_v9 }
  0x9a   : > { %884 = vmatpush.bf16.msrb.mxu3 %v1211_v10 }
  0x9c   : > { %866 = vmatpush.bf16.msrb.mxu2 %v1067_v11  ;;  %847 = vmatpush.bf16.msrb.mxu1 %v1191_v14 }
  0x9d   : > { %828 = vmatpush.bf16.msrb.mxu0 %v1063_v17 }
  0x9e   : > { %885 = vmatpush.bf16.msrb.mxu3 %v1195_v18 }
  0x9f   : > { %848 = vmatmul.bf16.vlgmr.msrb.gmra.mxu1 %v1722_v49  ;;  %867 = vmatmul.bf16.vlgmr.msrb.gmra.mxu2 %v1718_v45 }
  0xa0   : > { %829 = vmatmul.bf16.vlgmr.msrb.gmra.mxu0 %v1718_v45 }
  0xa1   : > { %886 = vmatmul.bf16.vlgmr.msrb.gmra.mxu3 %v1722_v49 }
  0xaf   : > { %853 = vmatmul.bf16.gmra.mxu1 %v1783_v43  ;;  %872 = vmatmul.bf16.gmra.mxu2 %v1778_v38 }
  0xb0   : > { %834 = vmatmul.bf16.gmra.mxu0 %v1778_v38 }
  0xb1   : > { %891 = vmatmul.bf16.gmra.mxu3 %v1783_v43 }
  0xeb   : > { %v388_v19 = vpop.permute.xlu0 %387 }
  0xf4   : > { %v1827_v34 = vpop.permute.xlu1 %397 }
  0xf5   : > { %v1822_v27 = vpop.permute.xlu0 %392 }
  0xfb   : > { %v754_v20 = vpop.f32.mrf.mxu0 }
  0xfc   : > { %v773_v21 = vpop.f32.mrf.mxu1  ;;  %v755_v22 = vadd.f32 %v754_v20, %v388_v19  ;;  %v403_v52 = vpop.permute.xlu1 %402 }
  0xfe   : > { %v774_v23 = vadd.f32 %v773_v21, %v755_v22 }
 0x100   : > { %v897_v28 = vmax.f32 %v774_v23, 0.0 }
 0x102   : > { %v792_v24 = vpop.f32.mrf.mxu2 }
 0x103   : > { %v793_v25 = vadd.f32 %v792_v24, %v388_v19  ;;  %v756_v45 = vpop.f32.mrf.mxu0 }
 0x104   : > { %v811_v26 = vpop.f32.mrf.mxu3  ;;  %v775_v49 = vpop.f32.mrf.mxu1  ;;  %v757_v31 = vadd.f32 %v756_v45, %v1822_v27 }
 0x105   : > { %v812_v29 = vadd.f32 %v811_v26, %v793_v25 }
 0x106   : > { %v776_v35 = vadd.f32 %v775_v49, %v757_v31 }
 0x107   : > { %v898_v30 = vmax.f32 %v812_v29, 0.0 }
 0x108   : > { %v901_v42 = vmax.f32 %v776_v35, 0.0 }
 0x109   : > { %v913_v32 = vpack.c.bf16 %v898_v30, %v897_v28 }
 0x10a   : > { %v794_v33 = vpop.f32.mrf.mxu2 }
 0x10b   : > { %921 = vst [vmem:[%s1829_s10] sm:$0xff] %v913_v32  ;;  %v795_v36 = vadd.f32 %v794_v33, %v1822_v27  ;;  %v759_v38 = vpop.f32.mrf.mxu0 }
 0x10c   : > { %v813_v37 = vpop.f32.mrf.mxu3  ;;  %v778_v39 = vpop.f32.mrf.mxu1  ;;  %v760_v41 = vadd.f32 %v759_v38, %v1827_v34 }
 0x10d   : > { %v814_v40 = vadd.f32 %v813_v37, %v795_v36 }
 0x10e   : > { %v779_v46 = vadd.f32 %v778_v39, %v760_v41 }
 0x10f   : > { %v902_v43 = vmax.f32 %v814_v40, 0.0 }
 0x110   : > { %v905_v54 = vmax.f32 %v779_v46, 0.0 }
 0x111   : > { %v915_v44 = vpack.c.bf16 %v902_v43, %v901_v42 }
 0x112   : > { %v797_v47 = vpop.f32.mrf.mxu2 }
 0x113   : > { %923 = vst [vmem:[%s1829_s10 + $0x10] sm:$0xff] %v915_v44  ;;  %v798_v48 = vadd.f32 %v797_v47, %v1827_v34  ;;  %v761_v51 = vpop.f32.mrf.mxu0 }
 0x114   : > { %v816_v50 = vpop.f32.mrf.mxu3  ;;  %v780_v53 = vpop.f32.mrf.mxu1  ;;  %v762_v57 = vadd.f32 %v761_v51, %v403_v52 }
 0x115   : > { %v817_v55 = vadd.f32 %v816_v50, %v798_v48 }
 0x116   : > { %v781_v60 = vadd.f32 %v780_v53, %v762_v57 }
 0x117   : > { %v906_v56 = vmax.f32 %v817_v55, 0.0 }
 0x118   : > { %v909_v3 = vmax.f32 %v781_v60, 0.0 }
 0x119   : > { %v917_v58 = vpack.c.bf16 %v906_v56, %v905_v54 }
 0x11a   : > { %v799_v59 = vpop.f32.mrf.mxu2  ;;  %v955_v48 = vld [vmem:[%s1829_s10 + $0x10] sm:$0xff] (%p1485_p5) }
 0x11b   : > { %925 = vst [vmem:[%s1829_s10 + $0x20] sm:$0xff] %v917_v58  ;;  %v800_v61 = vadd.f32 %v799_v59, %v403_v52 }
 0x11c   : > { %v818_v62 = vpop.f32.mrf.mxu3  ;;  %v849_v1 = vpop.f32.mrf.mxu1  ;;  %956 = vst [vmem:[%s938_s17 + $0x20] sm:$0xff] (%p1485_p5), %v955_v48 }
 0x11d   : > { %v830_v63 = vpop.f32.mrf.mxu0  ;;  %v819_v0 = vadd.f32 %v818_v62, %v800_v61 }
 0x11e   : > { %v831_v2 = vadd.f32 %v830_v63, %v388_v19 }
 0x11f   : > { %v910_v4 = vmax.f32 %v819_v0, 0.0 }
 0x120   : > { %v850_v6 = vadd.f32 %v849_v1, %v831_v2 }
 0x121   : > { %v919_v5 = vpack.c.bf16 %v910_v4, %v909_v3 }
 0x122   : > { %v868_v7 = vpop.f32.mrf.mxu2  ;;  %v899_v11 = vmax.f32 %v850_v6, 0.0  ;;  %v959_v51 = vld [vmem:[%s1829_s10 + $0x20] sm:$0xff] (%p1485_p5) }
 0x123   : > { %927 = vst [vmem:[%s1829_s10 + $0x30] sm:$0xff] %v919_v5  ;;  %v869_v9 = vadd.f32 %v868_v7, %v388_v19 }
 0x124   : > { %v887_v8 = vpop.f32.mrf.mxu3  ;;  %v851_v13 = vpop.f32.mrf.mxu1  ;;  %960 = vst [vmem:[%s938_s17 + $0x40] sm:$0xff] (%p1485_p5), %v959_v51 }
 0x125   : > { %v832_v10 = vpop.f32.mrf.mxu0  ;;  %v888_v12 = vadd.f32 %v887_v8, %v869_v9 }
 0x126   : > { %v833_v15 = vadd.f32 %v832_v10, %v1822_v27 }
 0x127   : > { %v900_v14 = vmax.f32 %v888_v12, 0.0 }
 0x128   : > { %v852_v20 = vadd.f32 %v851_v13, %v833_v15 }
 0x129   : > { %v914_v16 = vpack.c.bf16 %v900_v14, %v899_v11 }
 0x12a   : > { %v870_v17 = vpop.f32.mrf.mxu2  ;;  %v903_v19 = vmax.f32 %v852_v20, 0.0  ;;  %v963_v53 = vld [vmem:[%s1829_s10 + $0x30] sm:$0xff] (%p1485_p5) }
 0x12b   : > { %922 = vst [vmem:[%s1829_s10 + $0x8] sm:$0xff] %v914_v16  ;;  %v871_v21 = vadd.f32 %v870_v17, %v1822_v27 }
 0x12c   : > { %v889_v18 = vpop.f32.mrf.mxu3  ;;  %v854_v26 = vpop.f32.mrf.mxu1  ;;  %964 = vst [vmem:[%s938_s17 + $0x60] sm:$0xff] (%p1485_p5), %v963_v53 }
 0x12d   : > { %v835_v22 = vpop.f32.mrf.mxu0  ;;  %v890_v23 = vadd.f32 %v889_v18, %v871_v21 }
 0x12e   : > { %v836_v24 = vadd.f32 %v835_v22, %v1827_v34 }
 0x12f   : > { %v904_v25 = vmax.f32 %v890_v23, 0.0 }
 0x130   : > { %v855_v49 = vadd.f32 %v854_v26, %v836_v24 }
 0x131   : > { %v916_v45 = vpack.c.bf16 %v904_v25, %v903_v19 }
 0x132   : > { %v873_v28 = vpop.f32.mrf.mxu2  ;;  %v907_v32 = vmax.f32 %v855_v49, 0.0  ;;  %v953_v47 = vld [vmem:[%s1829_s10 + $0x8] sm:$0xff] (%p1485_p5) }
 0x133   : > { %924 = vst [vmem:[%s1829_s10 + $0x18] sm:$0xff] %v916_v45  ;;  %v874_v30 = vadd.f32 %v873_v28, %v1827_v34  ;;  %v951_v34 = vld [vmem:[%s1829_s10] sm:$0xff] (%p1485_p5) }
 0x134   : > { %v892_v29 = vpop.f32.mrf.mxu3  ;;  %v856_v37 = vpop.f32.mrf.mxu1  ;;  %952 = vst [vmem:[%s938_s17] sm:$0xff] (%p1485_p5), %v951_v34 }
 0x135   : > { %v837_v31 = vpop.f32.mrf.mxu0  ;;  %v893_v33 = vadd.f32 %v892_v29, %v874_v30  ;;  %954 = vst [vmem:[%s938_s17 + $0x8] sm:$0xff] (%p1485_p5), %v953_v47 }
 0x136   : > { %v838_v35 = vadd.f32 %v837_v31, %v403_v52 }
 0x137   : > { %v908_v27 = vmax.f32 %v893_v33, 0.0 }
 0x138   : > { %v857_v39 = vadd.f32 %v856_v37, %v838_v35 }
 0x139   : > { %v918_v36 = vpack.c.bf16 %v908_v27, %v907_v32 }
 0x13a   : > { %v875_v38 = vpop.f32.mrf.mxu2  ;;  %v911_v43 = vmax.f32 %v857_v39, 0.0  ;;  %v957_v50 = vld [vmem:[%s1829_s10 + $0x18] sm:$0xff] (%p1485_p5) }
 0x13b   : > { %926 = vst [vmem:[%s1829_s10 + $0x28] sm:$0xff] %v918_v36  ;;  %v876_v40 = vadd.f32 %v875_v38, %v403_v52 }
 0x13c   : > { %v894_v41 = vpop.f32.mrf.mxu3  ;;  %958 = vst [vmem:[%s938_s17 + $0x28] sm:$0xff] (%p1485_p5), %v957_v50 }
 0x13d   : > { %v895_v42 = vadd.f32 %v894_v41, %v876_v40 }
 0x13f   : > { %v912_v44 = vmax.f32 %v895_v42, 0.0  ;;  %935 = sbr.rel (!%p1485_p5) target bundleno = 332 (0x14c), region = 59 }
 0x141   : > { %v920_v46 = vpack.c.bf16 %v912_v44, %v911_v43 }
 0x142   : > { %v961_v52 = vld [vmem:[%s1829_s10 + $0x28] sm:$0xff] (%p1485_p5) }
 0x143   : > { %928 = vst [vmem:[%s1829_s10 + $0x38] sm:$0xff] %v920_v46 }
 0x144   : > { %962 = vst [vmem:[%s938_s17 + $0x48] sm:$0xff] %v961_v52 }
 0x14a   : > { %v965_v54 = vld [vmem:[%s1829_s10 + $0x38] sm:$0xff] }
 0x14b   : > { %966 = vst [vmem:[%s938_s17 + $0x68] sm:$0xff] %v965_v54 }
 0x14c PF: > { %p10_p10 = scmp.ge.s32.totalorder %s1472_s16, 4   ;;  %s1876_s12 = smov %s1428_s13 }
 0x14d   : > { %s1877_s13 = smov %s1483_s19  ;;  %s1878_s14 = smov %s1472_s16 }
 0x14e   :  { %12 = sbr.rel (!%p10_p10) target bundleno = 2 (0x2), region = 113 }

// kernel: cnn_compress_forward.5
= control target key start
LH: loop header
LB: loop body
LE: loop exit
PB: predicated region body
PF: predicated region fallthrough
CT: control target
= control target key end

     0   :  { %s1851_s1 = inlined_call_operand.vmem [shape: bf16[512,256], index: 1, kind: input, shape index: {}]   ;;  %s1852_s0 = inlined_call_operand.vmem [shape: bf16[64,512], index: 0, kind: input, shape index: {}]   ;;  %s1853_s2 = inlined_call_operand.vmem [shape: f32[64,1], index: 2, kind: input, shape index: {}]   ;;  %s1854_s3 = inlined_call_operand.vmem [shape: bf16[64,256], index: 3, kind: output, shape index: {}]  }
   0x1   :  { %v932_v0 = vld [vmem:[%s1851_s1 + $0x70] sm:$0xf]  ;;  %v1161_v1 = vld [vmem:[%s1851_s1 + $0x74] sm:$0xf0]  ;;  %v924_v11 = vld [vmem:[%s1851_s1 + $0x60] sm:$0xf] }
   0x2   :  { %v996_v2 = vld [vmem:[%s1851_s1 + $0xf0] sm:$0xf]  ;;  %v933_v3 = vor.u32 %v1161_v1, %v932_v0  ;;  %v1177_v4 = vld [vmem:[%s1851_s1 + $0xf4] sm:$0xf0]  ;;  %v1159_v13 = vld [vmem:[%s1851_s1 + $0x64] sm:$0xf0] }
   0x3   :  { %v1060_v5 = vld [vmem:[%s1851_s1 + $0x170] sm:$0xf]  ;;  %v1193_v6 = vld [vmem:[%s1851_s1 + $0x174] sm:$0xf0]  ;;  %v997_v7 = vor.u32 %v1177_v4, %v996_v2  ;;  %v988_v14 = vld [vmem:[%s1851_s1 + $0xe0] sm:$0xf]  ;;  %v925_v16 = vor.u32 %v1159_v13, %v924_v11 }
   0x4   :  { %v1061_v8 = vor.u32 %v1193_v6, %v1060_v5  ;;  %v1124_v9 = vld [vmem:[%s1851_s1 + $0x1f0] sm:$0xf]  ;;  %v1209_v10 = vld [vmem:[%s1851_s1 + $0x1f4] sm:$0xf0]  ;;  %542 = vmatpush.bf16.msra.mxu0 %v933_v3  ;;  %v1175_v15 = vld [vmem:[%s1851_s1 + $0xe4] sm:$0xf0] }
   0x5   :  { %v1125_v12 = vor.u32 %v1209_v10, %v1124_v9  ;;  %571 = vmatpush.bf16.msra.mxu1 %v997_v7  ;;  %v989_v17 = vor.u32 %v1175_v15, %v988_v14  ;;  %v1052_v18 = vld [vmem:[%s1851_s1 + $0x160] sm:$0xf]  ;;  %v1191_v19 = vld [vmem:[%s1851_s1 + $0x164] sm:$0xf0]  ;;  %v916_v23 = vld [vmem:[%s1851_s1 + $0x50] sm:$0xf] }
   0x6   :  { %600 = vmatpush.bf16.msra.mxu2 %v1061_v8  ;;  %v1116_v20 = vld [vmem:[%s1851_s1 + $0x1e0] sm:$0xf]  ;;  %v1053_v21 = vor.u32 %v1191_v19, %v1052_v18  ;;  %v1207_v22 = vld [vmem:[%s1851_s1 + $0x1e4] sm:$0xf0]  ;;  %v1157_v24 = vld [vmem:[%s1851_s1 + $0x54] sm:$0xf0] }
   0x7   :  { %629 = vmatpush.bf16.msra.mxu3 %v1125_v12  ;;  %v1117_v25 = vor.u32 %v1207_v22, %v1116_v20  ;;  %v980_v26 = vld [vmem:[%s1851_s1 + $0xd0] sm:$0xf]  ;;  %v1173_v27 = vld [vmem:[%s1851_s1 + $0xd4] sm:$0xf0]  ;;  %v917_v29 = vor.u32 %v1157_v24, %v916_v23  ;;  %v908_v35 = vld [vmem:[%s1851_s1 + $0x40] sm:$0xf] }
   0x8   :  { %v1044_v28 = vld [vmem:[%s1851_s1 + $0x150] sm:$0xf]  ;;  %543 = vmatpush.bf16.msra.mxu0 %v925_v16  ;;  %v1189_v30 = vld [vmem:[%s1851_s1 + $0x154] sm:$0xf0]  ;;  %v981_v33 = vor.u32 %v1173_v27, %v980_v26  ;;  %v1155_v36 = vld [vmem:[%s1851_s1 + $0x44] sm:$0xf0] }
   0x9   :  { %v1108_v31 = vld [vmem:[%s1851_s1 + $0x1d0] sm:$0xf]  ;;  %v1205_v32 = vld [vmem:[%s1851_s1 + $0x1d4] sm:$0xf0]  ;;  %572 = vmatpush.bf16.msra.mxu1 %v989_v17  ;;  %v1045_v34 = vor.u32 %v1189_v30, %v1044_v28  ;;  %v972_v37 = vld [vmem:[%s1851_s1 + $0xc0] sm:$0xf]  ;;  %v909_v44 = vor.u32 %v1155_v36, %v908_v35 }
   0xa   :  { %601 = vmatpush.bf16.msra.mxu2 %v1053_v21  ;;  %v1109_v38 = vor.u32 %v1205_v32, %v1108_v31  ;;  %v1171_v39 = vld [vmem:[%s1851_s1 + $0xc4] sm:$0xf0]  ;;  %v1036_v40 = vld [vmem:[%s1851_s1 + $0x140] sm:$0xf]  ;;  %v900_v47 = vld [vmem:[%s1851_s1 + $0x30] sm:$0xf] }
   0xb   :  { %630 = vmatpush.bf16.msra.mxu3 %v1117_v25  ;;  %v1187_v41 = vld [vmem:[%s1851_s1 + $0x144] sm:$0xf0]  ;;  %v1100_v42 = vld [vmem:[%s1851_s1 + $0x1c0] sm:$0xf]  ;;  %v973_v45 = vor.u32 %v1171_v39, %v972_v37  ;;  %v1153_v48 = vld [vmem:[%s1851_s1 + $0x34] sm:$0xf0] }
   0xc   :  { %v1203_v43 = vld [vmem:[%s1851_s1 + $0x1c4] sm:$0xf0]  ;;  %544 = vmatpush.bf16.msra.mxu0 %v917_v29  ;;  %v1037_v46 = vor.u32 %v1187_v41, %v1036_v40  ;;  %v964_v49 = vld [vmem:[%s1851_s1 + $0xb0] sm:$0xf]  ;;  %v1169_v51 = vld [vmem:[%s1851_s1 + $0xb4] sm:$0xf0]  ;;  %v901_v56 = vor.u32 %v1153_v48, %v900_v47 }
   0xd   :  { %573 = vmatpush.bf16.msra.mxu1 %v981_v33  ;;  %v1101_v50 = vor.u32 %v1203_v43, %v1100_v42  ;;  %v1028_v52 = vld [vmem:[%s1851_s1 + $0x130] sm:$0xf]  ;;  %v1185_v53 = vld [vmem:[%s1851_s1 + $0x134] sm:$0xf0]  ;;  %v965_v57 = vor.u32 %v1169_v51, %v964_v49  ;;  %v892_v59 = vld [vmem:[%s1851_s1 + $0x20] sm:$0xf] }
   0xe   :  { %602 = vmatpush.bf16.msra.mxu2 %v1045_v34  ;;  %v1092_v54 = vld [vmem:[%s1851_s1 + $0x1b0] sm:$0xf]  ;;  %v1201_v55 = vld [vmem:[%s1851_s1 + $0x1b4] sm:$0xf0]  ;;  %v1029_v58 = vor.u32 %v1185_v53, %v1028_v52  ;;  %v1151_v60 = vld [vmem:[%s1851_s1 + $0x24] sm:$0xf0] }
   0xf   :  { %631 = vmatpush.bf16.msra.mxu3 %v1109_v38  ;;  %v956_v61 = vld [vmem:[%s1851_s1 + $0xa0] sm:$0xf]  ;;  %v1093_v62 = vor.u32 %v1201_v55, %v1092_v54  ;;  %v1167_v63 = vld [vmem:[%s1851_s1 + $0xa4] sm:$0xf0]  ;;  %v893_v4 = vor.u32 %v1151_v60, %v892_v59  ;;  %v884_v7 = vld [vmem:[%s1851_s1 + $0x10] sm:$0xf] }
  0x10   :  { %545 = vmatpush.bf16.msra.mxu0 %v909_v44  ;;  %v1020_v0 = vld [vmem:[%s1851_s1 + $0x120] sm:$0xf]  ;;  %v1183_v1 = vld [vmem:[%s1851_s1 + $0x124] sm:$0xf0]  ;;  %v957_v5 = vor.u32 %v1167_v63, %v956_v61  ;;  %v1149_v8 = vld [vmem:[%s1851_s1 + $0x14] sm:$0xf0] }
  0x11   :  { %574 = vmatpush.bf16.msra.mxu1 %v973_v45  ;;  %v1084_v2 = vld [vmem:[%s1851_s1 + $0x1a0] sm:$0xf]  ;;  %v1199_v3 = vld [vmem:[%s1851_s1 + $0x1a4] sm:$0xf0]  ;;  %v1021_v6 = vor.u32 %v1183_v1, %v1020_v0  ;;  %v948_v9 = vld [vmem:[%s1851_s1 + $0x90] sm:$0xf]  ;;  %v885_v17 = vor.u32 %v1149_v8, %v884_v7 }
  0x12   :  { %603 = vmatpush.bf16.msra.mxu2 %v1037_v46  ;;  %v1085_v10 = vor.u32 %v1199_v3, %v1084_v2  ;;  %v1165_v11 = vld [vmem:[%s1851_s1 + $0x94] sm:$0xf0]  ;;  %v1012_v12 = vld [vmem:[%s1851_s1 + $0x110] sm:$0xf]  ;;  %v876_v16 = vld [vmem:[%s1851_s1] sm:$0xf] }
  0x13   :  { %632 = vmatpush.bf16.msra.mxu3 %v1101_v50  ;;  %v1181_v13 = vld [vmem:[%s1851_s1 + $0x114] sm:$0xf0]  ;;  %v1076_v14 = vld [vmem:[%s1851_s1 + $0x190] sm:$0xf]  ;;  %v1147_v18 = vld [vmem:[%s1851_s1 + $0x4] sm:$0xf0]  ;;  %v949_v21 = vor.u32 %v1165_v11, %v948_v9 }
  0x14   :  { %546 = vmatpush.bf16.msra.mxu0 %v901_v56  ;;  %v1197_v15 = vld [vmem:[%s1851_s1 + $0x194] sm:$0xf0]  ;;  %v940_v19 = vld [vmem:[%s1851_s1 + $0x80] sm:$0xf]  ;;  %v1163_v20 = vld [vmem:[%s1851_s1 + $0x84] sm:$0xf0]  ;;  %v1013_v22 = vor.u32 %v1181_v13, %v1012_v12  ;;  %v877_v35 = vor.u32 %v1147_v18, %v876_v16 }
  0x15   :  { %575 = vmatpush.bf16.msra.mxu1 %v965_v57  ;;  %v1004_v23 = vld [vmem:[%s1851_s1 + $0x100] sm:$0xf]  ;;  %v1179_v24 = vld [vmem:[%s1851_s1 + $0x104] sm:$0xf0]  ;;  %v1077_v26 = vor.u32 %v1197_v15, %v1076_v14  ;;  %v1132_v29 = vld [vmem:[%s1852_s0 + $0xc] sm:$0xf0]  ;;  %v941_v39 = vor.u32 %v1163_v20, %v940_v19 }
  0x16   :  { %604 = vmatpush.bf16.msra.mxu2 %v1029_v58  ;;  %v1068_v25 = vld [vmem:[%s1851_s1 + $0x180] sm:$0xf]  ;;  %v1195_v27 = vld [vmem:[%s1851_s1 + $0x184] sm:$0xf0]  ;;  %v1130_v30 = vld [vmem:[%s1852_s0 + $0x4] sm:$0xf]  ;;  %v1005_v40 = vor.u32 %v1179_v24, %v1004_v23 }
  0x17   :  { %633 = vmatpush.bf16.msra.mxu3 %v1093_v62  ;;  %v812_v28 = vld [vmem:[%s1852_s0] sm:$0xf]  ;;  %v814_v31 = vld [vmem:[%s1852_s0 + $0x10] sm:$0xf0]  ;;  %v820_v32 = vld [vmem:[%s1852_s0 + $0x8] sm:$0xf]  ;;  %v1069_v44 = vor.u32 %v1195_v27, %v1068_v25 }
  0x18   :  { %547 = vmatpush.bf16.msra.mxu0 %v893_v4  ;;  %v1192_v33 = vld [vmem:[%s1851_s1 + $0x174] sm:$0xf]  ;;  %v1062_v34 = vld [vmem:[%s1851_s1 + $0x178] sm:$0xf0]  ;;  %v94_v38 = vld [vmem:[%s1853_s2] sm:$0xff]  ;;  %v1214_v49 = vmov 0   ;;  %v1475_v50 = vor.u32 %v1132_v29, %v812_v28  ;;  %v1486_v55 = vor.u32 %v1130_v30, %v814_v31 }
  0x19   :  { %576 = vmatpush.bf16.msra.mxu1 %v957_v5  ;;  %v1208_v36 = vld [vmem:[%s1851_s1 + $0x1f4] sm:$0xf]  ;;  %v1126_v37 = vld [vmem:[%s1851_s1 + $0x1f8] sm:$0xf0]  ;;  %v1133_v41 = vld [vmem:[%s1852_s0 + $0x14] sm:$0xf0]  ;;  %v1065_v45 = vor.u32 %v1192_v33, %v1062_v34  ;;  %1211 = vset.pattern.permute.xlu0 %v1214_v49 }
  0x1a   :  { %605 = vmatpush.bf16.msra.mxu2 %v1021_v6  ;;  %v1131_v42 = vld [vmem:[%s1852_s0 + $0xc] sm:$0xf]  ;;  %v822_v43 = vld [vmem:[%s1852_s0 + $0x18] sm:$0xf0]  ;;  %v1160_v46 = vld [vmem:[%s1851_s1 + $0x74] sm:$0xf]  ;;  %v1129_v51 = vor.u32 %v1208_v36, %v1126_v37  ;;  %104 = vperm.xlu0 %1211, %v94_v38   ;;  %v1488_v56 = vor.u32 %v1133_v41, %v820_v32 }
  0x1b   :  { %634 = vmatpush.bf16.msra.mxu3 %v1085_v10  ;;  %v934_v47 = vld [vmem:[%s1851_s1 + $0x78] sm:$0xf0]  ;;  %v1176_v48 = vld [vmem:[%s1851_s1 + $0xf4] sm:$0xf]  ;;  %v1190_v53 = vld [vmem:[%s1851_s1 + $0x164] sm:$0xf]  ;;  %1212 = vset.pattern.permute.xlu1 %v1214_v49  ;;  %v1496_v59 = vor.u32 %v1131_v42, %v822_v43 }
  0x1c   :  { %548 = vmatpush.bf16.msra.mxu0 %v885_v17  ;;  %v998_v52 = vld [vmem:[%s1851_s1 + $0xf8] sm:$0xf0]  ;;  %v1054_v54 = vld [vmem:[%s1851_s1 + $0x168] sm:$0xf0]  ;;  %v1206_v57 = vld [vmem:[%s1851_s1 + $0x1e4] sm:$0xf]  ;;  %1213 = vset.pattern.permute.xlu2 %v1214_v49  ;;  %v937_v60 = vor.u32 %v1160_v46, %v934_v47 }
  0x1d   :  { %577 = vmatpush.bf16.msra.mxu1 %v949_v21  ;;  %v1118_v58 = vld [vmem:[%s1851_s1 + $0x1e8] sm:$0xf0]  ;;  %v1001_v61 = vor.u32 %v1176_v48, %v998_v52  ;;  %v1057_v62 = vor.u32 %v1190_v53, %v1054_v54  ;;  %v1158_v63 = vld [vmem:[%s1851_s1 + $0x64] sm:$0xf]  ;;  %v1188_v4 = vld [vmem:[%s1851_s1 + $0x154] sm:$0xf] }
  0x1e   :  { %606 = vmatpush.bf16.msra.mxu2 %v1013_v22  ;;  %v926_v0 = vld [vmem:[%s1851_s1 + $0x68] sm:$0xf0]  ;;  %v1174_v1 = vld [vmem:[%s1851_s1 + $0xe4] sm:$0xf]  ;;  %v1121_v2 = vor.u32 %v1206_v57, %v1118_v58  ;;  %v1046_v5 = vld [vmem:[%s1851_s1 + $0x158] sm:$0xf0] }
  0x1f   :  { %635 = vmatpush.bf16.msra.mxu3 %v1077_v26  ;;  %v990_v3 = vld [vmem:[%s1851_s1 + $0xe8] sm:$0xf0]  ;;  %v1204_v6 = vld [vmem:[%s1851_s1 + $0x1d4] sm:$0xf]  ;;  %v1110_v7 = vld [vmem:[%s1851_s1 + $0x1d8] sm:$0xf0]  ;;  %v929_v9 = vor.u32 %v1158_v63, %v926_v0  ;;  %v1049_v12 = vor.u32 %v1188_v4, %v1046_v5 }
  0x20   :  { %549 = vmatpush.bf16.msra.mxu0 %v877_v35  ;;  %v95_v8 = vld [vmem:[%s1853_s2 + $0x8] sm:$0xff]  ;;  %v1156_v10 = vld [vmem:[%s1851_s1 + $0x54] sm:$0xf]  ;;  %v993_v11 = vor.u32 %v1174_v1, %v990_v3  ;;  %v918_v13 = vld [vmem:[%s1851_s1 + $0x58] sm:$0xf0]  ;;  %v1113_v16 = vor.u32 %v1204_v6, %v1110_v7 }
  0x21   :  { %578 = vmatpush.bf16.msra.mxu1 %v941_v39  ;;  %v1172_v14 = vld [vmem:[%s1851_s1 + $0xd4] sm:$0xf]  ;;  %v982_v17 = vld [vmem:[%s1851_s1 + $0xd8] sm:$0xf0]  ;;  %v1186_v18 = vld [vmem:[%s1851_s1 + $0x144] sm:$0xf]  ;;  %v921_v22 = vor.u32 %v1156_v10, %v918_v13 }
  0x22   :  { %607 = vmatpush.bf16.msra.mxu2 %v1005_v40  ;;  %v96_v15 = vld [vmem:[%s1853_s2 + $0x10] sm:$0xff]  ;;  %109 = vperm.xlu0 %1211, %v95_v8   ;;  %v1038_v19 = vld [vmem:[%s1851_s1 + $0x148] sm:$0xf0]  ;;  %v1202_v20 = vld [vmem:[%s1851_s1 + $0x1c4] sm:$0xf]  ;;  %v985_v25 = vor.u32 %v1172_v14, %v982_v17 }
  0x23   :  { %636 = vmatpush.bf16.msra.mxu3 %v1069_v44  ;;  %550 = vmatmul.bf16.vlgmr.msra.gmra.mxu0 %v1475_v50  ;;  %v1102_v21 = vld [vmem:[%s1851_s1 + $0x1c8] sm:$0xf0]  ;;  %v828_v23 = vld [vmem:[%s1852_s0 + $0x20] sm:$0xf]  ;;  %v1136_v24 = vld [vmem:[%s1852_s0 + $0x2c] sm:$0xf0]  ;;  %v1041_v26 = vor.u32 %v1186_v18, %v1038_v19 }
  0x24   :  { %579 = vmatmul.bf16.vlgmr.msra.gmra.mxu1 %v1486_v55  ;;  %658 = vmatpush.bf16.msrb.mxu0 %v937_v60  ;;  %v1154_v27 = vld [vmem:[%s1851_s1 + $0x44] sm:$0xf]  ;;  %v910_v28 = vld [vmem:[%s1851_s1 + $0x48] sm:$0xf0]  ;;  %v830_v31 = vld [vmem:[%s1852_s0 + $0x30] sm:$0xf0]  ;;  %v1105_v33 = vor.u32 %v1202_v20, %v1102_v21  ;;  %v1616_v49 = vor.u32 %v1136_v24, %v828_v23 }
  0x25   :  { %608 = vmatmul.bf16.vlgmr.msra.gmra.mxu2 %v1488_v56  ;;  %687 = vmatpush.bf16.msrb.mxu1 %v1001_v61  ;;  %v1170_v29 = vld [vmem:[%s1851_s1 + $0xc4] sm:$0xf]  ;;  %v836_v32 = vld [vmem:[%s1852_s0 + $0x28] sm:$0xf]  ;;  %v974_v34 = vld [vmem:[%s1851_s1 + $0xc8] sm:$0xf0]  ;;  %v913_v42 = vor.u32 %v1154_v27, %v910_v28 }
  0x26   :  { %716 = vmatpush.bf16.msrb.mxu2 %v1065_v45  ;;  %637 = vmatmul.bf16.vlgmr.msra.gmra.mxu3 %v1496_v59  ;;  %v1134_v30 = vld [vmem:[%s1852_s0 + $0x24] sm:$0xf]  ;;  %v1184_v35 = vld [vmem:[%s1851_s1 + $0x134] sm:$0xf]  ;;  %v1030_v36 = vld [vmem:[%s1851_s1 + $0x138] sm:$0xf0]  ;;  %v977_v44 = vor.u32 %v1170_v29, %v974_v34 }
  0x27   :  { %745 = vmatpush.bf16.msrb.mxu3 %v1129_v51  ;;  %114 = vperm.xlu1 %1212, %v96_v15   ;;  %v1137_v37 = vld [vmem:[%s1852_s0 + $0x34] sm:$0xf0]  ;;  %v1200_v38 = vld [vmem:[%s1851_s1 + $0x1b4] sm:$0xf]  ;;  %v1094_v39 = vld [vmem:[%s1851_s1 + $0x1b8] sm:$0xf0]  ;;  %v1033_v45 = vor.u32 %v1184_v35, %v1030_v36  ;;  %v1627_v57 = vor.u32 %v1134_v30, %v830_v31 }
  0x28   :  { %659 = vmatpush.bf16.msrb.mxu0 %v929_v9  ;;  %v1135_v40 = vld [vmem:[%s1852_s0 + $0x2c] sm:$0xf]  ;;  %v838_v41 = vld [vmem:[%s1852_s0 + $0x38] sm:$0xf0]  ;;  %v1152_v46 = vld [vmem:[%s1851_s1 + $0x34] sm:$0xf]  ;;  %v1097_v51 = vor.u32 %v1200_v38, %v1094_v39  ;;  %v1629_v58 = vor.u32 %v1137_v37, %v836_v32 }
  0x29   :  { %688 = vmatpush.bf16.msrb.mxu1 %v993_v11  ;;  %v97_v43 = vld [vmem:[%s1853_s2 + $0x18] sm:$0xff]  ;;  %v1168_v48 = vld [vmem:[%s1851_s1 + $0xb4] sm:$0xf]  ;;  %v1182_v53 = vld [vmem:[%s1851_s1 + $0x124] sm:$0xf] }
  0x2a   :  { %717 = vmatpush.bf16.msrb.mxu2 %v1057_v62  ;;  %v902_v47 = vld [vmem:[%s1851_s1 + $0x38] sm:$0xf0]  ;;  %v1022_v54 = vld [vmem:[%s1851_s1 + $0x128] sm:$0xf0]  ;;  %v1198_v60 = vld [vmem:[%s1851_s1 + $0x1a4] sm:$0xf]  ;;  %v1637_v62 = vor.u32 %v1135_v40, %v838_v41 }
  0x2b   :  { %746 = vmatpush.bf16.msrb.mxu3 %v1121_v2  ;;  %v966_v52 = vld [vmem:[%s1851_s1 + $0xb8] sm:$0xf0]  ;;  %v1086_v61 = vld [vmem:[%s1851_s1 + $0x1a8] sm:$0xf0]  ;;  %v905_v63 = vor.u32 %v1152_v46, %v902_v47  ;;  %v1025_v1 = vor.u32 %v1182_v53, %v1022_v54  ;;  %v1150_v2 = vld [vmem:[%s1851_s1 + $0x24] sm:$0xf] }
  0x2c   :  { %660 = vmatpush.bf16.msrb.mxu0 %v921_v22  ;;  %v969_v0 = vor.u32 %v1168_v48, %v966_v52  ;;  %v894_v3 = vld [vmem:[%s1851_s1 + $0x28] sm:$0xf0]  ;;  %v1089_v4 = vor.u32 %v1198_v60, %v1086_v61  ;;  %v1166_v5 = vld [vmem:[%s1851_s1 + $0xa4] sm:$0xf]  ;;  %v1180_v8 = vld [vmem:[%s1851_s1 + $0x114] sm:$0xf] }
  0x2d   :  { %689 = vmatpush.bf16.msrb.mxu1 %v985_v25  ;;  %v958_v6 = vld [vmem:[%s1851_s1 + $0xa8] sm:$0xf0]  ;;  %v897_v7 = vor.u32 %v1150_v2, %v894_v3  ;;  %v1014_v9 = vld [vmem:[%s1851_s1 + $0x118] sm:$0xf0]  ;;  %v1148_v10 = vld [vmem:[%s1851_s1 + $0x14] sm:$0xf] }
  0x2e   :  { %718 = vmatpush.bf16.msrb.mxu2 %v1049_v12  ;;  %v961_v11 = vor.u32 %v1166_v5, %v958_v6  ;;  %v1017_v12 = vor.u32 %v1180_v8, %v1014_v9  ;;  %v886_v13 = vld [vmem:[%s1851_s1 + $0x18] sm:$0xf0]  ;;  %v1196_v14 = vld [vmem:[%s1851_s1 + $0x194] sm:$0xf]  ;;  %v1178_v19 = vld [vmem:[%s1851_s1 + $0x104] sm:$0xf] }
  0x2f   :  { %747 = vmatpush.bf16.msrb.mxu3 %v1113_v16  ;;  %119 = vperm.xlu1 %1212, %v97_v43   ;;  %v1078_v15 = vld [vmem:[%s1851_s1 + $0x198] sm:$0xf0]  ;;  %v1164_v17 = vld [vmem:[%s1851_s1 + $0x94] sm:$0xf]  ;;  %v1006_v20 = vld [vmem:[%s1851_s1 + $0x108] sm:$0xf0]  ;;  %v889_v21 = vor.u32 %v1148_v10, %v886_v13 }
  0x30   :  { %661 = vmatpush.bf16.msrb.mxu0 %v913_v42  ;;  %v1081_v16 = vor.u32 %v1196_v14, %v1078_v15  ;;  %v950_v18 = vld [vmem:[%s1851_s1 + $0x98] sm:$0xf0]  ;;  %v1194_v22 = vld [vmem:[%s1851_s1 + $0x184] sm:$0xf]  ;;  %v1070_v23 = vld [vmem:[%s1851_s1 + $0x188] sm:$0xf0]  ;;  %v1009_v25 = vor.u32 %v1178_v19, %v1006_v20 }
  0x31   :  { %690 = vmatpush.bf16.msrb.mxu1 %v977_v44  ;;  %v953_v24 = vor.u32 %v1164_v17, %v950_v18  ;;  %v878_v27 = vld [vmem:[%s1851_s1 + $0x8] sm:$0xf0]  ;;  %v100_v28 = vld [vmem:[%s1853_s2 + $0x30] sm:$0xff]  ;;  %v1073_v29 = vor.u32 %v1194_v22, %v1070_v23  ;;  %v1162_v30 = vld [vmem:[%s1851_s1 + $0x84] sm:$0xf] }
  0x32   :  { %719 = vmatpush.bf16.msrb.mxu2 %v1041_v26  ;;  %v1146_v26 = vld [vmem:[%s1851_s1 + $0x4] sm:$0xf]  ;;  %v942_v31 = vld [vmem:[%s1851_s1 + $0x88] sm:$0xf0]  ;;  %134 = vperm.xlu0 %1211, %v100_v28   ;;  %v844_v32 = vld [vmem:[%s1852_s0 + $0x40] sm:$0xf] }
  0x33   :  { %748 = vmatpush.bf16.msrb.mxu3 %v1105_v33  ;;  %555 = vmatmul.bf16.gmra.mxu0 %v1616_v49  ;;  %v1140_v33 = vld [vmem:[%s1852_s0 + $0x4c] sm:$0xf0]  ;;  %v1138_v34 = vld [vmem:[%s1852_s0 + $0x44] sm:$0xf]  ;;  %v846_v35 = vld [vmem:[%s1852_s0 + $0x50] sm:$0xf0]  ;;  %v881_v38 = vor.u32 %v1146_v26, %v878_v27  ;;  %v945_v41 = vor.u32 %v1162_v30, %v942_v31 }
  0x34   :  { %584 = vmatmul.bf16.gmra.mxu1 %v1627_v57  ;;  %662 = vmatpush.bf16.msrb.mxu0 %v905_v63  ;;  %v852_v36 = vld [vmem:[%s1852_s0 + $0x48] sm:$0xf]  ;;  %v1141_v37 = vld [vmem:[%s1852_s0 + $0x54] sm:$0xf0]  ;;  %v1139_v39 = vld [vmem:[%s1852_s0 + $0x4c] sm:$0xf]  ;;  %v845_v42 = vor.u32 %v1140_v33, %v844_v32  ;;  %v849_v43 = vor.u32 %v1138_v34, %v846_v35 }
  0x35   :  { %613 = vmatmul.bf16.gmra.mxu2 %v1629_v58  ;;  %691 = vmatpush.bf16.msrb.mxu1 %v969_v0  ;;  %v854_v40 = vld [vmem:[%s1852_s0 + $0x58] sm:$0xf0]  ;;  %v853_v44 = vor.u32 %v1141_v37, %v852_v36  ;;  %v98_v46 = vld [vmem:[%s1853_s2 + $0x20] sm:$0xff]  ;;  %v99_v48 = vld [vmem:[%s1853_s2 + $0x28] sm:$0xff] }
  0x36   :  { %720 = vmatpush.bf16.msrb.mxu2 %v1033_v45  ;;  %642 = vmatmul.bf16.gmra.mxu3 %v1637_v62  ;;  %v857_v45 = vor.u32 %v1139_v39, %v854_v40  ;;  %v101_v47 = vld [vmem:[%s1853_s2 + $0x38] sm:$0xff]  ;;  %v1144_v52 = vld [vmem:[%s1852_s0 + $0x6c] sm:$0xf0]  ;;  %v1142_v53 = vld [vmem:[%s1852_s0 + $0x64] sm:$0xf] }
  0x37   :  { %749 = vmatpush.bf16.msrb.mxu3 %v1097_v51  ;;  %124 = vperm.xlu2 %1213, %v98_v46   ;;  %v860_v51 = vld [vmem:[%s1852_s0 + $0x60] sm:$0xf]  ;;  %v862_v54 = vld [vmem:[%s1852_s0 + $0x70] sm:$0xf0]  ;;  %v868_v60 = vld [vmem:[%s1852_s0 + $0x68] sm:$0xf] }
  0x38   :  { %663 = vmatpush.bf16.msrb.mxu0 %v897_v7  ;;  %139 = vperm.xlu1 %1212, %v101_v47   ;;  %v1145_v61 = vld [vmem:[%s1852_s0 + $0x74] sm:$0xf0]  ;;  %v1143_v63 = vld [vmem:[%s1852_s0 + $0x6c] sm:$0xf]  ;;  %v870_v0 = vld [vmem:[%s1852_s0 + $0x78] sm:$0xf0]  ;;  %v865_v2 = vor.u32 %v1142_v53, %v862_v54 }
  0x39   :  { %692 = vmatpush.bf16.msrb.mxu1 %v961_v11  ;;  %v869_v3 = vor.u32 %v1145_v61, %v868_v60 }
  0x3a   :  { %721 = vmatpush.bf16.msrb.mxu2 %v1025_v1  ;;  %v861_v1 = vor.u32 %v1144_v52, %v860_v51 }
  0x3b   :  { %750 = vmatpush.bf16.msrb.mxu3 %v1089_v4  ;;  %v873_v4 = vor.u32 %v1143_v63, %v870_v0 }
  0x3c   :  { %664 = vmatpush.bf16.msrb.mxu0 %v889_v21 }
  0x3d   :  { %693 = vmatpush.bf16.msrb.mxu1 %v953_v24 }
  0x3e   :  { %722 = vmatpush.bf16.msrb.mxu2 %v1017_v12 }
  0x3f   :  { %751 = vmatpush.bf16.msrb.mxu3 %v1081_v16  ;;  %129 = vperm.xlu2 %1213, %v99_v48  }
  0x40   :  { %665 = vmatpush.bf16.msrb.mxu0 %v881_v38 }
  0x41   :  { %694 = vmatpush.bf16.msrb.mxu1 %v945_v41 }
  0x42   :  { %723 = vmatpush.bf16.msrb.mxu2 %v1009_v25 }
  0x43   :  { %752 = vmatpush.bf16.msrb.mxu3 %v1073_v29  ;;  %560 = vmatmul.bf16.gmra.mxu0 %v845_v42 }
  0x44   :  { %589 = vmatmul.bf16.gmra.mxu1 %v849_v43 }
  0x45   :  { %618 = vmatmul.bf16.gmra.mxu2 %v853_v44 }
  0x46   :  { %647 = vmatmul.bf16.gmra.mxu3 %v857_v45 }
  0x53   :  { %565 = vmatmul.bf16.gmra.mxu0 %v861_v1 }
  0x54   :  { %594 = vmatmul.bf16.gmra.mxu1 %v865_v2 }
  0x55   :  { %623 = vmatmul.bf16.gmra.mxu2 %v869_v3 }
  0x56   :  { %652 = vmatmul.bf16.gmra.mxu3 %v873_v4 }
  0x63   :  { %666 = vmatmul.bf16.vlgmr.msrb.gmra.mxu0 %v1475_v50 }
  0x64   :  { %695 = vmatmul.bf16.vlgmr.msrb.gmra.mxu1 %v1486_v55 }
  0x65   :  { %724 = vmatmul.bf16.vlgmr.msrb.gmra.mxu2 %v1488_v56 }
  0x66   :  { %753 = vmatmul.bf16.vlgmr.msrb.gmra.mxu3 %v1496_v59 }
  0x73   :  { %671 = vmatmul.bf16.gmra.mxu0 %v1616_v49 }
  0x74   :  { %700 = vmatmul.bf16.gmra.mxu1 %v1627_v57 }
  0x75   :  { %729 = vmatmul.bf16.gmra.mxu2 %v1629_v58 }
  0x76   :  { %758 = vmatmul.bf16.gmra.mxu3 %v1637_v62 }
  0x83   :  { %676 = vmatmul.bf16.gmra.mxu0 %v845_v42 }
  0x84   :  { %705 = vmatmul.bf16.gmra.mxu1 %v849_v43 }
  0x85   :  { %734 = vmatmul.bf16.gmra.mxu2 %v853_v44 }
  0x86   :  { %763 = vmatmul.bf16.gmra.mxu3 %v857_v45 }
  0x8c   :  { %v1771_v50 = vpop.permute.xlu0 %104 }
  0x91   :  { %v1789_v29 = vpop.permute.xlu2 %124 }
  0x93   :  { %681 = vmatmul.bf16.gmra.mxu0 %v861_v1 }
  0x94   :  { %710 = vmatmul.bf16.gmra.mxu1 %v865_v2  ;;  %v1774_v57 = vpop.permute.xlu0 %109 }
  0x95   :  { %739 = vmatmul.bf16.gmra.mxu2 %v869_v3 }
  0x96   :  { %768 = vmatmul.bf16.gmra.mxu3 %v873_v4 }
  0x99   :  { %v1779_v11 = vpop.permute.xlu1 %114  ;;  %v1794_v38 = vpop.permute.xlu2 %129 }
  0xa0   :  { %v551_v55 = vpop.f32.mrf.mxu0 }
  0xa1   :  { %v552_v56 = vadd.f32 %v551_v55, %v1771_v50  ;;  %v580_v59 = vpop.f32.mrf.mxu1  ;;  %v1784_v20 = vpop.permute.xlu1 %119 }
  0xa3   :  { %v581_v49 = vadd.f32 %v580_v59, %v552_v56 }
  0xa4   :  { %v1799_v47 = vpop.permute.xlu0 %134 }
  0xa8   :  { %v609_v58 = vpop.f32.mrf.mxu2  ;;  %v553_v6 = vpop.f32.mrf.mxu0 }
  0xa9   :  { %v610_v5 = vadd.f32 %v609_v58, %v581_v49  ;;  %v638_v62 = vpop.f32.mrf.mxu3  ;;  %v554_v7 = vadd.f32 %v553_v6, %v1774_v57  ;;  %v582_v8 = vpop.f32.mrf.mxu1 }
  0xaa   :  { %v1804_v0 = vpop.permute.xlu1 %139 }
  0xab   :  { %v1777_v9 = vadd.f32 %v638_v62, %v610_v5  ;;  %v583_v10 = vadd.f32 %v582_v8, %v554_v7 }
  0xb0   :  { %v611_v12 = vpop.f32.mrf.mxu2  ;;  %v556_v15 = vpop.f32.mrf.mxu0 }
  0xb1   :  { %v612_v13 = vadd.f32 %v611_v12, %v583_v10  ;;  %v640_v14 = vpop.f32.mrf.mxu3  ;;  %v557_v16 = vadd.f32 %v556_v15, %v1779_v11  ;;  %v585_v17 = vpop.f32.mrf.mxu1 }
  0xb3   :  { %v1782_v18 = vadd.f32 %v640_v14, %v612_v13  ;;  %v586_v19 = vadd.f32 %v585_v17, %v557_v16 }
  0xb8   :  { %v614_v21 = vpop.f32.mrf.mxu2  ;;  %v558_v24 = vpop.f32.mrf.mxu0 }
  0xb9   :  { %v615_v22 = vadd.f32 %v614_v21, %v586_v19  ;;  %v643_v23 = vpop.f32.mrf.mxu3  ;;  %v559_v25 = vadd.f32 %v558_v24, %v1784_v20  ;;  %v587_v26 = vpop.f32.mrf.mxu1 }
  0xbb   :  { %v1787_v27 = vadd.f32 %v643_v23, %v615_v22  ;;  %v588_v28 = vadd.f32 %v587_v26, %v559_v25  ;;  %v774_v22 = vmax.f32 %v1777_v9, 0.0 }
  0xc0   :  { %v616_v30 = vpop.f32.mrf.mxu2  ;;  %v561_v33 = vpop.f32.mrf.mxu0 }
  0xc1   :  { %v617_v31 = vadd.f32 %v616_v30, %v588_v28  ;;  %v645_v32 = vpop.f32.mrf.mxu3  ;;  %v562_v34 = vadd.f32 %v561_v33, %v1789_v29  ;;  %v590_v35 = vpop.f32.mrf.mxu1 }
  0xc3   :  { %v1792_v36 = vadd.f32 %v645_v32, %v617_v31  ;;  %v591_v37 = vadd.f32 %v590_v35, %v562_v34  ;;  %v776_v34 = vmax.f32 %v1782_v18, 0.0 }
  0xc8   :  { %v619_v39 = vpop.f32.mrf.mxu2  ;;  %v563_v42 = vpop.f32.mrf.mxu0 }
  0xc9   :  { %v620_v40 = vadd.f32 %v619_v39, %v591_v37  ;;  %v648_v41 = vpop.f32.mrf.mxu3  ;;  %v564_v43 = vadd.f32 %v563_v42, %v1794_v38  ;;  %v592_v44 = vpop.f32.mrf.mxu1 }
  0xcb   :  { %v1797_v45 = vadd.f32 %v648_v41, %v620_v40  ;;  %v593_v46 = vadd.f32 %v592_v44, %v564_v43 }
  0xd0   :  { %v621_v48 = vpop.f32.mrf.mxu2  ;;  %v566_v53 = vpop.f32.mrf.mxu0 }
  0xd1   :  { %v622_v51 = vadd.f32 %v621_v48, %v593_v46  ;;  %v650_v52 = vpop.f32.mrf.mxu3  ;;  %v595_v54 = vpop.f32.mrf.mxu1  ;;  %v567_v60 = vadd.f32 %v566_v53, %v1799_v47 }
  0xd3   :  { %v1802_v61 = vadd.f32 %v650_v52, %v622_v51  ;;  %v596_v63 = vadd.f32 %v595_v54, %v567_v60 }
  0xd8   :  { %v624_v1 = vpop.f32.mrf.mxu2  ;;  %v568_v4 = vpop.f32.mrf.mxu0 }
  0xd9   :  { %v625_v2 = vadd.f32 %v624_v1, %v596_v63  ;;  %v653_v3 = vpop.f32.mrf.mxu3  ;;  %v569_v55 = vadd.f32 %v568_v4, %v1804_v0  ;;  %v597_v56 = vpop.f32.mrf.mxu1 }
  0xdb   :  { %v1807_v59 = vadd.f32 %v653_v3, %v625_v2  ;;  %v598_v49 = vadd.f32 %v597_v56, %v569_v55  ;;  %v780_v2 = vmax.f32 %v1792_v36, 0.0 }
  0xe0   :  { %v626_v58 = vpop.f32.mrf.mxu2  ;;  %v667_v6 = vpop.f32.mrf.mxu0 }
  0xe1   :  { %v627_v5 = vadd.f32 %v626_v58, %v598_v49  ;;  %v655_v62 = vpop.f32.mrf.mxu3  ;;  %v668_v7 = vadd.f32 %v667_v6, %v1771_v50  ;;  %v696_v8 = vpop.f32.mrf.mxu1 }
  0xe3   :  { %v1810_v10 = vadd.f32 %v655_v62, %v627_v5  ;;  %v697_v12 = vadd.f32 %v696_v8, %v668_v7 }
  0xe8   :  { %v725_v13 = vpop.f32.mrf.mxu2  ;;  %v669_v16 = vpop.f32.mrf.mxu0 }
  0xe9   :  { %v726_v14 = vadd.f32 %v725_v13, %v697_v12  ;;  %v754_v15 = vpop.f32.mrf.mxu3  ;;  %v698_v17 = vpop.f32.mrf.mxu1  ;;  %v670_v21 = vadd.f32 %v669_v16, %v1774_v57 }
  0xeb   :  { %v755_v19 = vadd.f32 %v754_v15, %v726_v14  ;;  %v699_v25 = vadd.f32 %v698_v17, %v670_v21 }
  0xed   :  { %v775_v23 = vmax.f32 %v755_v19, 0.0  ;;  %v784_v19 = vmax.f32 %v1802_v61, 0.0 }
  0xef   :  { %v790_v24 = vpack.c.bf16 %v775_v23, %v774_v22 }
  0xf0   :  { %v727_v26 = vpop.f32.mrf.mxu2  ;;  %v672_v30 = vpop.f32.mrf.mxu0 }
  0xf1   :  { %798 = vst [vmem:[%s1854_s3] sm:$0xff] %v790_v24  ;;  %v728_v50 = vadd.f32 %v727_v26, %v699_v25  ;;  %v756_v28 = vpop.f32.mrf.mxu3  ;;  %v673_v31 = vadd.f32 %v672_v30, %v1779_v11  ;;  %v701_v32 = vpop.f32.mrf.mxu1  ;;  %v778_v11 = vmax.f32 %v1787_v27, 0.0 }
  0xf3   :  { %v757_v33 = vadd.f32 %v756_v28, %v728_v50  ;;  %v702_v35 = vadd.f32 %v701_v32, %v673_v31  ;;  %v786_v28 = vmax.f32 %v1807_v59, 0.0 }
  0xf5   :  { %v777_v57 = vmax.f32 %v757_v33, 0.0 }
  0xf7   :  { %v791_v9 = vpack.c.bf16 %v777_v57, %v776_v34 }
  0xf8   :  { %v730_v37 = vpop.f32.mrf.mxu2  ;;  %v674_v41 = vpop.f32.mrf.mxu0 }
  0xf9   :  { %799 = vst [vmem:[%s1854_s3 + $0x8] sm:$0xff] %v791_v9  ;;  %v731_v39 = vadd.f32 %v730_v37, %v702_v35  ;;  %v759_v40 = vpop.f32.mrf.mxu3  ;;  %v703_v42 = vpop.f32.mrf.mxu1  ;;  %v675_v44 = vadd.f32 %v674_v41, %v1784_v20  ;;  %v788_v35 = vmax.f32 %v1810_v10, 0.0 }
  0xfb   :  { %v760_v43 = vadd.f32 %v759_v40, %v731_v39  ;;  %v704_v18 = vadd.f32 %v703_v42, %v675_v44 }
  0xfd   :  { %v779_v46 = vmax.f32 %v760_v43, 0.0 }
  0xff   :  { %v792_v48 = vpack.c.bf16 %v779_v46, %v778_v11 }
 0x100   :  { %v732_v51 = vpop.f32.mrf.mxu2  ;;  %v677_v54 = vpop.f32.mrf.mxu0 }
 0x101   :  { %800 = vst [vmem:[%s1854_s3 + $0x10] sm:$0xff] %v792_v48  ;;  %v733_v52 = vadd.f32 %v732_v51, %v704_v18  ;;  %v761_v53 = vpop.f32.mrf.mxu3  ;;  %v678_v60 = vadd.f32 %v677_v54, %v1789_v29  ;;  %v706_v63 = vpop.f32.mrf.mxu1  ;;  %v782_v29 = vmax.f32 %v1797_v45, 0.0 }
 0x103   :  { %v762_v1 = vadd.f32 %v761_v53, %v733_v52  ;;  %v707_v3 = vadd.f32 %v706_v63, %v678_v60 }
 0x105   :  { %v781_v20 = vmax.f32 %v762_v1, 0.0 }
 0x107   :  { %v793_v27 = vpack.c.bf16 %v781_v20, %v780_v2 }
 0x108   :  { %v735_v4 = vpop.f32.mrf.mxu2  ;;  %v679_v49 = vpop.f32.mrf.mxu0 }
 0x109   :  { %801 = vst [vmem:[%s1854_s3 + $0x18] sm:$0xff] %v793_v27  ;;  %v736_v55 = vadd.f32 %v735_v4, %v707_v3  ;;  %v764_v56 = vpop.f32.mrf.mxu3  ;;  %v708_v58 = vpop.f32.mrf.mxu1  ;;  %v680_v62 = vadd.f32 %v679_v49, %v1794_v38 }
 0x10b   :  { %v765_v5 = vadd.f32 %v764_v56, %v736_v55  ;;  %v709_v36 = vadd.f32 %v708_v58, %v680_v62 }
 0x10d   :  { %v783_v6 = vmax.f32 %v765_v5, 0.0 }
 0x10f   :  { %v794_v7 = vpack.c.bf16 %v783_v6, %v782_v29 }
 0x110   :  { %v737_v8 = vpop.f32.mrf.mxu2  ;;  %v682_v14 = vpop.f32.mrf.mxu0 }
 0x111   :  { %802 = vst [vmem:[%s1854_s3 + $0x20] sm:$0xff] %v794_v7  ;;  %v738_v12 = vadd.f32 %v737_v8, %v709_v36  ;;  %v766_v13 = vpop.f32.mrf.mxu3  ;;  %v683_v16 = vadd.f32 %v682_v14, %v1799_v47  ;;  %v711_v17 = vpop.f32.mrf.mxu1 }
 0x113   :  { %v767_v15 = vadd.f32 %v766_v13, %v738_v12  ;;  %v712_v45 = vadd.f32 %v711_v17, %v683_v16 }
 0x115   :  { %v785_v38 = vmax.f32 %v767_v15, 0.0 }
 0x117   :  { %v795_v21 = vpack.c.bf16 %v785_v38, %v784_v19 }
 0x118   :  { %v740_v22 = vpop.f32.mrf.mxu2  ;;  %v684_v25 = vpop.f32.mrf.mxu0 }
 0x119   :  { %803 = vst [vmem:[%s1854_s3 + $0x28] sm:$0xff] %v795_v21  ;;  %v741_v23 = vadd.f32 %v740_v22, %v712_v45  ;;  %v769_v24 = vpop.f32.mrf.mxu3  ;;  %v685_v50 = vadd.f32 %v684_v25, %v1804_v0  ;;  %v713_v30 = vpop.f32.mrf.mxu1 }
 0x11b   :  { %v770_v26 = vadd.f32 %v769_v24, %v741_v23  ;;  %v714_v61 = vadd.f32 %v713_v30, %v685_v50 }
 0x11d   :  { %v787_v47 = vmax.f32 %v770_v26, 0.0 }
 0x11f   :  { %v796_v31 = vpack.c.bf16 %v787_v47, %v786_v28 }
 0x120   :  { %v742_v32 = vpop.f32.mrf.mxu2 }
 0x121   :  { %804 = vst [vmem:[%s1854_s3 + $0x30] sm:$0xff] %v796_v31  ;;  %v743_v33 = vadd.f32 %v742_v32, %v714_v61  ;;  %v771_v34 = vpop.f32.mrf.mxu3 }
 0x123   :  { %v772_v57 = vadd.f32 %v771_v34, %v743_v33 }
 0x125   :  { %v789_v9 = vmax.f32 %v772_v57, 0.0 }
 0x127   :  { %v797_v37 = vpack.c.bf16 %v789_v9, %v788_v35 }
 0x129   :  { %805 = vst [vmem:[%s1854_s3 + $0x38] sm:$0xff] %v797_v37 }

// kernel: cnn_compress_forward.6
= control target key start
LH: loop header
LB: loop body
LE: loop exit
PB: predicated region body
PF: predicated region fallthrough
CT: control target
= control target key end

     0   :  { %v1026_v8 = vmov 0   ;;  %s1332_s1 = inlined_call_operand.vmem [shape: bf16[640,128], index: 1, kind: input, shape index: {}]   ;;  %s1333_s2 = inlined_call_operand.vmem [shape: f32[64,1], index: 2, kind: input, shape index: {}]   ;;  %s1334_s0 = inlined_call_operand.vmem [shape: bf16[64,640], index: 0, kind: input, shape index: {}]   ;;  %s1335_s3 = inlined_call_operand.vmem [shape: bf16[64,128], index: 3, kind: output, shape index: {}]  }
   0x1   :  { %v950_v0 = vld [vmem:[%s1332_s1 + $0x38] sm:$0xff]  ;;  %v949_v2 = vld [vmem:[%s1332_s1 + $0x30] sm:$0xff]  ;;  %v948_v6 = vld [vmem:[%s1332_s1 + $0x28] sm:$0xff]  ;;  %1023 = vset.pattern.permute.xlu0 %v1026_v8  ;;  %1024 = vset.pattern.permute.xlu1 %v1026_v8 }
   0x2   :  { %v966_v1 = vld [vmem:[%s1332_s1 + $0xb8] sm:$0xff]  ;;  %1006 = vmatpush.bf16.msra.mxu1 %v950_v0  ;;  %510 = vmatpush.bf16.msra.mxu0 %v950_v0  ;;  %v965_v3 = vld [vmem:[%s1332_s1 + $0xb0] sm:$0xff]  ;;  %v964_v7 = vld [vmem:[%s1332_s1 + $0xa8] sm:$0xff] }
   0x3   :  { %568 = vmatpush.bf16.msra.mxu2 %v966_v1  ;;  %v974_v4 = vld [vmem:[%s1332_s1 + $0xf8] sm:$0xff]  ;;  %v973_v5 = vld [vmem:[%s1332_s1 + $0xf0] sm:$0xff]  ;;  %v972_v9 = vld [vmem:[%s1332_s1 + $0xe8] sm:$0xff]  ;;  %1025 = vset.pattern.permute.xlu2 %v1026_v8 }
   0x4   :  { %597 = vmatpush.bf16.msra.mxu3 %v974_v4  ;;  %v947_v10 = vld [vmem:[%s1332_s1 + $0x20] sm:$0xff]  ;;  %v946_v14 = vld [vmem:[%s1332_s1 + $0x18] sm:$0xff]  ;;  %v120_v17 = vld [vmem:[%s1333_s2 + $0x10] sm:$0xff] }
   0x5   :  { %v118_v11 = vld [vmem:[%s1333_s2] sm:$0xff]  ;;  %v962_v15 = vld [vmem:[%s1332_s1 + $0x98] sm:$0xff]  ;;  %v119_v18 = vld [vmem:[%s1333_s2 + $0x8] sm:$0xff]  ;;  %138 = vperm.xlu1 %1024, %v120_v17  }
   0x6   :  { %1007 = vmatpush.bf16.msra.mxu1 %v949_v2  ;;  %511 = vmatpush.bf16.msra.mxu0 %v949_v2  ;;  %v963_v12 = vld [vmem:[%s1332_s1 + $0xa0] sm:$0xff]  ;;  %v970_v16 = vld [vmem:[%s1332_s1 + $0xd8] sm:$0xff]  ;;  %v945_v19 = vld [vmem:[%s1332_s1 + $0x10] sm:$0xff] }
   0x7   :  { %569 = vmatpush.bf16.msra.mxu2 %v965_v3  ;;  %128 = vperm.xlu0 %1023, %v118_v11   ;;  %v971_v13 = vld [vmem:[%s1332_s1 + $0xe0] sm:$0xff]  ;;  %v961_v20 = vld [vmem:[%s1332_s1 + $0x90] sm:$0xff]  ;;  %v944_v22 = vld [vmem:[%s1332_s1 + $0x8] sm:$0xff] }
   0x8   :  { %598 = vmatpush.bf16.msra.mxu3 %v973_v5  ;;  %v969_v21 = vld [vmem:[%s1332_s1 + $0xd0] sm:$0xff]  ;;  %v960_v23 = vld [vmem:[%s1332_s1 + $0x88] sm:$0xff]  ;;  %v943_v24 = vld [vmem:[%s1332_s1] sm:$0xff] }
   0x9   :  { %v725_v25 = vld [vmem:[%s1334_s0 + $0x50] sm:$0xf]  ;;  %v121_v26 = vld [vmem:[%s1333_s2 + $0x18] sm:$0xff]  ;;  %v935_v27 = vld [vmem:[%s1334_s0 + $0x60] sm:$0xf0] }
   0xa   :  { %1008 = vmatpush.bf16.msra.mxu1 %v948_v6  ;;  %512 = vmatpush.bf16.msra.mxu0 %v948_v6  ;;  %v968_v28 = vld [vmem:[%s1332_s1 + $0xc8] sm:$0xff]  ;;  %v124_v29 = vld [vmem:[%s1333_s2 + $0x30] sm:$0xff]  ;;  %v958_v30 = vld [vmem:[%s1332_s1 + $0x78] sm:$0xff]  ;;  %v726_v37 = vor.u32 %v935_v27, %v725_v25 }
   0xb   :  { %570 = vmatpush.bf16.msra.mxu2 %v964_v7  ;;  %v685_v31 = vld [vmem:[%s1334_s0] sm:$0xf]  ;;  %v925_v32 = vld [vmem:[%s1334_s0 + $0x10] sm:$0xf0]  ;;  %v693_v34 = vld [vmem:[%s1334_s0 + $0x8] sm:$0xf] }
   0xc   :  { %599 = vmatpush.bf16.msra.mxu3 %v972_v9  ;;  %v959_v33 = vld [vmem:[%s1332_s1 + $0x80] sm:$0xff]  ;;  %v926_v35 = vld [vmem:[%s1334_s0 + $0x18] sm:$0xf0]  ;;  %v686_v38 = vor.u32 %v925_v32, %v685_v31  ;;  %v924_v41 = vld [vmem:[%s1334_s0 + $0xc] sm:$0xf] }
   0xd   :  { %143 = vperm.xlu1 %1024, %v121_v26   ;;  %v982_v36 = vld [vmem:[%s1332_s1 + $0x138] sm:$0xff]  ;;  %v694_v39 = vor.u32 %v926_v35, %v693_v34  ;;  %v967_v40 = vld [vmem:[%s1332_s1 + $0xc0] sm:$0xff]  ;;  %v957_v43 = vld [vmem:[%s1332_s1 + $0x70] sm:$0xff] }
   0xe   :  { %1009 = vmatpush.bf16.msra.mxu1 %v947_v10  ;;  %513 = vmatpush.bf16.msra.mxu0 %v947_v10  ;;  %v695_v42 = vld [vmem:[%s1334_s0 + $0x1c] sm:$0xf0]  ;;  %v981_v44 = vld [vmem:[%s1332_s1 + $0x130] sm:$0xff]  ;;  %v125_v47 = vld [vmem:[%s1333_s2 + $0x38] sm:$0xff] }
   0xf   :  { %571 = vmatpush.bf16.msra.mxu2 %v963_v12  ;;  %133 = vperm.xlu0 %1023, %v119_v18   ;;  %v698_v45 = vor.u32 %v924_v41, %v695_v42  ;;  %v122_v46 = vld [vmem:[%s1333_s2 + $0x20] sm:$0xff]  ;;  %v956_v48 = vld [vmem:[%s1332_s1 + $0x68] sm:$0xff]  ;;  %v745_v53 = vld [vmem:[%s1334_s0 + $0x78] sm:$0xf] }
  0x10   :  { %600 = vmatpush.bf16.msra.mxu3 %v971_v13  ;;  %148 = vperm.xlu2 %1025, %v122_v46   ;;  %v980_v49 = vld [vmem:[%s1332_s1 + $0x128] sm:$0xff]  ;;  %v955_v50 = vld [vmem:[%s1332_s1 + $0x60] sm:$0xff]  ;;  %v930_v56 = vld [vmem:[%s1334_s0 + $0x38] sm:$0xf0] }
  0x11   :  { %v979_v51 = vld [vmem:[%s1332_s1 + $0x120] sm:$0xff]  ;;  %v123_v52 = vld [vmem:[%s1333_s2 + $0x28] sm:$0xff]  ;;  %v954_v57 = vld [vmem:[%s1332_s1 + $0x58] sm:$0xff] }
  0x12   :  { %1010 = vmatpush.bf16.msra.mxu1 %v946_v14  ;;  %514 = vmatpush.bf16.msra.mxu0 %v946_v14  ;;  %v940_v54 = vld [vmem:[%s1334_s0 + $0x88] sm:$0xf0]  ;;  %v705_v55 = vld [vmem:[%s1334_s0 + $0x28] sm:$0xf]  ;;  %v713_v58 = vld [vmem:[%s1334_s0 + $0x30] sm:$0xf] }
  0x13   :  { %572 = vmatpush.bf16.msra.mxu2 %v962_v15  ;;  %v931_v59 = vld [vmem:[%s1334_s0 + $0x40] sm:$0xf0]  ;;  %v978_v60 = vld [vmem:[%s1332_s1 + $0x118] sm:$0xff]  ;;  %v746_v61 = vor.u32 %v940_v54, %v745_v53  ;;  %v706_v62 = vor.u32 %v930_v56, %v705_v55  ;;  %v929_v0 = vld [vmem:[%s1334_s0 + $0x34] sm:$0xf] }
  0x14   :  { %601 = vmatpush.bf16.msra.mxu3 %v970_v16  ;;  %v714_v63 = vor.u32 %v931_v59, %v713_v58  ;;  %v715_v1 = vld [vmem:[%s1334_s0 + $0x44] sm:$0xf0]  ;;  %v953_v2 = vld [vmem:[%s1332_s1 + $0x50] sm:$0xff]  ;;  %v951_v7 = vld [vmem:[%s1332_s1 + $0x40] sm:$0xff] }
  0x15   :  { %163 = vperm.xlu1 %1024, %v125_v47   ;;  %v977_v3 = vld [vmem:[%s1332_s1 + $0x110] sm:$0xff]  ;;  %v718_v4 = vor.u32 %v929_v0, %v715_v1  ;;  %v952_v5 = vld [vmem:[%s1332_s1 + $0x48] sm:$0xff]  ;;  %v975_v8 = vld [vmem:[%s1332_s1 + $0x100] sm:$0xff] }
  0x16   :  { %1011 = vmatpush.bf16.msra.mxu1 %v945_v19  ;;  %515 = vmatpush.bf16.msra.mxu0 %v945_v19  ;;  %v976_v6 = vld [vmem:[%s1332_s1 + $0x108] sm:$0xff]  ;;  %v923_v9 = vld [vmem:[%s1334_s0 + $0x4] sm:$0xf]  ;;  %v687_v10 = vld [vmem:[%s1334_s0 + $0x14] sm:$0xf0] }
  0x17   :  { %573 = vmatpush.bf16.msra.mxu2 %v961_v20  ;;  %158 = vperm.xlu0 %1023, %v124_v29   ;;  %v701_v11 = vld [vmem:[%s1334_s0 + $0x10] sm:$0xf]  ;;  %v927_v12 = vld [vmem:[%s1334_s0 + $0x20] sm:$0xf0]  ;;  %v733_v13 = vld [vmem:[%s1334_s0 + $0x58] sm:$0xf]  ;;  %v690_v15 = vor.u32 %v923_v9, %v687_v10 }
  0x18   :  { %602 = vmatpush.bf16.msra.mxu3 %v969_v21  ;;  %153 = vperm.xlu2 %1025, %v123_v52   ;;  %v936_v14 = vld [vmem:[%s1334_s0 + $0x68] sm:$0xf0]  ;;  %v702_v16 = vor.u32 %v927_v12, %v701_v11  ;;  %v934_v18 = vld [vmem:[%s1334_s0 + $0x5c] sm:$0xf]  ;;  %v735_v19 = vld [vmem:[%s1334_s0 + $0x6c] sm:$0xf0] }
  0x19   :  { %v734_v17 = vor.u32 %v936_v14, %v733_v13  ;;  %v738_v20 = vor.u32 %v934_v18, %v735_v19  ;;  %v928_v21 = vld [vmem:[%s1334_s0 + $0x2c] sm:$0xf]  ;;  %v753_v25 = vld [vmem:[%s1334_s0 + $0x80] sm:$0xf]  ;;  %v941_v26 = vld [vmem:[%s1334_s0 + $0x90] sm:$0xf0] }
  0x1a   :  { %1012 = vmatpush.bf16.msra.mxu1 %v944_v22  ;;  %516 = vmatpush.bf16.msra.mxu0 %v944_v22  ;;  %v707_v22 = vld [vmem:[%s1334_s0 + $0x3c] sm:$0xf0]  ;;  %v754_v29 = vor.u32 %v941_v26, %v753_v25  ;;  %v755_v31 = vld [vmem:[%s1334_s0 + $0x94] sm:$0xf0]  ;;  %v727_v34 = vld [vmem:[%s1334_s0 + $0x64] sm:$0xf0] }
  0x1b   :  { %574 = vmatpush.bf16.msra.mxu2 %v960_v23  ;;  %v721_v23 = vld [vmem:[%s1334_s0 + $0x38] sm:$0xf]  ;;  %v710_v27 = vor.u32 %v928_v21, %v707_v22  ;;  %v741_v35 = vld [vmem:[%s1334_s0 + $0x60] sm:$0xf]  ;;  %v938_v42 = vld [vmem:[%s1334_s0 + $0x7c] sm:$0xf] }
  0x1c   :  { %603 = vmatpush.bf16.msra.mxu3 %v968_v28 }
  0x1e   :  { %1013 = vmatpush.bf16.msra.mxu1 %v943_v24  ;;  %517 = vmatpush.bf16.msra.mxu0 %v943_v24  ;;  %v932_v24 = vld [vmem:[%s1334_s0 + $0x48] sm:$0xf0] }
  0x1f   :  { %575 = vmatpush.bf16.msra.mxu2 %v959_v33  ;;  %v722_v28 = vor.u32 %v932_v24, %v721_v23  ;;  %v933_v33 = vld [vmem:[%s1334_s0 + $0x54] sm:$0xf] }
  0x20   :  { %604 = vmatpush.bf16.msra.mxu3 %v967_v40 }
  0x21   :  { %528 = vmatmul.bf16.vlgmr.msra.gmra.mxu1 %v726_v37  ;;  %518 = vmatmul.bf16.vlgmr.msra.gmra.mxu0 %v686_v38  ;;  %v761_v37 = vld [vmem:[%s1334_s0 + $0x88] sm:$0xf]  ;;  %v942_v38 = vld [vmem:[%s1334_s0 + $0x98] sm:$0xf0] }
  0x22   :  { %539 = vmatpush.bf16.msrb.mxu1 %v958_v30  ;;  %626 = vmatpush.bf16.msrb.mxu0 %v982_v36  ;;  %v939_v30 = vld [vmem:[%s1334_s0 + $0x84] sm:$0xf]  ;;  %v762_v41 = vor.u32 %v942_v38, %v761_v37 }
  0x23   :  { %1014 = vmatpush.bf16.msrb.mxu2 %v982_v36  ;;  %605 = vmatmul.bf16.vlgmr.msra.gmra.mxu3 %v698_v45  ;;  %v758_v32 = vor.u32 %v939_v30, %v755_v31  ;;  %v937_v36 = vld [vmem:[%s1334_s0 + $0x70] sm:$0xf0] }
  0x24   :  { %576 = vmatmul.bf16.vlgmr.msra.gmra.mxu2 %v694_v39  ;;  %v730_v39 = vor.u32 %v933_v33, %v727_v34  ;;  %v742_v40 = vor.u32 %v937_v36, %v741_v35 }
  0x26   :  { %540 = vmatpush.bf16.msrb.mxu1 %v957_v43  ;;  %627 = vmatpush.bf16.msrb.mxu0 %v981_v44  ;;  %v747_v43 = vld [vmem:[%s1334_s0 + $0x8c] sm:$0xf0] }
  0x27   :  { %1015 = vmatpush.bf16.msrb.mxu2 %v981_v44  ;;  %v750_v44 = vor.u32 %v938_v42, %v747_v43 }
  0x2a   :  { %541 = vmatpush.bf16.msrb.mxu1 %v956_v48  ;;  %628 = vmatpush.bf16.msrb.mxu0 %v980_v49 }
  0x2b   :  { %1016 = vmatpush.bf16.msrb.mxu2 %v980_v49 }
  0x2e   :  { %542 = vmatpush.bf16.msrb.mxu1 %v955_v50  ;;  %629 = vmatpush.bf16.msrb.mxu0 %v979_v51 }
  0x2f   :  { %1017 = vmatpush.bf16.msrb.mxu2 %v979_v51 }
  0x31   :  { %533 = vmatmul.bf16.gmra.mxu1 %v746_v61  ;;  %523 = vmatmul.bf16.gmra.mxu0 %v706_v62 }
  0x32   :  { %543 = vmatpush.bf16.msrb.mxu1 %v954_v57  ;;  %630 = vmatpush.bf16.msrb.mxu0 %v978_v60 }
  0x33   :  { %1018 = vmatpush.bf16.msrb.mxu2 %v978_v60  ;;  %610 = vmatmul.bf16.gmra.mxu3 %v718_v4 }
  0x34   :  { %581 = vmatmul.bf16.gmra.mxu2 %v714_v63 }
  0x36   :  { %544 = vmatpush.bf16.msrb.mxu1 %v953_v2  ;;  %631 = vmatpush.bf16.msrb.mxu0 %v977_v3 }
  0x37   :  { %1019 = vmatpush.bf16.msrb.mxu2 %v977_v3 }
  0x3a   :  { %545 = vmatpush.bf16.msrb.mxu1 %v952_v5  ;;  %632 = vmatpush.bf16.msrb.mxu0 %v976_v6 }
  0x3b   :  { %1020 = vmatpush.bf16.msrb.mxu2 %v976_v6 }
  0x3e   :  { %546 = vmatpush.bf16.msrb.mxu1 %v951_v7  ;;  %633 = vmatpush.bf16.msrb.mxu0 %v975_v8 }
  0x3f   :  { %1021 = vmatpush.bf16.msrb.mxu2 %v975_v8 }
  0x41   :  { %547 = vmatmul.bf16.vlgmr.msrb.gmra.mxu1 %v690_v15  ;;  %634 = vmatmul.bf16.vlgmr.msrb.gmra.mxu0 %v702_v16 }
  0x43   :  { %615 = vmatmul.bf16.gmra.mxu3 %v738_v20 }
  0x44   :  { %586 = vmatmul.bf16.gmra.mxu2 %v734_v17 }
  0x51   :  { %552 = vmatmul.bf16.gmra.mxu1 %v710_v27  ;;  %639 = vmatmul.bf16.gmra.mxu0 %v722_v28 }
  0x53   :  { %620 = vmatmul.bf16.gmra.mxu3 %v758_v32 }
  0x54   :  { %591 = vmatmul.bf16.gmra.mxu2 %v754_v29 }
  0x61   :  { %557 = vmatmul.bf16.gmra.mxu1 %v730_v39  ;;  %644 = vmatmul.bf16.gmra.mxu0 %v742_v40 }
  0x64   :  { %649 = vmatmul.bf16.vlgmr.msrb.gmra.mxu2 %v762_v41 }
  0x6a   :  { %v149_v30 = vpop.permute.xlu2 %148 }
  0x71   :  { %562 = vmatmul.bf16.gmra.mxu1 %v750_v44 }
  0x72   :  { %v154_v44 = vpop.permute.xlu2 %153 }
  0x77   :  { %v139_v9 = vpop.permute.xlu1 %138 }
  0x79   :  { %v129_v57 = vpop.permute.xlu0 %128 }
  0x7f   :  { %v144_v23 = vpop.permute.xlu1 %143 }
  0x81   :  { %v134_v1 = vpop.permute.xlu0 %133 }
  0x9e   :  { %v529_v45 = vpop.f32.mrf.mxu1  ;;  %v519_v46 = vpop.f32.mrf.mxu0 }
  0x9f   :  { %v520_v58 = vadd.f32 %v519_v46, %v129_v57  ;;  %v530_v35 = vadd.f32 %v529_v45, %v149_v30 }
  0xa6   :  { %v1311_v48 = vpop.f32.mrf.mxu1  ;;  %v521_v49 = vpop.f32.mrf.mxu0 }
  0xa7   :  { %v577_v47 = vpop.f32.mrf.mxu2  ;;  %v606_v53 = vpop.f32.mrf.mxu3  ;;  %v522_v2 = vadd.f32 %v521_v49, %v134_v1 }
  0xae   :  { %v1313_v51 = vpop.f32.mrf.mxu1  ;;  %v524_v52 = vpop.f32.mrf.mxu0 }
  0xaf   :  { %v579_v50 = vpop.f32.mrf.mxu2  ;;  %v608_v59 = vpop.f32.mrf.mxu3  ;;  %v525_v13 = vadd.f32 %v524_v52, %v139_v9 }
  0xb6   :  { %v1315_v55 = vpop.f32.mrf.mxu1  ;;  %v526_v56 = vpop.f32.mrf.mxu0 }
  0xb7   :  { %v582_v54 = vpop.f32.mrf.mxu2  ;;  %v611_v7 = vpop.f32.mrf.mxu3  ;;  %v527_v25 = vadd.f32 %v526_v56, %v144_v23 }
  0xb8   :  { %v159_v56 = vpop.permute.xlu0 %158 }
  0xbe   :  { %v548_v60 = vpop.f32.mrf.mxu1  ;;  %v635_v61 = vpop.f32.mrf.mxu0 }
  0xbf   :  { %v549_v62 = vadd.f32 %v548_v60, %v520_v58  ;;  %v584_v63 = vpop.f32.mrf.mxu2  ;;  %v613_v21 = vpop.f32.mrf.mxu3  ;;  %v535_v60 = vadd.f32 %v1313_v51, %v159_v56 }
  0xc1   :  { %v578_v0 = vadd.f32 %v577_v47, %v549_v62  ;;  %v532_v47 = vadd.f32 %v1311_v48, %v154_v44  ;;  %v164_v48 = vpop.permute.xlu1 %163 }
  0xc3   :  { %v607_v5 = vadd.f32 %v606_v53, %v578_v0 }
  0xc5   :  { %v636_v11 = vadd.f32 %v635_v61, %v607_v5 }
  0xc6   :  { %v550_v3 = vpop.f32.mrf.mxu1  ;;  %v637_v4 = vpop.f32.mrf.mxu0 }
  0xc7   :  { %v551_v6 = vadd.f32 %v550_v3, %v522_v2  ;;  %v587_v10 = vpop.f32.mrf.mxu2  ;;  %v655_v17 = vmax.f32 %v636_v11, 0.0  ;;  %v616_v34 = vpop.f32.mrf.mxu3 }
  0xc9   :  { %v580_v8 = vadd.f32 %v579_v50, %v551_v6  ;;  %v537_v6 = vadd.f32 %v1315_v55, %v164_v48 }
  0xcb   :  { %v609_v12 = vadd.f32 %v608_v59, %v580_v8 }
  0xcd   :  { %v638_v14 = vadd.f32 %v637_v4, %v609_v12 }
  0xce   :  { %v553_v15 = vpop.f32.mrf.mxu1  ;;  %v640_v16 = vpop.f32.mrf.mxu0 }
  0xcf   :  { %v656_v18 = vmax.f32 %v638_v14, 0.0  ;;  %v554_v19 = vadd.f32 %v553_v15, %v525_v13  ;;  %v589_v24 = vpop.f32.mrf.mxu2  ;;  %v618_v49 = vpop.f32.mrf.mxu3 }
  0xd1   :  { %v986_v20 = vpack.c.bf16 %v656_v18, %v655_v17  ;;  %v583_v22 = vadd.f32 %v582_v54, %v554_v19 }
  0xd3   :  { %987 = vst [vmem:[%s1335_s3] sm:$0xff] %v986_v20   ;;  %v612_v28 = vadd.f32 %v611_v7, %v583_v22 }
  0xd5   :  { %v641_v32 = vadd.f32 %v640_v16, %v612_v28 }
  0xd6   :  { %v555_v26 = vpop.f32.mrf.mxu1  ;;  %v642_v27 = vpop.f32.mrf.mxu0 }
  0xd7   :  { %v556_v29 = vadd.f32 %v555_v26, %v527_v25  ;;  %v592_v37 = vpop.f32.mrf.mxu2  ;;  %v657_v39 = vmax.f32 %v641_v32, 0.0  ;;  %v621_v2 = vpop.f32.mrf.mxu3 }
  0xd9   :  { %v585_v31 = vadd.f32 %v584_v63, %v556_v29 }
  0xdb   :  { %v614_v33 = vadd.f32 %v613_v21, %v585_v31 }
  0xdd   :  { %v643_v36 = vadd.f32 %v642_v27, %v614_v33 }
  0xde   :  { %v558_v38 = vpop.f32.mrf.mxu1  ;;  %v645_v42 = vpop.f32.mrf.mxu0 }
  0xdf   :  { %v658_v40 = vmax.f32 %v643_v36, 0.0  ;;  %v559_v41 = vadd.f32 %v558_v38, %v530_v35  ;;  %v594_v53 = vpop.f32.mrf.mxu2 }
  0xe1   :  { %v991_v43 = vpack.c.bf16 %v658_v40, %v657_v39  ;;  %v588_v46 = vadd.f32 %v587_v10, %v559_v41  ;;  %v623_v10 = vpop.f32.mrf.mxu3 }
  0xe3   :  { %1003 = vst [vmem:[%s1335_s3 + $0x8] sm:$0xff] %v991_v43   ;;  %v617_v52 = vadd.f32 %v616_v34, %v588_v46 }
  0xe5   :  { %v646_v58 = vadd.f32 %v645_v42, %v617_v52 }
  0xe6   :  { %v560_v50 = vpop.f32.mrf.mxu1  ;;  %v647_v57 = vpop.f32.mrf.mxu0 }
  0xe7   :  { %v561_v45 = vadd.f32 %v560_v50, %v532_v47  ;;  %v659_v63 = vmax.f32 %v646_v58, 0.0  ;;  %v650_v4 = vpop.f32.mrf.mxu2 }
  0xe9   :  { %v590_v54 = vadd.f32 %v589_v24, %v561_v45 }
  0xeb   :  { %v619_v59 = vadd.f32 %v618_v49, %v590_v54 }
  0xed   :  { %v648_v61 = vadd.f32 %v647_v57, %v619_v59 }
  0xee   :  { %v563_v62 = vpop.f32.mrf.mxu1 }
  0xef   :  { %v660_v0 = vmax.f32 %v648_v61, 0.0  ;;  %v564_v1 = vadd.f32 %v563_v62, %v535_v60  ;;  %v652_v13 = vpop.f32.mrf.mxu2 }
  0xf1   :  { %v996_v3 = vpack.c.bf16 %v660_v0, %v659_v63  ;;  %v593_v5 = vadd.f32 %v592_v37, %v564_v1 }
  0xf3   :  { %1004 = vst [vmem:[%s1335_s3 + $0x10] sm:$0xff] %v996_v3   ;;  %v622_v8 = vadd.f32 %v621_v2, %v593_v5 }
  0xf5   :  { %v651_v11 = vadd.f32 %v650_v4, %v622_v8 }
  0xf6   :  { %v565_v7 = vpop.f32.mrf.mxu1 }
  0xf7   :  { %v566_v9 = vadd.f32 %v565_v7, %v537_v6  ;;  %v661_v15 = vmax.f32 %v651_v11, 0.0 }
  0xf9   :  { %v595_v51 = vadd.f32 %v594_v53, %v566_v9 }
  0xfb   :  { %v624_v12 = vadd.f32 %v623_v10, %v595_v51 }
  0xfd   :  { %v653_v14 = vadd.f32 %v652_v13, %v624_v12 }
  0xff   :  { %v662_v16 = vmax.f32 %v653_v14, 0.0 }
 0x101   :  { %v1001_v17 = vpack.c.bf16 %v662_v16, %v661_v15 }
 0x103   :  { %1005 = vst [vmem:[%s1335_s3 + $0x18] sm:$0xff] %v1001_v17  }

// kernel: cnn_compress_forward.7
= control target key start
LH: loop header
LB: loop body
LE: loop exit
PB: predicated region body
PF: predicated region fallthrough
CT: control target
= control target key end

     0   :  { %s15891_s0 = inlined_call_operand.vmem [shape: bf16[2,3200], index: 0, kind: input, shape index: {}]   ;;  %s15892_s1 = inlined_call_operand.vmem [shape: bf16[3200,512], index: 1, kind: input, shape index: {}]   ;;  %s15893_s2 = inlined_call_operand.vmem [shape: f32[1,512], index: 2, kind: input, shape index: {}]   ;;  %s15894_s3 = inlined_call_operand.vmem [shape: bf16[512,128], index: 3, kind: input, shape index: {}]   ;;  %s15895_s4 = inlined_call_operand.vmem [shape: f32[1,128], index: 4, kind: input, shape index: {}]   ;;  %s15896_s5 = inlined_call_operand.hbm [shape: f32[2,128], index: 5, kind: output, shape index: {}]  }
   0x1   :  { %v6644_v0 = vld [vmem:[%s15892_s1 + $0xe0] sm:$0xf]  ;;  %v9888_v1 = vld [vmem:[%s15892_s1 + $0xec] sm:$0xf0] }
   0x2   :  { %v6772_v2 = vld [vmem:[%s15892_s1 + $0x1e0] sm:$0xf]  ;;  %v6645_v3 = vor.u32 %v9888_v1, %v6644_v0  ;;  %v9920_v4 = vld [vmem:[%s15892_s1 + $0x1ec] sm:$0xf0] }
   0x3   :  { %v6900_v5 = vld [vmem:[%s15892_s1 + $0x2e0] sm:$0xf]  ;;  %v9952_v6 = vld [vmem:[%s15892_s1 + $0x2ec] sm:$0xf0]  ;;  %v6773_v7 = vor.u32 %v9920_v4, %v6772_v2 }
   0x4   :  { %v6901_v8 = vor.u32 %v9952_v6, %v6900_v5  ;;  %v7028_v9 = vld [vmem:[%s15892_s1 + $0x3e0] sm:$0xf]  ;;  %v9984_v10 = vld [vmem:[%s15892_s1 + $0x3ec] sm:$0xf0]  ;;  %4893 = vmatpush.bf16.msra.mxu0 %v6645_v3 }
   0x5   :  { %v6628_v11 = vld [vmem:[%s15892_s1 + $0xc0] sm:$0xf]  ;;  %v7029_v12 = vor.u32 %v9984_v10, %v7028_v9  ;;  %v9884_v13 = vld [vmem:[%s15892_s1 + $0xcc] sm:$0xf0]  ;;  %4906 = vmatpush.bf16.msra.mxu1 %v6773_v7 }
   0x6   :  { %v6756_v14 = vld [vmem:[%s15892_s1 + $0x1c0] sm:$0xf]  ;;  %v9916_v15 = vld [vmem:[%s15892_s1 + $0x1cc] sm:$0xf0]  ;;  %4919 = vmatpush.bf16.msra.mxu2 %v6901_v8  ;;  %v6629_v16 = vor.u32 %v9884_v13, %v6628_v11 }
   0x7   :  { %v6757_v17 = vor.u32 %v9916_v15, %v6756_v14  ;;  %v6884_v18 = vld [vmem:[%s15892_s1 + $0x2c0] sm:$0xf]  ;;  %v9948_v19 = vld [vmem:[%s15892_s1 + $0x2cc] sm:$0xf0]  ;;  %4932 = vmatpush.bf16.msra.mxu3 %v7029_v12 }
   0x8   :  { %v7012_v20 = vld [vmem:[%s15892_s1 + $0x3c0] sm:$0xf]  ;;  %v6885_v21 = vor.u32 %v9948_v19, %v6884_v18  ;;  %v9980_v22 = vld [vmem:[%s15892_s1 + $0x3cc] sm:$0xf0]  ;;  %4894 = vmatpush.bf16.msra.mxu0 %v6629_v16 }
   0x9   :  { %v6612_v23 = vld [vmem:[%s15892_s1 + $0xa0] sm:$0xf]  ;;  %v9880_v24 = vld [vmem:[%s15892_s1 + $0xac] sm:$0xf0]  ;;  %v7013_v25 = vor.u32 %v9980_v22, %v7012_v20  ;;  %4907 = vmatpush.bf16.msra.mxu1 %v6757_v17 }
   0xa   :  { %v6740_v26 = vld [vmem:[%s15892_s1 + $0x1a0] sm:$0xf]  ;;  %v9912_v27 = vld [vmem:[%s15892_s1 + $0x1ac] sm:$0xf0]  ;;  %v6613_v29 = vor.u32 %v9880_v24, %v6612_v23  ;;  %4920 = vmatpush.bf16.msra.mxu2 %v6885_v21 }
   0xb   :  { %v6868_v28 = vld [vmem:[%s15892_s1 + $0x2a0] sm:$0xf]  ;;  %v9944_v30 = vld [vmem:[%s15892_s1 + $0x2ac] sm:$0xf0]  ;;  %v6741_v33 = vor.u32 %v9912_v27, %v6740_v26  ;;  %4933 = vmatpush.bf16.msra.mxu3 %v7013_v25 }
   0xc   :  { %v6996_v31 = vld [vmem:[%s15892_s1 + $0x3a0] sm:$0xf]  ;;  %v9976_v32 = vld [vmem:[%s15892_s1 + $0x3ac] sm:$0xf0]  ;;  %v6869_v34 = vor.u32 %v9944_v30, %v6868_v28  ;;  %4895 = vmatpush.bf16.msra.mxu0 %v6613_v29 }
   0xd   :  { %v6596_v35 = vld [vmem:[%s15892_s1 + $0x80] sm:$0xf]  ;;  %v9876_v36 = vld [vmem:[%s15892_s1 + $0x8c] sm:$0xf0]  ;;  %v6997_v38 = vor.u32 %v9976_v32, %v6996_v31  ;;  %4908 = vmatpush.bf16.msra.mxu1 %v6741_v33 }
   0xe   :  { %v6724_v37 = vld [vmem:[%s15892_s1 + $0x180] sm:$0xf]  ;;  %v9908_v39 = vld [vmem:[%s15892_s1 + $0x18c] sm:$0xf0]  ;;  %v6597_v44 = vor.u32 %v9876_v36, %v6596_v35  ;;  %4921 = vmatpush.bf16.msra.mxu2 %v6869_v34 }
   0xf   :  { %v6852_v40 = vld [vmem:[%s15892_s1 + $0x280] sm:$0xf]  ;;  %v9940_v41 = vld [vmem:[%s15892_s1 + $0x28c] sm:$0xf0]  ;;  %v6725_v45 = vor.u32 %v9908_v39, %v6724_v37  ;;  %4934 = vmatpush.bf16.msra.mxu3 %v6997_v38 }
  0x10   :  { %v6980_v42 = vld [vmem:[%s15892_s1 + $0x380] sm:$0xf]  ;;  %v9972_v43 = vld [vmem:[%s15892_s1 + $0x38c] sm:$0xf0]  ;;  %v6853_v46 = vor.u32 %v9940_v41, %v6852_v40  ;;  %4896 = vmatpush.bf16.msra.mxu0 %v6597_v44 }
  0x11   :  { %v6580_v47 = vld [vmem:[%s15892_s1 + $0x60] sm:$0xf]  ;;  %v9872_v48 = vld [vmem:[%s15892_s1 + $0x6c] sm:$0xf0]  ;;  %v6981_v50 = vor.u32 %v9972_v43, %v6980_v42  ;;  %4909 = vmatpush.bf16.msra.mxu1 %v6725_v45 }
  0x12   :  { %v6708_v49 = vld [vmem:[%s15892_s1 + $0x160] sm:$0xf]  ;;  %v9904_v51 = vld [vmem:[%s15892_s1 + $0x16c] sm:$0xf0]  ;;  %v6581_v56 = vor.u32 %v9872_v48, %v6580_v47  ;;  %4922 = vmatpush.bf16.msra.mxu2 %v6853_v46 }
  0x13   :  { %v6836_v52 = vld [vmem:[%s15892_s1 + $0x260] sm:$0xf]  ;;  %v9936_v53 = vld [vmem:[%s15892_s1 + $0x26c] sm:$0xf0]  ;;  %v6709_v57 = vor.u32 %v9904_v51, %v6708_v49  ;;  %4935 = vmatpush.bf16.msra.mxu3 %v6981_v50 }
  0x14   :  { %v6964_v54 = vld [vmem:[%s15892_s1 + $0x360] sm:$0xf]  ;;  %v9968_v55 = vld [vmem:[%s15892_s1 + $0x36c] sm:$0xf0]  ;;  %v6837_v58 = vor.u32 %v9936_v53, %v6836_v52  ;;  %4897 = vmatpush.bf16.msra.mxu0 %v6581_v56 }
  0x15   :  { %v6564_v59 = vld [vmem:[%s15892_s1 + $0x40] sm:$0xf]  ;;  %v9868_v60 = vld [vmem:[%s15892_s1 + $0x4c] sm:$0xf0]  ;;  %v6965_v62 = vor.u32 %v9968_v55, %v6964_v54  ;;  %4910 = vmatpush.bf16.msra.mxu1 %v6709_v57 }
  0x16   :  { %v6692_v61 = vld [vmem:[%s15892_s1 + $0x140] sm:$0xf]  ;;  %v9900_v63 = vld [vmem:[%s15892_s1 + $0x14c] sm:$0xf0]  ;;  %v6565_v4 = vor.u32 %v9868_v60, %v6564_v59  ;;  %4923 = vmatpush.bf16.msra.mxu2 %v6837_v58 }
  0x17   :  { %v6820_v0 = vld [vmem:[%s15892_s1 + $0x240] sm:$0xf]  ;;  %v9932_v1 = vld [vmem:[%s15892_s1 + $0x24c] sm:$0xf0]  ;;  %v6693_v5 = vor.u32 %v9900_v63, %v6692_v61  ;;  %4936 = vmatpush.bf16.msra.mxu3 %v6965_v62 }
  0x18   :  { %v6948_v2 = vld [vmem:[%s15892_s1 + $0x340] sm:$0xf]  ;;  %v9964_v3 = vld [vmem:[%s15892_s1 + $0x34c] sm:$0xf0]  ;;  %v6821_v6 = vor.u32 %v9932_v1, %v6820_v0  ;;  %4898 = vmatpush.bf16.msra.mxu0 %v6565_v4 }
  0x19   :  { %v6548_v7 = vld [vmem:[%s15892_s1 + $0x20] sm:$0xf]  ;;  %v9864_v8 = vld [vmem:[%s15892_s1 + $0x2c] sm:$0xf0]  ;;  %v6949_v10 = vor.u32 %v9964_v3, %v6948_v2  ;;  %4911 = vmatpush.bf16.msra.mxu1 %v6693_v5 }
  0x1a   :  { %v6676_v9 = vld [vmem:[%s15892_s1 + $0x120] sm:$0xf]  ;;  %v9896_v11 = vld [vmem:[%s15892_s1 + $0x12c] sm:$0xf0]  ;;  %v6549_v16 = vor.u32 %v9864_v8, %v6548_v7  ;;  %4924 = vmatpush.bf16.msra.mxu2 %v6821_v6 }
  0x1b   :  { %v6804_v12 = vld [vmem:[%s15892_s1 + $0x220] sm:$0xf]  ;;  %v9928_v13 = vld [vmem:[%s15892_s1 + $0x22c] sm:$0xf0]  ;;  %v6677_v19 = vor.u32 %v9896_v11, %v6676_v9  ;;  %4937 = vmatpush.bf16.msra.mxu3 %v6949_v10 }
  0x1c   :  { %v6932_v14 = vld [vmem:[%s15892_s1 + $0x320] sm:$0xf]  ;;  %v9960_v15 = vld [vmem:[%s15892_s1 + $0x32c] sm:$0xf0]  ;;  %v6805_v20 = vor.u32 %v9928_v13, %v6804_v12  ;;  %4899 = vmatpush.bf16.msra.mxu0 %v6549_v16 }
  0x1d   :  { %v6532_v17 = vld [vmem:[%s15892_s1] sm:$0xf]  ;;  %v9860_v18 = vld [vmem:[%s15892_s1 + $0xc] sm:$0xf0]  ;;  %v6933_v24 = vor.u32 %v9960_v15, %v6932_v14  ;;  %4912 = vmatpush.bf16.msra.mxu1 %v6677_v19 }
  0x1e   :  { %v6660_v21 = vld [vmem:[%s15892_s1 + $0x100] sm:$0xf]  ;;  %v9892_v22 = vld [vmem:[%s15892_s1 + $0x10c] sm:$0xf0]  ;;  %v6533_v31 = vor.u32 %v9860_v18, %v6532_v17  ;;  %4925 = vmatpush.bf16.msra.mxu2 %v6805_v20 }
  0x1f   :  { %v6788_v23 = vld [vmem:[%s15892_s1 + $0x200] sm:$0xf]  ;;  %v9924_v25 = vld [vmem:[%s15892_s1 + $0x20c] sm:$0xf0]  ;;  %v6661_v35 = vor.u32 %v9892_v22, %v6660_v21  ;;  %4938 = vmatpush.bf16.msra.mxu3 %v6933_v24 }
  0x20   :  { %v6916_v26 = vld [vmem:[%s15892_s1 + $0x300] sm:$0xf]  ;;  %v9956_v27 = vld [vmem:[%s15892_s1 + $0x30c] sm:$0xf0]  ;;  %v6789_v36 = vor.u32 %v9924_v25, %v6788_v23  ;;  %4900 = vmatpush.bf16.msra.mxu0 %v6533_v31 }
  0x21   :  { %v7156_v28 = vld [vmem:[%s15892_s1 + $0x4e0] sm:$0xf]  ;;  %v10016_v29 = vld [vmem:[%s15892_s1 + $0x4ec] sm:$0xf0]  ;;  %v6917_v39 = vor.u32 %v9956_v27, %v6916_v26  ;;  %4913 = vmatpush.bf16.msra.mxu1 %v6661_v35 }
  0x22   :  { %v7284_v30 = vld [vmem:[%s15892_s1 + $0x5e0] sm:$0xf]  ;;  %v10048_v32 = vld [vmem:[%s15892_s1 + $0x5ec] sm:$0xf0]  ;;  %v7157_v40 = vor.u32 %v10016_v29, %v7156_v28  ;;  %4926 = vmatpush.bf16.msra.mxu2 %v6789_v36 }
  0x23   :  { %v7412_v33 = vld [vmem:[%s15892_s1 + $0x6e0] sm:$0xf]  ;;  %v10080_v34 = vld [vmem:[%s15892_s1 + $0x6ec] sm:$0xf0]  ;;  %v7285_v41 = vor.u32 %v10048_v32, %v7284_v30  ;;  %4939 = vmatpush.bf16.msra.mxu3 %v6917_v39 }
  0x24   :  { %v7540_v37 = vld [vmem:[%s15892_s1 + $0x7e0] sm:$0xf]  ;;  %v10112_v38 = vld [vmem:[%s15892_s1 + $0x7ec] sm:$0xf0]  ;;  %v7413_v42 = vor.u32 %v10080_v34, %v7412_v33  ;;  %4945 = vmatpush.bf16.msrb.mxu0 %v7157_v40 }
  0x25   :  { %v7140_v43 = vld [vmem:[%s15892_s1 + $0x4c0] sm:$0xf]  ;;  %v10012_v44 = vld [vmem:[%s15892_s1 + $0x4cc] sm:$0xf0]  ;;  %v7541_v46 = vor.u32 %v10112_v38, %v7540_v37  ;;  %4958 = vmatpush.bf16.msrb.mxu1 %v7285_v41 }
  0x26   :  { %v7268_v45 = vld [vmem:[%s15892_s1 + $0x5c0] sm:$0xf]  ;;  %v10044_v47 = vld [vmem:[%s15892_s1 + $0x5cc] sm:$0xf0]  ;;  %v7141_v52 = vor.u32 %v10012_v44, %v7140_v43  ;;  %4971 = vmatpush.bf16.msrb.mxu2 %v7413_v42 }
  0x27   :  { %v7396_v48 = vld [vmem:[%s15892_s1 + $0x6c0] sm:$0xf]  ;;  %v10076_v49 = vld [vmem:[%s15892_s1 + $0x6cc] sm:$0xf0]  ;;  %v7269_v53 = vor.u32 %v10044_v47, %v7268_v45  ;;  %4984 = vmatpush.bf16.msrb.mxu3 %v7541_v46 }
  0x28   :  { %v7524_v50 = vld [vmem:[%s15892_s1 + $0x7c0] sm:$0xf]  ;;  %v10108_v51 = vld [vmem:[%s15892_s1 + $0x7cc] sm:$0xf0]  ;;  %v7397_v54 = vor.u32 %v10076_v49, %v7396_v48  ;;  %4946 = vmatpush.bf16.msrb.mxu0 %v7141_v52 }
  0x29   :  { %v7124_v55 = vld [vmem:[%s15892_s1 + $0x4a0] sm:$0xf]  ;;  %v10008_v56 = vld [vmem:[%s15892_s1 + $0x4ac] sm:$0xf0]  ;;  %v7525_v58 = vor.u32 %v10108_v51, %v7524_v50  ;;  %4959 = vmatpush.bf16.msrb.mxu1 %v7269_v53 }
  0x2a   :  { %v7252_v57 = vld [vmem:[%s15892_s1 + $0x5a0] sm:$0xf]  ;;  %v10040_v59 = vld [vmem:[%s15892_s1 + $0x5ac] sm:$0xf0]  ;;  %v7125_v0 = vor.u32 %v10008_v56, %v7124_v55  ;;  %4972 = vmatpush.bf16.msrb.mxu2 %v7397_v54 }
  0x2b   :  { %v7380_v60 = vld [vmem:[%s15892_s1 + $0x6a0] sm:$0xf]  ;;  %v10072_v61 = vld [vmem:[%s15892_s1 + $0x6ac] sm:$0xf0]  ;;  %v7253_v3 = vor.u32 %v10040_v59, %v7252_v57  ;;  %4985 = vmatpush.bf16.msrb.mxu3 %v7525_v58 }
  0x2c   :  { %v7508_v62 = vld [vmem:[%s15892_s1 + $0x7a0] sm:$0xf]  ;;  %v10104_v63 = vld [vmem:[%s15892_s1 + $0x7ac] sm:$0xf0]  ;;  %v7381_v4 = vor.u32 %v10072_v61, %v7380_v60  ;;  %4947 = vmatpush.bf16.msrb.mxu0 %v7125_v0  ;;  %v22_v61 = vld [vmem:[%s15891_s0 + $0x8] sm:$0xff] }
  0x2d   :  { %v7108_v1 = vld [vmem:[%s15892_s1 + $0x480] sm:$0xf]  ;;  %v10004_v5 = vld [vmem:[%s15892_s1 + $0x48c] sm:$0xf0]  ;;  %v7509_v7 = vor.u32 %v10104_v63, %v7508_v62  ;;  %4960 = vmatpush.bf16.msrb.mxu1 %v7253_v3 }
  0x2e   :  { %v21_v2 = vld [vmem:[%s15891_s0] sm:$0xff]  ;;  %v10036_v8 = vld [vmem:[%s15892_s1 + $0x58c] sm:$0xf0]  ;;  %v7109_v13 = vor.u32 %v10004_v5, %v7108_v1  ;;  %4973 = vmatpush.bf16.msrb.mxu2 %v7381_v4 }
  0x2f   :  { %v7236_v6 = vld [vmem:[%s15892_s1 + $0x580] sm:$0xf]  ;;  %836 = vst [vmem:[#allocation1] ss:$9 sm:$0xff] %v21_v2  ;;  %v10068_v10 = vld [vmem:[%s15892_s1 + $0x68c] sm:$0xf0]  ;;  %4986 = vmatpush.bf16.msrb.mxu3 %v7509_v7 }
  0x30   :  { %v7364_v9 = vld [vmem:[%s15892_s1 + $0x680] sm:$0xf]  ;;  %v10100_v12 = vld [vmem:[%s15892_s1 + $0x78c] sm:$0xf0]  ;;  %v7237_v14 = vor.u32 %v10036_v8, %v7236_v6  ;;  %4948 = vmatpush.bf16.msrb.mxu0 %v7109_v13 }
  0x31   :  { %v7492_v11 = vld [vmem:[%s15892_s1 + $0x780] sm:$0xf]  ;;  %v7365_v15 = vor.u32 %v10068_v10, %v7364_v9  ;;  %v10000_v17 = vld [vmem:[%s15892_s1 + $0x46c] sm:$0xf0] }
  0x32   :  { %v7092_v16 = vld [vmem:[%s15892_s1 + $0x460] sm:$0xf]  ;;  %v7493_v19 = vor.u32 %v10100_v12, %v7492_v11  ;;  %v10032_v20 = vld [vmem:[%s15892_s1 + $0x56c] sm:$0xf0]  ;;  %4961 = vmatpush.bf16.msrb.mxu1 %v7237_v14 }
  0x33   :  { %v7220_v18 = vld [vmem:[%s15892_s1 + $0x560] sm:$0xf]  ;;  %v10064_v22 = vld [vmem:[%s15892_s1 + $0x66c] sm:$0xf0]  ;;  %v7093_v26 = vor.u32 %v10000_v17, %v7092_v16  ;;  %4974 = vmatpush.bf16.msrb.mxu2 %v7365_v15 }
  0x34   :  { %v7348_v21 = vld [vmem:[%s15892_s1 + $0x660] sm:$0xf]  ;;  %v10096_v24 = vld [vmem:[%s15892_s1 + $0x76c] sm:$0xf0]  ;;  %v7221_v30 = vor.u32 %v10032_v20, %v7220_v18  ;;  %4987 = vmatpush.bf16.msrb.mxu3 %v7493_v19 }
  0x35   :  { %v7476_v23 = vld [vmem:[%s15892_s1 + $0x760] sm:$0xf]  ;;  %v7349_v31 = vor.u32 %v10064_v22, %v7348_v21  ;;  %v9996_v32 = vld [vmem:[%s15892_s1 + $0x44c] sm:$0xf0]  ;;  %4949 = vmatpush.bf16.msrb.mxu0 %v7093_v26 }
  0x36   :  { %v7076_v25 = vld [vmem:[%s15892_s1 + $0x440] sm:$0xf]  ;;  %v11073_v27 = vld [vmem:[#allocation1 + $0x12] sm:$0xff]  ;;  %v11085_v34 = vld [vmem:[#allocation1 + $0x9] sm:$0xff]  ;;  %v7477_v35 = vor.u32 %v10096_v24, %v7476_v23  ;;  %4962 = vmatpush.bf16.msrb.mxu1 %v7221_v30 }
  0x37   :  { %v11075_v28 = vld [vmem:[#allocation1] sm:$0xff]  ;;  %v10028_v36 = vld [vmem:[%s15892_s1 + $0x54c] sm:$0xf0]  ;;  %4927 = vmatmul.bf16.vlgmr.msra.gmra.mxu2 %v11073_v27  ;;  %v7077_v41 = vor.u32 %v9996_v32, %v7076_v25  ;;  %4914 = vmatmul.bf16.vlgmr.msra.gmra.mxu1 %v11085_v34  ;;  %v11148_v60 = vld [vmem:[#allocation1 + $0x36] sm:$0xff] }
  0x38   :  { %v11077_v29 = vld [vmem:[#allocation1 + $0x1b] sm:$0xff]  ;;  %v10060_v38 = vld [vmem:[%s15892_s1 + $0x64c] sm:$0xf0]  ;;  %4901 = vmatmul.bf16.vlgmr.msra.gmra.mxu0 %v11075_v28  ;;  %4975 = vmatpush.bf16.msrb.mxu2 %v7349_v31  ;;  %v11153_v0 = vld [vmem:[#allocation1 + $0x24] sm:$0xff] }
  0x39   :  { %v7204_v33 = vld [vmem:[%s15892_s1 + $0x540] sm:$0xf]  ;;  %v10092_v40 = vld [vmem:[%s15892_s1 + $0x74c] sm:$0xf0]  ;;  %4940 = vmatmul.bf16.vlgmr.msra.gmra.mxu3 %v11077_v29  ;;  %4950 = vmatpush.bf16.msrb.mxu0 %v7077_v41 }
  0x3a   :  { %v7332_v37 = vld [vmem:[%s15892_s1 + $0x640] sm:$0xf]  ;;  %v7205_v43 = vor.u32 %v10028_v36, %v7204_v33  ;;  %v9992_v45 = vld [vmem:[%s15892_s1 + $0x42c] sm:$0xf0]  ;;  %4988 = vmatpush.bf16.msrb.mxu3 %v7477_v35 }
  0x3b   :  { %v7460_v39 = vld [vmem:[%s15892_s1 + $0x740] sm:$0xf]  ;;  %v7333_v44 = vor.u32 %v10060_v38, %v7332_v37  ;;  %v10024_v47 = vld [vmem:[%s15892_s1 + $0x52c] sm:$0xf0] }
  0x3c   :  { %v7060_v42 = vld [vmem:[%s15892_s1 + $0x420] sm:$0xf]  ;;  %v7461_v48 = vor.u32 %v10092_v40, %v7460_v39  ;;  %v10056_v50 = vld [vmem:[%s15892_s1 + $0x62c] sm:$0xf0]  ;;  %4963 = vmatpush.bf16.msrb.mxu1 %v7205_v43 }
  0x3d   :  { %v7188_v46 = vld [vmem:[%s15892_s1 + $0x520] sm:$0xf]  ;;  %v10088_v52 = vld [vmem:[%s15892_s1 + $0x72c] sm:$0xf0]  ;;  %v7061_v55 = vor.u32 %v9992_v45, %v7060_v42  ;;  %4976 = vmatpush.bf16.msrb.mxu2 %v7333_v44 }
  0x3e   :  { %v7316_v49 = vld [vmem:[%s15892_s1 + $0x620] sm:$0xf]  ;;  %v9988_v54 = vld [vmem:[%s15892_s1 + $0x40c] sm:$0xf0]  ;;  %v7189_v62 = vor.u32 %v10024_v47, %v7188_v46  ;;  %4989 = vmatpush.bf16.msrb.mxu3 %v7461_v48 }
  0x3f   :  { %v7444_v51 = vld [vmem:[%s15892_s1 + $0x720] sm:$0xf]  ;;  %v10020_v57 = vld [vmem:[%s15892_s1 + $0x50c] sm:$0xf0]  ;;  %v7317_v63 = vor.u32 %v10056_v50, %v7316_v49  ;;  %4951 = vmatpush.bf16.msrb.mxu0 %v7061_v55 }
  0x40   :  { %v7044_v53 = vld [vmem:[%s15892_s1 + $0x400] sm:$0xf]  ;;  %v10052_v59 = vld [vmem:[%s15892_s1 + $0x60c] sm:$0xf0]  ;;  %v7445_v3 = vor.u32 %v10088_v52, %v7444_v51  ;;  %4964 = vmatpush.bf16.msrb.mxu1 %v7189_v62 }
  0x41   :  { %v7172_v56 = vld [vmem:[%s15892_s1 + $0x500] sm:$0xf]  ;;  %v11157_v2 = vld [vmem:[#allocation1 + $0x2d] sm:$0xff]  ;;  %v7045_v9 = vor.u32 %v9988_v54, %v7044_v53  ;;  %4977 = vmatpush.bf16.msrb.mxu2 %v7317_v63 }
  0x42   :  { %v7300_v58 = vld [vmem:[%s15892_s1 + $0x600] sm:$0xf]  ;;  %v10084_v5 = vld [vmem:[%s15892_s1 + $0x70c] sm:$0xf0]  ;;  %v7173_v13 = vor.u32 %v10020_v57, %v7172_v56  ;;  %4990 = vmatpush.bf16.msrb.mxu3 %v7445_v3 }
  0x43   :  { %v11155_v1 = vld [vmem:[#allocation1 + $0x3f] sm:$0xff]  ;;  %v10144_v7 = vld [vmem:[%s15892_s1 + $0x8ec] sm:$0xf0]  ;;  %v7301_v14 = vor.u32 %v10052_v59, %v7300_v58  ;;  %4952 = vmatpush.bf16.msrb.mxu0 %v7045_v9 }
  0x44   :  { %v7428_v4 = vld [vmem:[%s15892_s1 + $0x700] sm:$0xf]  ;;  %846 = vst [vmem:[#allocation1] ss:$9 sm:$0xff] %v22_v61  ;;  %v10176_v10 = vld [vmem:[%s15892_s1 + $0x9ec] sm:$0xf0]  ;;  %4965 = vmatpush.bf16.msrb.mxu1 %v7173_v13 }
  0x45   :  { %v7668_v6 = vld [vmem:[%s15892_s1 + $0x8e0] sm:$0xf]  ;;  %v10208_v12 = vld [vmem:[%s15892_s1 + $0xaec] sm:$0xf0]  ;;  %v7429_v17 = vor.u32 %v10084_v5, %v7428_v4  ;;  %4978 = vmatpush.bf16.msrb.mxu2 %v7301_v14 }
  0x46   :  { %v7796_v8 = vld [vmem:[%s15892_s1 + $0x9e0] sm:$0xf]  ;;  %v10240_v16 = vld [vmem:[%s15892_s1 + $0xbec] sm:$0xf0]  ;;  %v7669_v18 = vor.u32 %v10144_v7, %v7668_v6 }
  0x47   :  { %v7924_v11 = vld [vmem:[%s15892_s1 + $0xae0] sm:$0xf]  ;;  %v7797_v19 = vor.u32 %v10176_v10, %v7796_v8  ;;  %v10140_v22 = vld [vmem:[%s15892_s1 + $0x8cc] sm:$0xf0]  ;;  %4991 = vmatpush.bf16.msrb.mxu3 %v7429_v17  ;;  %4966 = vmatmul.bf16.vlgmr.msrb.gmra.mxu1 %v11157_v2 }
  0x48   :  { %v8052_v15 = vld [vmem:[%s15892_s1 + $0xbe0] sm:$0xf]  ;;  %v7925_v20 = vor.u32 %v10208_v12, %v7924_v11  ;;  %v10172_v25 = vld [vmem:[%s15892_s1 + $0x9cc] sm:$0xf0]  ;;  %4997 = vmatpush.bf16.msra.mxu0 %v7669_v18  ;;  %4979 = vmatmul.bf16.vlgmr.msrb.gmra.mxu2 %v11148_v60 }
  0x49   :  { %v7652_v21 = vld [vmem:[%s15892_s1 + $0x8c0] sm:$0xf]  ;;  %v8053_v24 = vor.u32 %v10240_v16, %v8052_v15  ;;  %v10204_v30 = vld [vmem:[%s15892_s1 + $0xacc] sm:$0xf0]  ;;  %5010 = vmatpush.bf16.msra.mxu1 %v7797_v19  ;;  %4953 = vmatmul.bf16.vlgmr.msrb.gmra.mxu0 %v11153_v0 }
  0x4a   :  { %v7780_v23 = vld [vmem:[%s15892_s1 + $0x9c0] sm:$0xf]  ;;  %v10236_v32 = vld [vmem:[%s15892_s1 + $0xbcc] sm:$0xf0]  ;;  %v7653_v33 = vor.u32 %v10140_v22, %v7652_v21  ;;  %5023 = vmatpush.bf16.msra.mxu2 %v7925_v20  ;;  %4992 = vmatmul.bf16.vlgmr.msrb.gmra.mxu3 %v11155_v1 }
  0x4b   :  { %v7908_v26 = vld [vmem:[%s15892_s1 + $0xac0] sm:$0xf]  ;;  %v7781_v35 = vor.u32 %v10172_v25, %v7780_v23  ;;  %v10136_v38 = vld [vmem:[%s15892_s1 + $0x8ac] sm:$0xf0]  ;;  %5036 = vmatpush.bf16.msra.mxu3 %v8053_v24 }
  0x4c   :  { %v8036_v31 = vld [vmem:[%s15892_s1 + $0xbc0] sm:$0xf]  ;;  %v7909_v36 = vor.u32 %v10204_v30, %v7908_v26  ;;  %v10168_v41 = vld [vmem:[%s15892_s1 + $0x9ac] sm:$0xf0]  ;;  %4998 = vmatpush.bf16.msra.mxu0 %v7653_v33 }
  0x4d   :  { %v7636_v37 = vld [vmem:[%s15892_s1 + $0x8a0] sm:$0xf]  ;;  %v8037_v40 = vor.u32 %v10236_v32, %v8036_v31  ;;  %v10200_v43 = vld [vmem:[%s15892_s1 + $0xaac] sm:$0xf0]  ;;  %5011 = vmatpush.bf16.msra.mxu1 %v7781_v35 }
  0x4e   :  { %v7764_v39 = vld [vmem:[%s15892_s1 + $0x9a0] sm:$0xf]  ;;  %v10232_v45 = vld [vmem:[%s15892_s1 + $0xbac] sm:$0xf0]  ;;  %v7637_v46 = vor.u32 %v10136_v38, %v7636_v37  ;;  %5024 = vmatpush.bf16.msra.mxu2 %v7909_v36 }
  0x4f   :  { %v7892_v42 = vld [vmem:[%s15892_s1 + $0xaa0] sm:$0xf]  ;;  %v7765_v47 = vor.u32 %v10168_v41, %v7764_v39  ;;  %v10132_v50 = vld [vmem:[%s15892_s1 + $0x88c] sm:$0xf0]  ;;  %5037 = vmatpush.bf16.msra.mxu3 %v8037_v40 }
  0x50   :  { %v8020_v44 = vld [vmem:[%s15892_s1 + $0xba0] sm:$0xf]  ;;  %v7893_v48 = vor.u32 %v10200_v43, %v7892_v42  ;;  %v10164_v53 = vld [vmem:[%s15892_s1 + $0x98c] sm:$0xf0]  ;;  %4999 = vmatpush.bf16.msra.mxu0 %v7637_v46 }
  0x51   :  { %v7620_v49 = vld [vmem:[%s15892_s1 + $0x880] sm:$0xf]  ;;  %v8021_v52 = vor.u32 %v10232_v45, %v8020_v44  ;;  %v10196_v55 = vld [vmem:[%s15892_s1 + $0xa8c] sm:$0xf0]  ;;  %5012 = vmatpush.bf16.msra.mxu1 %v7765_v47 }
  0x52   :  { %v7748_v51 = vld [vmem:[%s15892_s1 + $0x980] sm:$0xf]  ;;  %v10228_v57 = vld [vmem:[%s15892_s1 + $0xb8c] sm:$0xf0]  ;;  %v7621_v58 = vor.u32 %v10132_v50, %v7620_v49  ;;  %5025 = vmatpush.bf16.msra.mxu2 %v7893_v48 }
  0x53   :  { %v7876_v54 = vld [vmem:[%s15892_s1 + $0xa80] sm:$0xf]  ;;  %v7749_v59 = vor.u32 %v10164_v53, %v7748_v51  ;;  %v10128_v63 = vld [vmem:[%s15892_s1 + $0x86c] sm:$0xf0]  ;;  %5038 = vmatpush.bf16.msra.mxu3 %v8021_v52 }
  0x54   :  { %v8004_v56 = vld [vmem:[%s15892_s1 + $0xb80] sm:$0xf]  ;;  %v7877_v61 = vor.u32 %v10196_v55, %v7876_v54  ;;  %v10160_v5 = vld [vmem:[%s15892_s1 + $0x96c] sm:$0xf0]  ;;  %5000 = vmatpush.bf16.msra.mxu0 %v7621_v58 }
  0x55   :  { %v7604_v62 = vld [vmem:[%s15892_s1 + $0x860] sm:$0xf]  ;;  %v8005_v4 = vor.u32 %v10228_v57, %v8004_v56  ;;  %v10192_v7 = vld [vmem:[%s15892_s1 + $0xa6c] sm:$0xf0]  ;;  %5013 = vmatpush.bf16.msra.mxu1 %v7749_v59 }
  0x56   :  { %v7732_v3 = vld [vmem:[%s15892_s1 + $0x960] sm:$0xf]  ;;  %v10224_v9 = vld [vmem:[%s15892_s1 + $0xb6c] sm:$0xf0]  ;;  %v7605_v10 = vor.u32 %v10128_v63, %v7604_v62  ;;  %5026 = vmatpush.bf16.msra.mxu2 %v7877_v61 }
  0x57   :  { %v7860_v6 = vld [vmem:[%s15892_s1 + $0xa60] sm:$0xf]  ;;  %v7733_v11 = vor.u32 %v10160_v5, %v7732_v3  ;;  %v10124_v14 = vld [vmem:[%s15892_s1 + $0x84c] sm:$0xf0]  ;;  %5039 = vmatpush.bf16.msra.mxu3 %v8005_v4 }
  0x58   :  { %v7988_v8 = vld [vmem:[%s15892_s1 + $0xb60] sm:$0xf]  ;;  %v7861_v12 = vor.u32 %v10192_v7, %v7860_v6  ;;  %v10156_v17 = vld [vmem:[%s15892_s1 + $0x94c] sm:$0xf0]  ;;  %5001 = vmatpush.bf16.msra.mxu0 %v7605_v10 }
  0x59   :  { %v7588_v13 = vld [vmem:[%s15892_s1 + $0x840] sm:$0xf]  ;;  %v7989_v16 = vor.u32 %v10224_v9, %v7988_v8  ;;  %v10188_v19 = vld [vmem:[%s15892_s1 + $0xa4c] sm:$0xf0]  ;;  %5014 = vmatpush.bf16.msra.mxu1 %v7733_v11 }
  0x5a   :  { %v7716_v15 = vld [vmem:[%s15892_s1 + $0x940] sm:$0xf]  ;;  %v10220_v21 = vld [vmem:[%s15892_s1 + $0xb4c] sm:$0xf0]  ;;  %v7589_v22 = vor.u32 %v10124_v14, %v7588_v13  ;;  %5027 = vmatpush.bf16.msra.mxu2 %v7861_v12 }
  0x5b   :  { %v7844_v18 = vld [vmem:[%s15892_s1 + $0xa40] sm:$0xf]  ;;  %v7717_v23 = vor.u32 %v10156_v17, %v7716_v15  ;;  %v10120_v26 = vld [vmem:[%s15892_s1 + $0x82c] sm:$0xf0]  ;;  %5040 = vmatpush.bf16.msra.mxu3 %v7989_v16 }
  0x5c   :  { %v7972_v20 = vld [vmem:[%s15892_s1 + $0xb40] sm:$0xf]  ;;  %v7845_v24 = vor.u32 %v10188_v19, %v7844_v18  ;;  %v10152_v32 = vld [vmem:[%s15892_s1 + $0x92c] sm:$0xf0]  ;;  %5002 = vmatpush.bf16.msra.mxu0 %v7589_v22 }
  0x5d   :  { %v7572_v25 = vld [vmem:[%s15892_s1 + $0x820] sm:$0xf]  ;;  %v7973_v31 = vor.u32 %v10220_v21, %v7972_v20  ;;  %v10184_v35 = vld [vmem:[%s15892_s1 + $0xa2c] sm:$0xf0]  ;;  %5015 = vmatpush.bf16.msra.mxu1 %v7717_v23 }
  0x5e   :  { %v7700_v30 = vld [vmem:[%s15892_s1 + $0x920] sm:$0xf]  ;;  %v10216_v37 = vld [vmem:[%s15892_s1 + $0xb2c] sm:$0xf0]  ;;  %v7573_v38 = vor.u32 %v10120_v26, %v7572_v25  ;;  %5028 = vmatpush.bf16.msra.mxu2 %v7845_v24 }
  0x5f   :  { %v7828_v33 = vld [vmem:[%s15892_s1 + $0xa20] sm:$0xf]  ;;  %v10116_v40 = vld [vmem:[%s15892_s1 + $0x80c] sm:$0xf0]  ;;  %v7701_v41 = vor.u32 %v10152_v32, %v7700_v30  ;;  %5041 = vmatpush.bf16.msra.mxu3 %v7973_v31 }
  0x60   :  { %v7956_v36 = vld [vmem:[%s15892_s1 + $0xb20] sm:$0xf]  ;;  %v7829_v42 = vor.u32 %v10184_v35, %v7828_v33  ;;  %v10148_v44 = vld [vmem:[%s15892_s1 + $0x90c] sm:$0xf0]  ;;  %5003 = vmatpush.bf16.msra.mxu0 %v7573_v38 }
  0x61   :  { %v7556_v39 = vld [vmem:[%s15892_s1 + $0x800] sm:$0xf]  ;;  %v7957_v46 = vor.u32 %v10216_v37, %v7956_v36  ;;  %v10180_v47 = vld [vmem:[%s15892_s1 + $0xa0c] sm:$0xf0]  ;;  %5016 = vmatpush.bf16.msra.mxu1 %v7701_v41 }
  0x62   :  { %v7684_v43 = vld [vmem:[%s15892_s1 + $0x900] sm:$0xf]  ;;  %v10212_v49 = vld [vmem:[%s15892_s1 + $0xb0c] sm:$0xf0]  ;;  %v7557_v53 = vor.u32 %v10116_v40, %v7556_v39  ;;  %5029 = vmatpush.bf16.msra.mxu2 %v7829_v42 }
  0x63   :  { %v7812_v45 = vld [vmem:[%s15892_s1 + $0xa00] sm:$0xf]  ;;  %v10272_v51 = vld [vmem:[%s15892_s1 + $0xcec] sm:$0xf0]  ;;  %v7685_v57 = vor.u32 %v10148_v44, %v7684_v43  ;;  %5042 = vmatpush.bf16.msra.mxu3 %v7957_v46 }
  0x64   :  { %v7940_v48 = vld [vmem:[%s15892_s1 + $0xb00] sm:$0xf]  ;;  %v10304_v54 = vld [vmem:[%s15892_s1 + $0xdec] sm:$0xf0]  ;;  %v7813_v58 = vor.u32 %v10180_v47, %v7812_v45  ;;  %5004 = vmatpush.bf16.msra.mxu0 %v7557_v53 }
  0x65   :  { %v8180_v50 = vld [vmem:[%s15892_s1 + $0xce0] sm:$0xf]  ;;  %v10336_v56 = vld [vmem:[%s15892_s1 + $0xeec] sm:$0xf0]  ;;  %v7941_v62 = vor.u32 %v10212_v49, %v7940_v48  ;;  %5017 = vmatpush.bf16.msra.mxu1 %v7685_v57 }
  0x66   :  { %v8308_v52 = vld [vmem:[%s15892_s1 + $0xde0] sm:$0xf]  ;;  %v10368_v61 = vld [vmem:[%s15892_s1 + $0xfec] sm:$0xf0]  ;;  %v8181_v63 = vor.u32 %v10272_v51, %v8180_v50  ;;  %5030 = vmatpush.bf16.msra.mxu2 %v7813_v58 }
  0x67   :  { %v8436_v55 = vld [vmem:[%s15892_s1 + $0xee0] sm:$0xf]  ;;  %v8309_v3 = vor.u32 %v10304_v54, %v8308_v52  ;;  %v10268_v6 = vld [vmem:[%s15892_s1 + $0xccc] sm:$0xf0]  ;;  %5043 = vmatpush.bf16.msra.mxu3 %v7941_v62 }
  0x68   :  { %v8564_v59 = vld [vmem:[%s15892_s1 + $0xfe0] sm:$0xf]  ;;  %v8437_v4 = vor.u32 %v10336_v56, %v8436_v55  ;;  %v10300_v9 = vld [vmem:[%s15892_s1 + $0xdcc] sm:$0xf0]  ;;  %5049 = vmatpush.bf16.msrb.mxu0 %v8181_v63 }
  0x69   :  { %v8164_v5 = vld [vmem:[%s15892_s1 + $0xcc0] sm:$0xf]  ;;  %v8565_v8 = vor.u32 %v10368_v61, %v8564_v59  ;;  %v10332_v11 = vld [vmem:[%s15892_s1 + $0xecc] sm:$0xf0]  ;;  %5062 = vmatpush.bf16.msrb.mxu1 %v8309_v3 }
  0x6a   :  { %v8292_v7 = vld [vmem:[%s15892_s1 + $0xdc0] sm:$0xf]  ;;  %v10364_v14 = vld [vmem:[%s15892_s1 + $0xfcc] sm:$0xf0]  ;;  %v8165_v18 = vor.u32 %v10268_v6, %v8164_v5  ;;  %5075 = vmatpush.bf16.msrb.mxu2 %v8437_v4 }
  0x6b   :  { %v8420_v10 = vld [vmem:[%s15892_s1 + $0xec0] sm:$0xf]  ;;  %v11411_v15 = vld [vmem:[#allocation1 + $0x12] sm:$0xff]  ;;  %v11413_v16 = vld [vmem:[#allocation1 + $0x9] sm:$0xff]  ;;  %v8293_v19 = vor.u32 %v10300_v9, %v8292_v7  ;;  %5088 = vmatpush.bf16.msrb.mxu3 %v8565_v8 }
  0x6c   :  { %v11403_v12 = vld [vmem:[#allocation1] sm:$0xff]  ;;  %v8421_v20 = vor.u32 %v10332_v11, %v8420_v10  ;;  %v10264_v22 = vld [vmem:[%s15892_s1 + $0xcac] sm:$0xf0]  ;;  %5031 = vmatmul.bf16.vlgmr.msra.gmra.mxu2 %v11411_v15  ;;  %5018 = vmatmul.bf16.vlgmr.msra.gmra.mxu1 %v11413_v16 }
  0x6d   :  { %v8548_v13 = vld [vmem:[%s15892_s1 + $0xfc0] sm:$0xf]  ;;  %5005 = vmatmul.bf16.vlgmr.msra.gmra.mxu0 %v11403_v12  ;;  %v10296_v25 = vld [vmem:[%s15892_s1 + $0xdac] sm:$0xf0]  ;;  %5063 = vmatpush.bf16.msrb.mxu1 %v8293_v19 }
  0x6e   :  { %v11415_v17 = vld [vmem:[#allocation1 + $0x1b] sm:$0xff]  ;;  %v8549_v24 = vor.u32 %v10364_v14, %v8548_v13  ;;  %v10328_v30 = vld [vmem:[%s15892_s1 + $0xeac] sm:$0xf0]  ;;  %5050 = vmatpush.bf16.msrb.mxu0 %v8165_v18  ;;  %5076 = vmatpush.bf16.msrb.mxu2 %v8421_v20 }
  0x6f   :  { %v8148_v21 = vld [vmem:[%s15892_s1 + $0xca0] sm:$0xf]  ;;  %v10360_v32 = vld [vmem:[%s15892_s1 + $0xfac] sm:$0xf0]  ;;  %5044 = vmatmul.bf16.vlgmr.msra.gmra.mxu3 %v11415_v17 }
  0x70   :  { %v8276_v23 = vld [vmem:[%s15892_s1 + $0xda0] sm:$0xf]  ;;  %v8149_v33 = vor.u32 %v10264_v22, %v8148_v21  ;;  %v10260_v38 = vld [vmem:[%s15892_s1 + $0xc8c] sm:$0xf0]  ;;  %5089 = vmatpush.bf16.msrb.mxu3 %v8549_v24 }
  0x71   :  { %v8404_v26 = vld [vmem:[%s15892_s1 + $0xea0] sm:$0xf]  ;;  %v8277_v36 = vor.u32 %v10296_v25, %v8276_v23  ;;  %v10292_v40 = vld [vmem:[%s15892_s1 + $0xd8c] sm:$0xf0] }
  0x72   :  { %v8532_v31 = vld [vmem:[%s15892_s1 + $0xfa0] sm:$0xf]  ;;  %v8405_v37 = vor.u32 %v10328_v30, %v8404_v26  ;;  %v10324_v43 = vld [vmem:[%s15892_s1 + $0xe8c] sm:$0xf0] }
  0x73   :  { %v8132_v35 = vld [vmem:[%s15892_s1 + $0xc80] sm:$0xf]  ;;  %v8533_v41 = vor.u32 %v10360_v32, %v8532_v31  ;;  %v10356_v45 = vld [vmem:[%s15892_s1 + $0xf8c] sm:$0xf0] }
  0x74   :  { %v8260_v39 = vld [vmem:[%s15892_s1 + $0xd80] sm:$0xf] }
  0x75   :  { %v8388_v42 = vld [vmem:[%s15892_s1 + $0xe80] sm:$0xf] }
  0x76   :  { %v8516_v44 = vld [vmem:[%s15892_s1 + $0xf80] sm:$0xf] }
  0x77   :  { %10 = vsyncpa [#allocation3], 0  ;;  %5051 = vmatpush.bf16.msrb.mxu0 %v8149_v33  ;;  %v8133_v46 = vor.u32 %v10260_v38, %v8132_v35  ;;  %5064 = vmatpush.bf16.msrb.mxu1 %v8277_v36  ;;  %v8261_v47 = vor.u32 %v10292_v40, %v8260_v39  ;;  %v8389_v48 = vor.u32 %v10324_v43, %v8388_v42  ;;  %v8116_v49 = vld [vmem:[%s15892_s1 + $0xc60] sm:$0xf]  ;;  %v10256_v50 = vld [vmem:[%s15892_s1 + $0xc6c] sm:$0xf0] }
  0x78   :  { %5077 = vmatpush.bf16.msrb.mxu2 %v8405_v37  ;;  %v8244_v51 = vld [vmem:[%s15892_s1 + $0xd60] sm:$0xf]  ;;  %5090 = vmatpush.bf16.msrb.mxu3 %v8533_v41  ;;  %v8517_v52 = vor.u32 %v10356_v45, %v8516_v44  ;;  %v10288_v53 = vld [vmem:[%s15892_s1 + $0xd6c] sm:$0xf0]  ;;  %v8117_v58 = vor.u32 %v10256_v50, %v8116_v49  ;;  %s10724_s19 = smov [#allocation2]   ;;  %s6521_s23 = sshll.u32 %s15896_s5, 4  ;;  %s6522_s23 = int_to_ptr.hbm [resolvable:$true] %s6521_s23 }
  0x79   :  { %v8372_v54 = vld [vmem:[%s15892_s1 + $0xe60] sm:$0xf]  ;;  %v10320_v55 = vld [vmem:[%s15892_s1 + $0xe6c] sm:$0xf0]  ;;  %v8245_v59 = vor.u32 %v10288_v53, %v8244_v51  ;;  %s6519_s20 = sshll.u32 %s10724_s19, 4  ;;  %s6520_s20 = int_to_ptr.vmem [resolvable:$true] %s6519_s20 }
  0x7a   :  { %v8500_v56 = vld [vmem:[%s15892_s1 + $0xf60] sm:$0xf]  ;;  %v10352_v57 = vld [vmem:[%s15892_s1 + $0xf6c] sm:$0xf0]  ;;  %v8373_v61 = vor.u32 %v10320_v55, %v8372_v54 }
  0x7b   :  { %5052 = vmatpush.bf16.msrb.mxu0 %v8133_v46  ;;  %5065 = vmatpush.bf16.msrb.mxu1 %v8261_v47  ;;  %v8100_v62 = vld [vmem:[%s15892_s1 + $0xc40] sm:$0xf]  ;;  %v10252_v63 = vld [vmem:[%s15892_s1 + $0xc4c] sm:$0xf0]  ;;  %v8501_v4 = vor.u32 %v10352_v57, %v8500_v56  ;;  %v11577_v46 = vld [vmem:[#allocation1 + $0x24] sm:$0xff] }
  0x7c   :  { %5078 = vmatpush.bf16.msrb.mxu2 %v8389_v48  ;;  %v8228_v3 = vld [vmem:[%s15892_s1 + $0xd40] sm:$0xf]  ;;  %5091 = vmatpush.bf16.msrb.mxu3 %v8517_v52  ;;  %v10284_v5 = vld [vmem:[%s15892_s1 + $0xd4c] sm:$0xf0]  ;;  %v8101_v10 = vor.u32 %v10252_v63, %v8100_v62  ;;  %v11579_v47 = vld [vmem:[#allocation1 + $0x36] sm:$0xff] }
  0x7d   :  { %v8356_v6 = vld [vmem:[%s15892_s1 + $0xe40] sm:$0xf]  ;;  %v10316_v7 = vld [vmem:[%s15892_s1 + $0xe4c] sm:$0xf0]  ;;  %v8229_v13 = vor.u32 %v10284_v5, %v8228_v3 }
  0x7e   :  { %v8484_v8 = vld [vmem:[%s15892_s1 + $0xf40] sm:$0xf]  ;;  %v10348_v9 = vld [vmem:[%s15892_s1 + $0xf4c] sm:$0xf0]  ;;  %v8357_v14 = vor.u32 %v10316_v7, %v8356_v6 }
  0x7f   :  { %5053 = vmatpush.bf16.msrb.mxu0 %v8117_v58  ;;  %v8084_v11 = vld [vmem:[%s15892_s1 + $0xc20] sm:$0xf]  ;;  %5066 = vmatpush.bf16.msrb.mxu1 %v8245_v59  ;;  %v10248_v18 = vld [vmem:[%s15892_s1 + $0xc2c] sm:$0xf0]  ;;  %v8485_v21 = vor.u32 %v10348_v9, %v8484_v8 }
  0x80   :  { %5079 = vmatpush.bf16.msrb.mxu2 %v8373_v61  ;;  %v8212_v19 = vld [vmem:[%s15892_s1 + $0xd20] sm:$0xf]  ;;  %v10280_v20 = vld [vmem:[%s15892_s1 + $0xd2c] sm:$0xf0]  ;;  %5092 = vmatpush.bf16.msrb.mxu3 %v8501_v4  ;;  %v8085_v31 = vor.u32 %v10248_v18, %v8084_v11 }
  0x81   :  { %v8340_v22 = vld [vmem:[%s15892_s1 + $0xe20] sm:$0xf]  ;;  %v10312_v23 = vld [vmem:[%s15892_s1 + $0xe2c] sm:$0xf0]  ;;  %v8213_v37 = vor.u32 %v10280_v20, %v8212_v19 }
  0x82   :  { %v8468_v24 = vld [vmem:[%s15892_s1 + $0xf20] sm:$0xf]  ;;  %v10344_v25 = vld [vmem:[%s15892_s1 + $0xf2c] sm:$0xf0]  ;;  %v8341_v38 = vor.u32 %v10312_v23, %v8340_v22 }
  0x83   :  { %v8068_v26 = vld [vmem:[%s15892_s1 + $0xc00] sm:$0xf]  ;;  %v10244_v30 = vld [vmem:[%s15892_s1 + $0xc0c] sm:$0xf0]  ;;  %5054 = vmatpush.bf16.msrb.mxu0 %v8101_v10  ;;  %5067 = vmatpush.bf16.msrb.mxu1 %v8229_v13  ;;  %v8469_v43 = vor.u32 %v10344_v25, %v8468_v24 }
  0x84   :  { %v8196_v32 = vld [vmem:[%s15892_s1 + $0xd00] sm:$0xf]  ;;  %v10276_v33 = vld [vmem:[%s15892_s1 + $0xd0c] sm:$0xf0]  ;;  %5080 = vmatpush.bf16.msrb.mxu2 %v8357_v14  ;;  %5093 = vmatpush.bf16.msrb.mxu3 %v8485_v21  ;;  %v8069_v51 = vor.u32 %v10244_v30, %v8068_v26 }
  0x85   :  { %v8324_v35 = vld [vmem:[%s15892_s1 + $0xe00] sm:$0xf]  ;;  %v10308_v36 = vld [vmem:[%s15892_s1 + $0xe0c] sm:$0xf0]  ;;  %v8197_v54 = vor.u32 %v10276_v33, %v8196_v32 }
  0x86   :  { %v8452_v39 = vld [vmem:[%s15892_s1 + $0xf00] sm:$0xf]  ;;  %v10340_v40 = vld [vmem:[%s15892_s1 + $0xf0c] sm:$0xf0]  ;;  %v8325_v55 = vor.u32 %v10308_v36, %v8324_v35 }
  0x87   :  { %v8692_v41 = vld [vmem:[%s15892_s1 + $0x10e0] sm:$0xf]  ;;  %v10400_v42 = vld [vmem:[%s15892_s1 + $0x10ec] sm:$0xf0]  ;;  %5055 = vmatpush.bf16.msrb.mxu0 %v8085_v31  ;;  %5068 = vmatpush.bf16.msrb.mxu1 %v8213_v37  ;;  %v8453_v58 = vor.u32 %v10340_v40, %v8452_v39 }
  0x88   :  { %v8820_v44 = vld [vmem:[%s15892_s1 + $0x11e0] sm:$0xf]  ;;  %v10432_v45 = vld [vmem:[%s15892_s1 + $0x11ec] sm:$0xf0]  ;;  %5081 = vmatpush.bf16.msrb.mxu2 %v8341_v38  ;;  %5094 = vmatpush.bf16.msrb.mxu3 %v8469_v43  ;;  %v8693_v59 = vor.u32 %v10400_v42, %v8692_v41 }
  0x89   :  { %v11581_v48 = vld [vmem:[#allocation1 + $0x2d] sm:$0xff]  ;;  %v11583_v49 = vld [vmem:[#allocation1 + $0x3f] sm:$0xff]  ;;  %v8821_v61 = vor.u32 %v10432_v45, %v8820_v44 }
  0x8a   :  { %v23_v50 = vld [vmem:[%s15891_s0 + $0x10] sm:$0xff]  ;;  %v8948_v52 = vld [vmem:[%s15892_s1 + $0x12e0] sm:$0xf] }
  0x8b   :  { %v10464_v53 = vld [vmem:[%s15892_s1 + $0x12ec] sm:$0xf0]  ;;  %856 = vst [vmem:[#allocation1] ss:$9 sm:$0xff] %v23_v50  ;;  %v9076_v56 = vld [vmem:[%s15892_s1 + $0x13e0] sm:$0xf]  ;;  %5056 = vmatpush.bf16.msrb.mxu0 %v8069_v51  ;;  %5069 = vmatpush.bf16.msrb.mxu1 %v8197_v54 }
  0x8c   :  { %v10496_v57 = vld [vmem:[%s15892_s1 + $0x13ec] sm:$0xf0]  ;;  %v8949_v62 = vor.u32 %v10464_v53, %v8948_v52  ;;  %v8676_v63 = vld [vmem:[%s15892_s1 + $0x10c0] sm:$0xf]  ;;  %5082 = vmatpush.bf16.msrb.mxu2 %v8325_v55  ;;  %5095 = vmatpush.bf16.msrb.mxu3 %v8453_v58 }
  0x8d   :  { %v10396_v3 = vld [vmem:[%s15892_s1 + $0x10cc] sm:$0xf0]  ;;  %v8804_v4 = vld [vmem:[%s15892_s1 + $0x11c0] sm:$0xf]  ;;  %v9077_v5 = vor.u32 %v10496_v57, %v9076_v56 }
  0x8e   :  { %v10428_v6 = vld [vmem:[%s15892_s1 + $0x11cc] sm:$0xf0]  ;;  %v8932_v7 = vld [vmem:[%s15892_s1 + $0x12c0] sm:$0xf]  ;;  %v8677_v11 = vor.u32 %v10396_v3, %v8676_v63  ;;  %5057 = vmatmul.bf16.vlgmr.msrb.gmra.mxu0 %v11577_v46  ;;  %5070 = vmatmul.bf16.vlgmr.msrb.gmra.mxu1 %v11581_v48 }
  0x8f   :  { %v10460_v8 = vld [vmem:[%s15892_s1 + $0x12cc] sm:$0xf0]  ;;  %v9060_v9 = vld [vmem:[%s15892_s1 + $0x13c0] sm:$0xf]  ;;  %5101 = vmatpush.bf16.msra.mxu0 %v8693_v59  ;;  %5114 = vmatpush.bf16.msra.mxu1 %v8821_v61  ;;  %v8805_v13 = vor.u32 %v10428_v6, %v8804_v4 }
  0x90   :  { %v10492_v10 = vld [vmem:[%s15892_s1 + $0x13cc] sm:$0xf0]  ;;  %5127 = vmatpush.bf16.msra.mxu2 %v8949_v62  ;;  %v8933_v14 = vor.u32 %v10460_v8, %v8932_v7  ;;  %v8660_v18 = vld [vmem:[%s15892_s1 + $0x10a0] sm:$0xf]  ;;  %5140 = vmatpush.bf16.msra.mxu3 %v9077_v5 }
  0x91   :  { %v10392_v19 = vld [vmem:[%s15892_s1 + $0x10ac] sm:$0xf0]  ;;  %v8788_v20 = vld [vmem:[%s15892_s1 + $0x11a0] sm:$0xf]  ;;  %v9061_v21 = vor.u32 %v10492_v10, %v9060_v9  ;;  %5083 = vmatmul.bf16.vlgmr.msrb.gmra.mxu2 %v11579_v47  ;;  %5096 = vmatmul.bf16.vlgmr.msrb.gmra.mxu3 %v11583_v49 }
  0x92   :  { %v10424_v22 = vld [vmem:[%s15892_s1 + $0x11ac] sm:$0xf0]  ;;  %v8916_v23 = vld [vmem:[%s15892_s1 + $0x12a0] sm:$0xf]  ;;  %v8661_v30 = vor.u32 %v10392_v19, %v8660_v18 }
  0x93   :  { %v10456_v24 = vld [vmem:[%s15892_s1 + $0x12ac] sm:$0xf0]  ;;  %v9044_v25 = vld [vmem:[%s15892_s1 + $0x13a0] sm:$0xf]  ;;  %5102 = vmatpush.bf16.msra.mxu0 %v8677_v11  ;;  %5115 = vmatpush.bf16.msra.mxu1 %v8805_v13  ;;  %v8789_v31 = vor.u32 %v10424_v22, %v8788_v20 }
  0x94   :  { %v10488_v26 = vld [vmem:[%s15892_s1 + $0x13ac] sm:$0xf0]  ;;  %5128 = vmatpush.bf16.msra.mxu2 %v8933_v14  ;;  %v8917_v32 = vor.u32 %v10456_v24, %v8916_v23  ;;  %v8644_v33 = vld [vmem:[%s15892_s1 + $0x1080] sm:$0xf]  ;;  %5141 = vmatpush.bf16.msra.mxu3 %v9061_v21 }
  0x95   :  { %v10388_v35 = vld [vmem:[%s15892_s1 + $0x108c] sm:$0xf0]  ;;  %v8772_v36 = vld [vmem:[%s15892_s1 + $0x1180] sm:$0xf]  ;;  %v9045_v37 = vor.u32 %v10488_v26, %v9044_v25 }
  0x96   :  { %v10420_v38 = vld [vmem:[%s15892_s1 + $0x118c] sm:$0xf0]  ;;  %v8900_v39 = vld [vmem:[%s15892_s1 + $0x1280] sm:$0xf]  ;;  %v8645_v43 = vor.u32 %v10388_v35, %v8644_v33 }
  0x97   :  { %v10452_v40 = vld [vmem:[%s15892_s1 + $0x128c] sm:$0xf0]  ;;  %v9028_v41 = vld [vmem:[%s15892_s1 + $0x1380] sm:$0xf]  ;;  %5103 = vmatpush.bf16.msra.mxu0 %v8661_v30  ;;  %5116 = vmatpush.bf16.msra.mxu1 %v8789_v31  ;;  %v8773_v44 = vor.u32 %v10420_v38, %v8772_v36 }
  0x98   :  { %v10484_v42 = vld [vmem:[%s15892_s1 + $0x138c] sm:$0xf0]  ;;  %5129 = vmatpush.bf16.msra.mxu2 %v8917_v32  ;;  %v8901_v45 = vor.u32 %v10452_v40, %v8900_v39  ;;  %v8628_v50 = vld [vmem:[%s15892_s1 + $0x1060] sm:$0xf]  ;;  %5142 = vmatpush.bf16.msra.mxu3 %v9045_v37 }
  0x99   :  { %v10384_v51 = vld [vmem:[%s15892_s1 + $0x106c] sm:$0xf0]  ;;  %v8756_v52 = vld [vmem:[%s15892_s1 + $0x1160] sm:$0xf]  ;;  %v9029_v53 = vor.u32 %v10484_v42, %v9028_v41 }
  0x9a   :  { %v10416_v54 = vld [vmem:[%s15892_s1 + $0x116c] sm:$0xf0]  ;;  %v8884_v55 = vld [vmem:[%s15892_s1 + $0x1260] sm:$0xf]  ;;  %v8629_v59 = vor.u32 %v10384_v51, %v8628_v50 }
  0x9b   :  { %v10448_v56 = vld [vmem:[%s15892_s1 + $0x126c] sm:$0xf0]  ;;  %v9012_v57 = vld [vmem:[%s15892_s1 + $0x1360] sm:$0xf]  ;;  %5104 = vmatpush.bf16.msra.mxu0 %v8645_v43  ;;  %5117 = vmatpush.bf16.msra.mxu1 %v8773_v44  ;;  %v8757_v61 = vor.u32 %v10416_v54, %v8756_v52 }
  0x9c   :  { %v10480_v58 = vld [vmem:[%s15892_s1 + $0x136c] sm:$0xf0]  ;;  %5130 = vmatpush.bf16.msra.mxu2 %v8901_v45  ;;  %v8885_v62 = vor.u32 %v10448_v56, %v8884_v55  ;;  %v8612_v63 = vld [vmem:[%s15892_s1 + $0x1040] sm:$0xf]  ;;  %5143 = vmatpush.bf16.msra.mxu3 %v9029_v53 }
  0x9d   :  { %v10380_v3 = vld [vmem:[%s15892_s1 + $0x104c] sm:$0xf0]  ;;  %v8740_v4 = vld [vmem:[%s15892_s1 + $0x1140] sm:$0xf]  ;;  %v9013_v5 = vor.u32 %v10480_v58, %v9012_v57 }
  0x9e   :  { %v10412_v6 = vld [vmem:[%s15892_s1 + $0x114c] sm:$0xf0]  ;;  %v8868_v7 = vld [vmem:[%s15892_s1 + $0x1240] sm:$0xf]  ;;  %v8613_v11 = vor.u32 %v10380_v3, %v8612_v63 }
  0x9f   :  { %v10444_v8 = vld [vmem:[%s15892_s1 + $0x124c] sm:$0xf0]  ;;  %v8996_v9 = vld [vmem:[%s15892_s1 + $0x1340] sm:$0xf]  ;;  %5105 = vmatpush.bf16.msra.mxu0 %v8629_v59  ;;  %5118 = vmatpush.bf16.msra.mxu1 %v8757_v61  ;;  %v8741_v13 = vor.u32 %v10412_v6, %v8740_v4 }
  0xa0   :  { %v10476_v10 = vld [vmem:[%s15892_s1 + $0x134c] sm:$0xf0]  ;;  %5131 = vmatpush.bf16.msra.mxu2 %v8885_v62  ;;  %v8869_v14 = vor.u32 %v10444_v8, %v8868_v7  ;;  %v8596_v18 = vld [vmem:[%s15892_s1 + $0x1020] sm:$0xf]  ;;  %5144 = vmatpush.bf16.msra.mxu3 %v9013_v5 }
  0xa1   :  { %v10376_v19 = vld [vmem:[%s15892_s1 + $0x102c] sm:$0xf0]  ;;  %v8724_v20 = vld [vmem:[%s15892_s1 + $0x1120] sm:$0xf]  ;;  %v8997_v21 = vor.u32 %v10476_v10, %v8996_v9 }
  0xa2   :  { %v10408_v22 = vld [vmem:[%s15892_s1 + $0x112c] sm:$0xf0]  ;;  %v8852_v23 = vld [vmem:[%s15892_s1 + $0x1220] sm:$0xf]  ;;  %v8597_v30 = vor.u32 %v10376_v19, %v8596_v18 }
  0xa3   :  { %v10440_v24 = vld [vmem:[%s15892_s1 + $0x122c] sm:$0xf0]  ;;  %v8980_v25 = vld [vmem:[%s15892_s1 + $0x1320] sm:$0xf]  ;;  %5106 = vmatpush.bf16.msra.mxu0 %v8613_v11  ;;  %5119 = vmatpush.bf16.msra.mxu1 %v8741_v13  ;;  %v8725_v33 = vor.u32 %v10408_v22, %v8724_v20 }
  0xa4   :  { %v10472_v26 = vld [vmem:[%s15892_s1 + $0x132c] sm:$0xf0]  ;;  %v8580_v31 = vld [vmem:[%s15892_s1 + $0x1000] sm:$0xf]  ;;  %5132 = vmatpush.bf16.msra.mxu2 %v8869_v14  ;;  %v8853_v35 = vor.u32 %v10440_v24, %v8852_v23  ;;  %5145 = vmatpush.bf16.msra.mxu3 %v8997_v21 }
  0xa5   :  { %v10372_v32 = vld [vmem:[%s15892_s1 + $0x100c] sm:$0xf0]  ;;  %v8708_v36 = vld [vmem:[%s15892_s1 + $0x1100] sm:$0xf]  ;;  %v8981_v39 = vor.u32 %v10472_v26, %v8980_v25 }
  0xa6   :  { %v10404_v37 = vld [vmem:[%s15892_s1 + $0x110c] sm:$0xf0]  ;;  %v8836_v38 = vld [vmem:[%s15892_s1 + $0x1200] sm:$0xf]  ;;  %v8581_v50 = vor.u32 %v10372_v32, %v8580_v31 }
  0xa7   :  { %v10436_v40 = vld [vmem:[%s15892_s1 + $0x120c] sm:$0xf0]  ;;  %v8964_v41 = vld [vmem:[%s15892_s1 + $0x1300] sm:$0xf]  ;;  %5107 = vmatpush.bf16.msra.mxu0 %v8597_v30  ;;  %5120 = vmatpush.bf16.msra.mxu1 %v8725_v33  ;;  %v8709_v54 = vor.u32 %v10404_v37, %v8708_v36 }
  0xa8   :  { %v10468_v42 = vld [vmem:[%s15892_s1 + $0x130c] sm:$0xf0]  ;;  %v9204_v43 = vld [vmem:[%s15892_s1 + $0x14e0] sm:$0xf]  ;;  %5133 = vmatpush.bf16.msra.mxu2 %v8853_v35  ;;  %v8837_v55 = vor.u32 %v10436_v40, %v8836_v38  ;;  %5146 = vmatpush.bf16.msra.mxu3 %v8981_v39 }
  0xa9   :  { %v10528_v44 = vld [vmem:[%s15892_s1 + $0x14ec] sm:$0xf0]  ;;  %v9332_v45 = vld [vmem:[%s15892_s1 + $0x15e0] sm:$0xf]  ;;  %v8965_v58 = vor.u32 %v10468_v42, %v8964_v41 }
  0xaa   :  { %v10560_v51 = vld [vmem:[%s15892_s1 + $0x15ec] sm:$0xf0]  ;;  %v9460_v52 = vld [vmem:[%s15892_s1 + $0x16e0] sm:$0xf]  ;;  %v9205_v59 = vor.u32 %v10528_v44, %v9204_v43 }
  0xab   :  { %v10592_v53 = vld [vmem:[%s15892_s1 + $0x16ec] sm:$0xf0]  ;;  %v9588_v56 = vld [vmem:[%s15892_s1 + $0x17e0] sm:$0xf]  ;;  %v9333_v61 = vor.u32 %v10560_v51, %v9332_v45  ;;  %5108 = vmatpush.bf16.msra.mxu0 %v8581_v50  ;;  %5121 = vmatpush.bf16.msra.mxu1 %v8709_v54 }
  0xac   :  { %v10624_v57 = vld [vmem:[%s15892_s1 + $0x17ec] sm:$0xf0]  ;;  %v9461_v62 = vor.u32 %v10592_v53, %v9460_v52  ;;  %v9188_v63 = vld [vmem:[%s15892_s1 + $0x14c0] sm:$0xf]  ;;  %5134 = vmatpush.bf16.msra.mxu2 %v8837_v55  ;;  %5147 = vmatpush.bf16.msra.mxu3 %v8965_v58 }
  0xad   :  { %v10524_v3 = vld [vmem:[%s15892_s1 + $0x14cc] sm:$0xf0]  ;;  %v9316_v4 = vld [vmem:[%s15892_s1 + $0x15c0] sm:$0xf]  ;;  %v9589_v5 = vor.u32 %v10624_v57, %v9588_v56 }
  0xae   :  { %v10556_v6 = vld [vmem:[%s15892_s1 + $0x15cc] sm:$0xf0]  ;;  %v9444_v7 = vld [vmem:[%s15892_s1 + $0x16c0] sm:$0xf]  ;;  %v9189_v19 = vor.u32 %v10524_v3, %v9188_v63 }
  0xaf   :  { %v10588_v8 = vld [vmem:[%s15892_s1 + $0x16cc] sm:$0xf0]  ;;  %v11814_v9 = vld [vmem:[#allocation1] sm:$0xff]  ;;  %5153 = vmatpush.bf16.msrb.mxu0 %v9205_v59  ;;  %5166 = vmatpush.bf16.msrb.mxu1 %v9333_v61  ;;  %v9317_v20 = vor.u32 %v10556_v6, %v9316_v4 }
  0xb0   :  { %v9572_v10 = vld [vmem:[%s15892_s1 + $0x17c0] sm:$0xf]  ;;  %v10620_v11 = vld [vmem:[%s15892_s1 + $0x17cc] sm:$0xf0]  ;;  %5179 = vmatpush.bf16.msrb.mxu2 %v9461_v62  ;;  %v9445_v21 = vor.u32 %v10588_v8, %v9444_v7  ;;  %5192 = vmatpush.bf16.msrb.mxu3 %v9589_v5 }
  0xb1   :  { %v11822_v13 = vld [vmem:[#allocation1 + $0x12] sm:$0xff]  ;;  %v11824_v14 = vld [vmem:[#allocation1 + $0x9] sm:$0xff]  ;;  %v11826_v18 = vld [vmem:[#allocation1 + $0x1b] sm:$0xff]  ;;  %5109 = vmatmul.bf16.vlgmr.msra.gmra.mxu0 %v11814_v9  ;;  %v9573_v25 = vor.u32 %v10620_v11, %v9572_v10 }
  0xb2   :  { %v9172_v22 = vld [vmem:[%s15892_s1 + $0x14a0] sm:$0xf]  ;;  %v10520_v23 = vld [vmem:[%s15892_s1 + $0x14ac] sm:$0xf0]  ;;  %5135 = vmatmul.bf16.vlgmr.msra.gmra.mxu2 %v11822_v13  ;;  %5122 = vmatmul.bf16.vlgmr.msra.gmra.mxu1 %v11824_v14 }
  0xb3   :  { %v9300_v24 = vld [vmem:[%s15892_s1 + $0x15a0] sm:$0xf]  ;;  %v10552_v26 = vld [vmem:[%s15892_s1 + $0x15ac] sm:$0xf0]  ;;  %5148 = vmatmul.bf16.vlgmr.msra.gmra.mxu3 %v11826_v18  ;;  %5154 = vmatpush.bf16.msrb.mxu0 %v9189_v19  ;;  %v9173_v35 = vor.u32 %v10520_v23, %v9172_v22 }
  0xb4   :  { %v9428_v30 = vld [vmem:[%s15892_s1 + $0x16a0] sm:$0xf]  ;;  %v10584_v31 = vld [vmem:[%s15892_s1 + $0x16ac] sm:$0xf0]  ;;  %5167 = vmatpush.bf16.msrb.mxu1 %v9317_v20  ;;  %5180 = vmatpush.bf16.msrb.mxu2 %v9445_v21  ;;  %v9301_v36 = vor.u32 %v10552_v26, %v9300_v24 }
  0xb5   :  { %v9556_v32 = vld [vmem:[%s15892_s1 + $0x17a0] sm:$0xf]  ;;  %v10616_v33 = vld [vmem:[%s15892_s1 + $0x17ac] sm:$0xf0]  ;;  %v9429_v37 = vor.u32 %v10584_v31, %v9428_v30  ;;  %5193 = vmatpush.bf16.msrb.mxu3 %v9573_v25 }
  0xb6   :  { %v9156_v38 = vld [vmem:[%s15892_s1 + $0x1480] sm:$0xf]  ;;  %v10516_v39 = vld [vmem:[%s15892_s1 + $0x148c] sm:$0xf0]  ;;  %v9557_v41 = vor.u32 %v10616_v33, %v9556_v32 }
  0xb7   :  { %v9284_v40 = vld [vmem:[%s15892_s1 + $0x1580] sm:$0xf]  ;;  %v10548_v42 = vld [vmem:[%s15892_s1 + $0x158c] sm:$0xf0]  ;;  %5155 = vmatpush.bf16.msrb.mxu0 %v9173_v35  ;;  %v9157_v51 = vor.u32 %v10516_v39, %v9156_v38 }
  0xb8   :  { %v9412_v43 = vld [vmem:[%s15892_s1 + $0x1680] sm:$0xf]  ;;  %v10580_v44 = vld [vmem:[%s15892_s1 + $0x168c] sm:$0xf0]  ;;  %5168 = vmatpush.bf16.msrb.mxu1 %v9301_v36  ;;  %5181 = vmatpush.bf16.msrb.mxu2 %v9429_v37  ;;  %v9285_v52 = vor.u32 %v10548_v42, %v9284_v40 }
  0xb9   :  { %v9540_v45 = vld [vmem:[%s15892_s1 + $0x1780] sm:$0xf]  ;;  %v10612_v50 = vld [vmem:[%s15892_s1 + $0x178c] sm:$0xf0]  ;;  %v9413_v53 = vor.u32 %v10580_v44, %v9412_v43  ;;  %5194 = vmatpush.bf16.msrb.mxu3 %v9557_v41 }
  0xba   :  { %v9140_v54 = vld [vmem:[%s15892_s1 + $0x1460] sm:$0xf]  ;;  %v10512_v55 = vld [vmem:[%s15892_s1 + $0x146c] sm:$0xf0]  ;;  %v9541_v57 = vor.u32 %v10612_v50, %v9540_v45 }
  0xbb   :  { %v9268_v56 = vld [vmem:[%s15892_s1 + $0x1560] sm:$0xf]  ;;  %v10544_v58 = vld [vmem:[%s15892_s1 + $0x156c] sm:$0xf0]  ;;  %5156 = vmatpush.bf16.msrb.mxu0 %v9157_v51  ;;  %v9141_v3 = vor.u32 %v10512_v55, %v9140_v54 }
  0xbc   :  { %v9396_v59 = vld [vmem:[%s15892_s1 + $0x1660] sm:$0xf]  ;;  %v10576_v61 = vld [vmem:[%s15892_s1 + $0x166c] sm:$0xf0]  ;;  %5169 = vmatpush.bf16.msrb.mxu1 %v9285_v52  ;;  %5182 = vmatpush.bf16.msrb.mxu2 %v9413_v53  ;;  %v9269_v5 = vor.u32 %v10544_v58, %v9268_v56  ;;  %v4902_v52 = vpop.f32.mrf.mxu0 }
  0xbd   :  { %v9524_v62 = vld [vmem:[%s15892_s1 + $0x1760] sm:$0xf]  ;;  %v10608_v63 = vld [vmem:[%s15892_s1 + $0x176c] sm:$0xf0]  ;;  %v9397_v6 = vor.u32 %v10576_v61, %v9396_v59  ;;  %5195 = vmatpush.bf16.msrb.mxu3 %v9541_v57  ;;  %v4915_v61 = vpop.f32.mrf.mxu1 }
  0xbe   :  { %v9124_v4 = vld [vmem:[%s15892_s1 + $0x1440] sm:$0xf]  ;;  %v10508_v7 = vld [vmem:[%s15892_s1 + $0x144c] sm:$0xf0]  ;;  %v9525_v11 = vor.u32 %v10608_v63, %v9524_v62  ;;  %v9886_v63 = vld [vmem:[%s15892_s1 + $0xe4] sm:$0xf] }
  0xbf   :  { %v9252_v8 = vld [vmem:[%s15892_s1 + $0x1540] sm:$0xf]  ;;  %v10540_v10 = vld [vmem:[%s15892_s1 + $0x154c] sm:$0xf0]  ;;  %5157 = vmatpush.bf16.msrb.mxu0 %v9141_v3  ;;  %v9125_v24 = vor.u32 %v10508_v7, %v9124_v4  ;;  %v6646_v3 = vld [vmem:[%s15892_s1 + $0xf0] sm:$0xf0] }
  0xc0   :  { %v9380_v19 = vld [vmem:[%s15892_s1 + $0x1640] sm:$0xf]  ;;  %v10572_v20 = vld [vmem:[%s15892_s1 + $0x164c] sm:$0xf0]  ;;  %5170 = vmatpush.bf16.msrb.mxu1 %v9269_v5  ;;  %5183 = vmatpush.bf16.msrb.mxu2 %v9397_v6  ;;  %v9253_v30 = vor.u32 %v10540_v10, %v9252_v8  ;;  %v11991_v4 = vld [vmem:[#allocation1 + $0x24] sm:$0xff] }
  0xc1   :  { %v825_v21 = vld [vmem:[%s15893_s2] sm:$0xf]  ;;  %v10604_v23 = vld [vmem:[%s15892_s1 + $0x174c] sm:$0xf0]  ;;  %v9381_v31 = vor.u32 %v10572_v20, %v9380_v19  ;;  %5196 = vmatpush.bf16.msrb.mxu3 %v9525_v11  ;;  %v11993_v5 = vld [vmem:[#allocation1 + $0x36] sm:$0xff] }
  0xc2   :  { %v9508_v22 = vld [vmem:[%s15892_s1 + $0x1740] sm:$0xf]  ;;  %v10504_v26 = vld [vmem:[%s15892_s1 + $0x142c] sm:$0xf0]  ;;  %v827_v35 = vperm.slane %v825_v21, 0 }
  0xc3   :  { %v9108_v25 = vld [vmem:[%s15892_s1 + $0x1420] sm:$0xf]  ;;  %v10536_v33 = vld [vmem:[%s15892_s1 + $0x152c] sm:$0xf0]  ;;  %v9509_v36 = vor.u32 %v10604_v23, %v9508_v22  ;;  %5158 = vmatpush.bf16.msrb.mxu0 %v9125_v24  ;;  %v24_v10 = vld [vmem:[%s15891_s0 + $0x18] sm:$0x1] }
  0xc4   :  { %v9236_v32 = vld [vmem:[%s15892_s1 + $0x1520] sm:$0xf]  ;;  %v10568_v38 = vld [vmem:[%s15892_s1 + $0x162c] sm:$0xf0]  ;;  %v9109_v43 = vor.u32 %v10504_v26, %v9108_v25  ;;  %5171 = vmatpush.bf16.msrb.mxu1 %v9253_v30  ;;  %5184 = vmatpush.bf16.msrb.mxu2 %v9381_v31  ;;  %v4903_v59 = vadd.f32 %v4902_v52, %v827_v35  ;;  %v9918_v19 = vld [vmem:[%s15892_s1 + $0x1e4] sm:$0xf]  ;;  %v4928_v25 = vpop.f32.mrf.mxu2 }
  0xc5   :  { %v9364_v37 = vld [vmem:[%s15892_s1 + $0x1620] sm:$0xf]  ;;  %v10600_v40 = vld [vmem:[%s15892_s1 + $0x172c] sm:$0xf0]  ;;  %v9237_v53 = vor.u32 %v10536_v33, %v9236_v32  ;;  %5197 = vmatpush.bf16.msrb.mxu3 %v9509_v36  ;;  %v6774_v20 = vld [vmem:[%s15892_s1 + $0x1f0] sm:$0xf0]  ;;  %v4941_v32 = vpop.f32.mrf.mxu3  ;;  %v6649_v33 = vor.u32 %v9886_v63, %v6646_v3 }
  0xc6   :  { %v9492_v39 = vld [vmem:[%s15892_s1 + $0x1720] sm:$0xf]  ;;  %v10500_v42 = vld [vmem:[%s15892_s1 + $0x140c] sm:$0xf0]  ;;  %v9365_v54 = vor.u32 %v10568_v38, %v9364_v37  ;;  %v4916_v8 = vadd.f32 %v4915_v61, %v4903_v59  ;;  %v9950_v23 = vld [vmem:[%s15892_s1 + $0x2e4] sm:$0xf]  ;;  %v6777_v35 = vor.u32 %v9918_v19, %v6774_v20 }
  0xc7   :  { %v9092_v41 = vld [vmem:[%s15892_s1 + $0x1400] sm:$0xf]  ;;  %v10532_v45 = vld [vmem:[%s15892_s1 + $0x150c] sm:$0xf0]  ;;  %v9493_v62 = vor.u32 %v10600_v40, %v9492_v39  ;;  %5159 = vmatpush.bf16.msrb.mxu0 %v9109_v43  ;;  %v6902_v24 = vld [vmem:[%s15892_s1 + $0x2f0] sm:$0xf0] }
  0xc8   :  { %v9220_v44 = vld [vmem:[%s15892_s1 + $0x1500] sm:$0xf]  ;;  %v10564_v51 = vld [vmem:[%s15892_s1 + $0x160c] sm:$0xf0]  ;;  %v9093_v11 = vor.u32 %v10500_v42, %v9092_v41  ;;  %5172 = vmatpush.bf16.msrb.mxu1 %v9237_v53  ;;  %5185 = vmatpush.bf16.msrb.mxu2 %v9365_v54  ;;  %v4929_v31 = vadd.f32 %v4928_v25, %v4916_v8  ;;  %v9882_v38 = vld [vmem:[%s15892_s1 + $0xc4] sm:$0xf]  ;;  %v6905_v39 = vor.u32 %v9950_v23, %v6902_v24 }
  0xc9   :  { %v9348_v50 = vld [vmem:[%s15892_s1 + $0x1600] sm:$0xf]  ;;  %v10596_v56 = vld [vmem:[%s15892_s1 + $0x170c] sm:$0xf0]  ;;  %v9221_v21 = vor.u32 %v10532_v45, %v9220_v44  ;;  %5198 = vmatpush.bf16.msrb.mxu3 %v9493_v62  ;;  %v6630_v40 = vld [vmem:[%s15892_s1 + $0xd0] sm:$0xf0]  ;;  %v4904_v44 = vpop.f32.mrf.mxu0 }
  0xca   :  { %v9476_v55 = vld [vmem:[%s15892_s1 + $0x1700] sm:$0xf]  ;;  %v10656_v58 = vld [vmem:[%s15892_s1 + $0x18ec] sm:$0xf0]  ;;  %v9349_v22 = vor.u32 %v10564_v51, %v9348_v50  ;;  %v9914_v41 = vld [vmem:[%s15892_s1 + $0x1c4] sm:$0xf]  ;;  %v4942_v43 = vadd.f32 %v4941_v32, %v4929_v31  ;;  %v4917_v51 = vpop.f32.mrf.mxu1  ;;  %v6633_v53 = vor.u32 %v9882_v38, %v6630_v40 }
  0xcb   :  { %v9716_v57 = vld [vmem:[%s15892_s1 + $0x18e0] sm:$0xf]  ;;  %v11995_v6 = vld [vmem:[#allocation1 + $0x2d] sm:$0xff]  ;;  %v9477_v26 = vor.u32 %v10596_v56, %v9476_v55  ;;  %5160 = vmatpush.bf16.msrb.mxu0 %v9093_v11  ;;  %v9946_v45 = vld [vmem:[%s15892_s1 + $0x2c4] sm:$0xf] }
  0xcc   :  { %v11997_v7 = vld [vmem:[#allocation1 + $0x3f] sm:$0xff]  ;;  %v9717_v30 = vor.u32 %v10656_v58, %v9716_v57  ;;  %v10652_v37 = vld [vmem:[%s15892_s1 + $0x18cc] sm:$0xf0]  ;;  %v6758_v42 = vld [vmem:[%s15892_s1 + $0x1d0] sm:$0xf0]  ;;  %5173 = vmatpush.bf16.msrb.mxu1 %v9221_v21  ;;  %5186 = vmatpush.bf16.msrb.mxu2 %v9349_v22  ;;  %v4930_v8 = vpop.f32.mrf.mxu2 }
  0xcd   :  { %866 = vst [vmem:[#allocation1] ss:$9 sm:$0xff] %v24_v10  ;;  %v9700_v36 = vld [vmem:[%s15892_s1 + $0x18c0] sm:$0xf]  ;;  %v6886_v50 = vld [vmem:[%s15892_s1 + $0x2d0] sm:$0xf0]  ;;  %5199 = vmatpush.bf16.msrb.mxu3 %v9477_v26  ;;  %v6761_v54 = vor.u32 %v9914_v41, %v6758_v42  ;;  %v4943_v11 = vpop.f32.mrf.mxu3 }
  0xce   :  { %v9701_v52 = vor.u32 %v10652_v37, %v9700_v36  ;;  %v9684_v55 = vld [vmem:[%s15892_s1 + $0x18a0] sm:$0xf]  ;;  %v10648_v56 = vld [vmem:[%s15892_s1 + $0x18ac] sm:$0xf0]  ;;  %v9878_v57 = vld [vmem:[%s15892_s1 + $0xa4] sm:$0xf]  ;;  %5161 = vmatmul.bf16.vlgmr.msrb.gmra.mxu0 %v11991_v4  ;;  %v6889_v58 = vor.u32 %v9946_v45, %v6886_v50 }
  0xcf   :  { %5205 = vmatpush.bf16.msra.mxu0 %v9717_v30  ;;  %v6614_v59 = vld [vmem:[%s15892_s1 + $0xb0] sm:$0xf0]  ;;  %v9910_v61 = vld [vmem:[%s15892_s1 + $0x1a4] sm:$0xf]  ;;  %5187 = vmatmul.bf16.vlgmr.msrb.gmra.mxu2 %v11993_v5  ;;  %v9685_v10 = vor.u32 %v10648_v56, %v9684_v55  ;;  %v9668_v21 = vld [vmem:[%s15892_s1 + $0x1880] sm:$0xf] }
  0xd0   :  { %5218 = vmatpush.bf16.msra.mxu1 %v6649_v33  ;;  %5231 = vmatpush.bf16.msra.mxu2 %v6777_v35  ;;  %v6742_v62 = vld [vmem:[%s15892_s1 + $0x1b0] sm:$0xf0]  ;;  %v9942_v63 = vld [vmem:[%s15892_s1 + $0x2a4] sm:$0xf]  ;;  %v6617_v19 = vor.u32 %v9878_v57, %v6614_v59  ;;  %v10644_v22 = vld [vmem:[%s15892_s1 + $0x188c] sm:$0xf0] }
  0xd1   :  { %5244 = vmatpush.bf16.msra.mxu3 %v6905_v39  ;;  %5174 = vmatmul.bf16.vlgmr.msrb.gmra.mxu1 %v11995_v6  ;;  %v6870_v3 = vld [vmem:[%s15892_s1 + $0x2b0] sm:$0xf0]  ;;  %v6745_v20 = vor.u32 %v9910_v61, %v6742_v62  ;;  %v9874_v23 = vld [vmem:[%s15892_s1 + $0x84] sm:$0xf]  ;;  %v9669_v33 = vor.u32 %v10644_v22, %v9668_v21  ;;  %v4954_v35 = vpop.f32.mrf.mxu0  ;;  %v9652_v38 = vld [vmem:[%s15892_s1 + $0x1860] sm:$0xf] }
  0xd2   :  { %5200 = vmatmul.bf16.vlgmr.msrb.gmra.mxu3 %v11997_v7  ;;  %v6873_v24 = vor.u32 %v9942_v63, %v6870_v3  ;;  %v6598_v25 = vld [vmem:[%s15892_s1 + $0x90] sm:$0xf0]  ;;  %v9906_v26 = vld [vmem:[%s15892_s1 + $0x184] sm:$0xf]  ;;  %v10640_v39 = vld [vmem:[%s15892_s1 + $0x186c] sm:$0xf0]  ;;  %v4955_v41 = vadd.f32 %v4954_v35, %v4942_v43  ;;  %v4967_v42 = vpop.f32.mrf.mxu1 }
  0xd3   :  { %5206 = vmatpush.bf16.msra.mxu0 %v9701_v52  ;;  %v6726_v30 = vld [vmem:[%s15892_s1 + $0x190] sm:$0xf0]  ;;  %v9938_v31 = vld [vmem:[%s15892_s1 + $0x284] sm:$0xf]  ;;  %v6601_v36 = vor.u32 %v9874_v23, %v6598_v25  ;;  %v9636_v57 = vld [vmem:[%s15892_s1 + $0x1840] sm:$0xf] }
  0xd4   :  { %5219 = vmatpush.bf16.msra.mxu1 %v6633_v53  ;;  %5232 = vmatpush.bf16.msra.mxu2 %v6761_v54  ;;  %v6854_v32 = vld [vmem:[%s15892_s1 + $0x290] sm:$0xf0]  ;;  %v6729_v37 = vor.u32 %v9906_v26, %v6726_v30  ;;  %v9870_v40 = vld [vmem:[%s15892_s1 + $0x64] sm:$0xf]  ;;  %v4968_v53 = vadd.f32 %v4967_v42, %v4955_v41  ;;  %v9653_v54 = vor.u32 %v10640_v39, %v9652_v38  ;;  %v4980_v61 = vpop.f32.mrf.mxu2  ;;  %v9620_v26 = vld [vmem:[%s15892_s1 + $0x1820] sm:$0xf] }
  0xd5   :  { %5245 = vmatpush.bf16.msra.mxu3 %v6889_v58  ;;  %v6857_v44 = vor.u32 %v9938_v31, %v6854_v32  ;;  %v6582_v45 = vld [vmem:[%s15892_s1 + $0x70] sm:$0xf0]  ;;  %v9902_v50 = vld [vmem:[%s15892_s1 + $0x164] sm:$0xf]  ;;  %v10636_v58 = vld [vmem:[%s15892_s1 + $0x184c] sm:$0xf0]  ;;  %v4993_v11 = vpop.f32.mrf.mxu3 }
  0xd6   :  { %v6710_v51 = vld [vmem:[%s15892_s1 + $0x170] sm:$0xf0]  ;;  %v9934_v52 = vld [vmem:[%s15892_s1 + $0x264] sm:$0xf]  ;;  %v6585_v55 = vor.u32 %v9870_v40, %v6582_v45  ;;  %v9637_v21 = vor.u32 %v10636_v58, %v9636_v57  ;;  %v10632_v30 = vld [vmem:[%s15892_s1 + $0x182c] sm:$0xf0] }
  0xd7   :  { %5207 = vmatpush.bf16.msra.mxu0 %v9685_v10  ;;  %v6838_v43 = vld [vmem:[%s15892_s1 + $0x270] sm:$0xf0]  ;;  %v6713_v56 = vor.u32 %v9902_v50, %v6710_v51  ;;  %v9866_v59 = vld [vmem:[%s15892_s1 + $0x44] sm:$0xf]  ;;  %v4981_v10 = vadd.f32 %v4980_v61, %v4968_v53  ;;  %v9621_v40 = vor.u32 %v10632_v30, %v9620_v26  ;;  %v9604_v41 = vld [vmem:[%s15892_s1 + $0x1800] sm:$0xf] }
  0xd8   :  { %5220 = vmatpush.bf16.msra.mxu1 %v6617_v19  ;;  %5233 = vmatpush.bf16.msra.mxu2 %v6745_v20  ;;  %v6841_v62 = vor.u32 %v9934_v52, %v6838_v43  ;;  %v6566_v63 = vld [vmem:[%s15892_s1 + $0x50] sm:$0xf0]  ;;  %v9898_v3 = vld [vmem:[%s15892_s1 + $0x144] sm:$0xf]  ;;  %v10628_v42 = vld [vmem:[%s15892_s1 + $0x180c] sm:$0xf0] }
  0xd9   :  { %5246 = vmatpush.bf16.msra.mxu3 %v6873_v24  ;;  %v6694_v8 = vld [vmem:[%s15892_s1 + $0x150] sm:$0xf0]  ;;  %v9930_v19 = vld [vmem:[%s15892_s1 + $0x244] sm:$0xf]  ;;  %v12138_v22 = vadd.f32 %v4993_v11, %v4981_v10  ;;  %v4956_v23 = vpop.f32.mrf.mxu0  ;;  %v6569_v24 = vor.u32 %v9866_v59, %v6566_v63 }
  0xda   :  { %v6822_v20 = vld [vmem:[%s15892_s1 + $0x250] sm:$0xf0]  ;;  %v6697_v25 = vor.u32 %v9898_v3, %v6694_v8  ;;  %v9862_v31 = vld [vmem:[%s15892_s1 + $0x24] sm:$0xf]  ;;  %v4969_v32 = vpop.f32.mrf.mxu1 }
  0xdb   :  { %5208 = vmatpush.bf16.msra.mxu0 %v9669_v33  ;;  %v6825_v33 = vor.u32 %v9930_v19, %v6822_v20  ;;  %v6550_v35 = vld [vmem:[%s15892_s1 + $0x30] sm:$0xf0]  ;;  %v9926_v38 = vld [vmem:[%s15892_s1 + $0x224] sm:$0xf] }
  0xdc   :  { %5221 = vmatpush.bf16.msra.mxu1 %v6601_v36  ;;  %5234 = vmatpush.bf16.msra.mxu2 %v6729_v37  ;;  %v9894_v36 = vld [vmem:[%s15892_s1 + $0x124] sm:$0xf]  ;;  %v6678_v37 = vld [vmem:[%s15892_s1 + $0x130] sm:$0xf0]  ;;  %v4982_v43 = vpop.f32.mrf.mxu2 }
  0xdd   :  { %5247 = vmatpush.bf16.msra.mxu3 %v6857_v44  ;;  %v6806_v39 = vld [vmem:[%s15892_s1 + $0x230] sm:$0xf0]  ;;  %v6553_v44 = vor.u32 %v9862_v31, %v6550_v35  ;;  %v6681_v45 = vor.u32 %v9894_v36, %v6678_v37  ;;  %v9858_v50 = vld [vmem:[%s15892_s1 + $0x4] sm:$0xf]  ;;  %v4995_v57 = vpop.f32.mrf.mxu3 }
  0xde   :  { %v6534_v51 = vld [vmem:[%s15892_s1 + $0x10] sm:$0xf0]  ;;  %v9890_v52 = vld [vmem:[%s15892_s1 + $0x104] sm:$0xf]  ;;  %v6809_v53 = vor.u32 %v9926_v38, %v6806_v39 }
  0xdf   :  { %5209 = vmatpush.bf16.msra.mxu0 %v9653_v54  ;;  %v6662_v54 = vld [vmem:[%s15892_s1 + $0x110] sm:$0xf0]  ;;  %v9982_v58 = vld [vmem:[%s15892_s1 + $0x3e4] sm:$0xf]  ;;  %v6537_v10 = vor.u32 %v9858_v50, %v6534_v51 }
  0xe0   :  { %5222 = vmatpush.bf16.msra.mxu1 %v6585_v55  ;;  %5235 = vmatpush.bf16.msra.mxu2 %v6713_v56  ;;  %v9922_v55 = vld [vmem:[%s15892_s1 + $0x204] sm:$0xf]  ;;  %v6790_v56 = vld [vmem:[%s15892_s1 + $0x210] sm:$0xf0]  ;;  %v6665_v11 = vor.u32 %v9890_v52, %v6662_v54 }
  0xe1   :  { %5248 = vmatpush.bf16.msra.mxu3 %v6841_v62  ;;  %v7030_v59 = vld [vmem:[%s15892_s1 + $0x3f0] sm:$0xf0]  ;;  %v10014_v61 = vld [vmem:[%s15892_s1 + $0x4e4] sm:$0xf]  ;;  %v9605_v62 = vor.u32 %v10628_v42, %v9604_v41 }
  0xe2   :  { %v7158_v63 = vld [vmem:[%s15892_s1 + $0x4f0] sm:$0xf0]  ;;  %v10046_v3 = vld [vmem:[%s15892_s1 + $0x5e4] sm:$0xf]  ;;  %v7033_v23 = vor.u32 %v9982_v58, %v7030_v59 }
  0xe3   :  { %5210 = vmatpush.bf16.msra.mxu0 %v9637_v21  ;;  %v7286_v8 = vld [vmem:[%s15892_s1 + $0x5f0] sm:$0xf0]  ;;  %v10078_v19 = vld [vmem:[%s15892_s1 + $0x6e4] sm:$0xf]  ;;  %v6793_v21 = vor.u32 %v9922_v55, %v6790_v56 }
  0xe4   :  { %5223 = vmatpush.bf16.msra.mxu1 %v6569_v24  ;;  %5236 = vmatpush.bf16.msra.mxu2 %v6697_v25  ;;  %v7414_v20 = vld [vmem:[%s15892_s1 + $0x6f0] sm:$0xf0]  ;;  %v7161_v24 = vor.u32 %v10014_v61, %v7158_v63  ;;  %v7289_v25 = vor.u32 %v10046_v3, %v7286_v8  ;;  %v9978_v26 = vld [vmem:[%s15892_s1 + $0x3c4] sm:$0xf] }
  0xe5   :  { %5249 = vmatpush.bf16.msra.mxu3 %v6825_v33  ;;  %v7014_v30 = vld [vmem:[%s15892_s1 + $0x3d0] sm:$0xf0]  ;;  %v10010_v31 = vld [vmem:[%s15892_s1 + $0x4c4] sm:$0xf]  ;;  %v7417_v32 = vor.u32 %v10078_v19, %v7414_v20 }
  0xe6   :  { %v7142_v33 = vld [vmem:[%s15892_s1 + $0x4d0] sm:$0xf0]  ;;  %v10042_v35 = vld [vmem:[%s15892_s1 + $0x5c4] sm:$0xf] }
  0xe7   :  { %5211 = vmatpush.bf16.msra.mxu0 %v9621_v40  ;;  %v7270_v36 = vld [vmem:[%s15892_s1 + $0x5d0] sm:$0xf0]  ;;  %v867_v37 = vld [vmem:[#allocation1] sm:$0xff]  ;;  %v7017_v40 = vor.u32 %v9978_v26, %v7014_v30  ;;  %v7145_v41 = vor.u32 %v10010_v31, %v7142_v33 }
  0xe8   :  { %5224 = vmatpush.bf16.msra.mxu1 %v6553_v44  ;;  %5237 = vmatpush.bf16.msra.mxu2 %v6681_v45  ;;  %v10074_v38 = vld [vmem:[%s15892_s1 + $0x6c4] sm:$0xf]  ;;  %v7398_v39 = vld [vmem:[%s15892_s1 + $0x6d0] sm:$0xf0]  ;;  %v7273_v42 = vor.u32 %v10042_v35, %v7270_v36 }
  0xe9   :  { %5250 = vmatpush.bf16.msra.mxu3 %v6809_v53  ;;  %v9974_v44 = vld [vmem:[%s15892_s1 + $0x3a4] sm:$0xf]  ;;  %v6998_v45 = vld [vmem:[%s15892_s1 + $0x3b0] sm:$0xf0]  ;;  %v7401_v51 = vor.u32 %v10074_v38, %v7398_v39 }
  0xea   :  { %v10006_v50 = vld [vmem:[%s15892_s1 + $0x4a4] sm:$0xf]  ;;  %v7126_v52 = vld [vmem:[%s15892_s1 + $0x4b0] sm:$0xf0]  ;;  %v7001_v56 = vor.u32 %v9974_v44, %v6998_v45 }
  0xeb   :  { %5212 = vmatpush.bf16.msra.mxu0 %v9605_v62  ;;  %v10038_v43 = vld [vmem:[%s15892_s1 + $0x5a4] sm:$0xf]  ;;  %v7254_v53 = vld [vmem:[%s15892_s1 + $0x5b0] sm:$0xf0]  ;;  %v7129_v57 = vor.u32 %v10006_v50, %v7126_v52 }
  0xec   :  { %5225 = vmatpush.bf16.msra.mxu1 %v6537_v10  ;;  %5238 = vmatpush.bf16.msra.mxu2 %v6665_v11  ;;  %v10070_v54 = vld [vmem:[%s15892_s1 + $0x6a4] sm:$0xf]  ;;  %v7382_v55 = vld [vmem:[%s15892_s1 + $0x6b0] sm:$0xf0]  ;;  %v7257_v58 = vor.u32 %v10038_v43, %v7254_v53  ;;  %v5006_v11 = vpop.f32.mrf.mxu0 }
  0xed   :  { %5251 = vmatpush.bf16.msra.mxu3 %v6793_v21  ;;  %v9970_v59 = vld [vmem:[%s15892_s1 + $0x384] sm:$0xf]  ;;  %v6982_v61 = vld [vmem:[%s15892_s1 + $0x390] sm:$0xf0]  ;;  %v7385_v63 = vor.u32 %v10070_v54, %v7382_v55  ;;  %v5007_v21 = vadd.f32 %v5006_v11, %v12138_v22 }
  0xee   :  { %5213 = vmatmul.bf16.vlgmr.msra.gmra.mxu0 %v867_v37  ;;  %v10002_v62 = vld [vmem:[%s15892_s1 + $0x484] sm:$0xf]  ;;  %v7110_v3 = vld [vmem:[%s15892_s1 + $0x490] sm:$0xf0] }
  0xef   :  { %5257 = vmatpush.bf16.msrb.mxu0 %v7033_v23  ;;  %5239 = vmatmul.bf16.vlgmr.msra.gmra.mxu2 %v11085_v34  ;;  %v10034_v8 = vld [vmem:[%s15892_s1 + $0x584] sm:$0xf]  ;;  %v7238_v10 = vld [vmem:[%s15892_s1 + $0x590] sm:$0xf0]  ;;  %v6985_v23 = vor.u32 %v9970_v59, %v6982_v61  ;;  %v5032_v52 = vpop.f32.mrf.mxu2 }
  0xf0   :  { %5270 = vmatpush.bf16.msrb.mxu1 %v7161_v24  ;;  %5283 = vmatpush.bf16.msrb.mxu2 %v7289_v25  ;;  %v10066_v19 = vld [vmem:[%s15892_s1 + $0x684] sm:$0xf]  ;;  %v7366_v20 = vld [vmem:[%s15892_s1 + $0x690] sm:$0xf0]  ;;  %v5019_v24 = vpop.f32.mrf.mxu1  ;;  %v7113_v25 = vor.u32 %v10002_v62, %v7110_v3  ;;  %v7241_v26 = vor.u32 %v10034_v8, %v7238_v10 }
  0xf1   :  { %5296 = vmatpush.bf16.msrb.mxu3 %v7417_v32  ;;  %5226 = vmatmul.bf16.vlgmr.msra.gmra.mxu1 %v11075_v28  ;;  %v9966_v30 = vld [vmem:[%s15892_s1 + $0x364] sm:$0xf]  ;;  %v6966_v31 = vld [vmem:[%s15892_s1 + $0x370] sm:$0xf0]  ;;  %v7369_v22 = vor.u32 %v10066_v19, %v7366_v20  ;;  %v5020_v33 = vadd.f32 %v5019_v24, %v5007_v21 }
  0xf2   :  { %5252 = vmatmul.bf16.vlgmr.msra.gmra.mxu3 %v11073_v27  ;;  %v9998_v32 = vld [vmem:[%s15892_s1 + $0x464] sm:$0xf]  ;;  %v7094_v35 = vld [vmem:[%s15892_s1 + $0x470] sm:$0xf0] }
  0xf3   :  { %5258 = vmatpush.bf16.msrb.mxu0 %v7017_v40  ;;  %v10030_v36 = vld [vmem:[%s15892_s1 + $0x564] sm:$0xf]  ;;  %v7222_v37 = vld [vmem:[%s15892_s1 + $0x570] sm:$0xf0]  ;;  %v6969_v40 = vor.u32 %v9966_v30, %v6966_v31  ;;  %v5033_v55 = vadd.f32 %v5032_v52, %v5020_v33 }
  0xf4   :  { %5271 = vmatpush.bf16.msrb.mxu1 %v7145_v41  ;;  %5284 = vmatpush.bf16.msrb.mxu2 %v7273_v42  ;;  %v10062_v38 = vld [vmem:[%s15892_s1 + $0x664] sm:$0xf]  ;;  %v7350_v39 = vld [vmem:[%s15892_s1 + $0x670] sm:$0xf0]  ;;  %v7097_v41 = vor.u32 %v9998_v32, %v7094_v35  ;;  %v7225_v42 = vor.u32 %v10030_v36, %v7222_v37  ;;  %v5008_v59 = vpop.f32.mrf.mxu0 }
  0xf5   :  { %5297 = vmatpush.bf16.msrb.mxu3 %v7401_v51  ;;  %v9962_v44 = vld [vmem:[%s15892_s1 + $0x344] sm:$0xf]  ;;  %v6950_v45 = vld [vmem:[%s15892_s1 + $0x350] sm:$0xf0]  ;;  %v7353_v51 = vor.u32 %v10062_v38, %v7350_v39 }
  0xf6   :  { %v9994_v50 = vld [vmem:[%s15892_s1 + $0x444] sm:$0xf]  ;;  %v7078_v43 = vld [vmem:[%s15892_s1 + $0x450] sm:$0xf0]  ;;  %v6953_v61 = vor.u32 %v9962_v44, %v6950_v45 }
  0xf7   :  { %5259 = vmatpush.bf16.msrb.mxu0 %v7001_v56  ;;  %v10026_v53 = vld [vmem:[%s15892_s1 + $0x544] sm:$0xf]  ;;  %v7206_v54 = vld [vmem:[%s15892_s1 + $0x550] sm:$0xf0]  ;;  %v5045_v56 = vpop.f32.mrf.mxu3  ;;  %v7081_v3 = vor.u32 %v9994_v50, %v7078_v43 }
  0xf8   :  { %5272 = vmatpush.bf16.msrb.mxu1 %v7129_v57  ;;  %5285 = vmatpush.bf16.msrb.mxu2 %v7257_v58  ;;  %v10058_v57 = vld [vmem:[%s15892_s1 + $0x644] sm:$0xf]  ;;  %v7334_v58 = vld [vmem:[%s15892_s1 + $0x650] sm:$0xf0]  ;;  %v5021_v62 = vpop.f32.mrf.mxu1  ;;  %v7209_v8 = vor.u32 %v10026_v53, %v7206_v54 }
  0xf9   :  { %5298 = vmatpush.bf16.msrb.mxu3 %v7385_v63  ;;  %v12336_v63 = vadd.f32 %v5045_v56, %v5033_v55  ;;  %v9958_v10 = vld [vmem:[%s15892_s1 + $0x324] sm:$0xf]  ;;  %v6934_v11 = vld [vmem:[%s15892_s1 + $0x330] sm:$0xf0]  ;;  %v7337_v20 = vor.u32 %v10058_v57, %v7334_v58 }
  0xfa   :  { %v9990_v19 = vld [vmem:[%s15892_s1 + $0x424] sm:$0xf]  ;;  %v7062_v21 = vld [vmem:[%s15892_s1 + $0x430] sm:$0xf0]  ;;  %v6937_v30 = vor.u32 %v9958_v10, %v6934_v11 }
  0xfb   :  { %5260 = vmatpush.bf16.msrb.mxu0 %v6985_v23  ;;  %v10022_v23 = vld [vmem:[%s15892_s1 + $0x524] sm:$0xf]  ;;  %v7190_v24 = vld [vmem:[%s15892_s1 + $0x530] sm:$0xf0] }
  0xfc   :  { %5273 = vmatpush.bf16.msrb.mxu1 %v7113_v25  ;;  %5286 = vmatpush.bf16.msrb.mxu2 %v7241_v26  ;;  %v10054_v25 = vld [vmem:[%s15892_s1 + $0x624] sm:$0xf]  ;;  %v7318_v26 = vld [vmem:[%s15892_s1 + $0x630] sm:$0xf0]  ;;  %v7193_v33 = vor.u32 %v10022_v23, %v7190_v24 }
  0xfd   :  { %5299 = vmatpush.bf16.msrb.mxu3 %v7369_v22  ;;  %v9954_v31 = vld [vmem:[%s15892_s1 + $0x304] sm:$0xf]  ;;  %v6918_v32 = vld [vmem:[%s15892_s1 + $0x310] sm:$0xf0]  ;;  %v7065_v22 = vor.u32 %v9990_v19, %v7062_v21  ;;  %v7321_v38 = vor.u32 %v10054_v25, %v7318_v26 }
  0xfe   :  { %v9986_v35 = vld [vmem:[%s15892_s1 + $0x404] sm:$0xf]  ;;  %v7046_v36 = vld [vmem:[%s15892_s1 + $0x410] sm:$0xf0]  ;;  %v6921_v52 = vor.u32 %v9954_v31, %v6918_v32 }
  0xff   :  { %5261 = vmatpush.bf16.msrb.mxu0 %v6969_v40  ;;  %v10018_v37 = vld [vmem:[%s15892_s1 + $0x504] sm:$0xf]  ;;  %v7174_v39 = vld [vmem:[%s15892_s1 + $0x510] sm:$0xf0]  ;;  %v7049_v55 = vor.u32 %v9986_v35, %v7046_v36 }
 0x100   :  { %5274 = vmatpush.bf16.msrb.mxu1 %v7097_v41  ;;  %5287 = vmatpush.bf16.msrb.mxu2 %v7225_v42  ;;  %v10050_v40 = vld [vmem:[%s15892_s1 + $0x604] sm:$0xf]  ;;  %v7302_v41 = vld [vmem:[%s15892_s1 + $0x610] sm:$0xf0]  ;;  %v5034_v42 = vpop.f32.mrf.mxu2  ;;  %v7177_v56 = vor.u32 %v10018_v37, %v7174_v39 }
 0x101   :  { %5300 = vmatpush.bf16.msrb.mxu3 %v7353_v51  ;;  %v10110_v44 = vld [vmem:[%s15892_s1 + $0x7e4] sm:$0xf]  ;;  %v7542_v45 = vld [vmem:[%s15892_s1 + $0x7f0] sm:$0xf0]  ;;  %v5047_v51 = vpop.f32.mrf.mxu3  ;;  %v7305_v59 = vor.u32 %v10050_v40, %v7302_v41 }
 0x102   :  { %v10142_v50 = vld [vmem:[%s15892_s1 + $0x8e4] sm:$0xf]  ;;  %v7670_v43 = vld [vmem:[%s15892_s1 + $0x8f0] sm:$0xf0] }
 0x103   :  { %5262 = vmatpush.bf16.msrb.mxu0 %v6953_v61  ;;  %v10174_v53 = vld [vmem:[%s15892_s1 + $0x9e4] sm:$0xf]  ;;  %v7798_v54 = vld [vmem:[%s15892_s1 + $0x9f0] sm:$0xf0]  ;;  %v7545_v61 = vor.u32 %v10110_v44, %v7542_v45  ;;  %v7673_v62 = vor.u32 %v10142_v50, %v7670_v43 }
 0x104   :  { %5275 = vmatpush.bf16.msrb.mxu1 %v7081_v3  ;;  %5288 = vmatpush.bf16.msrb.mxu2 %v7209_v8  ;;  %v10206_v57 = vld [vmem:[%s15892_s1 + $0xae4] sm:$0xf]  ;;  %v7926_v58 = vld [vmem:[%s15892_s1 + $0xaf0] sm:$0xf0]  ;;  %v7801_v3 = vor.u32 %v10174_v53, %v7798_v54 }
 0x105   :  { %5301 = vmatpush.bf16.msrb.mxu3 %v7337_v20  ;;  %v10106_v8 = vld [vmem:[%s15892_s1 + $0x7c4] sm:$0xf]  ;;  %v7526_v10 = vld [vmem:[%s15892_s1 + $0x7d0] sm:$0xf0]  ;;  %v7929_v19 = vor.u32 %v10206_v57, %v7926_v58 }
 0x106   :  { %v10138_v11 = vld [vmem:[%s15892_s1 + $0x8c4] sm:$0xf]  ;;  %v7654_v20 = vld [vmem:[%s15892_s1 + $0x8d0] sm:$0xf0]  ;;  %v7529_v26 = vor.u32 %v10106_v8, %v7526_v10 }
 0x107   :  { %5263 = vmatpush.bf16.msrb.mxu0 %v6937_v30  ;;  %v10170_v21 = vld [vmem:[%s15892_s1 + $0x9c4] sm:$0xf]  ;;  %v7782_v23 = vld [vmem:[%s15892_s1 + $0x9d0] sm:$0xf0]  ;;  %v7657_v30 = vor.u32 %v10138_v11, %v7654_v20 }
 0x108   :  { %5276 = vmatpush.bf16.msrb.mxu1 %v7065_v22  ;;  %5289 = vmatpush.bf16.msrb.mxu2 %v7193_v33  ;;  %v10202_v24 = vld [vmem:[%s15892_s1 + $0xac4] sm:$0xf]  ;;  %v7910_v25 = vld [vmem:[%s15892_s1 + $0xad0] sm:$0xf0]  ;;  %v7785_v31 = vor.u32 %v10170_v21, %v7782_v23 }
 0x109   :  { %5302 = vmatpush.bf16.msrb.mxu3 %v7321_v38  ;;  %v10102_v32 = vld [vmem:[%s15892_s1 + $0x7a4] sm:$0xf]  ;;  %v7510_v22 = vld [vmem:[%s15892_s1 + $0x7b0] sm:$0xf0]  ;;  %v7913_v35 = vor.u32 %v10202_v24, %v7910_v25 }
 0x10a   :  { %v10134_v33 = vld [vmem:[%s15892_s1 + $0x8a4] sm:$0xf]  ;;  %v7638_v36 = vld [vmem:[%s15892_s1 + $0x8b0] sm:$0xf0]  ;;  %v7513_v41 = vor.u32 %v10102_v32, %v7510_v22 }
 0x10b   :  { %5264 = vmatpush.bf16.msrb.mxu0 %v6921_v52  ;;  %v10166_v37 = vld [vmem:[%s15892_s1 + $0x9a4] sm:$0xf]  ;;  %v7766_v38 = vld [vmem:[%s15892_s1 + $0x9b0] sm:$0xf0]  ;;  %v7641_v42 = vor.u32 %v10134_v33, %v7638_v36 }
 0x10c   :  { %5277 = vmatpush.bf16.msrb.mxu1 %v7049_v55  ;;  %5290 = vmatpush.bf16.msrb.mxu2 %v7177_v56  ;;  %v10198_v39 = vld [vmem:[%s15892_s1 + $0xaa4] sm:$0xf]  ;;  %v7894_v40 = vld [vmem:[%s15892_s1 + $0xab0] sm:$0xf0]  ;;  %v7769_v44 = vor.u32 %v10166_v37, %v7766_v38  ;;  %v5058_v55 = vpop.f32.mrf.mxu0 }
 0x10d   :  { %5303 = vmatpush.bf16.msrb.mxu3 %v7305_v59  ;;  %v10098_v45 = vld [vmem:[%s15892_s1 + $0x784] sm:$0xf]  ;;  %v7494_v50 = vld [vmem:[%s15892_s1 + $0x790] sm:$0xf0]  ;;  %v7897_v52 = vor.u32 %v10198_v39, %v7894_v40  ;;  %v5059_v58 = vadd.f32 %v5058_v55, %v12336_v63 }
 0x10e   :  { %5265 = vmatmul.bf16.vlgmr.msrb.gmra.mxu0 %v11077_v29  ;;  %v10130_v51 = vld [vmem:[%s15892_s1 + $0x884] sm:$0xf]  ;;  %v7622_v43 = vld [vmem:[%s15892_s1 + $0x890] sm:$0xf0]  ;;  %v7497_v59 = vor.u32 %v10098_v45, %v7494_v50 }
 0x10f   :  { %5309 = vmatpush.bf16.msra.mxu0 %v7545_v61  ;;  %5291 = vmatmul.bf16.vlgmr.msrb.gmra.mxu2 %v11157_v2  ;;  %v10162_v53 = vld [vmem:[%s15892_s1 + $0x984] sm:$0xf]  ;;  %v7750_v54 = vld [vmem:[%s15892_s1 + $0x990] sm:$0xf0]  ;;  %v5071_v61 = vpop.f32.mrf.mxu1 }
 0x110   :  { %5322 = vmatpush.bf16.msra.mxu1 %v7673_v62  ;;  %5335 = vmatpush.bf16.msra.mxu2 %v7801_v3  ;;  %v10194_v56 = vld [vmem:[%s15892_s1 + $0xa84] sm:$0xf]  ;;  %v7878_v57 = vld [vmem:[%s15892_s1 + $0xa90] sm:$0xf0]  ;;  %v7625_v62 = vor.u32 %v10130_v51, %v7622_v43  ;;  %v7753_v3 = vor.u32 %v10162_v53, %v7750_v54 }
 0x111   :  { %5348 = vmatpush.bf16.msra.mxu3 %v7929_v19  ;;  %5278 = vmatmul.bf16.vlgmr.msrb.gmra.mxu1 %v11153_v0  ;;  %v10094_v8 = vld [vmem:[%s15892_s1 + $0x764] sm:$0xf]  ;;  %v7478_v10 = vld [vmem:[%s15892_s1 + $0x770] sm:$0xf0]  ;;  %v7881_v63 = vor.u32 %v10194_v56, %v7878_v57  ;;  %v5072_v19 = vadd.f32 %v5071_v61, %v5059_v58 }
 0x112   :  { %5304 = vmatmul.bf16.vlgmr.msrb.gmra.mxu3 %v11148_v60  ;;  %v10126_v11 = vld [vmem:[%s15892_s1 + $0x864] sm:$0xf]  ;;  %v7606_v20 = vld [vmem:[%s15892_s1 + $0x870] sm:$0xf0] }
 0x113   :  { %5310 = vmatpush.bf16.msra.mxu0 %v7529_v26  ;;  %v10158_v21 = vld [vmem:[%s15892_s1 + $0x964] sm:$0xf]  ;;  %v7734_v23 = vld [vmem:[%s15892_s1 + $0x970] sm:$0xf0]  ;;  %v7481_v26 = vor.u32 %v10094_v8, %v7478_v10 }
 0x114   :  { %5323 = vmatpush.bf16.msra.mxu1 %v7657_v30  ;;  %5336 = vmatpush.bf16.msra.mxu2 %v7785_v31  ;;  %v10190_v24 = vld [vmem:[%s15892_s1 + $0xa64] sm:$0xf]  ;;  %v7862_v25 = vld [vmem:[%s15892_s1 + $0xa70] sm:$0xf0]  ;;  %v7609_v30 = vor.u32 %v10126_v11, %v7606_v20  ;;  %v7737_v31 = vor.u32 %v10158_v21, %v7734_v23  ;;  %v5084_v36 = vpop.f32.mrf.mxu2  ;;  %v5060_v45 = vpop.f32.mrf.mxu0 }
 0x115   :  { %5349 = vmatpush.bf16.msra.mxu3 %v7913_v35  ;;  %v10090_v32 = vld [vmem:[%s15892_s1 + $0x744] sm:$0xf]  ;;  %v7462_v22 = vld [vmem:[%s15892_s1 + $0x750] sm:$0xf0]  ;;  %v7865_v35 = vor.u32 %v10190_v24, %v7862_v25  ;;  %v5085_v40 = vadd.f32 %v5084_v36, %v5072_v19 }
 0x116   :  { %v10122_v33 = vld [vmem:[%s15892_s1 + $0x844] sm:$0xf]  ;;  %v7590_v37 = vld [vmem:[%s15892_s1 + $0x850] sm:$0xf0]  ;;  %v7465_v50 = vor.u32 %v10090_v32, %v7462_v22 }
 0x117   :  { %5311 = vmatpush.bf16.msra.mxu0 %v7513_v41  ;;  %v10154_v38 = vld [vmem:[%s15892_s1 + $0x944] sm:$0xf]  ;;  %v7718_v39 = vld [vmem:[%s15892_s1 + $0x950] sm:$0xf0]  ;;  %v5097_v41 = vpop.f32.mrf.mxu3  ;;  %v5073_v51 = vpop.f32.mrf.mxu1  ;;  %v7593_v43 = vor.u32 %v10122_v33, %v7590_v37 }
 0x118   :  { %5324 = vmatpush.bf16.msra.mxu1 %v7641_v42  ;;  %5337 = vmatpush.bf16.msra.mxu2 %v7769_v44  ;;  %v10186_v42 = vld [vmem:[%s15892_s1 + $0xa44] sm:$0xf]  ;;  %v7846_v44 = vld [vmem:[%s15892_s1 + $0xa50] sm:$0xf0]  ;;  %v7721_v53 = vor.u32 %v10154_v38, %v7718_v39 }
 0x119   :  { %5350 = vmatpush.bf16.msra.mxu3 %v7897_v52  ;;  %v12535_v52 = vadd.f32 %v5097_v41, %v5085_v40  ;;  %v10086_v54 = vld [vmem:[%s15892_s1 + $0x724] sm:$0xf]  ;;  %v7446_v55 = vld [vmem:[%s15892_s1 + $0x730] sm:$0xf0]  ;;  %v7849_v57 = vor.u32 %v10186_v42, %v7846_v44 }
 0x11a   :  { %v10118_v56 = vld [vmem:[%s15892_s1 + $0x824] sm:$0xf]  ;;  %v7574_v58 = vld [vmem:[%s15892_s1 + $0x830] sm:$0xf0]  ;;  %v7449_v8 = vor.u32 %v10086_v54, %v7446_v55 }
 0x11b   :  { %5312 = vmatpush.bf16.msra.mxu0 %v7497_v59  ;;  %v10150_v59 = vld [vmem:[%s15892_s1 + $0x924] sm:$0xf]  ;;  %v7702_v61 = vld [vmem:[%s15892_s1 + $0x930] sm:$0xf0] }
 0x11c   :  { %5325 = vmatpush.bf16.msra.mxu1 %v7625_v62  ;;  %5338 = vmatpush.bf16.msra.mxu2 %v7753_v3  ;;  %v10182_v62 = vld [vmem:[%s15892_s1 + $0xa24] sm:$0xf]  ;;  %v7830_v3 = vld [vmem:[%s15892_s1 + $0xa30] sm:$0xf0]  ;;  %v7705_v19 = vor.u32 %v10150_v59, %v7702_v61 }
 0x11d   :  { %5351 = vmatpush.bf16.msra.mxu3 %v7881_v63  ;;  %v10082_v10 = vld [vmem:[%s15892_s1 + $0x704] sm:$0xf]  ;;  %v7430_v11 = vld [vmem:[%s15892_s1 + $0x710] sm:$0xf0]  ;;  %v7577_v63 = vor.u32 %v10118_v56, %v7574_v58  ;;  %v7833_v24 = vor.u32 %v10182_v62, %v7830_v3 }
 0x11e   :  { %v10114_v20 = vld [vmem:[%s15892_s1 + $0x804] sm:$0xf]  ;;  %v7558_v21 = vld [vmem:[%s15892_s1 + $0x810] sm:$0xf0]  ;;  %v7433_v36 = vor.u32 %v10082_v10, %v7430_v11 }
 0x11f   :  { %5313 = vmatpush.bf16.msra.mxu0 %v7481_v26  ;;  %v10146_v23 = vld [vmem:[%s15892_s1 + $0x904] sm:$0xf]  ;;  %v7686_v25 = vld [vmem:[%s15892_s1 + $0x910] sm:$0xf0]  ;;  %v7561_v40 = vor.u32 %v10114_v20, %v7558_v21 }
 0x120   :  { %5326 = vmatpush.bf16.msra.mxu1 %v7609_v30  ;;  %5339 = vmatpush.bf16.msra.mxu2 %v7737_v31  ;;  %v10178_v26 = vld [vmem:[%s15892_s1 + $0xa04] sm:$0xf]  ;;  %v7814_v30 = vld [vmem:[%s15892_s1 + $0xa10] sm:$0xf0]  ;;  %v5086_v31 = vpop.f32.mrf.mxu2  ;;  %v7689_v41 = vor.u32 %v10146_v23, %v7686_v25 }
 0x121   :  { %5352 = vmatpush.bf16.msra.mxu3 %v7865_v35  ;;  %v10238_v32 = vld [vmem:[%s15892_s1 + $0xbe4] sm:$0xf]  ;;  %v8054_v22 = vld [vmem:[%s15892_s1 + $0xbf0] sm:$0xf0]  ;;  %v5099_v35 = vpop.f32.mrf.mxu3  ;;  %v7817_v45 = vor.u32 %v10178_v26, %v7814_v30 }
 0x122   :  { %v10270_v33 = vld [vmem:[%s15892_s1 + $0xce4] sm:$0xf]  ;;  %v8182_v37 = vld [vmem:[%s15892_s1 + $0xcf0] sm:$0xf0] }
 0x123   :  { %5314 = vmatpush.bf16.msra.mxu0 %v7465_v50  ;;  %v10302_v38 = vld [vmem:[%s15892_s1 + $0xde4] sm:$0xf]  ;;  %v8310_v39 = vld [vmem:[%s15892_s1 + $0xdf0] sm:$0xf0]  ;;  %v8057_v50 = vor.u32 %v10238_v32, %v8054_v22  ;;  %v8185_v51 = vor.u32 %v10270_v33, %v8182_v37 }
 0x124   :  { %5327 = vmatpush.bf16.msra.mxu1 %v7593_v43  ;;  %5340 = vmatpush.bf16.msra.mxu2 %v7721_v53  ;;  %v10334_v42 = vld [vmem:[%s15892_s1 + $0xee4] sm:$0xf]  ;;  %v8438_v44 = vld [vmem:[%s15892_s1 + $0xef0] sm:$0xf0]  ;;  %v8313_v43 = vor.u32 %v10302_v38, %v8310_v39 }
 0x125   :  { %5353 = vmatpush.bf16.msra.mxu3 %v7849_v57  ;;  %v10234_v53 = vld [vmem:[%s15892_s1 + $0xbc4] sm:$0xf]  ;;  %v8038_v54 = vld [vmem:[%s15892_s1 + $0xbd0] sm:$0xf0]  ;;  %v8441_v56 = vor.u32 %v10334_v42, %v8438_v44 }
 0x126   :  { %v10266_v55 = vld [vmem:[%s15892_s1 + $0xcc4] sm:$0xf]  ;;  %v8166_v57 = vld [vmem:[%s15892_s1 + $0xcd0] sm:$0xf0]  ;;  %v8041_v3 = vor.u32 %v10234_v53, %v8038_v54 }
 0x127   :  { %5315 = vmatpush.bf16.msra.mxu0 %v7449_v8  ;;  %v10298_v58 = vld [vmem:[%s15892_s1 + $0xdc4] sm:$0xf]  ;;  %v8294_v59 = vld [vmem:[%s15892_s1 + $0xdd0] sm:$0xf0]  ;;  %v8169_v8 = vor.u32 %v10266_v55, %v8166_v57 }
 0x128   :  { %5328 = vmatpush.bf16.msra.mxu1 %v7577_v63  ;;  %5341 = vmatpush.bf16.msra.mxu2 %v7705_v19  ;;  %v10330_v61 = vld [vmem:[%s15892_s1 + $0xec4] sm:$0xf]  ;;  %v8422_v62 = vld [vmem:[%s15892_s1 + $0xed0] sm:$0xf0]  ;;  %v8297_v10 = vor.u32 %v10298_v58, %v8294_v59 }
 0x129   :  { %5354 = vmatpush.bf16.msra.mxu3 %v7833_v24  ;;  %v10230_v11 = vld [vmem:[%s15892_s1 + $0xba4] sm:$0xf]  ;;  %v8022_v63 = vld [vmem:[%s15892_s1 + $0xbb0] sm:$0xf0]  ;;  %v8425_v20 = vor.u32 %v10330_v61, %v8422_v62 }
 0x12a   :  { %v10262_v19 = vld [vmem:[%s15892_s1 + $0xca4] sm:$0xf]  ;;  %v8150_v21 = vld [vmem:[%s15892_s1 + $0xcb0] sm:$0xf0]  ;;  %v8025_v30 = vor.u32 %v10230_v11, %v8022_v63 }
 0x12b   :  { %5316 = vmatpush.bf16.msra.mxu0 %v7433_v36  ;;  %v10294_v23 = vld [vmem:[%s15892_s1 + $0xda4] sm:$0xf]  ;;  %v8278_v24 = vld [vmem:[%s15892_s1 + $0xdb0] sm:$0xf0]  ;;  %v8153_v31 = vor.u32 %v10262_v19, %v8150_v21 }
 0x12c   :  { %5329 = vmatpush.bf16.msra.mxu1 %v7561_v40  ;;  %5342 = vmatpush.bf16.msra.mxu2 %v7689_v41  ;;  %v10326_v25 = vld [vmem:[%s15892_s1 + $0xea4] sm:$0xf]  ;;  %v8406_v26 = vld [vmem:[%s15892_s1 + $0xeb0] sm:$0xf0]  ;;  %v8281_v32 = vor.u32 %v10294_v23, %v8278_v24 }
 0x12d   :  { %5355 = vmatpush.bf16.msra.mxu3 %v7817_v45  ;;  %v10226_v22 = vld [vmem:[%s15892_s1 + $0xb84] sm:$0xf]  ;;  %v8006_v33 = vld [vmem:[%s15892_s1 + $0xb90] sm:$0xf0]  ;;  %v8409_v36 = vor.u32 %v10326_v25, %v8406_v26 }
 0x12e   :  { %5317 = vmatmul.bf16.vlgmr.msra.gmra.mxu0 %v11155_v1  ;;  %v10258_v35 = vld [vmem:[%s15892_s1 + $0xc84] sm:$0xf]  ;;  %v8134_v37 = vld [vmem:[%s15892_s1 + $0xc90] sm:$0xf0]  ;;  %v5110_v40 = vpop.f32.mrf.mxu0  ;;  %v8009_v45 = vor.u32 %v10226_v22, %v8006_v33 }
 0x12f   :  { %5361 = vmatpush.bf16.msrb.mxu0 %v8057_v50  ;;  %5343 = vmatmul.bf16.vlgmr.msra.gmra.mxu2 %v11413_v16  ;;  %v10290_v38 = vld [vmem:[%s15892_s1 + $0xd84] sm:$0xf]  ;;  %v8262_v39 = vld [vmem:[%s15892_s1 + $0xd90] sm:$0xf0]  ;;  %v5111_v44 = vadd.f32 %v5110_v40, %v12535_v52  ;;  %v5123_v50 = vpop.f32.mrf.mxu1 }
 0x130   :  { %5374 = vmatpush.bf16.msrb.mxu1 %v8185_v51  ;;  %5387 = vmatpush.bf16.msrb.mxu2 %v8313_v43  ;;  %v10322_v41 = vld [vmem:[%s15892_s1 + $0xe84] sm:$0xf]  ;;  %v8390_v42 = vld [vmem:[%s15892_s1 + $0xe90] sm:$0xf0]  ;;  %v8137_v51 = vor.u32 %v10258_v35, %v8134_v37  ;;  %v8265_v43 = vor.u32 %v10290_v38, %v8262_v39 }
 0x131   :  { %5400 = vmatpush.bf16.msrb.mxu3 %v8441_v56  ;;  %5330 = vmatmul.bf16.vlgmr.msra.gmra.mxu1 %v11403_v12  ;;  %v10222_v53 = vld [vmem:[%s15892_s1 + $0xb64] sm:$0xf]  ;;  %v7990_v54 = vld [vmem:[%s15892_s1 + $0xb70] sm:$0xf0]  ;;  %v8393_v52 = vor.u32 %v10322_v41, %v8390_v42  ;;  %v5124_v56 = vadd.f32 %v5123_v50, %v5111_v44 }
 0x132   :  { %5356 = vmatmul.bf16.vlgmr.msra.gmra.mxu3 %v11411_v15  ;;  %v10254_v55 = vld [vmem:[%s15892_s1 + $0xc64] sm:$0xf]  ;;  %v8118_v57 = vld [vmem:[%s15892_s1 + $0xc70] sm:$0xf0] }
 0x133   :  { %5362 = vmatpush.bf16.msrb.mxu0 %v8041_v3  ;;  %v10286_v58 = vld [vmem:[%s15892_s1 + $0xd64] sm:$0xf]  ;;  %v8246_v59 = vld [vmem:[%s15892_s1 + $0xd70] sm:$0xf0]  ;;  %v7993_v3 = vor.u32 %v10222_v53, %v7990_v54 }
 0x134   :  { %5375 = vmatpush.bf16.msrb.mxu1 %v8169_v8  ;;  %5388 = vmatpush.bf16.msrb.mxu2 %v8297_v10  ;;  %v10318_v61 = vld [vmem:[%s15892_s1 + $0xe64] sm:$0xf]  ;;  %v8374_v62 = vld [vmem:[%s15892_s1 + $0xe70] sm:$0xf0]  ;;  %v8121_v8 = vor.u32 %v10254_v55, %v8118_v57  ;;  %v8249_v10 = vor.u32 %v10286_v58, %v8246_v59 }
 0x135   :  { %5401 = vmatpush.bf16.msrb.mxu3 %v8425_v20  ;;  %v10218_v11 = vld [vmem:[%s15892_s1 + $0xb44] sm:$0xf]  ;;  %v7974_v63 = vld [vmem:[%s15892_s1 + $0xb50] sm:$0xf0]  ;;  %v8377_v20 = vor.u32 %v10318_v61, %v8374_v62  ;;  %v5136_v21 = vpop.f32.mrf.mxu2 }
 0x136   :  { %v10250_v19 = vld [vmem:[%s15892_s1 + $0xc44] sm:$0xf]  ;;  %v8102_v23 = vld [vmem:[%s15892_s1 + $0xc50] sm:$0xf0]  ;;  %v5137_v26 = vadd.f32 %v5136_v21, %v5124_v56  ;;  %v5112_v22 = vpop.f32.mrf.mxu0  ;;  %v7977_v33 = vor.u32 %v10218_v11, %v7974_v63 }
 0x137   :  { %5363 = vmatpush.bf16.msrb.mxu0 %v8025_v30  ;;  %v10282_v24 = vld [vmem:[%s15892_s1 + $0xd44] sm:$0xf]  ;;  %v8230_v25 = vld [vmem:[%s15892_s1 + $0xd50] sm:$0xf0]  ;;  %v5149_v30 = vpop.f32.mrf.mxu3  ;;  %v5125_v35 = vpop.f32.mrf.mxu1  ;;  %v8105_v37 = vor.u32 %v10250_v19, %v8102_v23 }
 0x138   :  { %5376 = vmatpush.bf16.msrb.mxu1 %v8153_v31  ;;  %5389 = vmatpush.bf16.msrb.mxu2 %v8281_v32  ;;  %v10314_v31 = vld [vmem:[%s15892_s1 + $0xe44] sm:$0xf]  ;;  %v8358_v32 = vld [vmem:[%s15892_s1 + $0xe50] sm:$0xf0]  ;;  %v8233_v38 = vor.u32 %v10282_v24, %v8230_v25 }
 0x139   :  { %5402 = vmatpush.bf16.msrb.mxu3 %v8409_v36  ;;  %v12734_v36 = vadd.f32 %v5149_v30, %v5137_v26  ;;  %v10214_v39 = vld [vmem:[%s15892_s1 + $0xb24] sm:$0xf]  ;;  %v7958_v40 = vld [vmem:[%s15892_s1 + $0xb30] sm:$0xf0]  ;;  %v8361_v42 = vor.u32 %v10314_v31, %v8358_v32 }
 0x13a   :  { %v10246_v41 = vld [vmem:[%s15892_s1 + $0xc24] sm:$0xf]  ;;  %v8086_v44 = vld [vmem:[%s15892_s1 + $0xc30] sm:$0xf0]  ;;  %v7961_v53 = vor.u32 %v10214_v39, %v7958_v40 }
 0x13b   :  { %5364 = vmatpush.bf16.msrb.mxu0 %v8009_v45  ;;  %v10278_v45 = vld [vmem:[%s15892_s1 + $0xd24] sm:$0xf]  ;;  %v8214_v50 = vld [vmem:[%s15892_s1 + $0xd30] sm:$0xf0] }
 0x13c   :  { %5377 = vmatpush.bf16.msrb.mxu1 %v8137_v51  ;;  %5390 = vmatpush.bf16.msrb.mxu2 %v8265_v43  ;;  %v10310_v51 = vld [vmem:[%s15892_s1 + $0xe24] sm:$0xf]  ;;  %v8342_v43 = vld [vmem:[%s15892_s1 + $0xe30] sm:$0xf0]  ;;  %v8217_v56 = vor.u32 %v10278_v45, %v8214_v50 }
 0x13d   :  { %5403 = vmatpush.bf16.msrb.mxu3 %v8393_v52  ;;  %v10210_v54 = vld [vmem:[%s15892_s1 + $0xb04] sm:$0xf]  ;;  %v7942_v55 = vld [vmem:[%s15892_s1 + $0xb10] sm:$0xf0]  ;;  %v8089_v52 = vor.u32 %v10246_v41, %v8086_v44  ;;  %v8345_v61 = vor.u32 %v10310_v51, %v8342_v43 }
 0x13e   :  { %v10242_v57 = vld [vmem:[%s15892_s1 + $0xc04] sm:$0xf]  ;;  %v8070_v58 = vld [vmem:[%s15892_s1 + $0xc10] sm:$0xf0]  ;;  %v7945_v21 = vor.u32 %v10210_v54, %v7942_v55 }
 0x13f   :  { %5365 = vmatpush.bf16.msrb.mxu0 %v7993_v3  ;;  %v10274_v59 = vld [vmem:[%s15892_s1 + $0xd04] sm:$0xf]  ;;  %v8198_v62 = vld [vmem:[%s15892_s1 + $0xd10] sm:$0xf0]  ;;  %v8073_v26 = vor.u32 %v10242_v57, %v8070_v58 }
 0x140   :  { %5378 = vmatpush.bf16.msrb.mxu1 %v8121_v8  ;;  %5391 = vmatpush.bf16.msrb.mxu2 %v8249_v10  ;;  %v10306_v3 = vld [vmem:[%s15892_s1 + $0xe04] sm:$0xf]  ;;  %v8326_v8 = vld [vmem:[%s15892_s1 + $0xe10] sm:$0xf0]  ;;  %v5138_v10 = vpop.f32.mrf.mxu2  ;;  %v8201_v30 = vor.u32 %v10274_v59, %v8198_v62 }
 0x141   :  { %5404 = vmatpush.bf16.msrb.mxu3 %v8377_v20  ;;  %v10366_v11 = vld [vmem:[%s15892_s1 + $0xfe4] sm:$0xf]  ;;  %v8566_v63 = vld [vmem:[%s15892_s1 + $0xff0] sm:$0xf0]  ;;  %v5151_v20 = vpop.f32.mrf.mxu3  ;;  %v8329_v22 = vor.u32 %v10306_v3, %v8326_v8 }
 0x142   :  { %v10398_v19 = vld [vmem:[%s15892_s1 + $0x10e4] sm:$0xf]  ;;  %v8694_v23 = vld [vmem:[%s15892_s1 + $0x10f0] sm:$0xf0] }
 0x143   :  { %5366 = vmatpush.bf16.msrb.mxu0 %v7977_v33  ;;  %v10430_v24 = vld [vmem:[%s15892_s1 + $0x11e4] sm:$0xf]  ;;  %v8822_v25 = vld [vmem:[%s15892_s1 + $0x11f0] sm:$0xf0]  ;;  %v8569_v33 = vor.u32 %v10366_v11, %v8566_v63  ;;  %v8697_v35 = vor.u32 %v10398_v19, %v8694_v23 }
 0x144   :  { %5379 = vmatpush.bf16.msrb.mxu1 %v8105_v37  ;;  %5392 = vmatpush.bf16.msrb.mxu2 %v8233_v38  ;;  %v10462_v31 = vld [vmem:[%s15892_s1 + $0x12e4] sm:$0xf]  ;;  %v8950_v32 = vld [vmem:[%s15892_s1 + $0x12f0] sm:$0xf0]  ;;  %v8825_v37 = vor.u32 %v10430_v24, %v8822_v25 }
 0x145   :  { %5405 = vmatpush.bf16.msrb.mxu3 %v8361_v42  ;;  %v10362_v38 = vld [vmem:[%s15892_s1 + $0xfc4] sm:$0xf]  ;;  %v8550_v39 = vld [vmem:[%s15892_s1 + $0xfd0] sm:$0xf0]  ;;  %v8953_v41 = vor.u32 %v10462_v31, %v8950_v32 }
 0x146   :  { %v10394_v40 = vld [vmem:[%s15892_s1 + $0x10c4] sm:$0xf]  ;;  %v8678_v42 = vld [vmem:[%s15892_s1 + $0x10d0] sm:$0xf0]  ;;  %v8553_v43 = vor.u32 %v10362_v38, %v8550_v39 }
 0x147   :  { %5367 = vmatpush.bf16.msrb.mxu0 %v7961_v53  ;;  %v10426_v44 = vld [vmem:[%s15892_s1 + $0x11c4] sm:$0xf]  ;;  %v8806_v45 = vld [vmem:[%s15892_s1 + $0x11d0] sm:$0xf0]  ;;  %v8681_v53 = vor.u32 %v10394_v40, %v8678_v42 }
 0x148   :  { %5380 = vmatpush.bf16.msrb.mxu1 %v8089_v52  ;;  %5393 = vmatpush.bf16.msrb.mxu2 %v8217_v56  ;;  %v10458_v50 = vld [vmem:[%s15892_s1 + $0x12c4] sm:$0xf]  ;;  %v8934_v51 = vld [vmem:[%s15892_s1 + $0x12d0] sm:$0xf0]  ;;  %v8809_v54 = vor.u32 %v10426_v44, %v8806_v45 }
 0x149   :  { %5406 = vmatpush.bf16.msrb.mxu3 %v8345_v61  ;;  %v10358_v55 = vld [vmem:[%s15892_s1 + $0xfa4] sm:$0xf]  ;;  %v8534_v52 = vld [vmem:[%s15892_s1 + $0xfb0] sm:$0xf0]  ;;  %v8937_v57 = vor.u32 %v10458_v50, %v8934_v51 }
 0x14a   :  { %v10390_v56 = vld [vmem:[%s15892_s1 + $0x10a4] sm:$0xf]  ;;  %v8662_v58 = vld [vmem:[%s15892_s1 + $0x10b0] sm:$0xf0]  ;;  %v8537_v8 = vor.u32 %v10358_v55, %v8534_v52 }
 0x14b   :  { %5368 = vmatpush.bf16.msrb.mxu0 %v7945_v21  ;;  %v10422_v59 = vld [vmem:[%s15892_s1 + $0x11a4] sm:$0xf]  ;;  %v8790_v61 = vld [vmem:[%s15892_s1 + $0x11b0] sm:$0xf0]  ;;  %v8665_v10 = vor.u32 %v10390_v56, %v8662_v58 }
 0x14c   :  { %5381 = vmatpush.bf16.msrb.mxu1 %v8073_v26  ;;  %5394 = vmatpush.bf16.msrb.mxu2 %v8201_v30  ;;  %v10454_v62 = vld [vmem:[%s15892_s1 + $0x12a4] sm:$0xf]  ;;  %v8918_v3 = vld [vmem:[%s15892_s1 + $0x12b0] sm:$0xf0]  ;;  %v8793_v11 = vor.u32 %v10422_v59, %v8790_v61  ;;  %v5162_v26 = vpop.f32.mrf.mxu0 }
 0x14d   :  { %5407 = vmatpush.bf16.msrb.mxu3 %v8329_v22  ;;  %v10354_v63 = vld [vmem:[%s15892_s1 + $0xf84] sm:$0xf]  ;;  %v8518_v19 = vld [vmem:[%s15892_s1 + $0xf90] sm:$0xf0]  ;;  %v8921_v21 = vor.u32 %v10454_v62, %v8918_v3  ;;  %v5163_v32 = vadd.f32 %v5162_v26, %v12734_v36 }
 0x14e   :  { %5369 = vmatmul.bf16.vlgmr.msrb.gmra.mxu0 %v11415_v17  ;;  %v10386_v20 = vld [vmem:[%s15892_s1 + $0x1084] sm:$0xf]  ;;  %v8646_v23 = vld [vmem:[%s15892_s1 + $0x1090] sm:$0xf0]  ;;  %v8521_v22 = vor.u32 %v10354_v63, %v8518_v19 }
 0x14f   :  { %5413 = vmatpush.bf16.msra.mxu0 %v8569_v33  ;;  %5395 = vmatmul.bf16.vlgmr.msrb.gmra.mxu2 %v11581_v48  ;;  %v10418_v24 = vld [vmem:[%s15892_s1 + $0x1184] sm:$0xf]  ;;  %v8774_v25 = vld [vmem:[%s15892_s1 + $0x1190] sm:$0xf0]  ;;  %v5175_v33 = vpop.f32.mrf.mxu1 }
 0x150   :  { %5426 = vmatpush.bf16.msra.mxu1 %v8697_v35  ;;  %5439 = vmatpush.bf16.msra.mxu2 %v8825_v37  ;;  %v10450_v30 = vld [vmem:[%s15892_s1 + $0x1284] sm:$0xf]  ;;  %v8902_v31 = vld [vmem:[%s15892_s1 + $0x1290] sm:$0xf0]  ;;  %v8649_v35 = vor.u32 %v10386_v20, %v8646_v23  ;;  %v8777_v37 = vor.u32 %v10418_v24, %v8774_v25 }
 0x151   :  { %5452 = vmatpush.bf16.msra.mxu3 %v8953_v41  ;;  %5382 = vmatmul.bf16.vlgmr.msrb.gmra.mxu1 %v11577_v46  ;;  %v10350_v38 = vld [vmem:[%s15892_s1 + $0xf64] sm:$0xf]  ;;  %v8502_v39 = vld [vmem:[%s15892_s1 + $0xf70] sm:$0xf0]  ;;  %v8905_v36 = vor.u32 %v10450_v30, %v8902_v31  ;;  %v5176_v41 = vadd.f32 %v5175_v33, %v5163_v32 }
 0x152   :  { %5408 = vmatmul.bf16.vlgmr.msrb.gmra.mxu3 %v11579_v47  ;;  %v10382_v40 = vld [vmem:[%s15892_s1 + $0x1064] sm:$0xf]  ;;  %v8630_v42 = vld [vmem:[%s15892_s1 + $0x1070] sm:$0xf0]  ;;  %v5188_v58 = vpop.f32.mrf.mxu2 }
 0x153   :  { %5414 = vmatpush.bf16.msra.mxu0 %v8553_v43  ;;  %v10414_v44 = vld [vmem:[%s15892_s1 + $0x1164] sm:$0xf]  ;;  %v8758_v45 = vld [vmem:[%s15892_s1 + $0x1170] sm:$0xf0]  ;;  %v8505_v43 = vor.u32 %v10350_v38, %v8502_v39  ;;  %v5189_v3 = vadd.f32 %v5188_v58, %v5176_v41 }
 0x154   :  { %5427 = vmatpush.bf16.msra.mxu1 %v8681_v53  ;;  %5440 = vmatpush.bf16.msra.mxu2 %v8809_v54  ;;  %v10446_v50 = vld [vmem:[%s15892_s1 + $0x1264] sm:$0xf]  ;;  %v8886_v51 = vld [vmem:[%s15892_s1 + $0x1270] sm:$0xf0]  ;;  %v8633_v53 = vor.u32 %v10382_v40, %v8630_v42  ;;  %v8761_v54 = vor.u32 %v10414_v44, %v8758_v45  ;;  %v5164_v63 = vpop.f32.mrf.mxu0 }
 0x155   :  { %5453 = vmatpush.bf16.msra.mxu3 %v8937_v57  ;;  %v10346_v55 = vld [vmem:[%s15892_s1 + $0xf44] sm:$0xf]  ;;  %v8486_v52 = vld [vmem:[%s15892_s1 + $0xf50] sm:$0xf0]  ;;  %v8889_v57 = vor.u32 %v10446_v50, %v8886_v51 }
 0x156   :  { %v10378_v56 = vld [vmem:[%s15892_s1 + $0x1044] sm:$0xf]  ;;  %v8614_v59 = vld [vmem:[%s15892_s1 + $0x1050] sm:$0xf0]  ;;  %v8489_v19 = vor.u32 %v10346_v55, %v8486_v52 }
 0x157   :  { %5415 = vmatpush.bf16.msra.mxu0 %v8537_v8  ;;  %v10410_v61 = vld [vmem:[%s15892_s1 + $0x1144] sm:$0xf]  ;;  %v8742_v62 = vld [vmem:[%s15892_s1 + $0x1150] sm:$0xf0]  ;;  %v5201_v8 = vpop.f32.mrf.mxu3  ;;  %v5177_v20 = vpop.f32.mrf.mxu1  ;;  %v8617_v23 = vor.u32 %v10378_v56, %v8614_v59 }
 0x158   :  { %5428 = vmatpush.bf16.msra.mxu1 %v8665_v10  ;;  %5441 = vmatpush.bf16.msra.mxu2 %v8793_v11  ;;  %v10442_v10 = vld [vmem:[%s15892_s1 + $0x1244] sm:$0xf]  ;;  %v8870_v11 = vld [vmem:[%s15892_s1 + $0x1250] sm:$0xf0]  ;;  %v8745_v24 = vor.u32 %v10410_v61, %v8742_v62 }
 0x159   :  { %5454 = vmatpush.bf16.msra.mxu3 %v8921_v21  ;;  %v12933_v21 = vadd.f32 %v5201_v8, %v5189_v3  ;;  %v10342_v25 = vld [vmem:[%s15892_s1 + $0xf24] sm:$0xf]  ;;  %v8470_v26 = vld [vmem:[%s15892_s1 + $0xf30] sm:$0xf0]  ;;  %v8873_v31 = vor.u32 %v10442_v10, %v8870_v11 }
 0x15a   :  { %v10374_v30 = vld [vmem:[%s15892_s1 + $0x1024] sm:$0xf]  ;;  %v8598_v32 = vld [vmem:[%s15892_s1 + $0x1030] sm:$0xf0]  ;;  %v8473_v38 = vor.u32 %v10342_v25, %v8470_v26 }
 0x15b   :  { %5416 = vmatpush.bf16.msra.mxu0 %v8521_v22  ;;  %v10406_v22 = vld [vmem:[%s15892_s1 + $0x1124] sm:$0xf]  ;;  %v8726_v33 = vld [vmem:[%s15892_s1 + $0x1130] sm:$0xf0] }
 0x15c   :  { %5429 = vmatpush.bf16.msra.mxu1 %v8649_v35  ;;  %5442 = vmatpush.bf16.msra.mxu2 %v8777_v37  ;;  %v10438_v35 = vld [vmem:[%s15892_s1 + $0x1224] sm:$0xf]  ;;  %v8854_v37 = vld [vmem:[%s15892_s1 + $0x1230] sm:$0xf0]  ;;  %v8729_v41 = vor.u32 %v10406_v22, %v8726_v33 }
 0x15d   :  { %5455 = vmatpush.bf16.msra.mxu3 %v8905_v36  ;;  %v10338_v39 = vld [vmem:[%s15892_s1 + $0xf04] sm:$0xf]  ;;  %v8454_v40 = vld [vmem:[%s15892_s1 + $0xf10] sm:$0xf0]  ;;  %v8601_v36 = vor.u32 %v10374_v30, %v8598_v32  ;;  %v8857_v50 = vor.u32 %v10438_v35, %v8854_v37 }
 0x15e   :  { %v10370_v42 = vld [vmem:[%s15892_s1 + $0x1004] sm:$0xf]  ;;  %v8582_v44 = vld [vmem:[%s15892_s1 + $0x1010] sm:$0xf0]  ;;  %v8457_v58 = vor.u32 %v10338_v39, %v8454_v40 }
 0x15f   :  { %5417 = vmatpush.bf16.msra.mxu0 %v8505_v43  ;;  %v10402_v45 = vld [vmem:[%s15892_s1 + $0x1104] sm:$0xf]  ;;  %v8710_v51 = vld [vmem:[%s15892_s1 + $0x1110] sm:$0xf0]  ;;  %v8585_v3 = vor.u32 %v10370_v42, %v8582_v44 }
 0x160   :  { %5430 = vmatpush.bf16.msra.mxu1 %v8633_v53  ;;  %5443 = vmatpush.bf16.msra.mxu2 %v8761_v54  ;;  %v10434_v43 = vld [vmem:[%s15892_s1 + $0x1204] sm:$0xf]  ;;  %v8838_v53 = vld [vmem:[%s15892_s1 + $0x1210] sm:$0xf0]  ;;  %v5190_v54 = vpop.f32.mrf.mxu2  ;;  %v8713_v8 = vor.u32 %v10402_v45, %v8710_v51 }
 0x161   :  { %5456 = vmatpush.bf16.msra.mxu3 %v8889_v57  ;;  %v10494_v55 = vld [vmem:[%s15892_s1 + $0x13e4] sm:$0xf]  ;;  %v9078_v52 = vld [vmem:[%s15892_s1 + $0x13f0] sm:$0xf0]  ;;  %v5203_v57 = vpop.f32.mrf.mxu3  ;;  %v8841_v63 = vor.u32 %v10434_v43, %v8838_v53 }
 0x162   :  { %v10526_v56 = vld [vmem:[%s15892_s1 + $0x14e4] sm:$0xf]  ;;  %v9206_v59 = vld [vmem:[%s15892_s1 + $0x14f0] sm:$0xf0] }
 0x163   :  { %5418 = vmatpush.bf16.msra.mxu0 %v8489_v19  ;;  %v10558_v61 = vld [vmem:[%s15892_s1 + $0x15e4] sm:$0xf]  ;;  %v9334_v62 = vld [vmem:[%s15892_s1 + $0x15f0] sm:$0xf0]  ;;  %v9081_v19 = vor.u32 %v10494_v55, %v9078_v52  ;;  %v9209_v20 = vor.u32 %v10526_v56, %v9206_v59 }
 0x164   :  { %5431 = vmatpush.bf16.msra.mxu1 %v8617_v23  ;;  %5444 = vmatpush.bf16.msra.mxu2 %v8745_v24  ;;  %v10590_v10 = vld [vmem:[%s15892_s1 + $0x16e4] sm:$0xf]  ;;  %v9462_v11 = vld [vmem:[%s15892_s1 + $0x16f0] sm:$0xf0]  ;;  %v9337_v23 = vor.u32 %v10558_v61, %v9334_v62 }
 0x165   :  { %5457 = vmatpush.bf16.msra.mxu3 %v8873_v31  ;;  %v10490_v24 = vld [vmem:[%s15892_s1 + $0x13c4] sm:$0xf]  ;;  %v9062_v25 = vld [vmem:[%s15892_s1 + $0x13d0] sm:$0xf0]  ;;  %v9465_v30 = vor.u32 %v10590_v10, %v9462_v11  ;;  %v10692_v11 = vld [vmem:[%s15893_s2] sm:$0xf] }
 0x166   :  { %v10522_v26 = vld [vmem:[%s15892_s1 + $0x14c4] sm:$0xf]  ;;  %v9190_v31 = vld [vmem:[%s15892_s1 + $0x14d0] sm:$0xf0]  ;;  %v9065_v37 = vor.u32 %v10490_v24, %v9062_v25 }
 0x167   :  { %5419 = vmatpush.bf16.msra.mxu0 %v8473_v38  ;;  %v10554_v32 = vld [vmem:[%s15892_s1 + $0x15c4] sm:$0xf]  ;;  %v9318_v22 = vld [vmem:[%s15892_s1 + $0x15d0] sm:$0xf0]  ;;  %v9193_v38 = vor.u32 %v10522_v26, %v9190_v31 }
 0x168   :  { %5432 = vmatpush.bf16.msra.mxu1 %v8601_v36  ;;  %5445 = vmatpush.bf16.msra.mxu2 %v8729_v41  ;;  %v10586_v33 = vld [vmem:[%s15892_s1 + $0x16c4] sm:$0xf]  ;;  %v9446_v35 = vld [vmem:[%s15892_s1 + $0x16d0] sm:$0xf0]  ;;  %v9321_v39 = vor.u32 %v10554_v32, %v9318_v22 }
 0x169   :  { %5458 = vmatpush.bf16.msra.mxu3 %v8857_v50  ;;  %v10486_v40 = vld [vmem:[%s15892_s1 + $0x13a4] sm:$0xf]  ;;  %v9046_v36 = vld [vmem:[%s15892_s1 + $0x13b0] sm:$0xf0]  ;;  %v9449_v42 = vor.u32 %v10586_v33, %v9446_v35 }
 0x16a   :  { %v10518_v41 = vld [vmem:[%s15892_s1 + $0x14a4] sm:$0xf]  ;;  %v9174_v44 = vld [vmem:[%s15892_s1 + $0x14b0] sm:$0xf0]  ;;  %v9049_v53 = vor.u32 %v10486_v40, %v9046_v36 }
 0x16b   :  { %5420 = vmatpush.bf16.msra.mxu0 %v8457_v58  ;;  %v10550_v45 = vld [vmem:[%s15892_s1 + $0x15a4] sm:$0xf]  ;;  %v9302_v50 = vld [vmem:[%s15892_s1 + $0x15b0] sm:$0xf0]  ;;  %v9177_v54 = vor.u32 %v10518_v41, %v9174_v44 }
 0x16c   :  { %5433 = vmatpush.bf16.msra.mxu1 %v8585_v3  ;;  %5446 = vmatpush.bf16.msra.mxu2 %v8713_v8  ;;  %v10582_v51 = vld [vmem:[%s15892_s1 + $0x16a4] sm:$0xf]  ;;  %v9430_v43 = vld [vmem:[%s15892_s1 + $0x16b0] sm:$0xf0]  ;;  %v9305_v55 = vor.u32 %v10550_v45, %v9302_v50  ;;  %v5214_v3 = vpop.f32.mrf.mxu0 }
 0x16d   :  { %5459 = vmatpush.bf16.msra.mxu3 %v8841_v63  ;;  %v10482_v52 = vld [vmem:[%s15892_s1 + $0x1384] sm:$0xf]  ;;  %v9030_v56 = vld [vmem:[%s15892_s1 + $0x1390] sm:$0xf0]  ;;  %v9433_v58 = vor.u32 %v10582_v51, %v9430_v43  ;;  %v828_v63 = vperm.slane %v10692_v11, 1 }
 0x16e   :  { %5421 = vmatmul.bf16.vlgmr.msra.gmra.mxu0 %v11583_v49  ;;  %v10514_v57 = vld [vmem:[%s15892_s1 + $0x1484] sm:$0xf]  ;;  %v9158_v59 = vld [vmem:[%s15892_s1 + $0x1490] sm:$0xf0]  ;;  %v5227_v31 = vpop.f32.mrf.mxu1 }
 0x16f   :  { %5465 = vmatpush.bf16.msrb.mxu0 %v9081_v19  ;;  %5447 = vmatmul.bf16.vlgmr.msra.gmra.mxu2 %v11824_v14  ;;  %v10546_v61 = vld [vmem:[%s15892_s1 + $0x1584] sm:$0xf]  ;;  %v9286_v62 = vld [vmem:[%s15892_s1 + $0x1590] sm:$0xf0]  ;;  %v13087_v19 = vadd.f32 %v5214_v3, %v12933_v21 }
 0x170   :  { %5478 = vmatpush.bf16.msrb.mxu1 %v9209_v20  ;;  %5491 = vmatpush.bf16.msrb.mxu2 %v9337_v23  ;;  %v10578_v8 = vld [vmem:[%s15892_s1 + $0x1684] sm:$0xf]  ;;  %v9414_v10 = vld [vmem:[%s15892_s1 + $0x1690] sm:$0xf0]  ;;  %v9033_v20 = vor.u32 %v10482_v52, %v9030_v56  ;;  %v9161_v23 = vor.u32 %v10514_v57, %v9158_v59  ;;  %v9289_v24 = vor.u32 %v10546_v61, %v9286_v62 }
 0x171   :  { %5504 = vmatpush.bf16.msrb.mxu3 %v9465_v30  ;;  %5434 = vmatmul.bf16.vlgmr.msra.gmra.mxu1 %v11814_v9  ;;  %v10478_v25 = vld [vmem:[%s15892_s1 + $0x1364] sm:$0xf]  ;;  %v9014_v26 = vld [vmem:[%s15892_s1 + $0x1370] sm:$0xf0]  ;;  %v9417_v21 = vor.u32 %v10578_v8, %v9414_v10 }
 0x172   :  { %5460 = vmatmul.bf16.vlgmr.msra.gmra.mxu3 %v11822_v13  ;;  %v10510_v30 = vld [vmem:[%s15892_s1 + $0x1464] sm:$0xf]  ;;  %v9142_v32 = vld [vmem:[%s15892_s1 + $0x1470] sm:$0xf0] }
 0x173   :  { %5466 = vmatpush.bf16.msrb.mxu0 %v9065_v37  ;;  %v10542_v22 = vld [vmem:[%s15892_s1 + $0x1564] sm:$0xf]  ;;  %v9270_v33 = vld [vmem:[%s15892_s1 + $0x1570] sm:$0xf0]  ;;  %v9145_v40 = vor.u32 %v10510_v30, %v9142_v32 }
 0x174   :  { %5479 = vmatpush.bf16.msrb.mxu1 %v9193_v38  ;;  %5492 = vmatpush.bf16.msrb.mxu2 %v9321_v39  ;;  %v10574_v35 = vld [vmem:[%s15892_s1 + $0x1664] sm:$0xf]  ;;  %v9398_v37 = vld [vmem:[%s15892_s1 + $0x1670] sm:$0xf0]  ;;  %v5228_v38 = vadd.f32 %v5227_v31, %v828_v63  ;;  %v9017_v39 = vor.u32 %v10478_v25, %v9014_v26  ;;  %v9273_v36 = vor.u32 %v10542_v22, %v9270_v33  ;;  %v5216_v57 = vpop.f32.mrf.mxu0 }
 0x175   :  { %5505 = vmatpush.bf16.msrb.mxu3 %v9449_v42  ;;  %v10474_v41 = vld [vmem:[%s15892_s1 + $0x1344] sm:$0xf]  ;;  %v8998_v42 = vld [vmem:[%s15892_s1 + $0x1350] sm:$0xf0]  ;;  %v9401_v45 = vor.u32 %v10574_v35, %v9398_v37  ;;  %v9921_v57 = vld [vmem:[%s15892_s1 + $0x1f4] sm:$0xf0] }
 0x176   :  { %v10506_v44 = vld [vmem:[%s15892_s1 + $0x1444] sm:$0xf]  ;;  %v9126_v50 = vld [vmem:[%s15892_s1 + $0x1450] sm:$0xf0]  ;;  %v5229_v11 = vpop.f32.mrf.mxu1 }
 0x177   :  { %5467 = vmatpush.bf16.msrb.mxu0 %v9049_v53  ;;  %v10538_v51 = vld [vmem:[%s15892_s1 + $0x1544] sm:$0xf]  ;;  %v9254_v43 = vld [vmem:[%s15892_s1 + $0x1550] sm:$0xf0]  ;;  %v5240_v53 = vpop.f32.mrf.mxu2  ;;  %v9129_v59 = vor.u32 %v10506_v44, %v9126_v50 }
 0x178   :  { %5480 = vmatpush.bf16.msrb.mxu1 %v9177_v54  ;;  %5493 = vmatpush.bf16.msrb.mxu2 %v9305_v55  ;;  %v5253_v54 = vpop.f32.mrf.mxu3  ;;  %v10570_v55 = vld [vmem:[%s15892_s1 + $0x1644] sm:$0xf]  ;;  %v9382_v52 = vld [vmem:[%s15892_s1 + $0x1650] sm:$0xf0]  ;;  %v5241_v56 = vadd.f32 %v5240_v53, %v5228_v38  ;;  %v9257_v61 = vor.u32 %v10538_v51, %v9254_v43  ;;  %v6652_v53 = vld [vmem:[%s15892_s1 + $0xe8] sm:$0xf] }
 0x179   :  { %5506 = vmatpush.bf16.msrb.mxu3 %v9433_v58  ;;  %v9001_v58 = vor.u32 %v10474_v41, %v8998_v42  ;;  %v10470_v62 = vld [vmem:[%s15892_s1 + $0x1324] sm:$0xf]  ;;  %v8982_v3 = vld [vmem:[%s15892_s1 + $0x1330] sm:$0xf0]  ;;  %v9385_v63 = vor.u32 %v10570_v55, %v9382_v52 }
 0x17a   :  { %v10502_v8 = vld [vmem:[%s15892_s1 + $0x1424] sm:$0xf]  ;;  %v13146_v10 = vadd.f32 %v5253_v54, %v5241_v56  ;;  %v9366_v26 = vld [vmem:[%s15892_s1 + $0x1630] sm:$0xf0]  ;;  %v8985_v30 = vor.u32 %v10470_v62, %v8982_v3  ;;  %v9889_v54 = vld [vmem:[%s15892_s1 + $0xf4] sm:$0xf0] }
 0x17b   :  { %5468 = vmatpush.bf16.msrb.mxu0 %v9033_v20  ;;  %v9110_v20 = vld [vmem:[%s15892_s1 + $0x1430] sm:$0xf0]  ;;  %v10566_v25 = vld [vmem:[%s15892_s1 + $0x1624] sm:$0xf]  ;;  %v6780_v56 = vld [vmem:[%s15892_s1 + $0x1e8] sm:$0xf]  ;;  %v6653_v62 = vor.u32 %v9889_v54, %v6652_v53 }
 0x17c   :  { %5481 = vmatpush.bf16.msrb.mxu1 %v9161_v23  ;;  %5494 = vmatpush.bf16.msrb.mxu2 %v9289_v24  ;;  %v10534_v23 = vld [vmem:[%s15892_s1 + $0x1524] sm:$0xf]  ;;  %v9238_v24 = vld [vmem:[%s15892_s1 + $0x1530] sm:$0xf0]  ;;  %v9113_v32 = vor.u32 %v10502_v8, %v9110_v20  ;;  %v9369_v38 = vor.u32 %v10566_v25, %v9366_v26  ;;  %v6764_v25 = vld [vmem:[%s15892_s1 + $0x1c8] sm:$0xf] }
 0x17d   :  { %5507 = vmatpush.bf16.msrb.mxu3 %v9417_v21  ;;  %v10466_v31 = vld [vmem:[%s15892_s1 + $0x1304] sm:$0xf]  ;;  %v8966_v21 = vld [vmem:[%s15892_s1 + $0x1310] sm:$0xf0]  ;;  %v9241_v22 = vor.u32 %v10534_v23, %v9238_v24  ;;  %v6636_v23 = vld [vmem:[%s15892_s1 + $0xc8] sm:$0xf] }
 0x17e   :  { %v10498_v33 = vld [vmem:[%s15892_s1 + $0x1404] sm:$0xf]  ;;  %v9094_v35 = vld [vmem:[%s15892_s1 + $0x1410] sm:$0xf0]  ;;  %v8969_v51 = vor.u32 %v10466_v31, %v8966_v21  ;;  %v9885_v24 = vld [vmem:[%s15892_s1 + $0xd4] sm:$0xf0] }
 0x17f   :  { %5469 = vmatpush.bf16.msrb.mxu0 %v9017_v39  ;;  %v10530_v37 = vld [vmem:[%s15892_s1 + $0x1504] sm:$0xf]  ;;  %v9222_v39 = vld [vmem:[%s15892_s1 + $0x1510] sm:$0xf0]  ;;  %v5242_v41 = vpop.f32.mrf.mxu2  ;;  %v9097_v55 = vor.u32 %v10498_v33, %v9094_v35  ;;  %v9917_v26 = vld [vmem:[%s15892_s1 + $0x1d4] sm:$0xf0]  ;;  %v6637_v21 = vor.u32 %v9885_v24, %v6636_v23 }
 0x180   :  { %5482 = vmatpush.bf16.msrb.mxu1 %v9145_v40  ;;  %5495 = vmatpush.bf16.msrb.mxu2 %v9273_v36  ;;  %v10562_v40 = vld [vmem:[%s15892_s1 + $0x1604] sm:$0xf]  ;;  %v9350_v36 = vld [vmem:[%s15892_s1 + $0x1610] sm:$0xf0]  ;;  %v5255_v42 = vpop.f32.mrf.mxu3  ;;  %v9225_v52 = vor.u32 %v10530_v37, %v9222_v39  ;;  %v6765_v35 = vor.u32 %v9917_v26, %v6764_v25  ;;  %v9881_v39 = vld [vmem:[%s15892_s1 + $0xb4] sm:$0xf0] }
 0x181   :  { %5508 = vmatpush.bf16.msrb.mxu3 %v9401_v45  ;;  %v10622_v44 = vld [vmem:[%s15892_s1 + $0x17e4] sm:$0xf]  ;;  %v9590_v45 = vld [vmem:[%s15892_s1 + $0x17f0] sm:$0xf0]  ;;  %v6604_v54 = vld [vmem:[%s15892_s1 + $0x88] sm:$0xf] }
 0x182   :  { %v10654_v50 = vld [vmem:[%s15892_s1 + $0x18e4] sm:$0xf]  ;;  %v9718_v43 = vld [vmem:[%s15892_s1 + $0x18f0] sm:$0xf0]  ;;  %v6588_v24 = vld [vmem:[%s15892_s1 + $0x68] sm:$0xf] }
 0x183   :  { %5470 = vmatpush.bf16.msrb.mxu0 %v9001_v58  ;;  %v9353_v58 = vor.u32 %v10562_v40, %v9350_v36  ;;  %v10618_v3 = vld [vmem:[%s15892_s1 + $0x17c4] sm:$0xf]  ;;  %v9574_v8 = vld [vmem:[%s15892_s1 + $0x17d0] sm:$0xf0]  ;;  %v6748_v40 = vld [vmem:[%s15892_s1 + $0x1a8] sm:$0xf] }
 0x184   :  { %5483 = vmatpush.bf16.msrb.mxu1 %v9129_v59  ;;  %5496 = vmatpush.bf16.msrb.mxu2 %v9257_v61  ;;  %v9593_v59 = vor.u32 %v10622_v44, %v9590_v45  ;;  %v9721_v61 = vor.u32 %v10654_v50, %v9718_v43  ;;  %v10650_v11 = vld [vmem:[%s15892_s1 + $0x18c4] sm:$0xf]  ;;  %v9702_v20 = vld [vmem:[%s15892_s1 + $0x18d0] sm:$0xf0]  ;;  %v9913_v36 = vld [vmem:[%s15892_s1 + $0x1b4] sm:$0xf0] }
 0x185   :  { %5509 = vmatpush.bf16.msrb.mxu3 %v9385_v63  ;;  %v6781_v63 = vor.u32 %v9921_v57, %v6780_v56  ;;  %v9705_v31 = vor.u32 %v10650_v11, %v9702_v20  ;;  %v10646_v33 = vld [vmem:[%s15892_s1 + $0x18a4] sm:$0xf]  ;;  %v9686_v37 = vld [vmem:[%s15892_s1 + $0x18b0] sm:$0xf0]  ;;  %v6749_v43 = vor.u32 %v9913_v36, %v6748_v40  ;;  %v9909_v56 = vld [vmem:[%s15892_s1 + $0x194] sm:$0xf0] }
 0x186   :  { %v9689_v42 = vor.u32 %v10646_v33, %v9686_v37  ;;  %v10610_v45 = vld [vmem:[%s15892_s1 + $0x1784] sm:$0xf]  ;;  %v9542_v50 = vld [vmem:[%s15892_s1 + $0x1790] sm:$0xf0]  ;;  %v9873_v25 = vld [vmem:[%s15892_s1 + $0x74] sm:$0xf0] }
 0x187   :  { %5471 = vmatpush.bf16.msrb.mxu0 %v8985_v30  ;;  %v9577_v30 = vor.u32 %v10618_v3, %v9574_v8  ;;  %v9670_v53 = vld [vmem:[%s15892_s1 + $0x1890] sm:$0xf0]  ;;  %v9545_v57 = vor.u32 %v10610_v45, %v9542_v50  ;;  %v10638_v8 = vld [vmem:[%s15892_s1 + $0x1864] sm:$0xf]  ;;  %v6716_v26 = vld [vmem:[%s15892_s1 + $0x168] sm:$0xf] }
 0x188   :  { %5484 = vmatpush.bf16.msrb.mxu1 %v9113_v32  ;;  %5497 = vmatpush.bf16.msrb.mxu2 %v9241_v22  ;;  %v10614_v32 = vld [vmem:[%s15892_s1 + $0x17a4] sm:$0xf]  ;;  %v9558_v22 = vld [vmem:[%s15892_s1 + $0x17b0] sm:$0xf0]  ;;  %v6572_v40 = vld [vmem:[%s15892_s1 + $0x48] sm:$0xf] }
 0x189   :  { %5510 = vmatpush.bf16.msrb.mxu3 %v9369_v38  ;;  %v6620_v38 = vld [vmem:[%s15892_s1 + $0xa8] sm:$0xf]  ;;  %v9561_v41 = vor.u32 %v10614_v32, %v9558_v22  ;;  %v9526_v3 = vld [vmem:[%s15892_s1 + $0x1770] sm:$0xf0]  ;;  %v6589_v32 = vor.u32 %v9873_v25, %v6588_v24  ;;  %v10602_v22 = vld [vmem:[%s15892_s1 + $0x1744] sm:$0xf] }
 0x18a   :  { %v6621_v44 = vor.u32 %v9881_v39, %v6620_v38  ;;  %v9654_v23 = vld [vmem:[%s15892_s1 + $0x1870] sm:$0xf0]  ;;  %v9869_v36 = vld [vmem:[%s15892_s1 + $0x54] sm:$0xf0]  ;;  %v10626_v25 = vld [vmem:[%s15892_s1 + $0x1804] sm:$0xf] }
 0x18b   :  { %5472 = vmatpush.bf16.msrb.mxu0 %v8969_v51  ;;  %v10642_v51 = vld [vmem:[%s15892_s1 + $0x1884] sm:$0xf]  ;;  %v9510_v33 = vld [vmem:[%s15892_s1 + $0x1750] sm:$0xf0]  ;;  %v9901_v45 = vld [vmem:[%s15892_s1 + $0x154] sm:$0xf0] }
 0x18c   :  { %5485 = vmatpush.bf16.msrb.mxu1 %v9097_v55  ;;  %5498 = vmatpush.bf16.msrb.mxu2 %v9225_v52  ;;  %v9877_v55 = vld [vmem:[%s15892_s1 + $0x94] sm:$0xf0]  ;;  %v6732_v52 = vld [vmem:[%s15892_s1 + $0x188] sm:$0xf]  ;;  %v9638_v39 = vld [vmem:[%s15892_s1 + $0x1850] sm:$0xf0]  ;;  %v9513_v50 = vor.u32 %v10602_v22, %v9510_v33 }
 0x18d   :  { %5511 = vmatpush.bf16.msrb.mxu3 %v9353_v58  ;;  %v5266_v58 = vpop.f32.mrf.mxu0  ;;  %v6733_v20 = vor.u32 %v9909_v56, %v6732_v52  ;;  %v9494_v52 = vld [vmem:[%s15892_s1 + $0x1730] sm:$0xf0]  ;;  %v10630_v56 = vld [vmem:[%s15892_s1 + $0x1824] sm:$0xf]  ;;  %v9893_v22 = vld [vmem:[%s15892_s1 + $0x114] sm:$0xf0] }
 0x18e   :  { %5473 = vmatmul.bf16.vlgmr.msrb.gmra.mxu0 %v11826_v18  ;;  %v5267_v11 = vadd.f32 %v5266_v58, %v13146_v10  ;;  %v9905_v10 = vld [vmem:[%s15892_s1 + $0x174] sm:$0xf0] }
 0x18f   :  { %5517 = vmatpush.bf16.msra.mxu0 %v9593_v59  ;;  %5499 = vmatmul.bf16.vlgmr.msrb.gmra.mxu2 %v11995_v6  ;;  %v9673_v59 = vor.u32 %v10642_v51, %v9670_v53  ;;  %v6717_v38 = vor.u32 %v9905_v10, %v6716_v26  ;;  %v9606_v26 = vld [vmem:[%s15892_s1 + $0x1810] sm:$0xf0]  ;;  %v6540_v10 = vld [vmem:[%s15892_s1 + $0x8] sm:$0xf] }
 0x190   :  { %5530 = vmatpush.bf16.msra.mxu1 %v9721_v61  ;;  %5543 = vmatpush.bf16.msra.mxu2 %v6653_v62  ;;  %v6605_v61 = vor.u32 %v9877_v55, %v6604_v54  ;;  %v10606_v62 = vld [vmem:[%s15892_s1 + $0x1764] sm:$0xf]  ;;  %v6573_v54 = vor.u32 %v9869_v36, %v6572_v40  ;;  %v9985_v40 = vld [vmem:[%s15892_s1 + $0x3f4] sm:$0xf0]  ;;  %v7164_v36 = vld [vmem:[%s15892_s1 + $0x4e8] sm:$0xf] }
 0x191   :  { %5556 = vmatpush.bf16.msra.mxu3 %v6781_v63  ;;  %5486 = vmatmul.bf16.vlgmr.msrb.gmra.mxu1 %v11991_v4  ;;  %v5279_v63 = vpop.f32.mrf.mxu1  ;;  %v10598_v55 = vld [vmem:[%s15892_s1 + $0x1724] sm:$0xf] }
 0x192   :  { %5512 = vmatmul.bf16.vlgmr.msrb.gmra.mxu3 %v11993_v5  ;;  %v5292_v37 = vpop.f32.mrf.mxu2 }
 0x193   :  { %5518 = vmatpush.bf16.msra.mxu0 %v9577_v30  ;;  %v5280_v30 = vadd.f32 %v5279_v63, %v5267_v11  ;;  %v9497_v11 = vor.u32 %v10598_v55, %v9494_v52  ;;  %v10594_v63 = vld [vmem:[%s15892_s1 + $0x1704] sm:$0xf]  ;;  %v6892_v52 = vld [vmem:[%s15892_s1 + $0x2c8] sm:$0xf] }
 0x194   :  { %5531 = vmatpush.bf16.msra.mxu1 %v9705_v31  ;;  %5544 = vmatpush.bf16.msra.mxu2 %v6637_v21  ;;  %v9529_v31 = vor.u32 %v10606_v62, %v9526_v3  ;;  %v9657_v21 = vor.u32 %v10638_v8, %v9654_v23  ;;  %v9865_v62 = vld [vmem:[%s15892_s1 + $0x34] sm:$0xf0]  ;;  %v6684_v3 = vld [vmem:[%s15892_s1 + $0x128] sm:$0xf] }
 0x195   :  { %5557 = vmatpush.bf16.msra.mxu3 %v6765_v35  ;;  %v10634_v35 = vld [vmem:[%s15892_s1 + $0x1844] sm:$0xf]  ;;  %v9897_v8 = vld [vmem:[%s15892_s1 + $0x134] sm:$0xf0] }
 0x196   :  { %v9641_v53 = vor.u32 %v10634_v35, %v9638_v39  ;;  %v6908_v35 = vld [vmem:[%s15892_s1 + $0x2e8] sm:$0xf] }
 0x197   :  { %5519 = vmatpush.bf16.msra.mxu0 %v9561_v41  ;;  %v5293_v41 = vadd.f32 %v5292_v37, %v5280_v30  ;;  %v9953_v37 = vld [vmem:[%s15892_s1 + $0x2f4] sm:$0xf0] }
 0x198   :  { %5532 = vmatpush.bf16.msra.mxu1 %v9689_v42  ;;  %5545 = vmatpush.bf16.msra.mxu2 %v6621_v44  ;;  %v5305_v42 = vpop.f32.mrf.mxu3  ;;  %v6700_v44 = vld [vmem:[%s15892_s1 + $0x148] sm:$0xf] }
 0x199   :  { %5558 = vmatpush.bf16.msra.mxu3 %v6749_v43  ;;  %v13336_v51 = vadd.f32 %v5305_v42, %v5293_v41  ;;  %v5268_v43 = vpop.f32.mrf.mxu0  ;;  %v6701_v58 = vor.u32 %v9901_v45, %v6700_v44  ;;  %v10017_v41 = vld [vmem:[%s15892_s1 + $0x4f4] sm:$0xf0]  ;;  %v9609_v42 = vor.u32 %v10626_v25, %v9606_v26  ;;  %v7292_v45 = vld [vmem:[%s15892_s1 + $0x5e8] sm:$0xf] }
 0x19a   :  { %v5294_v30 = vpop.f32.mrf.mxu2  ;;  %v7165_v55 = vor.u32 %v10017_v41, %v7164_v36  ;;  %v7004_v25 = vld [vmem:[%s15892_s1 + $0x3a8] sm:$0xf]  ;;  %v9973_v41 = vld [vmem:[%s15892_s1 + $0x394] sm:$0xf0] }
 0x19b   :  { %5520 = vmatpush.bf16.msra.mxu0 %v9545_v57  ;;  %v5281_v57 = vpop.f32.mrf.mxu1  ;;  %v7132_v30 = vld [vmem:[%s15892_s1 + $0x4a8] sm:$0xf] }
 0x19c   :  { %5533 = vmatpush.bf16.msra.mxu1 %v9673_v59  ;;  %5546 = vmatpush.bf16.msra.mxu2 %v6605_v61  ;;  %v9622_v59 = vld [vmem:[%s15892_s1 + $0x1830] sm:$0xf0]  ;;  %v6556_v61 = vld [vmem:[%s15892_s1 + $0x28] sm:$0xf] }
 0x19d   :  { %5559 = vmatpush.bf16.msra.mxu3 %v6733_v20  ;;  %v9478_v20 = vld [vmem:[%s15892_s1 + $0x1710] sm:$0xf0]  ;;  %v9625_v23 = vor.u32 %v10630_v56, %v9622_v59  ;;  %v6557_v24 = vor.u32 %v9865_v62, %v6556_v61  ;;  %v9949_v56 = vld [vmem:[%s15892_s1 + $0x2d4] sm:$0xf0]  ;;  %v7020_v57 = vld [vmem:[%s15892_s1 + $0x3c8] sm:$0xf] }
 0x19e   :  { %v9481_v39 = vor.u32 %v10594_v63, %v9478_v20  ;;  %v9981_v59 = vld [vmem:[%s15892_s1 + $0x3d4] sm:$0xf0]  ;;  %v7148_v61 = vld [vmem:[%s15892_s1 + $0x4c8] sm:$0xf] }
 0x19f   :  { %5521 = vmatpush.bf16.msra.mxu0 %v9529_v31  ;;  %v6685_v31 = vor.u32 %v9897_v8, %v6684_v3  ;;  %v10013_v62 = vld [vmem:[%s15892_s1 + $0x4d4] sm:$0xf0]  ;;  %v7276_v3 = vld [vmem:[%s15892_s1 + $0x5c8] sm:$0xf]  ;;  %v7021_v63 = vor.u32 %v9981_v59, %v7020_v57 }
 0x1a0   :  { %5534 = vmatpush.bf16.msra.mxu1 %v9657_v21  ;;  %5547 = vmatpush.bf16.msra.mxu2 %v6589_v32  ;;  %v9861_v21 = vld [vmem:[%s15892_s1 + $0x14] sm:$0xf0]  ;;  %v6668_v32 = vld [vmem:[%s15892_s1 + $0x108] sm:$0xf]  ;;  %v5307_v33 = vpop.f32.mrf.mxu3  ;;  %v7149_v20 = vor.u32 %v10013_v62, %v7148_v61 }
 0x1a1   :  { %5560 = vmatpush.bf16.msra.mxu3 %v6717_v38  ;;  %v7036_v38 = vld [vmem:[%s15892_s1 + $0x3e8] sm:$0xf]  ;;  %v6541_v44 = vor.u32 %v9861_v21, %v6540_v10  ;;  %v6669_v43 = vor.u32 %v9893_v22, %v6668_v32  ;;  %v10045_v8 = vld [vmem:[%s15892_s1 + $0x5d4] sm:$0xf0]  ;;  %v10693_v21 = vld [vmem:[#allocation1] sm:$0xff] }
 0x1a2   :  { %v7277_v26 = vor.u32 %v10045_v8, %v7276_v3  ;;  %v9977_v10 = vld [vmem:[%s15892_s1 + $0x3b4] sm:$0xf0]  ;;  %v7260_v32 = vld [vmem:[%s15892_s1 + $0x5a8] sm:$0xf] }
 0x1a3   :  { %5522 = vmatpush.bf16.msra.mxu0 %v9513_v50  ;;  %v10049_v50 = vld [vmem:[%s15892_s1 + $0x5f4] sm:$0xf0]  ;;  %v6844_v57 = vld [vmem:[%s15892_s1 + $0x268] sm:$0xf] }
 0x1a4   :  { %5535 = vmatpush.bf16.msra.mxu1 %v9641_v53  ;;  %5548 = vmatpush.bf16.msra.mxu2 %v6573_v54  ;;  %v6909_v53 = vor.u32 %v9953_v37, %v6908_v35  ;;  %v7037_v54 = vor.u32 %v9985_v40, %v7036_v38  ;;  %v10041_v22 = vld [vmem:[%s15892_s1 + $0x5b4] sm:$0xf0]  ;;  %v7005_v35 = vor.u32 %v9977_v10, %v7004_v25  ;;  %v6860_v38 = vld [vmem:[%s15892_s1 + $0x288] sm:$0xf] }
 0x1a5   :  { %5561 = vmatpush.bf16.msra.mxu3 %v6701_v58  ;;  %v7293_v58 = vor.u32 %v10049_v50, %v7292_v45  ;;  %v6988_v40 = vld [vmem:[%s15892_s1 + $0x388] sm:$0xf]  ;;  %v7261_v36 = vor.u32 %v10041_v22, %v7260_v32  ;;  %v9969_v62 = vld [vmem:[%s15892_s1 + $0x374] sm:$0xf0] }
 0x1a6   :  { %v7244_v50 = vld [vmem:[%s15892_s1 + $0x588] sm:$0xf]  ;;  %v10001_v8 = vld [vmem:[%s15892_s1 + $0x474] sm:$0xf0] }
 0x1a7   :  { %5523 = vmatpush.bf16.msra.mxu0 %v9497_v11  ;;  %v6893_v11 = vor.u32 %v9949_v56, %v6892_v52  ;;  %v6989_v52 = vor.u32 %v9973_v41, %v6988_v40  ;;  %v6972_v59 = vld [vmem:[%s15892_s1 + $0x368] sm:$0xf]  ;;  %v9997_v22 = vld [vmem:[%s15892_s1 + $0x454] sm:$0xf0] }
 0x1a8   :  { %5536 = vmatpush.bf16.msra.mxu1 %v9625_v23  ;;  %5549 = vmatpush.bf16.msra.mxu2 %v6557_v24  ;;  %v6876_v23 = vld [vmem:[%s15892_s1 + $0x2a8] sm:$0xf]  ;;  %v9945_v24 = vld [vmem:[%s15892_s1 + $0x2b4] sm:$0xf0] }
 0x1a9   :  { %5562 = vmatpush.bf16.msra.mxu3 %v6685_v31  ;;  %v10009_v31 = vld [vmem:[%s15892_s1 + $0x4b4] sm:$0xf0]  ;;  %v6877_v33 = vor.u32 %v9945_v24, %v6876_v23  ;;  %v7100_v3 = vld [vmem:[%s15892_s1 + $0x468] sm:$0xf]  ;;  %v6973_v23 = vor.u32 %v9969_v62, %v6972_v59 }
 0x1aa   :  { %v7133_v37 = vor.u32 %v10009_v31, %v7132_v30  ;;  %v7101_v24 = vor.u32 %v10001_v8, %v7100_v3  ;;  %v6828_v25 = vld [vmem:[%s15892_s1 + $0x248] sm:$0xf]  ;;  %v9957_v8 = vld [vmem:[%s15892_s1 + $0x314] sm:$0xf0] }
 0x1ab   :  { %5524 = vmatpush.bf16.msra.mxu0 %v9481_v39  ;;  %v9941_v39 = vld [vmem:[%s15892_s1 + $0x294] sm:$0xf0]  ;;  %v5318_v45 = vpop.f32.mrf.mxu0  ;;  %v6956_v10 = vld [vmem:[%s15892_s1 + $0x348] sm:$0xf] }
 0x1ac   :  { %5537 = vmatpush.bf16.msra.mxu1 %v9609_v42  ;;  %5550 = vmatpush.bf16.msra.mxu2 %v6541_v44  ;;  %v7116_v42 = vld [vmem:[%s15892_s1 + $0x488] sm:$0xf]  ;;  %v10005_v44 = vld [vmem:[%s15892_s1 + $0x494] sm:$0xf0] }
 0x1ad   :  { %5563 = vmatpush.bf16.msra.mxu3 %v6669_v43  ;;  %v10037_v43 = vld [vmem:[%s15892_s1 + $0x594] sm:$0xf0]  ;;  %v7117_v56 = vor.u32 %v10005_v44, %v7116_v42  ;;  %v7084_v32 = vld [vmem:[%s15892_s1 + $0x448] sm:$0xf] }
 0x1ae   :  { %5525 = vmatmul.bf16.vlgmr.msra.gmra.mxu0 %v11997_v7  ;;  %v7085_v44 = vor.u32 %v9997_v22, %v7084_v32  ;;  %v6796_v59 = vld [vmem:[%s15892_s1 + $0x208] sm:$0xf]  ;;  %v10113_v32 = vld [vmem:[%s15892_s1 + $0x7f4] sm:$0xf0] }
 0x1af   :  { %5569 = vmatpush.bf16.msrb.mxu0 %v6909_v53  ;;  %5538 = vmatmul.bf16.vlgmr.msra.gmra.mxu1 %v10693_v21  ;;  %v5319_v53 = vadd.f32 %v5318_v45, %v13336_v51  ;;  %v7245_v51 = vor.u32 %v10037_v43, %v7244_v50  ;;  %v9965_v21 = vld [vmem:[%s15892_s1 + $0x354] sm:$0xf0]  ;;  %v6812_v45 = vld [vmem:[%s15892_s1 + $0x228] sm:$0xf] }
 0x1b0   :  { %5582 = vmatpush.bf16.msrb.mxu1 %v7037_v54  ;;  %5595 = vmatpush.bf16.msrb.mxu2 %v7165_v55  ;;  %v6861_v54 = vor.u32 %v9941_v39, %v6860_v38  ;;  %v5331_v55 = vpop.f32.mrf.mxu1  ;;  %v10029_v38 = vld [vmem:[%s15892_s1 + $0x554] sm:$0xf0]  ;;  %v6957_v42 = vor.u32 %v9965_v21, %v6956_v10  ;;  %v6940_v43 = vld [vmem:[%s15892_s1 + $0x328] sm:$0xf] }
 0x1b1   :  { %5608 = vmatpush.bf16.msrb.mxu3 %v7293_v58  ;;  %5551 = vmatmul.bf16.vlgmr.msra.gmra.mxu2 %v11075_v28  ;;  %v9937_v58 = vld [vmem:[%s15892_s1 + $0x274] sm:$0xf0]  ;;  %v5332_v61 = vadd.f32 %v5331_v55, %v5319_v53  ;;  %v7068_v55 = vld [vmem:[%s15892_s1 + $0x428] sm:$0xf] }
 0x1b2   :  { %5564 = vmatmul.bf16.vlgmr.msra.gmra.mxu3 %v11085_v34  ;;  %v5344_v31 = vpop.f32.mrf.mxu2  ;;  %v9929_v50 = vld [vmem:[%s15892_s1 + $0x234] sm:$0xf0]  ;;  %v6924_v3 = vld [vmem:[%s15892_s1 + $0x308] sm:$0xf] }
 0x1b3   :  { %5570 = vmatpush.bf16.msrb.mxu0 %v6893_v11  ;;  %v7228_v11 = vld [vmem:[%s15892_s1 + $0x568] sm:$0xf]  ;;  %v5320_v39 = vpop.f32.mrf.mxu0  ;;  %v10081_v10 = vld [vmem:[%s15892_s1 + $0x6f4] sm:$0xf0] }
 0x1b4   :  { %5583 = vmatpush.bf16.msrb.mxu1 %v7021_v63  ;;  %5596 = vmatpush.bf16.msrb.mxu2 %v7149_v20  ;;  %v10033_v63 = vld [vmem:[%s15892_s1 + $0x574] sm:$0xf0]  ;;  %v6845_v20 = vor.u32 %v9937_v58, %v6844_v57  ;;  %v6813_v58 = vor.u32 %v9929_v50, %v6812_v45  ;;  %v7676_v22 = vld [vmem:[%s15892_s1 + $0x8e8] sm:$0xf] }
 0x1b5   :  { %5609 = vmatpush.bf16.msrb.mxu3 %v7277_v26  ;;  %v9933_v26 = vld [vmem:[%s15892_s1 + $0x254] sm:$0xf0]  ;;  %v7229_v30 = vor.u32 %v10033_v63, %v7228_v11  ;;  %v7052_v11 = vld [vmem:[%s15892_s1 + $0x408] sm:$0xf] }
 0x1b6   :  { %v6829_v40 = vor.u32 %v9933_v26, %v6828_v25  ;;  %v10025_v57 = vld [vmem:[%s15892_s1 + $0x534] sm:$0xf0]  ;;  %v7420_v26 = vld [vmem:[%s15892_s1 + $0x6e8] sm:$0xf] }
 0x1b7   :  { %5571 = vmatpush.bf16.msrb.mxu0 %v6877_v33  ;;  %v5345_v33 = vadd.f32 %v5344_v31, %v5332_v61  ;;  %v10177_v39 = vld [vmem:[%s15892_s1 + $0x9f4] sm:$0xf0]  ;;  %v7404_v45 = vld [vmem:[%s15892_s1 + $0x6c8] sm:$0xf] }
 0x1b8   :  { %5584 = vmatpush.bf16.msrb.mxu1 %v7005_v35  ;;  %5597 = vmatpush.bf16.msrb.mxu2 %v7133_v37  ;;  %v5357_v35 = vpop.f32.mrf.mxu3  ;;  %v7212_v37 = vld [vmem:[%s15892_s1 + $0x548] sm:$0xf]  ;;  %v10077_v50 = vld [vmem:[%s15892_s1 + $0x6d4] sm:$0xf0] }
 0x1b9   :  { %5610 = vmatpush.bf16.msrb.mxu3 %v7261_v36  ;;  %v5333_v36 = vpop.f32.mrf.mxu1  ;;  %v13534_v41 = vadd.f32 %v5357_v35, %v5345_v33  ;;  %v7213_v53 = vor.u32 %v10029_v38, %v7212_v37  ;;  %v10145_v33 = vld [vmem:[%s15892_s1 + $0x8f4] sm:$0xf0]  ;;  %v6925_v35 = vor.u32 %v9957_v8, %v6924_v3  ;;  %v7804_v38 = vld [vmem:[%s15892_s1 + $0x9e8] sm:$0xf] }
 0x1ba   :  { %v5346_v25 = vpop.f32.mrf.mxu2  ;;  %v7421_v36 = vor.u32 %v10081_v10, %v7420_v26  ;;  %v7516_v3 = vld [vmem:[%s15892_s1 + $0x7a8] sm:$0xf] }
 0x1bb   :  { %5572 = vmatpush.bf16.msrb.mxu0 %v6861_v54  ;;  %v9961_v54 = vld [vmem:[%s15892_s1 + $0x334] sm:$0xf0] }
 0x1bc   :  { %5585 = vmatpush.bf16.msrb.mxu1 %v6989_v52  ;;  %5598 = vmatpush.bf16.msrb.mxu2 %v7117_v56  ;;  %v9993_v52 = vld [vmem:[%s15892_s1 + $0x434] sm:$0xf0]  ;;  %v7196_v56 = vld [vmem:[%s15892_s1 + $0x528] sm:$0xf]  ;;  %v6941_v61 = vor.u32 %v9961_v54, %v6940_v43 }
 0x1bd   :  { %5611 = vmatpush.bf16.msrb.mxu3 %v7245_v51  ;;  %v9925_v51 = vld [vmem:[%s15892_s1 + $0x214] sm:$0xf0]  ;;  %v7069_v62 = vor.u32 %v9993_v52, %v7068_v55  ;;  %v7197_v63 = vor.u32 %v10025_v57, %v7196_v56  ;;  %v7532_v43 = vld [vmem:[%s15892_s1 + $0x7c8] sm:$0xf] }
 0x1be   :  { %v6797_v21 = vor.u32 %v9925_v51, %v6796_v59  ;;  %v10109_v54 = vld [vmem:[%s15892_s1 + $0x7d4] sm:$0xf0]  ;;  %v7660_v55 = vld [vmem:[%s15892_s1 + $0x8c8] sm:$0xf] }
 0x1bf   :  { %5573 = vmatpush.bf16.msrb.mxu0 %v6845_v20  ;;  %v9989_v20 = vld [vmem:[%s15892_s1 + $0x414] sm:$0xf0]  ;;  %v7788_v56 = vld [vmem:[%s15892_s1 + $0x9c8] sm:$0xf]  ;;  %v7533_v59 = vor.u32 %v10109_v54, %v7532_v43 }
 0x1c0   :  { %5586 = vmatpush.bf16.msrb.mxu1 %v6973_v23  ;;  %5599 = vmatpush.bf16.msrb.mxu2 %v7101_v24  ;;  %v7180_v23 = vld [vmem:[%s15892_s1 + $0x508] sm:$0xf]  ;;  %v10021_v24 = vld [vmem:[%s15892_s1 + $0x514] sm:$0xf0]  ;;  %v5359_v31 = vpop.f32.mrf.mxu3  ;;  %v7053_v37 = vor.u32 %v9989_v20, %v7052_v11 }
 0x1c1   :  { %5612 = vmatpush.bf16.msrb.mxu3 %v7229_v30  ;;  %v7548_v30 = vld [vmem:[%s15892_s1 + $0x7e8] sm:$0xf]  ;;  %v10141_v52 = vld [vmem:[%s15892_s1 + $0x8d4] sm:$0xf0] }
 0x1c2   :  { %v10173_v57 = vld [vmem:[%s15892_s1 + $0x9d4] sm:$0xf0]  ;;  %v7661_v51 = vor.u32 %v10141_v52, %v7660_v55  ;;  %v7612_v52 = vld [vmem:[%s15892_s1 + $0x868] sm:$0xf] }
 0x1c3   :  { %5574 = vmatpush.bf16.msrb.mxu0 %v6829_v40  ;;  %v7181_v40 = vor.u32 %v10021_v24, %v7180_v23  ;;  %v7789_v8 = vor.u32 %v10173_v57, %v7788_v56  ;;  %v10105_v11 = vld [vmem:[%s15892_s1 + $0x7b4] sm:$0xf0]  ;;  %v7772_v23 = vld [vmem:[%s15892_s1 + $0x9a8] sm:$0xf] }
 0x1c4   :  { %5587 = vmatpush.bf16.msrb.mxu1 %v6957_v42  ;;  %5600 = vmatpush.bf16.msrb.mxu2 %v7085_v44  ;;  %v7549_v42 = vor.u32 %v10113_v32, %v7548_v30  ;;  %v7677_v44 = vor.u32 %v10145_v33, %v7676_v22  ;;  %v10137_v20 = vld [vmem:[%s15892_s1 + $0x8b4] sm:$0xf0]  ;;  %v7517_v26 = vor.u32 %v10105_v11, %v7516_v3  ;;  %v7372_v30 = vld [vmem:[%s15892_s1 + $0x688] sm:$0xf] }
 0x1c5   :  { %5613 = vmatpush.bf16.msrb.mxu3 %v7213_v53  ;;  %v7805_v53 = vor.u32 %v10177_v39, %v7804_v38  ;;  %v10169_v24 = vld [vmem:[%s15892_s1 + $0x9b4] sm:$0xf0]  ;;  %v7628_v33 = vld [vmem:[%s15892_s1 + $0x888] sm:$0xf] }
 0x1c6   :  { %v10069_v31 = vld [vmem:[%s15892_s1 + $0x694] sm:$0xf0]  ;;  %v7773_v32 = vor.u32 %v10169_v24, %v7772_v23  ;;  %v7756_v38 = vld [vmem:[%s15892_s1 + $0x988] sm:$0xf] }
 0x1c7   :  { %5575 = vmatpush.bf16.msrb.mxu0 %v6813_v58  ;;  %v7405_v58 = vor.u32 %v10077_v50, %v7404_v45  ;;  %v10101_v22 = vld [vmem:[%s15892_s1 + $0x794] sm:$0xf0]  ;;  %v7356_v50 = vld [vmem:[%s15892_s1 + $0x668] sm:$0xf] }
 0x1c8   :  { %5588 = vmatpush.bf16.msrb.mxu1 %v6941_v61  ;;  %5601 = vmatpush.bf16.msrb.mxu2 %v7069_v62  ;;  %v7388_v61 = vld [vmem:[%s15892_s1 + $0x6a8] sm:$0xf]  ;;  %v10073_v62 = vld [vmem:[%s15892_s1 + $0x6b4] sm:$0xf0] }
 0x1c9   :  { %5614 = vmatpush.bf16.msrb.mxu3 %v7197_v63  ;;  %v7644_v63 = vld [vmem:[%s15892_s1 + $0x8a8] sm:$0xf]  ;;  %v7389_v25 = vor.u32 %v10073_v62, %v7388_v61  ;;  %v10165_v39 = vld [vmem:[%s15892_s1 + $0x994] sm:$0xf0] }
 0x1ca   :  { %v7645_v10 = vor.u32 %v10137_v20, %v7644_v63  ;;  %v10065_v43 = vld [vmem:[%s15892_s1 + $0x674] sm:$0xf0]  ;;  %v7740_v57 = vld [vmem:[%s15892_s1 + $0x968] sm:$0xf] }
 0x1cb   :  { %5576 = vmatpush.bf16.msrb.mxu0 %v6797_v21  ;;  %v7500_v21 = vld [vmem:[%s15892_s1 + $0x788] sm:$0xf]  ;;  %v10097_v55 = vld [vmem:[%s15892_s1 + $0x774] sm:$0xf0] }
 0x1cc   :  { %5589 = vmatpush.bf16.msrb.mxu1 %v6925_v35  ;;  %5602 = vmatpush.bf16.msrb.mxu2 %v7053_v37  ;;  %v10133_v35 = vld [vmem:[%s15892_s1 + $0x894] sm:$0xf0]  ;;  %v5370_v37 = vpop.f32.mrf.mxu0  ;;  %v7340_v62 = vld [vmem:[%s15892_s1 + $0x648] sm:$0xf] }
 0x1cd   :  { %5615 = vmatpush.bf16.msrb.mxu3 %v7181_v40  ;;  %v5371_v40 = vadd.f32 %v5370_v37, %v13534_v41  ;;  %v7629_v45 = vor.u32 %v10133_v35, %v7628_v33  ;;  %v7757_v41 = vor.u32 %v10165_v39, %v7756_v38  ;;  %v10129_v56 = vld [vmem:[%s15892_s1 + $0x874] sm:$0xf0]  ;;  %v7596_v23 = vld [vmem:[%s15892_s1 + $0x848] sm:$0xf] }
 0x1ce   :  { %5577 = vmatmul.bf16.vlgmr.msrb.gmra.mxu0 %v11073_v27  ;;  %v7613_v61 = vor.u32 %v10129_v56, %v7612_v52  ;;  %v10061_v3 = vld [vmem:[%s15892_s1 + $0x654] sm:$0xf0]  ;;  %v7324_v37 = vld [vmem:[%s15892_s1 + $0x628] sm:$0xf] }
 0x1cf   :  { %5621 = vmatpush.bf16.msra.mxu0 %v7421_v36  ;;  %5603 = vmatmul.bf16.vlgmr.msrb.gmra.mxu2 %v11153_v0  ;;  %v7373_v36 = vor.u32 %v10069_v31, %v7372_v30  ;;  %v10093_v20 = vld [vmem:[%s15892_s1 + $0x754] sm:$0xf0]  ;;  %v7452_v39 = vld [vmem:[%s15892_s1 + $0x728] sm:$0xf] }
 0x1d0   :  { %5634 = vmatpush.bf16.msra.mxu1 %v7549_v42  ;;  %5647 = vmatpush.bf16.msra.mxu2 %v7677_v44  ;;  %v5383_v42 = vpop.f32.mrf.mxu1  ;;  %v7501_v44 = vor.u32 %v10101_v22, %v7500_v21  ;;  %v10125_v24 = vld [vmem:[%s15892_s1 + $0x854] sm:$0xf0]  ;;  %v7341_v21 = vor.u32 %v10061_v3, %v7340_v62  ;;  %v7436_v52 = vld [vmem:[%s15892_s1 + $0x708] sm:$0xf] }
 0x1d1   :  { %5660 = vmatpush.bf16.msra.mxu3 %v7805_v53  ;;  %5590 = vmatmul.bf16.vlgmr.msrb.gmra.mxu1 %v11077_v29  ;;  %v7484_v53 = vld [vmem:[%s15892_s1 + $0x768] sm:$0xf]  ;;  %v5384_v54 = vadd.f32 %v5383_v42, %v5371_v40  ;;  %v10157_v30 = vld [vmem:[%s15892_s1 + $0x954] sm:$0xf0]  ;;  %v7597_v35 = vor.u32 %v10125_v24, %v7596_v23 }
 0x1d2   :  { %5616 = vmatmul.bf16.vlgmr.msrb.gmra.mxu3 %v11157_v2  ;;  %v5396_v63 = vpop.f32.mrf.mxu2  ;;  %v10057_v38 = vld [vmem:[%s15892_s1 + $0x634] sm:$0xf0]  ;;  %v7580_v42 = vld [vmem:[%s15892_s1 + $0x828] sm:$0xf] }
 0x1d3   :  { %5622 = vmatpush.bf16.msra.mxu0 %v7405_v58  ;;  %v10161_v58 = vld [vmem:[%s15892_s1 + $0x974] sm:$0xf0]  ;;  %v7932_v3 = vld [vmem:[%s15892_s1 + $0xae8] sm:$0xf] }
 0x1d4   :  { %5635 = vmatpush.bf16.msra.mxu1 %v7533_v59  ;;  %5648 = vmatpush.bf16.msra.mxu2 %v7661_v51  ;;  %v7357_v59 = vor.u32 %v10065_v43, %v7356_v50  ;;  %v7485_v51 = vor.u32 %v10097_v55, %v7484_v53  ;;  %v7741_v11 = vor.u32 %v10161_v58, %v7740_v57  ;;  %v5372_v31 = vpop.f32.mrf.mxu0  ;;  %v10153_v50 = vld [vmem:[%s15892_s1 + $0x934] sm:$0xf0]  ;;  %v7308_v53 = vld [vmem:[%s15892_s1 + $0x608] sm:$0xf] }
 0x1d5   :  { %5661 = vmatpush.bf16.msra.mxu3 %v7789_v8  ;;  %v7468_v8 = vld [vmem:[%s15892_s1 + $0x748] sm:$0xf]  ;;  %v7325_v43 = vor.u32 %v10057_v38, %v7324_v37  ;;  %v10085_v56 = vld [vmem:[%s15892_s1 + $0x714] sm:$0xf0] }
 0x1d6   :  { %v7469_v33 = vor.u32 %v10093_v20, %v7468_v8  ;;  %v7564_v57 = vld [vmem:[%s15892_s1 + $0x808] sm:$0xf]  ;;  %v10209_v8 = vld [vmem:[%s15892_s1 + $0xaf4] sm:$0xf0] }
 0x1d7   :  { %5623 = vmatpush.bf16.msra.mxu0 %v7389_v25  ;;  %v5397_v25 = vadd.f32 %v5396_v63, %v5384_v54  ;;  %v10241_v23 = vld [vmem:[%s15892_s1 + $0xbf4] sm:$0xf0]  ;;  %v8188_v24 = vld [vmem:[%s15892_s1 + $0xce8] sm:$0xf] }
 0x1d8   :  { %5636 = vmatpush.bf16.msra.mxu1 %v7517_v26  ;;  %5649 = vmatpush.bf16.msra.mxu2 %v7645_v10  ;;  %v5409_v26 = vpop.f32.mrf.mxu3  ;;  %v7724_v10 = vld [vmem:[%s15892_s1 + $0x948] sm:$0xf]  ;;  %v10305_v31 = vld [vmem:[%s15892_s1 + $0xdf4] sm:$0xf0] }
 0x1d9   :  { %5662 = vmatpush.bf16.msra.mxu3 %v7773_v32  ;;  %v5385_v32 = vpop.f32.mrf.mxu1  ;;  %v13733_v22 = vadd.f32 %v5409_v26, %v5397_v25  ;;  %v7725_v40 = vor.u32 %v10157_v30, %v7724_v10  ;;  %v10273_v25 = vld [vmem:[%s15892_s1 + $0xcf4] sm:$0xf0]  ;;  %v7437_v26 = vor.u32 %v10085_v56, %v7436_v52  ;;  %v8316_v30 = vld [vmem:[%s15892_s1 + $0xde8] sm:$0xf] }
 0x1da   :  { %v5398_v62 = vpop.f32.mrf.mxu2  ;;  %v7933_v32 = vor.u32 %v10209_v8, %v7932_v3  ;;  %v7916_v37 = vld [vmem:[%s15892_s1 + $0xac8] sm:$0xf]  ;;  %v10205_v38 = vld [vmem:[%s15892_s1 + $0xad4] sm:$0xf0] }
 0x1db   :  { %5624 = vmatpush.bf16.msra.mxu0 %v7373_v36  ;;  %v10089_v36 = vld [vmem:[%s15892_s1 + $0x734] sm:$0xf0]  ;;  %v8028_v52 = vld [vmem:[%s15892_s1 + $0xba8] sm:$0xf] }
 0x1dc   :  { %5637 = vmatpush.bf16.msra.mxu1 %v7501_v44  ;;  %5650 = vmatpush.bf16.msra.mxu2 %v7629_v45  ;;  %v10121_v44 = vld [vmem:[%s15892_s1 + $0x834] sm:$0xf0]  ;;  %v7708_v45 = vld [vmem:[%s15892_s1 + $0x928] sm:$0xf]  ;;  %v7453_v54 = vor.u32 %v10089_v36, %v7452_v39 }
 0x1dd   :  { %5663 = vmatpush.bf16.msra.mxu3 %v7757_v41  ;;  %v10053_v41 = vld [vmem:[%s15892_s1 + $0x614] sm:$0xf0]  ;;  %v7581_v55 = vor.u32 %v10121_v44, %v7580_v42  ;;  %v7709_v58 = vor.u32 %v10153_v50, %v7708_v45  ;;  %v8044_v39 = vld [vmem:[%s15892_s1 + $0xbc8] sm:$0xf] }
 0x1de   :  { %v7309_v20 = vor.u32 %v10053_v41, %v7308_v53  ;;  %v10237_v36 = vld [vmem:[%s15892_s1 + $0xbd4] sm:$0xf0]  ;;  %v8172_v42 = vld [vmem:[%s15892_s1 + $0xcc8] sm:$0xf] }
 0x1df   :  { %5625 = vmatpush.bf16.msra.mxu0 %v7357_v59  ;;  %v10117_v59 = vld [vmem:[%s15892_s1 + $0x814] sm:$0xf0]  ;;  %v8300_v45 = vld [vmem:[%s15892_s1 + $0xdc8] sm:$0xf]  ;;  %v8045_v53 = vor.u32 %v10237_v36, %v8044_v39 }
 0x1e0   :  { %5638 = vmatpush.bf16.msra.mxu1 %v7485_v51  ;;  %5651 = vmatpush.bf16.msra.mxu2 %v7613_v61  ;;  %v7692_v51 = vld [vmem:[%s15892_s1 + $0x908] sm:$0xf]  ;;  %v10149_v61 = vld [vmem:[%s15892_s1 + $0x914] sm:$0xf0]  ;;  %v5411_v63 = vpop.f32.mrf.mxu3  ;;  %v7565_v10 = vor.u32 %v10117_v59, %v7564_v57 }
 0x1e1   :  { %5664 = vmatpush.bf16.msra.mxu3 %v7741_v11  ;;  %v8060_v11 = vld [vmem:[%s15892_s1 + $0xbe8] sm:$0xf]  ;;  %v10269_v44 = vld [vmem:[%s15892_s1 + $0xcd4] sm:$0xf0] }
 0x1e2   :  { %v10301_v50 = vld [vmem:[%s15892_s1 + $0xdd4] sm:$0xf0]  ;;  %v8173_v41 = vor.u32 %v10269_v44, %v8172_v42  ;;  %v8124_v44 = vld [vmem:[%s15892_s1 + $0xc68] sm:$0xf] }
 0x1e3   :  { %5626 = vmatpush.bf16.msra.mxu0 %v7341_v21  ;;  %v7693_v21 = vor.u32 %v10149_v61, %v7692_v51  ;;  %v8301_v56 = vor.u32 %v10301_v50, %v8300_v45  ;;  %v10233_v57 = vld [vmem:[%s15892_s1 + $0xbb4] sm:$0xf0]  ;;  %v8284_v51 = vld [vmem:[%s15892_s1 + $0xda8] sm:$0xf] }
 0x1e4   :  { %5639 = vmatpush.bf16.msra.mxu1 %v7469_v33  ;;  %5652 = vmatpush.bf16.msra.mxu2 %v7597_v35  ;;  %v8061_v33 = vor.u32 %v10241_v23, %v8060_v11  ;;  %v8189_v35 = vor.u32 %v10273_v25, %v8188_v24  ;;  %v10265_v59 = vld [vmem:[%s15892_s1 + $0xcb4] sm:$0xf0]  ;;  %v8029_v3 = vor.u32 %v10233_v57, %v8028_v52  ;;  %v7884_v11 = vld [vmem:[%s15892_s1 + $0xa88] sm:$0xf] }
 0x1e5   :  { %5665 = vmatpush.bf16.msra.mxu3 %v7725_v40  ;;  %v8317_v40 = vor.u32 %v10305_v31, %v8316_v30  ;;  %v10297_v61 = vld [vmem:[%s15892_s1 + $0xdb4] sm:$0xf0]  ;;  %v8140_v25 = vld [vmem:[%s15892_s1 + $0xc88] sm:$0xf] }
 0x1e6   :  { %v10197_v63 = vld [vmem:[%s15892_s1 + $0xa94] sm:$0xf0]  ;;  %v8285_v23 = vor.u32 %v10297_v61, %v8284_v51  ;;  %v8268_v30 = vld [vmem:[%s15892_s1 + $0xd88] sm:$0xf] }
 0x1e7   :  { %5627 = vmatpush.bf16.msra.mxu0 %v7325_v43  ;;  %v7917_v43 = vor.u32 %v10205_v38, %v7916_v37  ;;  %v10229_v24 = vld [vmem:[%s15892_s1 + $0xb94] sm:$0xf0]  ;;  %v7868_v38 = vld [vmem:[%s15892_s1 + $0xa68] sm:$0xf] }
 0x1e8   :  { %5640 = vmatpush.bf16.msra.mxu1 %v7453_v54  ;;  %5653 = vmatpush.bf16.msra.mxu2 %v7581_v55  ;;  %v7900_v54 = vld [vmem:[%s15892_s1 + $0xaa8] sm:$0xf]  ;;  %v10201_v55 = vld [vmem:[%s15892_s1 + $0xab4] sm:$0xf0] }
 0x1e9   :  { %5666 = vmatpush.bf16.msra.mxu3 %v7709_v58  ;;  %v8156_v58 = vld [vmem:[%s15892_s1 + $0xca8] sm:$0xf]  ;;  %v7901_v62 = vor.u32 %v10201_v55, %v7900_v54  ;;  %v10293_v31 = vld [vmem:[%s15892_s1 + $0xd94] sm:$0xf0] }
 0x1ea   :  { %v8157_v8 = vor.u32 %v10265_v59, %v8156_v58  ;;  %v10193_v39 = vld [vmem:[%s15892_s1 + $0xa74] sm:$0xf0]  ;;  %v8252_v50 = vld [vmem:[%s15892_s1 + $0xd68] sm:$0xf] }
 0x1eb   :  { %5628 = vmatpush.bf16.msra.mxu0 %v7309_v20  ;;  %v8012_v20 = vld [vmem:[%s15892_s1 + $0xb88] sm:$0xf]  ;;  %v10225_v42 = vld [vmem:[%s15892_s1 + $0xb74] sm:$0xf0] }
 0x1ec   :  { %5641 = vmatpush.bf16.msra.mxu1 %v7437_v26  ;;  %5654 = vmatpush.bf16.msra.mxu2 %v7565_v10  ;;  %v10261_v26 = vld [vmem:[%s15892_s1 + $0xc94] sm:$0xf0]  ;;  %v5422_v10 = vpop.f32.mrf.mxu0  ;;  %v7852_v55 = vld [vmem:[%s15892_s1 + $0xa48] sm:$0xf] }
 0x1ed   :  { %5667 = vmatpush.bf16.msra.mxu3 %v7693_v21  ;;  %v5423_v21 = vadd.f32 %v5422_v10, %v13733_v22  ;;  %v8141_v37 = vor.u32 %v10261_v26, %v8140_v25  ;;  %v8269_v22 = vor.u32 %v10293_v31, %v8268_v30  ;;  %v10257_v45 = vld [vmem:[%s15892_s1 + $0xc74] sm:$0xf0]  ;;  %v8108_v51 = vld [vmem:[%s15892_s1 + $0xc48] sm:$0xf] }
 0x1ee   :  { %5629 = vmatmul.bf16.vlgmr.msra.gmra.mxu0 %v11148_v60  ;;  %v8125_v54 = vor.u32 %v10257_v45, %v8124_v44  ;;  %v10189_v52 = vld [vmem:[%s15892_s1 + $0xa54] sm:$0xf0]  ;;  %v7836_v10 = vld [vmem:[%s15892_s1 + $0xa28] sm:$0xf] }
 0x1ef   :  { %5673 = vmatpush.bf16.msrb.mxu0 %v7933_v32  ;;  %5655 = vmatmul.bf16.vlgmr.msra.gmra.mxu2 %v11403_v12  ;;  %v7885_v32 = vor.u32 %v10197_v63, %v7884_v11  ;;  %v10221_v59 = vld [vmem:[%s15892_s1 + $0xb54] sm:$0xf0]  ;;  %v7964_v31 = vld [vmem:[%s15892_s1 + $0xb28] sm:$0xf] }
 0x1f0   :  { %5686 = vmatpush.bf16.msrb.mxu1 %v8061_v33  ;;  %5699 = vmatpush.bf16.msrb.mxu2 %v8189_v35  ;;  %v5435_v33 = vpop.f32.mrf.mxu1  ;;  %v8013_v35 = vor.u32 %v10229_v24, %v8012_v20  ;;  %v10253_v61 = vld [vmem:[%s15892_s1 + $0xc54] sm:$0xf0]  ;;  %v7853_v20 = vor.u32 %v10189_v52, %v7852_v55  ;;  %v7948_v44 = vld [vmem:[%s15892_s1 + $0xb08] sm:$0xf] }
 0x1f1   :  { %5712 = vmatpush.bf16.msrb.mxu3 %v8317_v40  ;;  %5642 = vmatmul.bf16.vlgmr.msra.gmra.mxu1 %v11155_v1  ;;  %v7996_v40 = vld [vmem:[%s15892_s1 + $0xb68] sm:$0xf]  ;;  %v5436_v36 = vadd.f32 %v5435_v33, %v5423_v21  ;;  %v10285_v11 = vld [vmem:[%s15892_s1 + $0xd54] sm:$0xf0]  ;;  %v8109_v26 = vor.u32 %v10253_v61, %v8108_v51 }
 0x1f2   :  { %5668 = vmatmul.bf16.vlgmr.msra.gmra.mxu3 %v11413_v16  ;;  %v5448_v58 = vpop.f32.mrf.mxu2  ;;  %v10185_v30 = vld [vmem:[%s15892_s1 + $0xa34] sm:$0xf0]  ;;  %v8092_v33 = vld [vmem:[%s15892_s1 + $0xc28] sm:$0xf] }
 0x1f3   :  { %5674 = vmatpush.bf16.msrb.mxu0 %v7917_v43  ;;  %v10289_v43 = vld [vmem:[%s15892_s1 + $0xd74] sm:$0xf0]  ;;  %v8444_v52 = vld [vmem:[%s15892_s1 + $0xee8] sm:$0xf] }
 0x1f4   :  { %5687 = vmatpush.bf16.msrb.mxu1 %v8045_v53  ;;  %5700 = vmatpush.bf16.msrb.mxu2 %v8173_v41  ;;  %v7869_v53 = vor.u32 %v10193_v39, %v7868_v38  ;;  %v7997_v41 = vor.u32 %v10225_v42, %v7996_v40  ;;  %v8253_v57 = vor.u32 %v10289_v43, %v8252_v50  ;;  %v5424_v63 = vpop.f32.mrf.mxu0  ;;  %v10281_v38 = vld [vmem:[%s15892_s1 + $0xd34] sm:$0xf0]  ;;  %v7820_v40 = vld [vmem:[%s15892_s1 + $0xa08] sm:$0xf] }
 0x1f5   :  { %5713 = vmatpush.bf16.msrb.mxu3 %v8301_v56  ;;  %v7980_v56 = vld [vmem:[%s15892_s1 + $0xb48] sm:$0xf]  ;;  %v7837_v39 = vor.u32 %v10185_v30, %v7836_v10  ;;  %v10213_v45 = vld [vmem:[%s15892_s1 + $0xb14] sm:$0xf0] }
 0x1f6   :  { %v7981_v25 = vor.u32 %v10221_v59, %v7980_v56  ;;  %v8076_v50 = vld [vmem:[%s15892_s1 + $0xc08] sm:$0xf]  ;;  %v10337_v56 = vld [vmem:[%s15892_s1 + $0xef4] sm:$0xf0] }
 0x1f7   :  { %5675 = vmatpush.bf16.msrb.mxu0 %v7901_v62  ;;  %v5449_v62 = vadd.f32 %v5448_v58, %v5436_v36  ;;  %v10369_v51 = vld [vmem:[%s15892_s1 + $0xff4] sm:$0xf0]  ;;  %v8700_v61 = vld [vmem:[%s15892_s1 + $0x10e8] sm:$0xf] }
 0x1f8   :  { %5688 = vmatpush.bf16.msrb.mxu1 %v8029_v3  ;;  %5701 = vmatpush.bf16.msrb.mxu2 %v8157_v8  ;;  %v5461_v3 = vpop.f32.mrf.mxu3  ;;  %v8236_v8 = vld [vmem:[%s15892_s1 + $0xd48] sm:$0xf]  ;;  %v10433_v63 = vld [vmem:[%s15892_s1 + $0x11f4] sm:$0xf0] }
 0x1f9   :  { %5714 = vmatpush.bf16.msrb.mxu3 %v8285_v23  ;;  %v5437_v23 = vpop.f32.mrf.mxu1  ;;  %v13932_v24 = vadd.f32 %v5461_v3, %v5449_v62  ;;  %v8237_v21 = vor.u32 %v10285_v11, %v8236_v8  ;;  %v10401_v62 = vld [vmem:[%s15892_s1 + $0x10f4] sm:$0xf0]  ;;  %v7949_v3 = vor.u32 %v10213_v45, %v7948_v44  ;;  %v8828_v11 = vld [vmem:[%s15892_s1 + $0x11e8] sm:$0xf] }
 0x1fa   :  { %v5450_v55 = vpop.f32.mrf.mxu2  ;;  %v8445_v23 = vor.u32 %v10337_v56, %v8444_v52  ;;  %v8428_v10 = vld [vmem:[%s15892_s1 + $0xec8] sm:$0xf]  ;;  %v10333_v30 = vld [vmem:[%s15892_s1 + $0xed4] sm:$0xf0] }
 0x1fb   :  { %5676 = vmatpush.bf16.msrb.mxu0 %v7885_v32  ;;  %v10217_v32 = vld [vmem:[%s15892_s1 + $0xb34] sm:$0xf0]  ;;  %v8540_v44 = vld [vmem:[%s15892_s1 + $0xfa8] sm:$0xf] }
 0x1fc   :  { %5689 = vmatpush.bf16.msrb.mxu1 %v8013_v35  ;;  %5702 = vmatpush.bf16.msrb.mxu2 %v8141_v37  ;;  %v10249_v35 = vld [vmem:[%s15892_s1 + $0xc34] sm:$0xf0]  ;;  %v8220_v37 = vld [vmem:[%s15892_s1 + $0xd28] sm:$0xf]  ;;  %v7965_v36 = vor.u32 %v10217_v32, %v7964_v31 }
 0x1fd   :  { %5715 = vmatpush.bf16.msrb.mxu3 %v8269_v22  ;;  %v10181_v22 = vld [vmem:[%s15892_s1 + $0xa14] sm:$0xf0]  ;;  %v8093_v42 = vor.u32 %v10249_v35, %v8092_v33  ;;  %v8221_v43 = vor.u32 %v10281_v38, %v8220_v37  ;;  %v8556_v31 = vld [vmem:[%s15892_s1 + $0xfc8] sm:$0xf] }
 0x1fe   :  { %v7821_v59 = vor.u32 %v10181_v22, %v7820_v40  ;;  %v10365_v32 = vld [vmem:[%s15892_s1 + $0xfd4] sm:$0xf0]  ;;  %v8684_v33 = vld [vmem:[%s15892_s1 + $0x10c8] sm:$0xf] }
 0x1ff   :  { %5677 = vmatpush.bf16.msrb.mxu0 %v7869_v53  ;;  %v10245_v53 = vld [vmem:[%s15892_s1 + $0xc14] sm:$0xf0]  ;;  %v8812_v37 = vld [vmem:[%s15892_s1 + $0x11c8] sm:$0xf]  ;;  %v8557_v40 = vor.u32 %v10365_v32, %v8556_v31 }
 0x200   :  { %5690 = vmatpush.bf16.msrb.mxu1 %v7997_v41  ;;  %5703 = vmatpush.bf16.msrb.mxu2 %v8125_v54  ;;  %v8204_v41 = vld [vmem:[%s15892_s1 + $0xd08] sm:$0xf]  ;;  %v10277_v54 = vld [vmem:[%s15892_s1 + $0xd14] sm:$0xf0]  ;;  %v5463_v58 = vpop.f32.mrf.mxu3  ;;  %v8077_v8 = vor.u32 %v10245_v53, %v8076_v50 }
 0x201   :  { %5716 = vmatpush.bf16.msrb.mxu3 %v8253_v57  ;;  %v8572_v57 = vld [vmem:[%s15892_s1 + $0xfe8] sm:$0xf]  ;;  %v10397_v35 = vld [vmem:[%s15892_s1 + $0x10d4] sm:$0xf0] }
 0x202   :  { %v10429_v38 = vld [vmem:[%s15892_s1 + $0x11d4] sm:$0xf0]  ;;  %v8685_v22 = vor.u32 %v10397_v35, %v8684_v33  ;;  %v8636_v35 = vld [vmem:[%s15892_s1 + $0x1068] sm:$0xf] }
 0x203   :  { %5678 = vmatpush.bf16.msrb.mxu0 %v7853_v20  ;;  %v8205_v20 = vor.u32 %v10277_v54, %v8204_v41  ;;  %v8813_v45 = vor.u32 %v10429_v38, %v8812_v37  ;;  %v10361_v50 = vld [vmem:[%s15892_s1 + $0xfb4] sm:$0xf0]  ;;  %v8796_v41 = vld [vmem:[%s15892_s1 + $0x11a8] sm:$0xf] }
 0x204   :  { %5691 = vmatpush.bf16.msrb.mxu1 %v7981_v25  ;;  %5704 = vmatpush.bf16.msrb.mxu2 %v8109_v26  ;;  %v8573_v25 = vor.u32 %v10369_v51, %v8572_v57  ;;  %v8701_v26 = vor.u32 %v10401_v62, %v8700_v61  ;;  %v10393_v53 = vld [vmem:[%s15892_s1 + $0x10b4] sm:$0xf0]  ;;  %v8541_v52 = vor.u32 %v10361_v50, %v8540_v44  ;;  %v8396_v57 = vld [vmem:[%s15892_s1 + $0xe88] sm:$0xf] }
 0x205   :  { %5717 = vmatpush.bf16.msrb.mxu3 %v8237_v21  ;;  %v8829_v21 = vor.u32 %v10433_v63, %v8828_v11  ;;  %v10425_v54 = vld [vmem:[%s15892_s1 + $0x11b4] sm:$0xf0]  ;;  %v8652_v62 = vld [vmem:[%s15892_s1 + $0x1088] sm:$0xf] }
 0x206   :  { %v10325_v58 = vld [vmem:[%s15892_s1 + $0xe94] sm:$0xf0]  ;;  %v8797_v51 = vor.u32 %v10425_v54, %v8796_v41  ;;  %v8780_v11 = vld [vmem:[%s15892_s1 + $0x1188] sm:$0xf] }
 0x207   :  { %5679 = vmatpush.bf16.msrb.mxu0 %v7837_v39  ;;  %v8429_v39 = vor.u32 %v10333_v30, %v8428_v10  ;;  %v10357_v61 = vld [vmem:[%s15892_s1 + $0xf94] sm:$0xf0]  ;;  %v8380_v30 = vld [vmem:[%s15892_s1 + $0xe68] sm:$0xf] }
 0x208   :  { %5692 = vmatpush.bf16.msrb.mxu1 %v7965_v36  ;;  %5705 = vmatpush.bf16.msrb.mxu2 %v8093_v42  ;;  %v8412_v36 = vld [vmem:[%s15892_s1 + $0xea8] sm:$0xf]  ;;  %v10329_v42 = vld [vmem:[%s15892_s1 + $0xeb4] sm:$0xf0] }
 0x209   :  { %5718 = vmatpush.bf16.msrb.mxu3 %v8221_v43  ;;  %v8668_v43 = vld [vmem:[%s15892_s1 + $0x10a8] sm:$0xf]  ;;  %v8413_v55 = vor.u32 %v10329_v42, %v8412_v36  ;;  %v10421_v63 = vld [vmem:[%s15892_s1 + $0x1194] sm:$0xf0] }
 0x20a   :  { %v8669_v56 = vor.u32 %v10393_v53, %v8668_v43  ;;  %v10321_v31 = vld [vmem:[%s15892_s1 + $0xe74] sm:$0xf0]  ;;  %v8764_v38 = vld [vmem:[%s15892_s1 + $0x1168] sm:$0xf] }
 0x20b   :  { %5680 = vmatpush.bf16.msrb.mxu0 %v7821_v59  ;;  %v8524_v59 = vld [vmem:[%s15892_s1 + $0xf88] sm:$0xf]  ;;  %v10353_v33 = vld [vmem:[%s15892_s1 + $0xf74] sm:$0xf0] }
 0x20c   :  { %5693 = vmatpush.bf16.msrb.mxu1 %v7949_v3  ;;  %5706 = vmatpush.bf16.msrb.mxu2 %v8077_v8  ;;  %v10389_v3 = vld [vmem:[%s15892_s1 + $0x1094] sm:$0xf0]  ;;  %v5474_v8 = vpop.f32.mrf.mxu0  ;;  %v8364_v42 = vld [vmem:[%s15892_s1 + $0xe48] sm:$0xf] }
 0x20d   :  { %5719 = vmatpush.bf16.msrb.mxu3 %v8205_v20  ;;  %v5475_v20 = vadd.f32 %v5474_v8, %v13932_v24  ;;  %v8653_v10 = vor.u32 %v10389_v3, %v8652_v62  ;;  %v8781_v24 = vor.u32 %v10421_v63, %v8780_v11  ;;  %v10385_v37 = vld [vmem:[%s15892_s1 + $0x1074] sm:$0xf0]  ;;  %v8620_v41 = vld [vmem:[%s15892_s1 + $0x1048] sm:$0xf] }
 0x20e   :  { %5681 = vmatmul.bf16.vlgmr.msrb.gmra.mxu0 %v11411_v15  ;;  %v8637_v36 = vor.u32 %v10385_v37, %v8636_v35  ;;  %v10317_v44 = vld [vmem:[%s15892_s1 + $0xe54] sm:$0xf0]  ;;  %v8348_v8 = vld [vmem:[%s15892_s1 + $0xe28] sm:$0xf] }
 0x20f   :  { %5725 = vmatpush.bf16.msra.mxu0 %v8445_v23  ;;  %5707 = vmatmul.bf16.vlgmr.msrb.gmra.mxu2 %v11577_v46  ;;  %v8397_v23 = vor.u32 %v10325_v58, %v8396_v57  ;;  %v10349_v53 = vld [vmem:[%s15892_s1 + $0xf54] sm:$0xf0]  ;;  %v8476_v63 = vld [vmem:[%s15892_s1 + $0xf28] sm:$0xf] }
 0x210   :  { %5738 = vmatpush.bf16.msra.mxu1 %v8573_v25  ;;  %5751 = vmatpush.bf16.msra.mxu2 %v8701_v26  ;;  %v5487_v25 = vpop.f32.mrf.mxu1  ;;  %v8525_v26 = vor.u32 %v10357_v61, %v8524_v59  ;;  %v10381_v54 = vld [vmem:[%s15892_s1 + $0x1054] sm:$0xf0]  ;;  %v8365_v59 = vor.u32 %v10317_v44, %v8364_v42  ;;  %v8460_v35 = vld [vmem:[%s15892_s1 + $0xf08] sm:$0xf] }
 0x211   :  { %5764 = vmatpush.bf16.msra.mxu3 %v8829_v21  ;;  %5694 = vmatmul.bf16.vlgmr.msrb.gmra.mxu1 %v11415_v17  ;;  %v8508_v21 = vld [vmem:[%s15892_s1 + $0xf68] sm:$0xf]  ;;  %v5488_v32 = vadd.f32 %v5487_v25, %v5475_v20  ;;  %v10413_v57 = vld [vmem:[%s15892_s1 + $0x1154] sm:$0xf0]  ;;  %v8621_v3 = vor.u32 %v10381_v54, %v8620_v41 }
 0x212   :  { %5720 = vmatmul.bf16.vlgmr.msrb.gmra.mxu3 %v11581_v48  ;;  %v5500_v43 = vpop.f32.mrf.mxu2  ;;  %v10313_v11 = vld [vmem:[%s15892_s1 + $0xe34] sm:$0xf0]  ;;  %v8604_v25 = vld [vmem:[%s15892_s1 + $0x1028] sm:$0xf] }
 0x213   :  { %5726 = vmatpush.bf16.msra.mxu0 %v8429_v39  ;;  %v10417_v39 = vld [vmem:[%s15892_s1 + $0x1174] sm:$0xf0]  ;;  %v8956_v44 = vld [vmem:[%s15892_s1 + $0x12e8] sm:$0xf] }
 0x214   :  { %5739 = vmatpush.bf16.msra.mxu1 %v8557_v40  ;;  %5752 = vmatpush.bf16.msra.mxu2 %v8685_v22  ;;  %v8381_v40 = vor.u32 %v10321_v31, %v8380_v30  ;;  %v8509_v22 = vor.u32 %v10353_v33, %v8508_v21  ;;  %v8765_v50 = vor.u32 %v10417_v39, %v8764_v38  ;;  %v5476_v58 = vpop.f32.mrf.mxu0  ;;  %v10409_v30 = vld [vmem:[%s15892_s1 + $0x1134] sm:$0xf0]  ;;  %v8332_v21 = vld [vmem:[%s15892_s1 + $0xe08] sm:$0xf] }
 0x215   :  { %5765 = vmatpush.bf16.msra.mxu3 %v8813_v45  ;;  %v8492_v45 = vld [vmem:[%s15892_s1 + $0xf48] sm:$0xf]  ;;  %v8349_v31 = vor.u32 %v10313_v11, %v8348_v8  ;;  %v10341_v37 = vld [vmem:[%s15892_s1 + $0xf14] sm:$0xf0] }
 0x216   :  { %v8493_v62 = vor.u32 %v10349_v53, %v8492_v45  ;;  %v8588_v38 = vld [vmem:[%s15892_s1 + $0x1008] sm:$0xf]  ;;  %v10465_v45 = vld [vmem:[%s15892_s1 + $0x12f4] sm:$0xf0] }
 0x217   :  { %5727 = vmatpush.bf16.msra.mxu0 %v8413_v55  ;;  %v5501_v55 = vadd.f32 %v5500_v43, %v5488_v32  ;;  %v10497_v41 = vld [vmem:[%s15892_s1 + $0x13f4] sm:$0xf0]  ;;  %v9212_v54 = vld [vmem:[%s15892_s1 + $0x14e8] sm:$0xf] }
 0x218   :  { %5740 = vmatpush.bf16.msra.mxu1 %v8541_v52  ;;  %5753 = vmatpush.bf16.msra.mxu2 %v8669_v56  ;;  %v5513_v52 = vpop.f32.mrf.mxu3  ;;  %v8748_v56 = vld [vmem:[%s15892_s1 + $0x1148] sm:$0xf]  ;;  %v10561_v58 = vld [vmem:[%s15892_s1 + $0x15f4] sm:$0xf0] }
 0x219   :  { %5766 = vmatpush.bf16.msra.mxu3 %v8797_v51  ;;  %v5489_v51 = vpop.f32.mrf.mxu1  ;;  %v14131_v61 = vadd.f32 %v5513_v52, %v5501_v55  ;;  %v8749_v20 = vor.u32 %v10413_v57, %v8748_v56  ;;  %v10529_v55 = vld [vmem:[%s15892_s1 + $0x14f4] sm:$0xf0]  ;;  %v8461_v52 = vor.u32 %v10341_v37, %v8460_v35  ;;  %v9340_v57 = vld [vmem:[%s15892_s1 + $0x15e8] sm:$0xf] }
 0x21a   :  { %v5502_v42 = vpop.f32.mrf.mxu2  ;;  %v8957_v51 = vor.u32 %v10465_v45, %v8956_v44  ;;  %v8940_v8 = vld [vmem:[%s15892_s1 + $0x12c8] sm:$0xf]  ;;  %v10461_v11 = vld [vmem:[%s15892_s1 + $0x12d4] sm:$0xf0] }
 0x21b   :  { %5728 = vmatpush.bf16.msra.mxu0 %v8397_v23  ;;  %v10345_v23 = vld [vmem:[%s15892_s1 + $0xf34] sm:$0xf0]  ;;  %v9052_v35 = vld [vmem:[%s15892_s1 + $0x13a8] sm:$0xf] }
 0x21c   :  { %5741 = vmatpush.bf16.msra.mxu1 %v8525_v26  ;;  %5754 = vmatpush.bf16.msra.mxu2 %v8653_v10  ;;  %v10377_v26 = vld [vmem:[%s15892_s1 + $0x1034] sm:$0xf0]  ;;  %v8732_v10 = vld [vmem:[%s15892_s1 + $0x1128] sm:$0xf]  ;;  %v8477_v32 = vor.u32 %v10345_v23, %v8476_v63 }
 0x21d   :  { %5767 = vmatpush.bf16.msra.mxu3 %v8781_v24  ;;  %v10309_v24 = vld [vmem:[%s15892_s1 + $0xe14] sm:$0xf0]  ;;  %v8605_v33 = vor.u32 %v10377_v26, %v8604_v25  ;;  %v8733_v39 = vor.u32 %v10409_v30, %v8732_v10  ;;  %v9068_v63 = vld [vmem:[%s15892_s1 + $0x13c8] sm:$0xf] }
 0x21e   :  { %v8333_v53 = vor.u32 %v10309_v24, %v8332_v21  ;;  %v10493_v23 = vld [vmem:[%s15892_s1 + $0x13d4] sm:$0xf0]  ;;  %v9196_v25 = vld [vmem:[%s15892_s1 + $0x14c8] sm:$0xf] }
 0x21f   :  { %5729 = vmatpush.bf16.msra.mxu0 %v8381_v40  ;;  %v10373_v40 = vld [vmem:[%s15892_s1 + $0x1014] sm:$0xf0]  ;;  %v9324_v10 = vld [vmem:[%s15892_s1 + $0x15c8] sm:$0xf]  ;;  %v9069_v21 = vor.u32 %v10493_v23, %v9068_v63 }
 0x220   :  { %5742 = vmatpush.bf16.msra.mxu1 %v8509_v22  ;;  %5755 = vmatpush.bf16.msra.mxu2 %v8637_v36  ;;  %v8716_v22 = vld [vmem:[%s15892_s1 + $0x1108] sm:$0xf]  ;;  %v10405_v36 = vld [vmem:[%s15892_s1 + $0x1114] sm:$0xf0]  ;;  %v5515_v43 = vpop.f32.mrf.mxu3  ;;  %v8589_v56 = vor.u32 %v10373_v40, %v8588_v38 }
 0x221   :  { %5768 = vmatpush.bf16.msra.mxu3 %v8765_v50  ;;  %v9084_v50 = vld [vmem:[%s15892_s1 + $0x13e8] sm:$0xf]  ;;  %v10525_v26 = vld [vmem:[%s15892_s1 + $0x14d4] sm:$0xf0] }
 0x222   :  { %v10557_v30 = vld [vmem:[%s15892_s1 + $0x15d4] sm:$0xf0]  ;;  %v9197_v24 = vor.u32 %v10525_v26, %v9196_v25  ;;  %v9148_v26 = vld [vmem:[%s15892_s1 + $0x1468] sm:$0xf] }
 0x223   :  { %5730 = vmatpush.bf16.msra.mxu0 %v8365_v59  ;;  %v8717_v59 = vor.u32 %v10405_v36, %v8716_v22  ;;  %v9325_v37 = vor.u32 %v10557_v30, %v9324_v10  ;;  %v10489_v38 = vld [vmem:[%s15892_s1 + $0x13b4] sm:$0xf0]  ;;  %v9308_v22 = vld [vmem:[%s15892_s1 + $0x15a8] sm:$0xf] }
 0x224   :  { %5743 = vmatpush.bf16.msra.mxu1 %v8493_v62  ;;  %5756 = vmatpush.bf16.msra.mxu2 %v8621_v3  ;;  %v9085_v62 = vor.u32 %v10497_v41, %v9084_v50  ;;  %v9213_v3 = vor.u32 %v10529_v55, %v9212_v54  ;;  %v10521_v40 = vld [vmem:[%s15892_s1 + $0x14b4] sm:$0xf0]  ;;  %v9053_v44 = vor.u32 %v10489_v38, %v9052_v35  ;;  %v8908_v50 = vld [vmem:[%s15892_s1 + $0x1288] sm:$0xf] }
 0x225   :  { %5769 = vmatpush.bf16.msra.mxu3 %v8749_v20  ;;  %v9341_v20 = vor.u32 %v10561_v58, %v9340_v57  ;;  %v10553_v36 = vld [vmem:[%s15892_s1 + $0x15b4] sm:$0xf0]  ;;  %v9164_v55 = vld [vmem:[%s15892_s1 + $0x1488] sm:$0xf] }
 0x226   :  { %v10453_v43 = vld [vmem:[%s15892_s1 + $0x1294] sm:$0xf0]  ;;  %v9309_v41 = vor.u32 %v10553_v36, %v9308_v22  ;;  %v9292_v57 = vld [vmem:[%s15892_s1 + $0x1588] sm:$0xf] }
 0x227   :  { %5731 = vmatpush.bf16.msra.mxu0 %v8349_v31  ;;  %v8941_v31 = vor.u32 %v10461_v11, %v8940_v8  ;;  %v10485_v54 = vld [vmem:[%s15892_s1 + $0x1394] sm:$0xf0]  ;;  %v8892_v11 = vld [vmem:[%s15892_s1 + $0x1268] sm:$0xf] }
 0x228   :  { %5744 = vmatpush.bf16.msra.mxu1 %v8477_v32  ;;  %5757 = vmatpush.bf16.msra.mxu2 %v8605_v33  ;;  %v8924_v32 = vld [vmem:[%s15892_s1 + $0x12a8] sm:$0xf]  ;;  %v10457_v33 = vld [vmem:[%s15892_s1 + $0x12b4] sm:$0xf0] }
 0x229   :  { %5770 = vmatpush.bf16.msra.mxu3 %v8733_v39  ;;  %v9180_v39 = vld [vmem:[%s15892_s1 + $0x14a8] sm:$0xf]  ;;  %v8925_v42 = vor.u32 %v10457_v33, %v8924_v32  ;;  %v10549_v58 = vld [vmem:[%s15892_s1 + $0x1594] sm:$0xf0] }
 0x22a   :  { %v9181_v45 = vor.u32 %v10521_v40, %v9180_v39  ;;  %v10449_v63 = vld [vmem:[%s15892_s1 + $0x1274] sm:$0xf0]  ;;  %v9276_v30 = vld [vmem:[%s15892_s1 + $0x1568] sm:$0xf] }
 0x22b   :  { %5732 = vmatpush.bf16.msra.mxu0 %v8333_v53  ;;  %v9036_v53 = vld [vmem:[%s15892_s1 + $0x1388] sm:$0xf]  ;;  %v10481_v25 = vld [vmem:[%s15892_s1 + $0x1374] sm:$0xf0]  ;;  %v8893_v32 = vor.u32 %v10449_v63, %v8892_v11 }
 0x22c   :  { %5745 = vmatpush.bf16.msra.mxu1 %v8461_v52  ;;  %5758 = vmatpush.bf16.msra.mxu2 %v8589_v56  ;;  %v10517_v52 = vld [vmem:[%s15892_s1 + $0x1494] sm:$0xf0]  ;;  %v5526_v56 = vpop.f32.mrf.mxu0  ;;  %v9004_v39 = vld [vmem:[%s15892_s1 + $0x1348] sm:$0xf] }
 0x22d   :  { %5771 = vmatpush.bf16.msra.mxu3 %v8717_v59  ;;  %v5527_v59 = vadd.f32 %v5526_v56, %v14131_v61  ;;  %v9165_v8 = vor.u32 %v10517_v52, %v9164_v55  ;;  %v9293_v61 = vor.u32 %v10549_v58, %v9292_v57  ;;  %v10513_v10 = vld [vmem:[%s15892_s1 + $0x1474] sm:$0xf0]  ;;  %v9132_v36 = vld [vmem:[%s15892_s1 + $0x1448] sm:$0xf] }
 0x22e   :  { %5733 = vmatmul.bf16.vlgmr.msra.gmra.mxu0 %v11579_v47  ;;  %v9149_v35 = vor.u32 %v10513_v10, %v9148_v26  ;;  %v10445_v38 = vld [vmem:[%s15892_s1 + $0x1254] sm:$0xf0]  ;;  %v8860_v57 = vld [vmem:[%s15892_s1 + $0x1228] sm:$0xf] }
 0x22f   :  { %5777 = vmatpush.bf16.msrb.mxu0 %v8957_v51  ;;  %5759 = vmatmul.bf16.vlgmr.msra.gmra.mxu2 %v11814_v9  ;;  %v8909_v51 = vor.u32 %v10453_v43, %v8908_v50  ;;  %v10477_v22 = vld [vmem:[%s15892_s1 + $0x1354] sm:$0xf0]  ;;  %v9244_v63 = vld [vmem:[%s15892_s1 + $0x1528] sm:$0xf] }
 0x230   :  { %5790 = vmatpush.bf16.msrb.mxu1 %v9085_v62  ;;  %5803 = vmatpush.bf16.msrb.mxu2 %v9213_v3  ;;  %v5539_v62 = vpop.f32.mrf.mxu1  ;;  %v9037_v3 = vor.u32 %v10485_v54, %v9036_v53  ;;  %v10541_v50 = vld [vmem:[%s15892_s1 + $0x1554] sm:$0xf0]  ;;  %v9005_v52 = vor.u32 %v10477_v22, %v9004_v39  ;;  %v9468_v39 = vld [vmem:[%s15892_s1 + $0x16e8] sm:$0xf] }
 0x231   :  { %5816 = vmatpush.bf16.msrb.mxu3 %v9341_v20  ;;  %5746 = vmatmul.bf16.vlgmr.msra.gmra.mxu1 %v11583_v49  ;;  %v9020_v20 = vld [vmem:[%s15892_s1 + $0x1368] sm:$0xf]  ;;  %v14291_v23 = vadd.f32 %v5539_v62, %v5527_v59  ;;  %v10441_v58 = vld [vmem:[%s15892_s1 + $0x1234] sm:$0xf0] }
 0x232   :  { %5772 = vmatmul.bf16.vlgmr.msra.gmra.mxu3 %v11824_v14  ;;  %v9021_v33 = vor.u32 %v10481_v25, %v9020_v20  ;;  %v8988_v59 = vld [vmem:[%s15892_s1 + $0x1328] sm:$0xf]  ;;  %v10505_v11 = vld [vmem:[%s15892_s1 + $0x1434] sm:$0xf0] }
 0x233   :  { %5778 = vmatpush.bf16.msrb.mxu0 %v8941_v31  ;;  %v10545_v31 = vld [vmem:[%s15892_s1 + $0x1574] sm:$0xf0]  ;;  %v8844_v25 = vld [vmem:[%s15892_s1 + $0x1208] sm:$0xf] }
 0x234   :  { %5791 = vmatpush.bf16.msrb.mxu1 %v9069_v21  ;;  %5804 = vmatpush.bf16.msrb.mxu2 %v9197_v24  ;;  %v10694_v21 = vld [vmem:[%s15893_s2] sm:$0xf]  ;;  %v9277_v40 = vor.u32 %v10545_v31, %v9276_v30  ;;  %v10537_v20 = vld [vmem:[%s15892_s1 + $0x1534] sm:$0xf0]  ;;  %v8972_v31 = vld [vmem:[%s15892_s1 + $0x1308] sm:$0xf] }
 0x235   :  { %5817 = vmatpush.bf16.msrb.mxu3 %v9325_v37  ;;  %v829_v24 = vperm.slane %v10694_v21, 2  ;;  %v8876_v37 = vld [vmem:[%s15892_s1 + $0x1248] sm:$0xf]  ;;  %v5565_v53 = vpop.f32.mrf.mxu3  ;;  %v10437_v26 = vld [vmem:[%s15892_s1 + $0x1214] sm:$0xf0] }
 0x236   :  { %v8877_v54 = vor.u32 %v10445_v38, %v8876_v37  ;;  %v10469_v21 = vld [vmem:[%s15892_s1 + $0x1314] sm:$0xf0]  ;;  %v9596_v22 = vld [vmem:[%s15892_s1 + $0x17e8] sm:$0xf] }
 0x237   :  { %5779 = vmatpush.bf16.msrb.mxu0 %v8925_v42  ;;  %v10509_v42 = vld [vmem:[%s15892_s1 + $0x1454] sm:$0xf0] }
 0x238   :  { %5792 = vmatpush.bf16.msrb.mxu1 %v9053_v44  ;;  %5805 = vmatpush.bf16.msrb.mxu2 %v9181_v45  ;;  %v5552_v44 = vpop.f32.mrf.mxu2  ;;  %v9260_v45 = vld [vmem:[%s15892_s1 + $0x1548] sm:$0xf]  ;;  %v5541_v55 = vpop.f32.mrf.mxu1  ;;  %v9133_v56 = vor.u32 %v10509_v42, %v9132_v36  ;;  %v10533_v37 = vld [vmem:[%s15892_s1 + $0x1514] sm:$0xf0]  ;;  %v8845_v42 = vor.u32 %v10437_v26, %v8844_v25 }
 0x239   :  { %5818 = vmatpush.bf16.msrb.mxu3 %v9309_v41  ;;  %v5553_v43 = vadd.f32 %v5552_v44, %v829_v24  ;;  %v5528_v41 = vpop.f32.mrf.mxu0  ;;  %v9261_v62 = vor.u32 %v10541_v50, %v9260_v45  ;;  %v9100_v24 = vld [vmem:[%s15892_s1 + $0x1408] sm:$0xf]  ;;  %v10625_v44 = vld [vmem:[%s15892_s1 + $0x17f4] sm:$0xf0] }
 0x23a   :  { %v9724_v45 = vld [vmem:[%s15892_s1 + $0x18e8] sm:$0xf]  ;;  %v10657_v50 = vld [vmem:[%s15892_s1 + $0x18f4] sm:$0xf0]  ;;  %v9887_v41 = vld [vmem:[%s15892_s1 + $0xec] sm:$0xf] }
 0x23b   :  { %5780 = vmatpush.bf16.msrb.mxu0 %v8909_v51  ;;  %v14344_v51 = vadd.f32 %v5565_v53, %v5553_v43  ;;  %v8973_v43 = vor.u32 %v10469_v21, %v8972_v31  ;;  %v10585_v31 = vld [vmem:[%s15892_s1 + $0x16b4] sm:$0xf0]  ;;  %v9564_v21 = vld [vmem:[%s15892_s1 + $0x17a8] sm:$0xf] }
 0x23c   :  { %5793 = vmatpush.bf16.msrb.mxu1 %v9037_v3  ;;  %5806 = vmatpush.bf16.msrb.mxu2 %v9165_v8  ;;  %v10473_v3 = vld [vmem:[%s15892_s1 + $0x1334] sm:$0xf0]  ;;  %v9116_v8 = vld [vmem:[%s15892_s1 + $0x1428] sm:$0xf] }
 0x23d   :  { %5819 = vmatpush.bf16.msrb.mxu3 %v9293_v61  ;;  %v8861_v61 = vor.u32 %v10441_v58, %v8860_v57  ;;  %v8989_v10 = vor.u32 %v10473_v3, %v8988_v59  ;;  %v9117_v30 = vor.u32 %v10505_v11, %v9116_v8  ;;  %v5567_v36 = vpop.f32.mrf.mxu3  ;;  %v9725_v57 = vor.u32 %v10657_v50, %v9724_v45  ;;  %v9452_v58 = vld [vmem:[%s15892_s1 + $0x16c8] sm:$0xf]  ;;  %v10589_v59 = vld [vmem:[%s15892_s1 + $0x16d4] sm:$0xf0] }
 0x23e   :  { %v10621_v8 = vld [vmem:[%s15892_s1 + $0x17d4] sm:$0xf0]  ;;  %v9708_v11 = vld [vmem:[%s15892_s1 + $0x18c8] sm:$0xf]  ;;  %v9453_v25 = vor.u32 %v10589_v59, %v9452_v58 }
 0x23f   :  { %5781 = vmatpush.bf16.msrb.mxu0 %v8893_v32  ;;  %v9245_v32 = vor.u32 %v10537_v20, %v9244_v63  ;;  %v10653_v63 = vld [vmem:[%s15892_s1 + $0x18d4] sm:$0xf0]  ;;  %v9883_v20 = vld [vmem:[%s15892_s1 + $0xcc] sm:$0xf]  ;;  %v9420_v36 = vld [vmem:[%s15892_s1 + $0x1688] sm:$0xf] }
 0x240   :  { %5794 = vmatpush.bf16.msrb.mxu1 %v9021_v33  ;;  %5807 = vmatpush.bf16.msrb.mxu2 %v9149_v35  ;;  %v10501_v33 = vld [vmem:[%s15892_s1 + $0x1414] sm:$0xf0]  ;;  %v9228_v35 = vld [vmem:[%s15892_s1 + $0x1508] sm:$0xf]  ;;  %v5554_v38 = vpop.f32.mrf.mxu2 }
 0x241   :  { %5820 = vmatpush.bf16.msrb.mxu3 %v9277_v40  ;;  %v10593_v40 = vld [vmem:[%s15892_s1 + $0x16f4] sm:$0xf0]  ;;  %v9101_v53 = vor.u32 %v10501_v33, %v9100_v24  ;;  %v9229_v55 = vor.u32 %v10533_v37, %v9228_v35  ;;  %v9692_v33 = vld [vmem:[%s15892_s1 + $0x18a8] sm:$0xf]  ;;  %v9879_v37 = vld [vmem:[%s15892_s1 + $0xac] sm:$0xf] }
 0x242   :  { %v10649_v35 = vld [vmem:[%s15892_s1 + $0x18b4] sm:$0xf0]  ;;  %v6622_v38 = vld [vmem:[%s15892_s1 + $0xb8] sm:$0xf0]  ;;  %v9404_v58 = vld [vmem:[%s15892_s1 + $0x1668] sm:$0xf] }
 0x243   :  { %5782 = vmatpush.bf16.msrb.mxu0 %v8877_v54  ;;  %v6654_v54 = vld [vmem:[%s15892_s1 + $0xf8] sm:$0xf0]  ;;  %v6625_v45 = vor.u32 %v9879_v37, %v6622_v38  ;;  %v10613_v50 = vld [vmem:[%s15892_s1 + $0x1794] sm:$0xf0]  ;;  %v9644_v38 = vld [vmem:[%s15892_s1 + $0x1848] sm:$0xf] }
 0x244   :  { %5795 = vmatpush.bf16.msrb.mxu1 %v9005_v52  ;;  %5808 = vmatpush.bf16.msrb.mxu2 %v9133_v56  ;;  %v9469_v52 = vor.u32 %v10593_v40, %v9468_v39  ;;  %v9597_v56 = vor.u32 %v10625_v44, %v9596_v22  ;;  %v6657_v3 = vor.u32 %v9887_v41, %v6654_v54  ;;  %v9548_v44 = vld [vmem:[%s15892_s1 + $0x1788] sm:$0xf]  ;;  %v9875_v41 = vld [vmem:[%s15892_s1 + $0x8c] sm:$0xf]  ;;  %v6606_v54 = vld [vmem:[%s15892_s1 + $0x98] sm:$0xf0] }
 0x245   :  { %5821 = vmatpush.bf16.msrb.mxu3 %v9261_v62  ;;  %v9580_v62 = vld [vmem:[%s15892_s1 + $0x17c8] sm:$0xf]  ;;  %v9693_v22 = vor.u32 %v10649_v35, %v9692_v33  ;;  %v10577_v59 = vld [vmem:[%s15892_s1 + $0x1674] sm:$0xf0] }
 0x246   :  { %v9581_v26 = vor.u32 %v10621_v8, %v9580_v62  ;;  %v9532_v62 = vld [vmem:[%s15892_s1 + $0x1768] sm:$0xf]  ;;  %v10605_v37 = vld [vmem:[%s15892_s1 + $0x1754] sm:$0xf0] }
 0x247   :  { %5783 = vmatpush.bf16.msrb.mxu0 %v8861_v61  ;;  %v6638_v61 = vld [vmem:[%s15892_s1 + $0xd8] sm:$0xf0] }
 0x248   :  { %5796 = vmatpush.bf16.msrb.mxu1 %v8989_v10  ;;  %5809 = vmatpush.bf16.msrb.mxu2 %v9117_v30  ;;  %v9709_v10 = vor.u32 %v10653_v63, %v9708_v11  ;;  %v9436_v30 = vld [vmem:[%s15892_s1 + $0x16a8] sm:$0xf]  ;;  %v6641_v24 = vor.u32 %v9883_v20, %v6638_v61  ;;  %v6609_v11 = vor.u32 %v9875_v41, %v6606_v54  ;;  %v10609_v63 = vld [vmem:[%s15892_s1 + $0x1774] sm:$0xf0] }
 0x249   :  { %5822 = vmatpush.bf16.msrb.mxu3 %v9245_v32  ;;  %v10617_v32 = vld [vmem:[%s15892_s1 + $0x17b4] sm:$0xf0]  ;;  %v9437_v39 = vor.u32 %v10585_v31, %v9436_v30  ;;  %v9660_v20 = vld [vmem:[%s15892_s1 + $0x1868] sm:$0xf]  ;;  %v9533_v30 = vor.u32 %v10609_v63, %v9532_v62  ;;  %v9863_v62 = vld [vmem:[%s15892_s1 + $0x2c] sm:$0xf] }
 0x24a   :  { %v9565_v40 = vor.u32 %v10617_v32, %v9564_v21  ;;  %v10641_v61 = vld [vmem:[%s15892_s1 + $0x1874] sm:$0xf0]  ;;  %v9388_v21 = vld [vmem:[%s15892_s1 + $0x1648] sm:$0xf] }
 0x24b   :  { %5784 = vmatpush.bf16.msrb.mxu0 %v8845_v42  ;;  %v10581_v42 = vld [vmem:[%s15892_s1 + $0x1694] sm:$0xf0]  ;;  %v9661_v31 = vor.u32 %v10641_v61, %v9660_v20  ;;  %v9516_v32 = vld [vmem:[%s15892_s1 + $0x1748] sm:$0xf] }
 0x24c   :  { %5797 = vmatpush.bf16.msrb.mxu1 %v8973_v43  ;;  %5810 = vmatpush.bf16.msrb.mxu2 %v9101_v53  ;;  %v9676_v43 = vld [vmem:[%s15892_s1 + $0x1888] sm:$0xf]  ;;  %v10645_v53 = vld [vmem:[%s15892_s1 + $0x1894] sm:$0xf0] }
 0x24d   :  { %5823 = vmatpush.bf16.msrb.mxu3 %v9229_v55  ;;  %v9421_v55 = vor.u32 %v10581_v42, %v9420_v36  ;;  %v9867_v36 = vld [vmem:[%s15892_s1 + $0x4c] sm:$0xf]  ;;  %v6574_v42 = vld [vmem:[%s15892_s1 + $0x58] sm:$0xf0]  ;;  %v9372_v41 = vld [vmem:[%s15892_s1 + $0x1628] sm:$0xf] }
 0x24e   :  { %5785 = vmatmul.bf16.vlgmr.msrb.gmra.mxu0 %v11822_v13  ;;  %v5591_v8 = vpop.f32.mrf.mxu1  ;;  %v10569_v54 = vld [vmem:[%s15892_s1 + $0x1634] sm:$0xf0] }
 0x24f   :  { %5829 = vmatpush.bf16.msra.mxu0 %v9469_v52  ;;  %5811 = vmatmul.bf16.vlgmr.msrb.gmra.mxu2 %v11991_v4  ;;  %v5578_v52 = vpop.f32.mrf.mxu0  ;;  %v10565_v63 = vld [vmem:[%s15892_s1 + $0x1614] sm:$0xf0] }
 0x250   :  { %5842 = vmatpush.bf16.msra.mxu1 %v9597_v56  ;;  %5855 = vmatpush.bf16.msra.mxu2 %v9725_v57  ;;  %v9549_v56 = vor.u32 %v10613_v50, %v9548_v44  ;;  %v9677_v57 = vor.u32 %v10645_v53, %v9676_v43  ;;  %v9517_v43 = vor.u32 %v10605_v37, %v9516_v32  ;;  %v9951_v37 = vld [vmem:[%s15892_s1 + $0x2ec] sm:$0xf] }
 0x251   :  { %5868 = vmatpush.bf16.msra.mxu3 %v6657_v3  ;;  %5798 = vmatmul.bf16.vlgmr.msrb.gmra.mxu1 %v11826_v18  ;;  %v5579_v3 = vadd.f32 %v5578_v52, %v14344_v51  ;;  %v6590_v51 = vld [vmem:[%s15892_s1 + $0x78] sm:$0xf0] }
 0x252   :  { %5824 = vmatmul.bf16.vlgmr.msrb.gmra.mxu3 %v11995_v6  ;;  %v5604_v33 = vpop.f32.mrf.mxu2 }
 0x253   :  { %5830 = vmatpush.bf16.msra.mxu0 %v9453_v25  ;;  %v9871_v25 = vld [vmem:[%s15892_s1 + $0x6c] sm:$0xf] }
 0x254   :  { %5843 = vmatpush.bf16.msra.mxu1 %v9581_v26  ;;  %5856 = vmatpush.bf16.msra.mxu2 %v9709_v10  ;;  %v5592_v26 = vadd.f32 %v5591_v8, %v5579_v3  ;;  %v9405_v10 = vor.u32 %v10577_v59, %v9404_v58  ;;  %v6593_v35 = vor.u32 %v9871_v25, %v6590_v51  ;;  %v9628_v58 = vld [vmem:[%s15892_s1 + $0x1828] sm:$0xf]  ;;  %v10633_v59 = vld [vmem:[%s15892_s1 + $0x1834] sm:$0xf0]  ;;  %v6558_v3 = vld [vmem:[%s15892_s1 + $0x38] sm:$0xf0] }
 0x255   :  { %5869 = vmatpush.bf16.msra.mxu3 %v6641_v24  ;;  %v10573_v24 = vld [vmem:[%s15892_s1 + $0x1654] sm:$0xf0]  ;;  %v9373_v8 = vor.u32 %v10569_v54, %v9372_v41  ;;  %v9629_v61 = vor.u32 %v10633_v59, %v9628_v58  ;;  %v9484_v25 = vld [vmem:[%s15892_s1 + $0x1708] sm:$0xf]  ;;  %v6894_v58 = vld [vmem:[%s15892_s1 + $0x2d8] sm:$0xf0] }
 0x256   :  { %v9389_v44 = vor.u32 %v10573_v24, %v9388_v21  ;;  %v5593_v52 = vpop.f32.mrf.mxu1  ;;  %v10597_v51 = vld [vmem:[%s15892_s1 + $0x1714] sm:$0xf0]  ;;  %v9859_v21 = vld [vmem:[%s15892_s1 + $0xc] sm:$0xf]  ;;  %v6542_v24 = vld [vmem:[%s15892_s1 + $0x18] sm:$0xf0] }
 0x257   :  { %5831 = vmatpush.bf16.msra.mxu0 %v9437_v39  ;;  %v10637_v39 = vld [vmem:[%s15892_s1 + $0x1854] sm:$0xf0]  ;;  %v5580_v50 = vpop.f32.mrf.mxu0  ;;  %v6766_v52 = vld [vmem:[%s15892_s1 + $0x1d8] sm:$0xf0]  ;;  %v9979_v59 = vld [vmem:[%s15892_s1 + $0x3cc] sm:$0xf] }
 0x258   :  { %5844 = vmatpush.bf16.msra.mxu1 %v9565_v40  ;;  %5857 = vmatpush.bf16.msra.mxu2 %v9693_v22  ;;  %v5605_v40 = vadd.f32 %v5604_v33, %v5592_v26  ;;  %v5617_v22 = vpop.f32.mrf.mxu3  ;;  %v9645_v53 = vor.u32 %v10637_v39, %v9644_v38  ;;  %v9612_v26 = vld [vmem:[%s15892_s1 + $0x1808] sm:$0xf]  ;;  %v9919_v33 = vld [vmem:[%s15892_s1 + $0x1ec] sm:$0xf]  ;;  %v6910_v39 = vld [vmem:[%s15892_s1 + $0x2f8] sm:$0xf0] }
 0x259   :  { %5870 = vmatpush.bf16.msra.mxu3 %v6625_v45  ;;  %v7166_v50 = vld [vmem:[%s15892_s1 + $0x4f8] sm:$0xf0]  ;;  %v6913_v41 = vor.u32 %v9951_v37, %v6910_v39 }
 0x25a   :  { %v14534_v45 = vadd.f32 %v5617_v22, %v5605_v40  ;;  %v9983_v40 = vld [vmem:[%s15892_s1 + $0x3ec] sm:$0xf]  ;;  %v7038_v22 = vld [vmem:[%s15892_s1 + $0x3f8] sm:$0xf0] }
 0x25b   :  { %5832 = vmatpush.bf16.msra.mxu0 %v9421_v55  ;;  %v9500_v55 = vld [vmem:[%s15892_s1 + $0x1728] sm:$0xf]  ;;  %v7041_v54 = vor.u32 %v9983_v40, %v7038_v22  ;;  %v6734_v39 = vld [vmem:[%s15892_s1 + $0x198] sm:$0xf0]  ;;  %v9939_v40 = vld [vmem:[%s15892_s1 + $0x28c] sm:$0xf] }
 0x25c   :  { %5845 = vmatpush.bf16.msra.mxu1 %v9549_v56  ;;  %5858 = vmatpush.bf16.msra.mxu2 %v9677_v57  ;;  %v6577_v56 = vor.u32 %v9867_v36, %v6574_v42  ;;  %v10601_v57 = vld [vmem:[%s15892_s1 + $0x1734] sm:$0xf0]  ;;  %v9485_v36 = vor.u32 %v10597_v51, %v9484_v25  ;;  %v6750_v25 = vld [vmem:[%s15892_s1 + $0x1b8] sm:$0xf0]  ;;  %v9943_v51 = vld [vmem:[%s15892_s1 + $0x2ac] sm:$0xf] }
 0x25d   :  { %5871 = vmatpush.bf16.msra.mxu3 %v6609_v11  ;;  %v9356_v11 = vld [vmem:[%s15892_s1 + $0x1608] sm:$0xf]  ;;  %v9501_v20 = vor.u32 %v10601_v57, %v9500_v55  ;;  %v9915_v55 = vld [vmem:[%s15892_s1 + $0x1cc] sm:$0xf] }
 0x25e   :  { %v9357_v38 = vor.u32 %v10565_v63, %v9356_v11  ;;  %v6769_v11 = vor.u32 %v9915_v55, %v6766_v52 }
 0x25f   :  { %5833 = vmatpush.bf16.msra.mxu0 %v9405_v10  ;;  %v5606_v10 = vpop.f32.mrf.mxu2 }
 0x260   :  { %5846 = vmatpush.bf16.msra.mxu1 %v9533_v30  ;;  %5859 = vmatpush.bf16.msra.mxu2 %v9661_v31  ;;  %v6561_v30 = vor.u32 %v9863_v62, %v6558_v3  ;;  %v10629_v31 = vld [vmem:[%s15892_s1 + $0x1814] sm:$0xf0]  ;;  %v5619_v32 = vpop.f32.mrf.mxu3  ;;  %v7022_v62 = vld [vmem:[%s15892_s1 + $0x3d8] sm:$0xf0]  ;;  %v10011_v3 = vld [vmem:[%s15892_s1 + $0x4cc] sm:$0xf] }
 0x261   :  { %5872 = vmatpush.bf16.msra.mxu3 %v6593_v35  ;;  %v6782_v35 = vld [vmem:[%s15892_s1 + $0x1f8] sm:$0xf0]  ;;  %v9613_v42 = vor.u32 %v10629_v31, %v9612_v26 }
 0x262   :  { %v6878_v10 = vld [vmem:[%s15892_s1 + $0x2b8] sm:$0xf0] }
 0x263   :  { %5834 = vmatpush.bf16.msra.mxu0 %v9389_v44  ;;  %v10015_v44 = vld [vmem:[%s15892_s1 + $0x4ec] sm:$0xf]  ;;  %v7006_v31 = vld [vmem:[%s15892_s1 + $0x3b8] sm:$0xf0] }
 0x264   :  { %5847 = vmatpush.bf16.msra.mxu1 %v9517_v43  ;;  %5860 = vmatpush.bf16.msra.mxu2 %v9645_v53  ;;  %v6545_v43 = vor.u32 %v9859_v21, %v6542_v24  ;;  %v6785_v53 = vor.u32 %v9919_v33, %v6782_v35  ;;  %v7169_v57 = vor.u32 %v10015_v44, %v7166_v50  ;;  %v10695_v21 = vld [vmem:[#allocation1] sm:$0xff]  ;;  %v10007_v24 = vld [vmem:[%s15892_s1 + $0x4ac] sm:$0xf]  ;;  %v7134_v32 = vld [vmem:[%s15892_s1 + $0x4b8] sm:$0xf0] }
 0x265   :  { %5873 = vmatpush.bf16.msra.mxu3 %v6577_v56  ;;  %v9947_v56 = vld [vmem:[%s15892_s1 + $0x2cc] sm:$0xf]  ;;  %v6881_v35 = vor.u32 %v9943_v51, %v6878_v10  ;;  %v7137_v22 = vor.u32 %v10007_v24, %v7134_v32  ;;  %v6958_v32 = vld [vmem:[%s15892_s1 + $0x358] sm:$0xf0] }
 0x266   :  { %v6897_v63 = vor.u32 %v9947_v56, %v6894_v58  ;;  %v10003_v50 = vld [vmem:[%s15892_s1 + $0x48c] sm:$0xf] }
 0x267   :  { %5835 = vmatpush.bf16.msra.mxu0 %v9373_v8  ;;  %v7150_v8 = vld [vmem:[%s15892_s1 + $0x4d8] sm:$0xf0]  ;;  %v9903_v56 = vld [vmem:[%s15892_s1 + $0x16c] sm:$0xf] }
 0x268   :  { %5848 = vmatpush.bf16.msra.mxu1 %v9501_v20  ;;  %5861 = vmatpush.bf16.msra.mxu2 %v9629_v61  ;;  %v7025_v20 = vor.u32 %v9979_v59, %v7022_v62  ;;  %v9911_v61 = vld [vmem:[%s15892_s1 + $0x1ac] sm:$0xf]  ;;  %v7153_v26 = vor.u32 %v10011_v3, %v7150_v8  ;;  %v6846_v62 = vld [vmem:[%s15892_s1 + $0x278] sm:$0xf0] }
 0x269   :  { %5874 = vmatpush.bf16.msra.mxu3 %v6561_v30  ;;  %v9975_v30 = vld [vmem:[%s15892_s1 + $0x3ac] sm:$0xf]  ;;  %v6753_v33 = vor.u32 %v9911_v61, %v6750_v25  ;;  %v6974_v8 = vld [vmem:[%s15892_s1 + $0x378] sm:$0xf0] }
 0x26a   :  { %v7009_v37 = vor.u32 %v9975_v30, %v7006_v31  ;;  %v9935_v58 = vld [vmem:[%s15892_s1 + $0x26c] sm:$0xf] }
 0x26b   :  { %5836 = vmatpush.bf16.msra.mxu0 %v9357_v38  ;;  %v9907_v38 = vld [vmem:[%s15892_s1 + $0x18c] sm:$0xf]  ;;  %v5630_v44 = vpop.f32.mrf.mxu0  ;;  %v6849_v61 = vor.u32 %v9935_v58, %v6846_v62 }
 0x26c   :  { %5849 = vmatpush.bf16.msra.mxu1 %v9485_v36  ;;  %5862 = vmatpush.bf16.msra.mxu2 %v9613_v42  ;;  %v9971_v36 = vld [vmem:[%s15892_s1 + $0x38c] sm:$0xf]  ;;  %v6990_v42 = vld [vmem:[%s15892_s1 + $0x398] sm:$0xf0] }
 0x26d   :  { %5875 = vmatpush.bf16.msra.mxu3 %v6545_v43  ;;  %v7118_v43 = vld [vmem:[%s15892_s1 + $0x498] sm:$0xf0]  ;;  %v6993_v52 = vor.u32 %v9971_v36, %v6990_v42  ;;  %v9967_v3 = vld [vmem:[%s15892_s1 + $0x36c] sm:$0xf] }
 0x26e   :  { %5837 = vmatmul.bf16.vlgmr.msra.gmra.mxu0 %v11993_v5  ;;  %v6977_v25 = vor.u32 %v9967_v3, %v6974_v8  ;;  %v9899_v51 = vld [vmem:[%s15892_s1 + $0x14c] sm:$0xf]  ;;  %v6798_v8 = vld [vmem:[%s15892_s1 + $0x218] sm:$0xf0] }
 0x26f   :  { %5881 = vmatpush.bf16.msrb.mxu0 %v6785_v53  ;;  %5863 = vmatmul.bf16.vlgmr.msra.gmra.mxu2 %v10695_v21  ;;  %v5631_v53 = vadd.f32 %v5630_v44, %v14534_v45  ;;  %v7121_v45 = vor.u32 %v10003_v50, %v7118_v43  ;;  %v9931_v10 = vld [vmem:[%s15892_s1 + $0x24c] sm:$0xf]  ;;  %v6830_v21 = vld [vmem:[%s15892_s1 + $0x258] sm:$0xf0] }
 0x270   :  { %5894 = vmatpush.bf16.msrb.mxu1 %v6913_v41  ;;  %5907 = vmatpush.bf16.msrb.mxu2 %v7041_v54  ;;  %v6737_v41 = vor.u32 %v9907_v38, %v6734_v39  ;;  %v5643_v54 = vpop.f32.mrf.mxu1  ;;  %v9963_v24 = vld [vmem:[%s15892_s1 + $0x34c] sm:$0xf]  ;;  %v7086_v38 = vld [vmem:[%s15892_s1 + $0x458] sm:$0xf0]  ;;  %v6833_v36 = vor.u32 %v9931_v10, %v6830_v21 }
 0x271   :  { %5920 = vmatpush.bf16.msrb.mxu3 %v7169_v57  ;;  %5850 = vmatmul.bf16.vlgmr.msra.gmra.mxu1 %v11997_v7  ;;  %v6718_v57 = vld [vmem:[%s15892_s1 + $0x178] sm:$0xf0]  ;;  %v5644_v59 = vadd.f32 %v5643_v54, %v5631_v53  ;;  %v6961_v42 = vor.u32 %v9963_v24, %v6958_v32  ;;  %v9895_v44 = vld [vmem:[%s15892_s1 + $0x12c] sm:$0xf] }
 0x272   :  { %5876 = vmatmul.bf16.vlgmr.msra.gmra.mxu3 %v11075_v28  ;;  %v6862_v28 = vld [vmem:[%s15892_s1 + $0x298] sm:$0xf0]  ;;  %v5656_v31 = vpop.f32.mrf.mxu2  ;;  %v9927_v43 = vld [vmem:[%s15892_s1 + $0x22c] sm:$0xf] }
 0x273   :  { %5882 = vmatpush.bf16.msrb.mxu0 %v6769_v11  ;;  %v6865_v55 = vor.u32 %v9939_v40, %v6862_v28  ;;  %v9999_v11 = vld [vmem:[%s15892_s1 + $0x46c] sm:$0xf]  ;;  %v5632_v39 = vpop.f32.mrf.mxu0  ;;  %v6686_v50 = vld [vmem:[%s15892_s1 + $0x138] sm:$0xf0] }
 0x274   :  { %5895 = vmatpush.bf16.msrb.mxu1 %v6897_v63  ;;  %5908 = vmatpush.bf16.msrb.mxu2 %v7025_v20  ;;  %v7102_v63 = vld [vmem:[%s15892_s1 + $0x478] sm:$0xf0]  ;;  %v6721_v20 = vor.u32 %v9903_v56, %v6718_v57  ;;  %v9959_v54 = vld [vmem:[%s15892_s1 + $0x32c] sm:$0xf]  ;;  %v6689_v57 = vor.u32 %v9895_v44, %v6686_v50 }
 0x275   :  { %5921 = vmatpush.bf16.msrb.mxu3 %v7153_v26  ;;  %v6702_v26 = vld [vmem:[%s15892_s1 + $0x158] sm:$0xf0]  ;;  %v7105_v30 = vor.u32 %v9999_v11, %v7102_v63  ;;  %v9891_v58 = vld [vmem:[%s15892_s1 + $0x10c] sm:$0xf] }
 0x276   :  { %v6705_v40 = vor.u32 %v9899_v51, %v6702_v26  ;;  %v7070_v56 = vld [vmem:[%s15892_s1 + $0x438] sm:$0xf0]  ;;  %v9923_v3 = vld [vmem:[%s15892_s1 + $0x20c] sm:$0xf] }
 0x277   :  { %5883 = vmatpush.bf16.msrb.mxu0 %v6753_v33  ;;  %v5657_v33 = vadd.f32 %v5656_v31, %v5644_v59  ;;  %v9955_v11 = vld [vmem:[%s15892_s1 + $0x30c] sm:$0xf]  ;;  %v7294_v10 = vld [vmem:[%s15892_s1 + $0x5f8] sm:$0xf0] }
 0x278   :  { %5896 = vmatpush.bf16.msrb.mxu1 %v6881_v35  ;;  %5909 = vmatpush.bf16.msrb.mxu2 %v7009_v37  ;;  %v5669_v35 = vpop.f32.mrf.mxu3  ;;  %v9995_v37 = vld [vmem:[%s15892_s1 + $0x44c] sm:$0xf]  ;;  %v7422_v24 = vld [vmem:[%s15892_s1 + $0x6f8] sm:$0xf0] }
 0x279   :  { %5922 = vmatpush.bf16.msrb.mxu3 %v7137_v22  ;;  %v5645_v22 = vpop.f32.mrf.mxu1  ;;  %v14732_v28 = vadd.f32 %v5669_v35, %v5657_v33  ;;  %v7089_v53 = vor.u32 %v9995_v37, %v7086_v38  ;;  %v10047_v26 = vld [vmem:[%s15892_s1 + $0x5ec] sm:$0xf]  ;;  %v7550_v33 = vld [vmem:[%s15892_s1 + $0x7f8] sm:$0xf0]  ;;  %v6801_v35 = vor.u32 %v9923_v3, %v6798_v8 }
 0x27a   :  { %v5658_v51 = vpop.f32.mrf.mxu2  ;;  %v10111_v32 = vld [vmem:[%s15892_s1 + $0x7ec] sm:$0xf]  ;;  %v7678_v39 = vld [vmem:[%s15892_s1 + $0x8f8] sm:$0xf0]  ;;  %v7297_v22 = vor.u32 %v10047_v26, %v7294_v10 }
 0x27b   :  { %5884 = vmatpush.bf16.msrb.mxu0 %v6737_v41  ;;  %v6814_v41 = vld [vmem:[%s15892_s1 + $0x238] sm:$0xf0]  ;;  %v10143_v38 = vld [vmem:[%s15892_s1 + $0x8ec] sm:$0xf] }
 0x27c   :  { %5897 = vmatpush.bf16.msrb.mxu1 %v6865_v55  ;;  %5910 = vmatpush.bf16.msrb.mxu2 %v6993_v52  ;;  %v6942_v55 = vld [vmem:[%s15892_s1 + $0x338] sm:$0xf0]  ;;  %v9991_v52 = vld [vmem:[%s15892_s1 + $0x42c] sm:$0xf]  ;;  %v6817_v59 = vor.u32 %v9927_v43, %v6814_v41 }
 0x27d   :  { %5923 = vmatpush.bf16.msrb.mxu3 %v7121_v45  ;;  %v6670_v45 = vld [vmem:[%s15892_s1 + $0x118] sm:$0xf0]  ;;  %v6945_v62 = vor.u32 %v9959_v54, %v6942_v55  ;;  %v7073_v63 = vor.u32 %v9991_v52, %v7070_v56  ;;  %v10043_v44 = vld [vmem:[%s15892_s1 + $0x5cc] sm:$0xf] }
 0x27e   :  { %v6673_v21 = vor.u32 %v9891_v58, %v6670_v45  ;;  %v7278_v50 = vld [vmem:[%s15892_s1 + $0x5d8] sm:$0xf0]  ;;  %v10075_v43 = vld [vmem:[%s15892_s1 + $0x6cc] sm:$0xf] }
 0x27f   :  { %5885 = vmatpush.bf16.msrb.mxu0 %v6721_v20  ;;  %v6926_v20 = vld [vmem:[%s15892_s1 + $0x318] sm:$0xf0]  ;;  %v10107_v54 = vld [vmem:[%s15892_s1 + $0x7cc] sm:$0xf] }
 0x280   :  { %5898 = vmatpush.bf16.msrb.mxu1 %v6849_v61  ;;  %5911 = vmatpush.bf16.msrb.mxu2 %v6977_v25  ;;  %v9987_v61 = vld [vmem:[%s15892_s1 + $0x40c] sm:$0xf]  ;;  %v7054_v25 = vld [vmem:[%s15892_s1 + $0x418] sm:$0xf0]  ;;  %v5671_v31 = vpop.f32.mrf.mxu3  ;;  %v6929_v37 = vor.u32 %v9955_v11, %v6926_v20 }
 0x281   :  { %5924 = vmatpush.bf16.msrb.mxu3 %v7105_v30  ;;  %v10079_v30 = vld [vmem:[%s15892_s1 + $0x6ec] sm:$0xf]  ;;  %v7406_v41 = vld [vmem:[%s15892_s1 + $0x6d8] sm:$0xf0] }
 0x282   :  { %v7534_v55 = vld [vmem:[%s15892_s1 + $0x7d8] sm:$0xf0]  ;;  %v10139_v52 = vld [vmem:[%s15892_s1 + $0x8cc] sm:$0xf]  ;;  %v7409_v58 = vor.u32 %v10075_v43, %v7406_v41 }
 0x283   :  { %5886 = vmatpush.bf16.msrb.mxu0 %v6705_v40  ;;  %v7057_v40 = vor.u32 %v9987_v61, %v7054_v25  ;;  %v7662_v56 = vld [vmem:[%s15892_s1 + $0x8d8] sm:$0xf0]  ;;  %v7537_v45 = vor.u32 %v10107_v54, %v7534_v55  ;;  %v10071_v3 = vld [vmem:[%s15892_s1 + $0x6ac] sm:$0xf] }
 0x284   :  { %5899 = vmatpush.bf16.msrb.mxu1 %v6833_v36  ;;  %5912 = vmatpush.bf16.msrb.mxu2 %v6961_v42  ;;  %v7425_v36 = vor.u32 %v10079_v30, %v7422_v24  ;;  %v7553_v42 = vor.u32 %v10111_v32, %v7550_v33  ;;  %v7665_v8 = vor.u32 %v10139_v52, %v7662_v56  ;;  %v7390_v11 = vld [vmem:[%s15892_s1 + $0x6b8] sm:$0xf0]  ;;  %v10135_v61 = vld [vmem:[%s15892_s1 + $0x8ac] sm:$0xf] }
 0x285   :  { %5925 = vmatpush.bf16.msrb.mxu3 %v7089_v53  ;;  %v7681_v53 = vor.u32 %v10143_v38, %v7678_v39  ;;  %v7518_v20 = vld [vmem:[%s15892_s1 + $0x7b8] sm:$0xf0]  ;;  %v7393_v51 = vor.u32 %v10071_v3, %v7390_v11  ;;  %v10035_v10 = vld [vmem:[%s15892_s1 + $0x58c] sm:$0xf] }
 0x286   :  { %v7246_v30 = vld [vmem:[%s15892_s1 + $0x598] sm:$0xf0]  ;;  %v10099_v31 = vld [vmem:[%s15892_s1 + $0x78c] sm:$0xf] }
 0x287   :  { %5887 = vmatpush.bf16.msrb.mxu0 %v6689_v57  ;;  %v7281_v57 = vor.u32 %v10043_v44, %v7278_v50  ;;  %v10131_v32 = vld [vmem:[%s15892_s1 + $0x88c] sm:$0xf]  ;;  %v7630_v33 = vld [vmem:[%s15892_s1 + $0x898] sm:$0xf0] }
 0x288   :  { %5900 = vmatpush.bf16.msrb.mxu1 %v6817_v59  ;;  %5913 = vmatpush.bf16.msrb.mxu2 %v6945_v62  ;;  %v10039_v59 = vld [vmem:[%s15892_s1 + $0x5ac] sm:$0xf]  ;;  %v7262_v62 = vld [vmem:[%s15892_s1 + $0x5b8] sm:$0xf0] }
 0x289   :  { %5926 = vmatpush.bf16.msrb.mxu3 %v7073_v63  ;;  %v10103_v63 = vld [vmem:[%s15892_s1 + $0x7ac] sm:$0xf]  ;;  %v7265_v25 = vor.u32 %v10039_v59, %v7262_v62  ;;  %v7358_v50 = vld [vmem:[%s15892_s1 + $0x678] sm:$0xf0] }
 0x28a   :  { %v7521_v26 = vor.u32 %v10103_v63, %v7518_v20  ;;  %v10095_v43 = vld [vmem:[%s15892_s1 + $0x76c] sm:$0xf]  ;;  %v7614_v54 = vld [vmem:[%s15892_s1 + $0x878] sm:$0xf0] }
 0x28b   :  { %5888 = vmatpush.bf16.msrb.mxu0 %v6673_v21  ;;  %v7502_v21 = vld [vmem:[%s15892_s1 + $0x798] sm:$0xf0]  ;;  %v5682_v24 = vpop.f32.mrf.mxu0  ;;  %v10127_v41 = vld [vmem:[%s15892_s1 + $0x86c] sm:$0xf] }
 0x28c   :  { %5901 = vmatpush.bf16.msrb.mxu1 %v6801_v35  ;;  %5914 = vmatpush.bf16.msrb.mxu2 %v6929_v37  ;;  %v5683_v35 = vadd.f32 %v5682_v24, %v14732_v28  ;;  %v7249_v37 = vor.u32 %v10035_v10, %v7246_v30  ;;  %v7633_v28 = vor.u32 %v10131_v32, %v7630_v33  ;;  %v7342_v3 = vld [vmem:[%s15892_s1 + $0x658] sm:$0xf0]  ;;  %v10087_v32 = vld [vmem:[%s15892_s1 + $0x72c] sm:$0xf] }
 0x28d   :  { %5927 = vmatpush.bf16.msrb.mxu3 %v7057_v40  ;;  %v7505_v40 = vor.u32 %v10099_v31, %v7502_v21  ;;  %v7617_v59 = vor.u32 %v10127_v41, %v7614_v54  ;;  %v7470_v11 = vld [vmem:[%s15892_s1 + $0x758] sm:$0xf0]  ;;  %v10055_v31 = vld [vmem:[%s15892_s1 + $0x62c] sm:$0xf] }
 0x28e   :  { %5889 = vmatmul.bf16.vlgmr.msrb.gmra.mxu0 %v11085_v34  ;;  %v10067_v34 = vld [vmem:[%s15892_s1 + $0x68c] sm:$0xf]  ;;  %v5695_v38 = vpop.f32.mrf.mxu1  ;;  %v7326_v24 = vld [vmem:[%s15892_s1 + $0x638] sm:$0xf0] }
 0x28f   :  { %5933 = vmatpush.bf16.msra.mxu0 %v7297_v22  ;;  %5915 = vmatmul.bf16.vlgmr.msrb.gmra.mxu2 %v11077_v29  ;;  %v7646_v29 = vld [vmem:[%s15892_s1 + $0x8b8] sm:$0xf0]  ;;  %v10031_v22 = vld [vmem:[%s15892_s1 + $0x56c] sm:$0xf]  ;;  %v5696_v44 = vadd.f32 %v5695_v38, %v5683_v35 }
 0x290   :  { %5946 = vmatpush.bf16.msra.mxu1 %v7425_v36  ;;  %5959 = vmatpush.bf16.msra.mxu2 %v7553_v42  ;;  %v7230_v36 = vld [vmem:[%s15892_s1 + $0x578] sm:$0xf0]  ;;  %v10063_v42 = vld [vmem:[%s15892_s1 + $0x66c] sm:$0xf] }
 0x291   :  { %5972 = vmatpush.bf16.msra.mxu3 %v7681_v53  ;;  %5902 = vmatmul.bf16.vlgmr.msrb.gmra.mxu1 %v11073_v27  ;;  %v7374_v27 = vld [vmem:[%s15892_s1 + $0x698] sm:$0xf0]  ;;  %v7233_v55 = vor.u32 %v10031_v22, %v7230_v36  ;;  %v7361_v52 = vor.u32 %v10063_v42, %v7358_v50  ;;  %v10119_v35 = vld [vmem:[%s15892_s1 + $0x82c] sm:$0xf]  ;;  %v7329_v22 = vor.u32 %v10055_v31, %v7326_v24 }
 0x292   :  { %5928 = vmatmul.bf16.vlgmr.msrb.gmra.mxu3 %v11153_v0  ;;  %v7649_v0 = vor.u32 %v10135_v61, %v7646_v29  ;;  %v7377_v39 = vor.u32 %v10067_v34, %v7374_v27  ;;  %v7486_v53 = vld [vmem:[%s15892_s1 + $0x778] sm:$0xf0]  ;;  %v5708_v62 = vpop.f32.mrf.mxu2  ;;  %v10123_v61 = vld [vmem:[%s15892_s1 + $0x84c] sm:$0xf] }
 0x293   :  { %5934 = vmatpush.bf16.msra.mxu0 %v7281_v57  ;;  %v7489_v56 = vor.u32 %v10095_v43, %v7486_v53  ;;  %v10027_v57 = vld [vmem:[%s15892_s1 + $0x54c] sm:$0xf]  ;;  %v5709_v63 = vadd.f32 %v5708_v62, %v5696_v44  ;;  %v7598_v29 = vld [vmem:[%s15892_s1 + $0x858] sm:$0xf0] }
 0x294   :  { %5947 = vmatpush.bf16.msra.mxu1 %v7409_v58  ;;  %5960 = vmatpush.bf16.msra.mxu2 %v7537_v45  ;;  %v7214_v58 = vld [vmem:[%s15892_s1 + $0x558] sm:$0xf0]  ;;  %v10059_v45 = vld [vmem:[%s15892_s1 + $0x64c] sm:$0xf]  ;;  %v7601_v21 = vor.u32 %v10123_v61, %v7598_v29 }
 0x295   :  { %5973 = vmatpush.bf16.msra.mxu3 %v7665_v8  ;;  %v10091_v8 = vld [vmem:[%s15892_s1 + $0x74c] sm:$0xf]  ;;  %v5721_v20 = vpop.f32.mrf.mxu3  ;;  %v7345_v30 = vor.u32 %v10059_v45, %v7342_v3  ;;  %v7198_v27 = vld [vmem:[%s15892_s1 + $0x538] sm:$0xf0] }
 0x296   :  { %v14931_v10 = vadd.f32 %v5721_v20, %v5709_v63  ;;  %v7473_v34 = vor.u32 %v10091_v8, %v7470_v11  ;;  %v7454_v33 = vld [vmem:[%s15892_s1 + $0x738] sm:$0xf0]  ;;  %v10051_v42 = vld [vmem:[%s15892_s1 + $0x60c] sm:$0xf] }
 0x297   :  { %5935 = vmatpush.bf16.msra.mxu0 %v7265_v25  ;;  %v5684_v25 = vpop.f32.mrf.mxu0  ;;  %v7457_v36 = vor.u32 %v10087_v32, %v7454_v33  ;;  %v10083_v44 = vld [vmem:[%s15892_s1 + $0x70c] sm:$0xf]  ;;  %v7438_v43 = vld [vmem:[%s15892_s1 + $0x718] sm:$0xf0] }
 0x298   :  { %5948 = vmatpush.bf16.msra.mxu1 %v7393_v51  ;;  %5961 = vmatpush.bf16.msra.mxu2 %v7521_v26  ;;  %v7217_v51 = vor.u32 %v10027_v57, %v7214_v58  ;;  %v5697_v26 = vpop.f32.mrf.mxu1  ;;  %v10115_v53 = vld [vmem:[%s15892_s1 + $0x80c] sm:$0xf]  ;;  %v7566_v41 = vld [vmem:[%s15892_s1 + $0x818] sm:$0xf0]  ;;  %v7441_v8 = vor.u32 %v10083_v44, %v7438_v43 }
 0x299   :  { %5974 = vmatpush.bf16.msra.mxu3 %v7649_v0  ;;  %v10023_v0 = vld [vmem:[%s15892_s1 + $0x52c] sm:$0xf]  ;;  %v7934_v45 = vld [vmem:[%s15892_s1 + $0xaf8] sm:$0xf0]  ;;  %v7569_v20 = vor.u32 %v10115_v53, %v7566_v41 }
 0x29a   :  { %v7201_v38 = vor.u32 %v10023_v0, %v7198_v27  ;;  %v5710_v54 = vpop.f32.mrf.mxu2  ;;  %v8062_v62 = vld [vmem:[%s15892_s1 + $0xbf8] sm:$0xf0]  ;;  %v10271_v11 = vld [vmem:[%s15892_s1 + $0xcec] sm:$0xf] }
 0x29b   :  { %5936 = vmatpush.bf16.msra.mxu0 %v7249_v37  ;;  %v7582_v37 = vld [vmem:[%s15892_s1 + $0x838] sm:$0xf0]  ;;  %v10235_v27 = vld [vmem:[%s15892_s1 + $0xbcc] sm:$0xf] }
 0x29c   :  { %5949 = vmatpush.bf16.msra.mxu1 %v7377_v39  ;;  %5962 = vmatpush.bf16.msra.mxu2 %v7505_v40  ;;  %v10019_v39 = vld [vmem:[%s15892_s1 + $0x50c] sm:$0xf]  ;;  %v7182_v40 = vld [vmem:[%s15892_s1 + $0x518] sm:$0xf0]  ;;  %v7585_v50 = vor.u32 %v10119_v35, %v7582_v37 }
 0x29d   :  { %5975 = vmatpush.bf16.msra.mxu3 %v7633_v28  ;;  %v7310_v28 = vld [vmem:[%s15892_s1 + $0x618] sm:$0xf0]  ;;  %v5723_v57 = vpop.f32.mrf.mxu3  ;;  %v7185_v58 = vor.u32 %v10019_v39, %v7182_v40  ;;  %v10167_v37 = vld [vmem:[%s15892_s1 + $0x9ac] sm:$0xf] }
 0x29e   :  { %v7313_v3 = vor.u32 %v10051_v42, %v7310_v28  ;;  %v8190_v63 = vld [vmem:[%s15892_s1 + $0xcf8] sm:$0xf0]  ;;  %v10199_v39 = vld [vmem:[%s15892_s1 + $0xaac] sm:$0xf] }
 0x29f   :  { %5937 = vmatpush.bf16.msra.mxu0 %v7233_v55  ;;  %v10175_v55 = vld [vmem:[%s15892_s1 + $0x9ec] sm:$0xf]  ;;  %v7790_v26 = vld [vmem:[%s15892_s1 + $0x9d8] sm:$0xf0] }
 0x2a0   :  { %5950 = vmatpush.bf16.msra.mxu1 %v7361_v52  ;;  %5963 = vmatpush.bf16.msra.mxu2 %v7489_v56  ;;  %v7806_v52 = vld [vmem:[%s15892_s1 + $0x9f8] sm:$0xf0]  ;;  %v10207_v56 = vld [vmem:[%s15892_s1 + $0xaec] sm:$0xf] }
 0x2a1   :  { %5976 = vmatpush.bf16.msra.mxu3 %v7617_v59  ;;  %v10239_v59 = vld [vmem:[%s15892_s1 + $0xbec] sm:$0xf]  ;;  %v7809_v61 = vor.u32 %v10175_v55, %v7806_v52  ;;  %v7937_v29 = vor.u32 %v10207_v56, %v7934_v45  ;;  %v7918_v0 = vld [vmem:[%s15892_s1 + $0xad8] sm:$0xf0] }
 0x2a2   :  { %v8065_v25 = vor.u32 %v10239_v59, %v8062_v62  ;;  %v8046_v31 = vld [vmem:[%s15892_s1 + $0xbd8] sm:$0xf0]  ;;  %v10195_v53 = vld [vmem:[%s15892_s1 + $0xa8c] sm:$0xf] }
 0x2a3   :  { %5938 = vmatpush.bf16.msra.mxu0 %v7217_v51  ;;  %v10171_v51 = vld [vmem:[%s15892_s1 + $0x9cc] sm:$0xf]  ;;  %v8174_v24 = vld [vmem:[%s15892_s1 + $0xcd8] sm:$0xf0]  ;;  %v8049_v35 = vor.u32 %v10235_v27, %v8046_v31 }
 0x2a4   :  { %5951 = vmatpush.bf16.msra.mxu1 %v7345_v30  ;;  %5964 = vmatpush.bf16.msra.mxu2 %v7473_v34  ;;  %v10203_v30 = vld [vmem:[%s15892_s1 + $0xacc] sm:$0xf]  ;;  %v8193_v34 = vor.u32 %v10271_v11, %v8190_v63  ;;  %v7793_v32 = vor.u32 %v10171_v51, %v7790_v26  ;;  %v8030_v42 = vld [vmem:[%s15892_s1 + $0xbb8] sm:$0xf0] }
 0x2a5   :  { %5977 = vmatpush.bf16.msra.mxu3 %v7601_v21  ;;  %v10267_v21 = vld [vmem:[%s15892_s1 + $0xccc] sm:$0xf]  ;;  %v7921_v33 = vor.u32 %v10203_v30, %v7918_v0  ;;  %v8158_v28 = vld [vmem:[%s15892_s1 + $0xcb8] sm:$0xf0] }
 0x2a6   :  { %v8177_v40 = vor.u32 %v10267_v21, %v8174_v24  ;;  %v7886_v41 = vld [vmem:[%s15892_s1 + $0xa98] sm:$0xf0]  ;;  %v10227_v54 = vld [vmem:[%s15892_s1 + $0xb8c] sm:$0xf] }
 0x2a7   :  { %5939 = vmatpush.bf16.msra.mxu0 %v7201_v38  ;;  %v7774_v38 = vld [vmem:[%s15892_s1 + $0x9b8] sm:$0xf0]  ;;  %v10259_v56 = vld [vmem:[%s15892_s1 + $0xc8c] sm:$0xf]  ;;  %v7889_v62 = vor.u32 %v10195_v53, %v7886_v41 }
 0x2a8   :  { %5952 = vmatpush.bf16.msra.mxu1 %v7329_v22  ;;  %5965 = vmatpush.bf16.msra.mxu2 %v7457_v36  ;;  %v7902_v22 = vld [vmem:[%s15892_s1 + $0xab8] sm:$0xf0]  ;;  %v10231_v36 = vld [vmem:[%s15892_s1 + $0xbac] sm:$0xf]  ;;  %v7777_v44 = vor.u32 %v10167_v37, %v7774_v38 }
 0x2a9   :  { %5978 = vmatpush.bf16.msra.mxu3 %v7585_v50  ;;  %v7905_v50 = vor.u32 %v10199_v39, %v7902_v22  ;;  %v8033_v43 = vor.u32 %v10231_v36, %v8030_v42  ;;  %v8014_v55 = vld [vmem:[%s15892_s1 + $0xb98] sm:$0xf0]  ;;  %v10191_v63 = vld [vmem:[%s15892_s1 + $0xa6c] sm:$0xf] }
 0x2aa   :  { %v8142_v57 = vld [vmem:[%s15892_s1 + $0xc98] sm:$0xf0]  ;;  %v10255_v51 = vld [vmem:[%s15892_s1 + $0xc6c] sm:$0xf] }
 0x2ab   :  { %5940 = vmatpush.bf16.msra.mxu0 %v7185_v58  ;;  %v5734_v52 = vpop.f32.mrf.mxu0  ;;  %v7742_v11 = vld [vmem:[%s15892_s1 + $0x978] sm:$0xf0]  ;;  %v10155_v27 = vld [vmem:[%s15892_s1 + $0x94c] sm:$0xf] }
 0x2ac   :  { %5953 = vmatpush.bf16.msra.mxu1 %v7313_v3  ;;  %5966 = vmatpush.bf16.msra.mxu2 %v7441_v8  ;;  %v5735_v58 = vadd.f32 %v5734_v52, %v14931_v10  ;;  %v8017_v3 = vor.u32 %v10227_v54, %v8014_v55  ;;  %v10159_v8 = vld [vmem:[%s15892_s1 + $0x96c] sm:$0xf]  ;;  %v8145_v10 = vor.u32 %v10259_v56, %v8142_v57  ;;  %v8126_v26 = vld [vmem:[%s15892_s1 + $0xc78] sm:$0xf0] }
 0x2ad   :  { %5979 = vmatpush.bf16.msra.mxu3 %v7569_v20  ;;  %v7745_v30 = vor.u32 %v10159_v8, %v7742_v11  ;;  %v7726_v31 = vld [vmem:[%s15892_s1 + $0x958] sm:$0xf0]  ;;  %v10187_v21 = vld [vmem:[%s15892_s1 + $0xa4c] sm:$0xf]  ;;  %v8129_v24 = vor.u32 %v10255_v51, %v8126_v26 }
 0x2ae   :  { %5941 = vmatmul.bf16.vlgmr.msra.gmra.mxu0 %v11157_v2  ;;  %v10263_v2 = vld [vmem:[%s15892_s1 + $0xcac] sm:$0xf]  ;;  %v5747_v59 = vpop.f32.mrf.mxu1  ;;  %v7982_v37 = vld [vmem:[%s15892_s1 + $0xb58] sm:$0xf0]  ;;  %v7729_v42 = vor.u32 %v10155_v27, %v7726_v31 }
 0x2af   :  { %5985 = vmatpush.bf16.msrb.mxu0 %v7809_v61  ;;  %5967 = vmatmul.bf16.vlgmr.msra.gmra.mxu2 %v11155_v1  ;;  %v7758_v1 = vld [vmem:[%s15892_s1 + $0x998] sm:$0xf0]  ;;  %v5748_v20 = vadd.f32 %v5747_v59, %v5735_v58  ;;  %v10215_v41 = vld [vmem:[%s15892_s1 + $0xb2c] sm:$0xf] }
 0x2b0   :  { %5998 = vmatpush.bf16.msrb.mxu1 %v7937_v29  ;;  %6011 = vmatpush.bf16.msrb.mxu2 %v8065_v25  ;;  %v7870_v61 = vld [vmem:[%s15892_s1 + $0xa78] sm:$0xf0]  ;;  %v10223_v29 = vld [vmem:[%s15892_s1 + $0xb6c] sm:$0xf] }
 0x2b1   :  { %6024 = vmatpush.bf16.msrb.mxu3 %v8193_v34  ;;  %5954 = vmatmul.bf16.vlgmr.msra.gmra.mxu1 %v11148_v60  ;;  %v10163_v60 = vld [vmem:[%s15892_s1 + $0x98c] sm:$0xf]  ;;  %v7998_v25 = vld [vmem:[%s15892_s1 + $0xb78] sm:$0xf0]  ;;  %v7873_v34 = vor.u32 %v10191_v63, %v7870_v61 }
 0x2b2   :  { %5980 = vmatmul.bf16.vlgmr.msra.gmra.mxu3 %v11403_v12  ;;  %v8161_v12 = vor.u32 %v10263_v2, %v8158_v28  ;;  %v7761_v45 = vor.u32 %v10163_v60, %v7758_v1  ;;  %v8001_v0 = vor.u32 %v10223_v29, %v7998_v25  ;;  %v8110_v22 = vld [vmem:[%s15892_s1 + $0xc58] sm:$0xf0]  ;;  %v10183_v1 = vld [vmem:[%s15892_s1 + $0xa2c] sm:$0xf] }
 0x2b3   :  { %5986 = vmatpush.bf16.msrb.mxu0 %v7793_v32  ;;  %v5760_v32 = vpop.f32.mrf.mxu2  ;;  %v5736_v36 = vpop.f32.mrf.mxu0  ;;  %v7710_v60 = vld [vmem:[%s15892_s1 + $0x938] sm:$0xf0]  ;;  %v10247_v55 = vld [vmem:[%s15892_s1 + $0xc2c] sm:$0xf] }
 0x2b4   :  { %5999 = vmatpush.bf16.msrb.mxu1 %v7921_v33  ;;  %6012 = vmatpush.bf16.msrb.mxu2 %v8049_v35  ;;  %v7854_v33 = vld [vmem:[%s15892_s1 + $0xa58] sm:$0xf0]  ;;  %v10219_v35 = vld [vmem:[%s15892_s1 + $0xb4c] sm:$0xf]  ;;  %v5761_v38 = vadd.f32 %v5760_v32, %v5748_v20 }
 0x2b5   :  { %6025 = vmatpush.bf16.msrb.mxu3 %v8177_v40  ;;  %v5773_v39 = vpop.f32.mrf.mxu3  ;;  %v10251_v40 = vld [vmem:[%s15892_s1 + $0xc4c] sm:$0xf]  ;;  %v7966_v54 = vld [vmem:[%s15892_s1 + $0xb38] sm:$0xf0] }
 0x2b6   :  { %v5749_v2 = vpop.f32.mrf.mxu1  ;;  %v15130_v28 = vadd.f32 %v5773_v39, %v5761_v38  ;;  %v8113_v53 = vor.u32 %v10251_v40, %v8110_v22  ;;  %v8094_v52 = vld [vmem:[%s15892_s1 + $0xc38] sm:$0xf0]  ;;  %v10147_v57 = vld [vmem:[%s15892_s1 + $0x90c] sm:$0xf]  ;;  %v7969_v59 = vor.u32 %v10215_v41, %v7966_v54 }
 0x2b7   :  { %5987 = vmatpush.bf16.msrb.mxu0 %v7777_v44  ;;  %v7857_v44 = vor.u32 %v10187_v21, %v7854_v33  ;;  %v7694_v58 = vld [vmem:[%s15892_s1 + $0x918] sm:$0xf0]  ;;  %v10211_v8 = vld [vmem:[%s15892_s1 + $0xb0c] sm:$0xf]  ;;  %v8097_v11 = vor.u32 %v10247_v55, %v8094_v52 }
 0x2b8   :  { %6000 = vmatpush.bf16.msrb.mxu1 %v7905_v50  ;;  %6013 = vmatpush.bf16.msrb.mxu2 %v8033_v43  ;;  %v7985_v50 = vor.u32 %v10219_v35, %v7982_v37  ;;  %v10151_v43 = vld [vmem:[%s15892_s1 + $0x92c] sm:$0xf]  ;;  %v7950_v63 = vld [vmem:[%s15892_s1 + $0xb18] sm:$0xf0] }
 0x2b9   :  { %6026 = vmatpush.bf16.msrb.mxu3 %v8161_v12  ;;  %v7838_v12 = vld [vmem:[%s15892_s1 + $0xa38] sm:$0xf0]  ;;  %v7713_v56 = vor.u32 %v10151_v43, %v7710_v60  ;;  %v10303_v29 = vld [vmem:[%s15892_s1 + $0xdec] sm:$0xf]  ;;  %v7953_v21 = vor.u32 %v10211_v8, %v7950_v63 }
 0x2ba   :  { %v8078_v20 = vld [vmem:[%s15892_s1 + $0xc18] sm:$0xf0]  ;;  %v10335_v51 = vld [vmem:[%s15892_s1 + $0xeec] sm:$0xf] }
 0x2bb   :  { %5988 = vmatpush.bf16.msrb.mxu0 %v7761_v45  ;;  %v7841_v45 = vor.u32 %v10183_v1, %v7838_v12  ;;  %v5762_v61 = vpop.f32.mrf.mxu2  ;;  %v8318_v25 = vld [vmem:[%s15892_s1 + $0xdf8] sm:$0xf0]  ;;  %v10299_v39 = vld [vmem:[%s15892_s1 + $0xdcc] sm:$0xf] }
 0x2bc   :  { %6001 = vmatpush.bf16.msrb.mxu1 %v7889_v62  ;;  %6014 = vmatpush.bf16.msrb.mxu2 %v8017_v3  ;;  %v10179_v62 = vld [vmem:[%s15892_s1 + $0xa0c] sm:$0xf]  ;;  %v7822_v3 = vld [vmem:[%s15892_s1 + $0xa18] sm:$0xf0]  ;;  %v8321_v35 = vor.u32 %v10303_v29, %v8318_v25 }
 0x2bd   :  { %6027 = vmatpush.bf16.msrb.mxu3 %v8145_v10  ;;  %v10243_v10 = vld [vmem:[%s15892_s1 + $0xc0c] sm:$0xf]  ;;  %v5775_v26 = vpop.f32.mrf.mxu3  ;;  %v8574_v27 = vld [vmem:[%s15892_s1 + $0xff8] sm:$0xf0]  ;;  %v7825_v31 = vor.u32 %v10179_v62, %v7822_v3 }
 0x2be   :  { %v8702_v32 = vld [vmem:[%s15892_s1 + $0x10f8] sm:$0xf0]  ;;  %v8081_v33 = vor.u32 %v10243_v10, %v8078_v20  ;;  %v10331_v22 = vld [vmem:[%s15892_s1 + $0xecc] sm:$0xf] }
 0x2bf   :  { %5989 = vmatpush.bf16.msrb.mxu0 %v7745_v30  ;;  %v7697_v30 = vor.u32 %v10147_v57, %v7694_v58  ;;  %v8302_v40 = vld [vmem:[%s15892_s1 + $0xdd8] sm:$0xf0]  ;;  %v10363_v2 = vld [vmem:[%s15892_s1 + $0xfcc] sm:$0xf] }
 0x2c0   :  { %6002 = vmatpush.bf16.msrb.mxu1 %v7873_v34  ;;  %6015 = vmatpush.bf16.msrb.mxu2 %v8001_v0  ;;  %v8446_v34 = vld [vmem:[%s15892_s1 + $0xef8] sm:$0xf0]  ;;  %v10367_v0 = vld [vmem:[%s15892_s1 + $0xfec] sm:$0xf]  ;;  %v8305_v60 = vor.u32 %v10299_v39, %v8302_v40 }
 0x2c1   :  { %6028 = vmatpush.bf16.msrb.mxu3 %v8129_v24  ;;  %v10399_v24 = vld [vmem:[%s15892_s1 + $0x10ec] sm:$0xf]  ;;  %v8449_v37 = vor.u32 %v10335_v51, %v8446_v34  ;;  %v8577_v38 = vor.u32 %v10367_v0, %v8574_v27  ;;  %v8686_v43 = vld [vmem:[%s15892_s1 + $0x10d8] sm:$0xf0] }
 0x2c2   :  { %v8705_v36 = vor.u32 %v10399_v24, %v8702_v32  ;;  %v10295_v12 = vld [vmem:[%s15892_s1 + $0xdac] sm:$0xf]  ;;  %v8286_v41 = vld [vmem:[%s15892_s1 + $0xdb8] sm:$0xf0] }
 0x2c3   :  { %5990 = vmatpush.bf16.msrb.mxu0 %v7729_v42  ;;  %v8430_v42 = vld [vmem:[%s15892_s1 + $0xed8] sm:$0xf0]  ;;  %v10327_v54 = vld [vmem:[%s15892_s1 + $0xeac] sm:$0xf] }
 0x2c4   :  { %6003 = vmatpush.bf16.msrb.mxu1 %v7857_v44  ;;  %6016 = vmatpush.bf16.msrb.mxu2 %v7985_v50  ;;  %v8558_v44 = vld [vmem:[%s15892_s1 + $0xfd8] sm:$0xf0]  ;;  %v10395_v50 = vld [vmem:[%s15892_s1 + $0x10cc] sm:$0xf]  ;;  %v8433_v1 = vor.u32 %v10331_v22, %v8430_v42 }
 0x2c5   :  { %6029 = vmatpush.bf16.msrb.mxu3 %v8113_v53  ;;  %v8561_v53 = vor.u32 %v10363_v2, %v8558_v44  ;;  %v8689_v55 = vor.u32 %v10395_v50, %v8686_v43  ;;  %v8414_v52 = vld [vmem:[%s15892_s1 + $0xeb8] sm:$0xf0]  ;;  %v10323_v3 = vld [vmem:[%s15892_s1 + $0xe8c] sm:$0xf] }
 0x2c6   :  { %v8542_v57 = vld [vmem:[%s15892_s1 + $0xfb8] sm:$0xf0]  ;;  %v10387_v20 = vld [vmem:[%s15892_s1 + $0x108c] sm:$0xf] }
 0x2c7   :  { %5991 = vmatpush.bf16.msrb.mxu0 %v7713_v56  ;;  %v10359_v56 = vld [vmem:[%s15892_s1 + $0xfac] sm:$0xf]  ;;  %v8670_v58 = vld [vmem:[%s15892_s1 + $0x10b8] sm:$0xf0] }
 0x2c8   :  { %6004 = vmatpush.bf16.msrb.mxu1 %v7841_v45  ;;  %6017 = vmatpush.bf16.msrb.mxu2 %v7969_v59  ;;  %v8289_v45 = vor.u32 %v10295_v12, %v8286_v41  ;;  %v8417_v59 = vor.u32 %v10327_v54, %v8414_v52  ;;  %v8545_v62 = vor.u32 %v10359_v56, %v8542_v57  ;;  %v8398_v8 = vld [vmem:[%s15892_s1 + $0xe98] sm:$0xf0]  ;;  %v10287_v34 = vld [vmem:[%s15892_s1 + $0xd6c] sm:$0xf] }
 0x2c9   :  { %6030 = vmatpush.bf16.msrb.mxu3 %v8097_v11  ;;  %v10355_v11 = vld [vmem:[%s15892_s1 + $0xf8c] sm:$0xf]  ;;  %v8526_v63 = vld [vmem:[%s15892_s1 + $0xf98] sm:$0xf0]  ;;  %v8401_v26 = vor.u32 %v10323_v3, %v8398_v8 }
 0x2ca   :  { %v8654_v61 = vld [vmem:[%s15892_s1 + $0x1098] sm:$0xf0]  ;;  %v10319_v27 = vld [vmem:[%s15892_s1 + $0xe6c] sm:$0xf] }
 0x2cb   :  { %5992 = vmatpush.bf16.msrb.mxu0 %v7697_v30  ;;  %v5786_v10 = vpop.f32.mrf.mxu0  ;;  %v8529_v30 = vor.u32 %v10355_v11, %v8526_v63  ;;  %v8254_v0 = vld [vmem:[%s15892_s1 + $0xd78] sm:$0xf0]  ;;  %v10351_v24 = vld [vmem:[%s15892_s1 + $0xf6c] sm:$0xf] }
 0x2cc   :  { %6005 = vmatpush.bf16.msrb.mxu1 %v7825_v31  ;;  %6018 = vmatpush.bf16.msrb.mxu2 %v7953_v21  ;;  %v5787_v29 = vadd.f32 %v5786_v10, %v15130_v28  ;;  %v8657_v28 = vor.u32 %v10387_v20, %v8654_v61  ;;  %v8382_v21 = vld [vmem:[%s15892_s1 + $0xe78] sm:$0xf0]  ;;  %v10283_v40 = vld [vmem:[%s15892_s1 + $0xd4c] sm:$0xf] }
 0x2cd   :  { %6031 = vmatpush.bf16.msrb.mxu3 %v8081_v33  ;;  %v8510_v32 = vld [vmem:[%s15892_s1 + $0xf78] sm:$0xf0]  ;;  %v10383_v33 = vld [vmem:[%s15892_s1 + $0x106c] sm:$0xf] }
 0x2ce   :  { %5993 = vmatmul.bf16.vlgmr.msrb.gmra.mxu0 %v11413_v16  ;;  %v10391_v16 = vld [vmem:[%s15892_s1 + $0x10ac] sm:$0xf]  ;;  %v5799_v51 = vpop.f32.mrf.mxu1  ;;  %v8513_v39 = vor.u32 %v10351_v24, %v8510_v32  ;;  %v8238_v22 = vld [vmem:[%s15892_s1 + $0xd58] sm:$0xf0] }
 0x2cf   :  { %6037 = vmatpush.bf16.msra.mxu0 %v8321_v35  ;;  %6019 = vmatmul.bf16.vlgmr.msrb.gmra.mxu2 %v11415_v17  ;;  %v8270_v17 = vld [vmem:[%s15892_s1 + $0xd98] sm:$0xf0]  ;;  %v5800_v31 = vadd.f32 %v5799_v51, %v5787_v29  ;;  %v10347_v50 = vld [vmem:[%s15892_s1 + $0xf4c] sm:$0xf]  ;;  %v8241_v54 = vor.u32 %v10283_v40, %v8238_v22 }
 0x2d0   :  { %6050 = vmatpush.bf16.msra.mxu1 %v8449_v37  ;;  %6063 = vmatpush.bf16.msra.mxu2 %v8577_v38  ;;  %v8638_v35 = vld [vmem:[%s15892_s1 + $0x1078] sm:$0xf0]  ;;  %v8257_v37 = vor.u32 %v10287_v34, %v8254_v0  ;;  %v8385_v38 = vor.u32 %v10319_v27, %v8382_v21  ;;  %v10375_v3 = vld [vmem:[%s15892_s1 + $0x102c] sm:$0xf] }
 0x2d1   :  { %6076 = vmatpush.bf16.msra.mxu3 %v8705_v36  ;;  %6006 = vmatmul.bf16.vlgmr.msrb.gmra.mxu1 %v11411_v15  ;;  %v10291_v15 = vld [vmem:[%s15892_s1 + $0xd8c] sm:$0xf]  ;;  %v8641_v42 = vor.u32 %v10383_v33, %v8638_v35  ;;  %v8366_v44 = vld [vmem:[%s15892_s1 + $0xe58] sm:$0xf0] }
 0x2d2   :  { %6032 = vmatmul.bf16.vlgmr.msrb.gmra.mxu3 %v11577_v46  ;;  %v8673_v46 = vor.u32 %v10391_v16, %v8670_v58  ;;  %v8273_v25 = vor.u32 %v10291_v15, %v8270_v17  ;;  %v10315_v36 = vld [vmem:[%s15892_s1 + $0xe4c] sm:$0xf]  ;;  %v5812_v2 = vpop.f32.mrf.mxu2  ;;  %v8494_v43 = vld [vmem:[%s15892_s1 + $0xf58] sm:$0xf0] }
 0x2d3   :  { %6038 = vmatpush.bf16.msra.mxu0 %v8305_v60  ;;  %v5813_v60 = vadd.f32 %v5812_v2, %v5800_v31  ;;  %v8622_v12 = vld [vmem:[%s15892_s1 + $0x1058] sm:$0xf0]  ;;  %v5788_v41 = vpop.f32.mrf.mxu0  ;;  %v8369_v56 = vor.u32 %v10315_v36, %v8366_v44  ;;  %v8497_v57 = vor.u32 %v10347_v50, %v8494_v43  ;;  %v10279_v16 = vld [vmem:[%s15892_s1 + $0xd2c] sm:$0xf] }
 0x2d4   :  { %6051 = vmatpush.bf16.msra.mxu1 %v8433_v1  ;;  %6064 = vmatpush.bf16.msra.mxu2 %v8561_v53  ;;  %v10379_v53 = vld [vmem:[%s15892_s1 + $0x104c] sm:$0xf]  ;;  %v8222_v58 = vld [vmem:[%s15892_s1 + $0xd38] sm:$0xf0] }
 0x2d5   :  { %6077 = vmatpush.bf16.msra.mxu3 %v8689_v55  ;;  %v5825_v1 = vpop.f32.mrf.mxu3  ;;  %v10343_v15 = vld [vmem:[%s15892_s1 + $0xf2c] sm:$0xf]  ;;  %v8478_v17 = vld [vmem:[%s15892_s1 + $0xf38] sm:$0xf0]  ;;  %v8225_v8 = vor.u32 %v10279_v16, %v8222_v58 }
 0x2d6   :  { %v5801_v55 = vpop.f32.mrf.mxu1  ;;  %v15329_v52 = vadd.f32 %v5825_v1, %v5813_v60  ;;  %v10275_v11 = vld [vmem:[%s15892_s1 + $0xd0c] sm:$0xf]  ;;  %v8206_v63 = vld [vmem:[%s15892_s1 + $0xd18] sm:$0xf0]  ;;  %v8481_v20 = vor.u32 %v10343_v15, %v8478_v17 }
 0x2d7   :  { %6039 = vmatpush.bf16.msra.mxu0 %v8289_v45  ;;  %v10311_v45 = vld [vmem:[%s15892_s1 + $0xe2c] sm:$0xf]  ;;  %v8334_v29 = vld [vmem:[%s15892_s1 + $0xe18] sm:$0xf0]  ;;  %v8209_v24 = vor.u32 %v10275_v11, %v8206_v63 }
 0x2d8   :  { %6052 = vmatpush.bf16.msra.mxu1 %v8417_v59  ;;  %6065 = vmatpush.bf16.msra.mxu2 %v8545_v62  ;;  %v8625_v59 = vor.u32 %v10379_v53, %v8622_v12  ;;  %v8350_v62 = vld [vmem:[%s15892_s1 + $0xe38] sm:$0xf0]  ;;  %v10307_v61 = vld [vmem:[%s15892_s1 + $0xe0c] sm:$0xf] }
 0x2d9   :  { %6078 = vmatpush.bf16.msra.mxu3 %v8673_v46  ;;  %v8606_v46 = vld [vmem:[%s15892_s1 + $0x1038] sm:$0xf0]  ;;  %v8353_v10 = vor.u32 %v10311_v45, %v8350_v62  ;;  %v10431_v27 = vld [vmem:[%s15892_s1 + $0x11ec] sm:$0xf] }
 0x2da   :  { %v8609_v51 = vor.u32 %v10375_v3, %v8606_v46  ;;  %v8590_v34 = vld [vmem:[%s15892_s1 + $0x1018] sm:$0xf0]  ;;  %v5814_v0 = vpop.f32.mrf.mxu2  ;;  %v10463_v31 = vld [vmem:[%s15892_s1 + $0x12ec] sm:$0xf] }
 0x2db   :  { %6040 = vmatpush.bf16.msra.mxu0 %v8273_v25  ;;  %v10339_v25 = vld [vmem:[%s15892_s1 + $0xf0c] sm:$0xf]  ;;  %v8958_v32 = vld [vmem:[%s15892_s1 + $0x12f8] sm:$0xf0] }
 0x2dc   :  { %6053 = vmatpush.bf16.msra.mxu1 %v8401_v26  ;;  %6066 = vmatpush.bf16.msra.mxu2 %v8529_v30  ;;  %v8462_v26 = vld [vmem:[%s15892_s1 + $0xf18] sm:$0xf0]  ;;  %v10371_v30 = vld [vmem:[%s15892_s1 + $0x100c] sm:$0xf] }
 0x2dd   :  { %6079 = vmatpush.bf16.msra.mxu3 %v8657_v28  ;;  %v8830_v28 = vld [vmem:[%s15892_s1 + $0x11f8] sm:$0xf0]  ;;  %v5827_v21 = vpop.f32.mrf.mxu3  ;;  %v10495_v33 = vld [vmem:[%s15892_s1 + $0x13ec] sm:$0xf]  ;;  %v8593_v22 = vor.u32 %v10371_v30, %v8590_v34 }
 0x2de   :  { %v9086_v35 = vld [vmem:[%s15892_s1 + $0x13f8] sm:$0xf0]  ;;  %v8833_v36 = vor.u32 %v10431_v27, %v8830_v28  ;;  %v10427_v44 = vld [vmem:[%s15892_s1 + $0x11cc] sm:$0xf] }
 0x2df   :  { %6041 = vmatpush.bf16.msra.mxu0 %v8257_v37  ;;  %v8337_v37 = vor.u32 %v10307_v61, %v8334_v29  ;;  %v9214_v40 = vld [vmem:[%s15892_s1 + $0x14f8] sm:$0xf0]  ;;  %v9089_v2 = vor.u32 %v10495_v33, %v9086_v35  ;;  %v10459_v43 = vld [vmem:[%s15892_s1 + $0x12cc] sm:$0xf] }
 0x2e0   :  { %6054 = vmatpush.bf16.msra.mxu1 %v8385_v38  ;;  %6067 = vmatpush.bf16.msra.mxu2 %v8513_v39  ;;  %v8465_v38 = vor.u32 %v10339_v25, %v8462_v26  ;;  %v10527_v39 = vld [vmem:[%s15892_s1 + $0x14ec] sm:$0xf]  ;;  %v8814_v50 = vld [vmem:[%s15892_s1 + $0x11d8] sm:$0xf0] }
 0x2e1   :  { %6080 = vmatpush.bf16.msra.mxu3 %v8641_v42  ;;  %v8961_v42 = vor.u32 %v10463_v31, %v8958_v32  ;;  %v9217_v60 = vor.u32 %v10527_v39, %v9214_v40  ;;  %v8942_v1 = vld [vmem:[%s15892_s1 + $0x12d8] sm:$0xf0]  ;;  %v10491_v53 = vld [vmem:[%s15892_s1 + $0x13cc] sm:$0xf]  ;;  %v8817_v55 = vor.u32 %v10427_v44, %v8814_v50 }
 0x2e2   :  { %v9070_v12 = vld [vmem:[%s15892_s1 + $0x13d8] sm:$0xf0]  ;;  %v10523_v41 = vld [vmem:[%s15892_s1 + $0x14cc] sm:$0xf] }
 0x2e3   :  { %6042 = vmatpush.bf16.msra.mxu0 %v8241_v54  ;;  %v9198_v54 = vld [vmem:[%s15892_s1 + $0x14d8] sm:$0xf0]  ;;  %v10423_v16 = vld [vmem:[%s15892_s1 + $0x11ac] sm:$0xf] }
 0x2e4   :  { %6055 = vmatpush.bf16.msra.mxu1 %v8369_v56  ;;  %6068 = vmatpush.bf16.msra.mxu2 %v8497_v57  ;;  %v8945_v56 = vor.u32 %v10459_v43, %v8942_v1  ;;  %v9073_v57 = vor.u32 %v10491_v53, %v9070_v12  ;;  %v8798_v58 = vld [vmem:[%s15892_s1 + $0x11b8] sm:$0xf0]  ;;  %v10455_v45 = vld [vmem:[%s15892_s1 + $0x12ac] sm:$0xf] }
 0x2e5   :  { %6081 = vmatpush.bf16.msra.mxu3 %v8625_v59  ;;  %v9201_v59 = vor.u32 %v10523_v41, %v9198_v54  ;;  %v8926_v62 = vld [vmem:[%s15892_s1 + $0x12b8] sm:$0xf0]  ;;  %v10487_v15 = vld [vmem:[%s15892_s1 + $0x13ac] sm:$0xf]  ;;  %v8801_v46 = vor.u32 %v10423_v16, %v8798_v58 }
 0x2e6   :  { %v9054_v17 = vld [vmem:[%s15892_s1 + $0x13b8] sm:$0xf0]  ;;  %v10451_v63 = vld [vmem:[%s15892_s1 + $0x128c] sm:$0xf] }
 0x2e7   :  { %6043 = vmatpush.bf16.msra.mxu0 %v8225_v8  ;;  %v9182_v3 = vld [vmem:[%s15892_s1 + $0x14b8] sm:$0xf0]  ;;  %v8929_v8 = vor.u32 %v10455_v45, %v8926_v62  ;;  %v9057_v11 = vor.u32 %v10487_v15, %v9054_v17  ;;  %v10515_v25 = vld [vmem:[%s15892_s1 + $0x148c] sm:$0xf] }
 0x2e8   :  { %6056 = vmatpush.bf16.msra.mxu1 %v8353_v10  ;;  %6069 = vmatpush.bf16.msra.mxu2 %v8481_v20  ;;  %v8910_v10 = vld [vmem:[%s15892_s1 + $0x1298] sm:$0xf0]  ;;  %v10483_v20 = vld [vmem:[%s15892_s1 + $0x138c] sm:$0xf] }
 0x2e9   :  { %6082 = vmatpush.bf16.msra.mxu3 %v8609_v51  ;;  %v9038_v61 = vld [vmem:[%s15892_s1 + $0x1398] sm:$0xf0]  ;;  %v8913_v0 = vor.u32 %v10451_v63, %v8910_v10  ;;  %v10415_v28 = vld [vmem:[%s15892_s1 + $0x116c] sm:$0xf] }
 0x2ea   :  { %v9166_v51 = vld [vmem:[%s15892_s1 + $0x1498] sm:$0xf0]  ;;  %v9041_v27 = vor.u32 %v10483_v20, %v9038_v61  ;;  %v10447_v21 = vld [vmem:[%s15892_s1 + $0x126c] sm:$0xf] }
 0x2eb   :  { %6044 = vmatpush.bf16.msra.mxu0 %v8209_v24  ;;  %v5838_v29 = vpop.f32.mrf.mxu0  ;;  %v8766_v31 = vld [vmem:[%s15892_s1 + $0x1178] sm:$0xf0]  ;;  %v10479_v33 = vld [vmem:[%s15892_s1 + $0x136c] sm:$0xf] }
 0x2ec   :  { %6057 = vmatpush.bf16.msra.mxu1 %v8337_v37  ;;  %6070 = vmatpush.bf16.msra.mxu2 %v8465_v38  ;;  %v5839_v26 = vadd.f32 %v5838_v29, %v15329_v52  ;;  %v9169_v52 = vor.u32 %v10515_v25, %v9166_v51  ;;  %v8894_v32 = vld [vmem:[%s15892_s1 + $0x1278] sm:$0xf0]  ;;  %v10511_v37 = vld [vmem:[%s15892_s1 + $0x146c] sm:$0xf]  ;;  %v8769_v39 = vor.u32 %v10415_v28, %v8766_v31 }
 0x2ed   :  { %6083 = vmatpush.bf16.msra.mxu3 %v8593_v22  ;;  %v9022_v35 = vld [vmem:[%s15892_s1 + $0x1378] sm:$0xf0]  ;;  %v8897_v40 = vor.u32 %v10447_v21, %v8894_v32  ;;  %v10507_v12 = vld [vmem:[%s15892_s1 + $0x144c] sm:$0xf] }
 0x2ee   :  { %6045 = vmatmul.bf16.vlgmr.msra.gmra.mxu0 %v11581_v48  ;;  %v10519_v48 = vld [vmem:[%s15892_s1 + $0x14ac] sm:$0xf]  ;;  %v5851_v34 = vpop.f32.mrf.mxu1  ;;  %v9150_v38 = vld [vmem:[%s15892_s1 + $0x1478] sm:$0xf0]  ;;  %v9025_v22 = vor.u32 %v10479_v33, %v9022_v35 }
 0x2ef   :  { %6089 = vmatpush.bf16.msrb.mxu0 %v8833_v36  ;;  %6071 = vmatmul.bf16.vlgmr.msra.gmra.mxu2 %v11583_v49  ;;  %v8782_v49 = vld [vmem:[%s15892_s1 + $0x1198] sm:$0xf0]  ;;  %v5852_v24 = vadd.f32 %v5851_v34, %v5839_v26  ;;  %v10411_v36 = vld [vmem:[%s15892_s1 + $0x114c] sm:$0xf]  ;;  %v9153_v44 = vor.u32 %v10511_v37, %v9150_v38 }
 0x2f0   :  { %6102 = vmatpush.bf16.msrb.mxu1 %v8961_v42  ;;  %6115 = vmatpush.bf16.msrb.mxu2 %v9089_v2  ;;  %v8750_v42 = vld [vmem:[%s15892_s1 + $0x1158] sm:$0xf0]  ;;  %v10443_v2 = vld [vmem:[%s15892_s1 + $0x124c] sm:$0xf] }
 0x2f1   :  { %6128 = vmatpush.bf16.msrb.mxu3 %v9217_v60  ;;  %6058 = vmatmul.bf16.vlgmr.msra.gmra.mxu1 %v11579_v47  ;;  %v10419_v47 = vld [vmem:[%s15892_s1 + $0x118c] sm:$0xf]  ;;  %v8878_v43 = vld [vmem:[%s15892_s1 + $0x1258] sm:$0xf0] }
 0x2f2   :  { %6084 = vmatmul.bf16.vlgmr.msra.gmra.mxu3 %v11814_v9  ;;  %v9185_v9 = vor.u32 %v10519_v48, %v9182_v3  ;;  %v8785_v30 = vor.u32 %v10419_v47, %v8782_v49  ;;  %v5864_v50 = vpop.f32.mrf.mxu2  ;;  %v10475_v60 = vld [vmem:[%s15892_s1 + $0x134c] sm:$0xf]  ;;  %v9006_v1 = vld [vmem:[%s15892_s1 + $0x1358] sm:$0xf0]  ;;  %v8881_v16 = vor.u32 %v10443_v2, %v8878_v43 }
 0x2f3   :  { %6090 = vmatpush.bf16.msrb.mxu0 %v8817_v55  ;;  %v15522_v53 = vadd.f32 %v5864_v50, %v5852_v24  ;;  %v9134_v41 = vld [vmem:[%s15892_s1 + $0x1458] sm:$0xf0]  ;;  %v5840_v55 = vpop.f32.mrf.mxu0  ;;  %v9009_v58 = vor.u32 %v10475_v60, %v9006_v1  ;;  %v10407_v45 = vld [vmem:[%s15892_s1 + $0x112c] sm:$0xf] }
 0x2f4   :  { %6103 = vmatpush.bf16.msrb.mxu1 %v8945_v56  ;;  %6116 = vmatpush.bf16.msrb.mxu2 %v9073_v57  ;;  %v8753_v56 = vor.u32 %v10411_v36, %v8750_v42  ;;  %v10439_v62 = vld [vmem:[%s15892_s1 + $0x122c] sm:$0xf]  ;;  %v9137_v15 = vor.u32 %v10507_v12, %v9134_v41  ;;  %v8862_v17 = vld [vmem:[%s15892_s1 + $0x1238] sm:$0xf0] }
 0x2f5   :  { %6129 = vmatpush.bf16.msrb.mxu3 %v9201_v59  ;;  %v15530_v54 = vpop.f32.mrf.mxu3  ;;  %v8734_v59 = vld [vmem:[%s15892_s1 + $0x1138] sm:$0xf0]  ;;  %v10471_v48 = vld [vmem:[%s15892_s1 + $0x132c] sm:$0xf]  ;;  %v8865_v63 = vor.u32 %v10439_v62, %v8862_v17 }
 0x2f6   :  { %v5853_v57 = vpop.f32.mrf.mxu1  ;;  %v8990_v3 = vld [vmem:[%s15892_s1 + $0x1338] sm:$0xf0]  ;;  %v10403_v47 = vld [vmem:[%s15892_s1 + $0x110c] sm:$0xf] }
 0x2f7   :  { %6091 = vmatpush.bf16.msrb.mxu0 %v8801_v46  ;;  %v10503_v46 = vld [vmem:[%s15892_s1 + $0x142c] sm:$0xf]  ;;  %v8718_v49 = vld [vmem:[%s15892_s1 + $0x1118] sm:$0xf0] }
 0x2f8   :  { %6104 = vmatpush.bf16.msrb.mxu1 %v8929_v8  ;;  %6117 = vmatpush.bf16.msrb.mxu2 %v9057_v11  ;;  %v9118_v8 = vld [vmem:[%s15892_s1 + $0x1438] sm:$0xf0]  ;;  %v8737_v11 = vor.u32 %v10407_v45, %v8734_v59  ;;  %v10435_v10 = vld [vmem:[%s15892_s1 + $0x120c] sm:$0xf]  ;;  %v8721_v31 = vor.u32 %v10403_v47, %v8718_v49  ;;  %v10696_v45 = vld [vmem:[%s15893_s2] sm:$0xf] }
 0x2f9   :  { %6130 = vmatpush.bf16.msrb.mxu3 %v9185_v9  ;;  %v8993_v9 = vor.u32 %v10471_v48, %v8990_v3  ;;  %v8846_v20 = vld [vmem:[%s15892_s1 + $0x1218] sm:$0xf0]  ;;  %v10467_v61 = vld [vmem:[%s15892_s1 + $0x130c] sm:$0xf]  ;;  %v9121_v29 = vor.u32 %v10503_v46, %v9118_v8  ;;  %v830_v59 = vperm.slane %v10696_v45, 3 }
 0x2fa   :  { %v8974_v25 = vld [vmem:[%s15892_s1 + $0x1318] sm:$0xf0]  ;;  %v10499_v51 = vld [vmem:[%s15892_s1 + $0x140c] sm:$0xf]  ;;  %v8849_v32 = vor.u32 %v10435_v10, %v8846_v20 }
 0x2fb   :  { %6092 = vmatpush.bf16.msrb.mxu0 %v8785_v30  ;;  %v9102_v26 = vld [vmem:[%s15892_s1 + $0x1418] sm:$0xf0]  ;;  %v5866_v30 = vpop.f32.mrf.mxu2  ;;  %v10559_v34 = vld [vmem:[%s15892_s1 + $0x15ec] sm:$0xf]  ;;  %v8977_v33 = vor.u32 %v10467_v61, %v8974_v25 }
 0x2fc   :  { %6105 = vmatpush.bf16.msrb.mxu1 %v8913_v0  ;;  %6118 = vmatpush.bf16.msrb.mxu2 %v9041_v27  ;;  %v9342_v0 = vld [vmem:[%s15892_s1 + $0x15f8] sm:$0xf0]  ;;  %v10591_v27 = vld [vmem:[%s15892_s1 + $0x16ec] sm:$0xf]  ;;  %v9105_v38 = vor.u32 %v10499_v51, %v9102_v26 }
 0x2fd   :  { %6131 = vmatpush.bf16.msrb.mxu3 %v9169_v52  ;;  %v5879_v28 = vpop.f32.mrf.mxu3  ;;  %v9470_v21 = vld [vmem:[%s15892_s1 + $0x16f8] sm:$0xf0]  ;;  %v10623_v52 = vld [vmem:[%s15892_s1 + $0x17ec] sm:$0xf] }
 0x2fe   :  { %v9598_v24 = vld [vmem:[%s15892_s1 + $0x17f8] sm:$0xf0]  ;;  %v10655_v35 = vld [vmem:[%s15892_s1 + $0x18ec] sm:$0xf] }
 0x2ff   :  { %6093 = vmatpush.bf16.msrb.mxu0 %v8769_v39  ;;  %v9726_v37 = vld [vmem:[%s15892_s1 + $0x18f8] sm:$0xf0]  ;;  %v9345_v39 = vor.u32 %v10559_v34, %v9342_v0  ;;  %v10555_v36 = vld [vmem:[%s15892_s1 + $0x15cc] sm:$0xf] }
 0x300   :  { %6106 = vmatpush.bf16.msrb.mxu1 %v8897_v40  ;;  %6119 = vmatpush.bf16.msrb.mxu2 %v9025_v22  ;;  %v9473_v40 = vor.u32 %v10591_v27, %v9470_v21  ;;  %v9601_v22 = vor.u32 %v10623_v52, %v9598_v24  ;;  %v9326_v42 = vld [vmem:[%s15892_s1 + $0x15d8] sm:$0xf0]  ;;  %v10587_v2 = vld [vmem:[%s15892_s1 + $0x16cc] sm:$0xf] }
 0x301   :  { %6132 = vmatpush.bf16.msrb.mxu3 %v9153_v44  ;;  %v9729_v44 = vor.u32 %v10655_v35, %v9726_v37  ;;  %v9454_v50 = vld [vmem:[%s15892_s1 + $0x16d8] sm:$0xf0]  ;;  %v10619_v43 = vld [vmem:[%s15892_s1 + $0x17cc] sm:$0xf]  ;;  %v9329_v41 = vor.u32 %v10555_v36, %v9326_v42 }
 0x302   :  { %v9582_v60 = vld [vmem:[%s15892_s1 + $0x17d8] sm:$0xf0]  ;;  %v10651_v1 = vld [vmem:[%s15892_s1 + $0x18cc] sm:$0xf] }
 0x303   :  { %6094 = vmatpush.bf16.msrb.mxu0 %v8753_v56  ;;  %v9710_v12 = vld [vmem:[%s15892_s1 + $0x18d8] sm:$0xf0]  ;;  %v10551_v55 = vld [vmem:[%s15892_s1 + $0x15ac] sm:$0xf]  ;;  %v9457_v56 = vor.u32 %v10587_v2, %v9454_v50  ;;  %v9585_v57 = vor.u32 %v10619_v43, %v9582_v60 }
 0x304   :  { %6107 = vmatpush.bf16.msrb.mxu1 %v8881_v16  ;;  %6120 = vmatpush.bf16.msrb.mxu2 %v9009_v58  ;;  %v9310_v16 = vld [vmem:[%s15892_s1 + $0x15b8] sm:$0xf0]  ;;  %v10583_v58 = vld [vmem:[%s15892_s1 + $0x16ac] sm:$0xf]  ;;  %v9713_v62 = vor.u32 %v10651_v1, %v9710_v12 }
 0x305   :  { %6133 = vmatpush.bf16.msrb.mxu3 %v9137_v15  ;;  %v9438_v15 = vld [vmem:[%s15892_s1 + $0x16b8] sm:$0xf0]  ;;  %v10615_v17 = vld [vmem:[%s15892_s1 + $0x17ac] sm:$0xf]  ;;  %v9313_v46 = vor.u32 %v10551_v55, %v9310_v16 }
 0x306   :  { %v9566_v48 = vld [vmem:[%s15892_s1 + $0x17b8] sm:$0xf0]  ;;  %v9441_v8 = vor.u32 %v10583_v58, %v9438_v15  ;;  %v10643_v10 = vld [vmem:[%s15892_s1 + $0x188c] sm:$0xf] }
 0x307   :  { %6095 = vmatpush.bf16.msrb.mxu0 %v8737_v11  ;;  %v9694_v3 = vld [vmem:[%s15892_s1 + $0x18b8] sm:$0xf0]  ;;  %v9569_v11 = vor.u32 %v10615_v17, %v9566_v48  ;;  %v10543_v26 = vld [vmem:[%s15892_s1 + $0x156c] sm:$0xf] }
 0x308   :  { %6108 = vmatpush.bf16.msrb.mxu1 %v8865_v63  ;;  %6121 = vmatpush.bf16.msrb.mxu2 %v8993_v9  ;;  %v9294_v47 = vld [vmem:[%s15892_s1 + $0x1598] sm:$0xf0]  ;;  %v10575_v34 = vld [vmem:[%s15892_s1 + $0x166c] sm:$0xf] }
 0x309   :  { %6134 = vmatpush.bf16.msrb.mxu3 %v9121_v29  ;;  %v9422_v63 = vld [vmem:[%s15892_s1 + $0x1698] sm:$0xf0]  ;;  %v10607_v21 = vld [vmem:[%s15892_s1 + $0x176c] sm:$0xf] }
 0x30a   :  { %v9550_v9 = vld [vmem:[%s15892_s1 + $0x1798] sm:$0xf0]  ;;  %v10639_v24 = vld [vmem:[%s15892_s1 + $0x186c] sm:$0xf] }
 0x30b   :  { %6096 = vmatpush.bf16.msrb.mxu0 %v8721_v31  ;;  %v9678_v20 = vld [vmem:[%s15892_s1 + $0x1898] sm:$0xf0]  ;;  %v5890_v29 = vpop.f32.mrf.mxu0  ;;  %v10635_v1 = vld [vmem:[%s15892_s1 + $0x184c] sm:$0xf] }
 0x30c   :  { %6109 = vmatpush.bf16.msrb.mxu1 %v8849_v32  ;;  %6122 = vmatpush.bf16.msrb.mxu2 %v8977_v33  ;;  %v9278_v30 = vld [vmem:[%s15892_s1 + $0x1578] sm:$0xf0]  ;;  %v9681_v28 = vor.u32 %v10643_v10, %v9678_v20  ;;  %v10535_v58 = vld [vmem:[%s15892_s1 + $0x152c] sm:$0xf] }
 0x30d   :  { %6135 = vmatpush.bf16.msrb.mxu3 %v9105_v38  ;;  %v9406_v31 = vld [vmem:[%s15892_s1 + $0x1678] sm:$0xf0]  ;;  %v9281_v35 = vor.u32 %v10543_v26, %v9278_v30  ;;  %v10599_v48 = vld [vmem:[%s15892_s1 + $0x172c] sm:$0xf] }
 0x30e   :  { %6097 = vmatmul.bf16.vlgmr.msrb.gmra.mxu0 %v11824_v14  ;;  %v10647_v14 = vld [vmem:[%s15892_s1 + $0x18ac] sm:$0xf]  ;;  %v5903_v27 = vpop.f32.mrf.mxu1  ;;  %v9534_v52 = vld [vmem:[%s15892_s1 + $0x1778] sm:$0xf0]  ;;  %v9409_v37 = vor.u32 %v10575_v34, %v9406_v31  ;;  %v10672_v31 = vld [vmem:[%s15894_s3 + $0x70] sm:$0xff] }
 0x30f   :  { %6141 = vmatpush.bf16.msra.mxu0 %v9345_v39  ;;  %6123 = vmatmul.bf16.vlgmr.msrb.gmra.mxu2 %v11826_v18  ;;  %v5878_v18 = vadd.f32 %v15530_v54, %v830_v59  ;;  %v9697_v49 = vor.u32 %v10647_v14, %v9694_v3  ;;  %v10611_v54 = vld [vmem:[%s15892_s1 + $0x178c] sm:$0xf]  ;;  %v9662_v32 = vld [vmem:[%s15892_s1 + $0x1878] sm:$0xf0]  ;;  %v9537_v38 = vor.u32 %v10607_v21, %v9534_v52  ;;  %v10680_v21 = vld [vmem:[%s15894_s3 + $0xb0] sm:$0xff] }
 0x310   :  { %6154 = vmatpush.bf16.msra.mxu1 %v9473_v40  ;;  %6167 = vmatpush.bf16.msra.mxu2 %v9601_v22  ;;  %v9553_v51 = vor.u32 %v10611_v54, %v9550_v9  ;;  %v10539_v39 = vld [vmem:[%s15892_s1 + $0x154c] sm:$0xf]  ;;  %v9262_v40 = vld [vmem:[%s15892_s1 + $0x1558] sm:$0xf0]  ;;  %v9665_v42 = vor.u32 %v10639_v24, %v9662_v32  ;;  %v10697_v52 = vld [vmem:[#allocation1] sm:$0xff] }
 0x311   :  { %6180 = vmatpush.bf16.msra.mxu3 %v9729_v44  ;;  %6110 = vmatmul.bf16.vlgmr.msrb.gmra.mxu1 %v11822_v13  ;;  %v10547_v13 = vld [vmem:[%s15892_s1 + $0x158c] sm:$0xf]  ;;  %v5891_v0 = vadd.f32 %v5890_v29, %v5878_v18  ;;  %v9390_v2 = vld [vmem:[%s15892_s1 + $0x1658] sm:$0xf0] }
 0x312   :  { %6136 = vmatmul.bf16.vlgmr.msrb.gmra.mxu3 %v11991_v4  ;;  %v10579_v4 = vld [vmem:[%s15892_s1 + $0x168c] sm:$0xf]  ;;  %v9297_v61 = vor.u32 %v10547_v13, %v9294_v47  ;;  %v5916_v36 = vpop.f32.mrf.mxu2  ;;  %v9518_v50 = vld [vmem:[%s15892_s1 + $0x1758] sm:$0xf0] }
 0x313   :  { %6142 = vmatpush.bf16.msra.mxu0 %v9329_v41  ;;  %v9425_v25 = vor.u32 %v10579_v4, %v9422_v63  ;;  %v5904_v33 = vadd.f32 %v5903_v27, %v5891_v0  ;;  %v10571_v22 = vld [vmem:[%s15892_s1 + $0x164c] sm:$0xf]  ;;  %v9646_v12 = vld [vmem:[%s15892_s1 + $0x1858] sm:$0xf0]  ;;  %v9265_v41 = vor.u32 %v10539_v39, %v9262_v40 }
 0x314   :  { %6155 = vmatpush.bf16.msra.mxu1 %v9457_v56  ;;  %6168 = vmatpush.bf16.msra.mxu2 %v9585_v57  ;;  %v10603_v44 = vld [vmem:[%s15892_s1 + $0x174c] sm:$0xf]  ;;  %v5892_v56 = vpop.f32.mrf.mxu0  ;;  %v9393_v57 = vor.u32 %v10571_v22, %v9390_v2  ;;  %v9246_v45 = vld [vmem:[%s15892_s1 + $0x1538] sm:$0xf0]  ;;  %v9649_v15 = vor.u32 %v10635_v1, %v9646_v12  ;;  %v10668_v12 = vld [vmem:[%s15894_s3 + $0x50] sm:$0xff] }
 0x315   :  { %6181 = vmatpush.bf16.msra.mxu3 %v9713_v62  ;;  %v5917_v43 = vadd.f32 %v5916_v36, %v5904_v33  ;;  %v5929_v60 = vpop.f32.mrf.mxu3  ;;  %v9521_v16 = vor.u32 %v10603_v44, %v9518_v50  ;;  %v10567_v59 = vld [vmem:[%s15892_s1 + $0x162c] sm:$0xf]  ;;  %v9374_v17 = vld [vmem:[%s15892_s1 + $0x1638] sm:$0xf0]  ;;  %v10662_v33 = vld [vmem:[%s15894_s3 + $0x20] sm:$0xff] }
 0x316   :  { %v5905_v62 = vpop.f32.mrf.mxu1  ;;  %v9502_v14 = vld [vmem:[%s15892_s1 + $0x1738] sm:$0xf0]  ;;  %v10631_v3 = vld [vmem:[%s15892_s1 + $0x182c] sm:$0xf] }
 0x317   :  { %6143 = vmatpush.bf16.msra.mxu0 %v9313_v46  ;;  %v15732_v55 = vadd.f32 %v5929_v60, %v5917_v43  ;;  %v9630_v46 = vld [vmem:[%s15892_s1 + $0x1838] sm:$0xf0]  ;;  %v9505_v18 = vor.u32 %v10599_v48, %v9502_v14  ;;  %v10531_v13 = vld [vmem:[%s15892_s1 + $0x150c] sm:$0xf]  ;;  %v10660_v43 = vld [vmem:[%s15894_s3 + $0x10] sm:$0xff]  ;;  %v6195_v48 = vmax.f32 %v15522_v53, 0.0 }
 0x318   :  { %6156 = vmatpush.bf16.msra.mxu1 %v9441_v8  ;;  %6169 = vmatpush.bf16.msra.mxu2 %v9569_v11  ;;  %v9249_v8 = vor.u32 %v10535_v58, %v9246_v45  ;;  %v9377_v11 = vor.u32 %v10567_v59, %v9374_v17  ;;  %v9230_v47 = vld [vmem:[%s15892_s1 + $0x1518] sm:$0xf0]  ;;  %v10563_v4 = vld [vmem:[%s15892_s1 + $0x160c] sm:$0xf]  ;;  %v9633_v63 = vor.u32 %v10631_v3, %v9630_v46  ;;  %v10658_v45 = vld [vmem:[%s15894_s3] sm:$0xff]  ;;  %v6193_v59 = vmax.f32 %v13087_v19, 0.0 }
 0x319   :  { %6182 = vmatpush.bf16.msra.mxu3 %v9697_v49  ;;  %v9358_v54 = vld [vmem:[%s15892_s1 + $0x1618] sm:$0xf0]  ;;  %v10595_v9 = vld [vmem:[%s15892_s1 + $0x170c] sm:$0xf]  ;;  %v10666_v62 = vld [vmem:[%s15894_s3 + $0x40] sm:$0xff]  ;;  %v6194_v17 = vmax.f32 %v14291_v23, 0.0  ;;  %v6199_v19 = vpack.c.bf16 %v6195_v48, %v6195_v48 }
 0x31a   :  { %v5918_v49 = vpop.f32.mrf.mxu2  ;;  %v9486_v10 = vld [vmem:[%s15892_s1 + $0x1718] sm:$0xf0]  ;;  %v10663_v24 = vld [vmem:[%s15894_s3 + $0x28] sm:$0xff]  ;;  %v6197_v14 = vpack.c.bf16 %v6193_v59, %v6193_v59 }
 0x31b   :  { %6144 = vmatpush.bf16.msra.mxu0 %v9297_v61  ;;  %v10627_v61 = vld [vmem:[%s15892_s1 + $0x180c] sm:$0xf]  ;;  %v9614_v29 = vld [vmem:[%s15892_s1 + $0x1818] sm:$0xf0]  ;;  %v9489_v26 = vor.u32 %v10595_v9, %v9486_v10  ;;  %v6198_v3 = vpack.c.bf16 %v6194_v17, %v6194_v17 }
 0x31c   :  { %6157 = vmatpush.bf16.msra.mxu1 %v9425_v25  ;;  %6170 = vmatpush.bf16.msra.mxu2 %v9553_v51  ;;  %v9233_v25 = vor.u32 %v10531_v13, %v9230_v47  ;;  %v9361_v51 = vor.u32 %v10563_v4, %v9358_v54  ;;  %v9617_v30 = vor.u32 %v10627_v61, %v9614_v29  ;;  %v10665_v34 = vld [vmem:[%s15894_s3 + $0x38] sm:$0xff]  ;;  %v10671_v32 = vld [vmem:[%s15894_s3 + $0x68] sm:$0xff] }
 0x31d   :  { %6183 = vmatpush.bf16.msra.mxu3 %v9681_v28  ;;  %v5931_v20 = vpop.f32.mrf.mxu3  ;;  %v10673_v0 = vld [vmem:[%s15894_s3 + $0x78] sm:$0xff]  ;;  %v10664_v28 = vld [vmem:[%s15894_s3 + $0x30] sm:$0xff]  ;;  %v10667_v56 = vld [vmem:[%s15894_s3 + $0x48] sm:$0xff] }
 0x31e   :  { %v10681_v27 = vld [vmem:[%s15894_s3 + $0xb8] sm:$0xff] }
 0x31f   :  { %6145 = vmatpush.bf16.msra.mxu0 %v9281_v35  ;;  %v10661_v40 = vld [vmem:[%s15894_s3 + $0x18] sm:$0xff] }
 0x320   :  { %6158 = vmatpush.bf16.msra.mxu1 %v9409_v37  ;;  %6171 = vmatpush.bf16.msra.mxu2 %v9537_v38  ;;  %v10670_v37 = vld [vmem:[%s15894_s3 + $0x60] sm:$0xff]  ;;  %v10669_v22 = vld [vmem:[%s15894_s3 + $0x58] sm:$0xff] }
 0x321   :  { %6184 = vmatpush.bf16.msra.mxu3 %v9665_v42  ;;  %v10678_v38 = vld [vmem:[%s15894_s3 + $0xa0] sm:$0xff]  ;;  %v10677_v36 = vld [vmem:[%s15894_s3 + $0x98] sm:$0xff] }
 0x323   :  { %6146 = vmatpush.bf16.msra.mxu0 %v9265_v41  ;;  %v10676_v41 = vld [vmem:[%s15894_s3 + $0x90] sm:$0xff] }
 0x324   :  { %6159 = vmatpush.bf16.msra.mxu1 %v9393_v57  ;;  %6172 = vmatpush.bf16.msra.mxu2 %v9521_v16  ;;  %v10675_v57 = vld [vmem:[%s15894_s3 + $0x88] sm:$0xff] }
 0x325   :  { %6185 = vmatpush.bf16.msra.mxu3 %v9649_v15  ;;  %v10674_v15 = vld [vmem:[%s15894_s3 + $0x80] sm:$0xff] }
 0x327   :  { %6147 = vmatpush.bf16.msra.mxu0 %v9249_v8 }
 0x328   :  { %6160 = vmatpush.bf16.msra.mxu1 %v9377_v11  ;;  %6173 = vmatpush.bf16.msra.mxu2 %v9505_v18 }
 0x329   :  { %6186 = vmatpush.bf16.msra.mxu3 %v9633_v63 }
 0x32b   :  { %6148 = vmatpush.bf16.msra.mxu0 %v9233_v25  ;;  %v10689_v25 = vld [vmem:[%s15894_s3 + $0xf8] sm:$0xff] }
 0x32c   :  { %6161 = vmatpush.bf16.msra.mxu1 %v9361_v51  ;;  %6174 = vmatpush.bf16.msra.mxu2 %v9489_v26  ;;  %v10688_v26 = vld [vmem:[%s15894_s3 + $0xf0] sm:$0xff] }
 0x32d   :  { %6187 = vmatpush.bf16.msra.mxu3 %v9617_v30  ;;  %v10687_v30 = vld [vmem:[%s15894_s3 + $0xe8] sm:$0xff] }
 0x32e   :  { %6149 = vmatmul.bf16.vlgmr.msra.gmra.mxu0 %v11995_v6  ;;  %v10679_v6 = vld [vmem:[%s15894_s3 + $0xa8] sm:$0xff]  ;;  %v5955_v35 = vpop.f32.mrf.mxu1 }
 0x32f   :  { %6461 = vmatpush.bf16.msrb.mxu0 %v10665_v34  ;;  %6162 = vmatmul.bf16.vlgmr.msra.gmra.mxu1 %v11993_v5  ;;  %v5942_v5 = vpop.f32.mrf.mxu0 }
 0x330   :  { %6474 = vmatpush.bf16.msrb.mxu1 %v10673_v0  ;;  %6487 = vmatpush.bf16.msrb.mxu2 %v10681_v27  ;;  %v10686_v27 = vld [vmem:[%s15894_s3 + $0xe0] sm:$0xff] }
 0x331   :  { %6175 = vmatmul.bf16.vlgmr.msra.gmra.mxu2 %v11997_v7  ;;  %6188 = vmatmul.bf16.vlgmr.msra.gmra.mxu3 %v10697_v52  ;;  %v5943_v7 = vadd.f32 %v5942_v5, %v15732_v55  ;;  %v10659_v55 = vld [vmem:[%s15894_s3 + $0x8] sm:$0xff]  ;;  %v10684_v52 = vld [vmem:[%s15894_s3 + $0xd0] sm:$0xff] }
 0x332   :  { %v5968_v42 = vpop.f32.mrf.mxu2  ;;  %6500 = vmatpush.bf16.msrb.mxu3 %v10689_v25 }
 0x333   :  { %6462 = vmatpush.bf16.msrb.mxu0 %v10664_v28  ;;  %v5956_v39 = vadd.f32 %v5955_v35, %v5943_v7  ;;  %v10685_v28 = vld [vmem:[%s15894_s3 + $0xd8] sm:$0xff]  ;;  %v10682_v35 = vld [vmem:[%s15894_s3 + $0xc0] sm:$0xff] }
 0x334   :  { %6475 = vmatpush.bf16.msrb.mxu1 %v10672_v31  ;;  %6488 = vmatpush.bf16.msrb.mxu2 %v10680_v21 }
 0x335   :  { %v5969_v2 = vadd.f32 %v5968_v42, %v5956_v39  ;;  %v5981_v44 = vpop.f32.mrf.mxu3 }
 0x336   :  { %v5957_v60 = vpop.f32.mrf.mxu1  ;;  %6501 = vmatpush.bf16.msrb.mxu3 %v10688_v26 }
 0x337   :  { %6463 = vmatpush.bf16.msrb.mxu0 %v10663_v24  ;;  %v5944_v50 = vpop.f32.mrf.mxu0  ;;  %v5982_v1 = vadd.f32 %v5981_v44, %v5969_v2  ;;  %v10683_v24 = vld [vmem:[%s15894_s3 + $0xc8] sm:$0xff] }
 0x338   :  { %6476 = vmatpush.bf16.msrb.mxu1 %v10671_v32  ;;  %6489 = vmatpush.bf16.msrb.mxu2 %v10679_v6 }
 0x33a   :  { %v5970_v16 = vpop.f32.mrf.mxu2  ;;  %6502 = vmatpush.bf16.msrb.mxu3 %v10687_v30 }
 0x33b   :  { %6464 = vmatpush.bf16.msrb.mxu0 %v10662_v33 }
 0x33c   :  { %6477 = vmatpush.bf16.msrb.mxu1 %v10670_v37  ;;  %6490 = vmatpush.bf16.msrb.mxu2 %v10678_v38 }
 0x33d   :  { %v5983_v58 = vpop.f32.mrf.mxu3 }
 0x33e   :  { %6503 = vmatpush.bf16.msrb.mxu3 %v10686_v27 }
 0x33f   :  { %6465 = vmatpush.bf16.msrb.mxu0 %v10661_v40 }
 0x340   :  { %6478 = vmatpush.bf16.msrb.mxu1 %v10669_v22  ;;  %6491 = vmatpush.bf16.msrb.mxu2 %v10677_v36 }
 0x342   :  { %6504 = vmatpush.bf16.msrb.mxu3 %v10685_v28 }
 0x343   :  { %6466 = vmatpush.bf16.msrb.mxu0 %v10660_v43 }
 0x344   :  { %6479 = vmatpush.bf16.msrb.mxu1 %v10668_v12  ;;  %6492 = vmatpush.bf16.msrb.mxu2 %v10676_v41 }
 0x346   :  { %6505 = vmatpush.bf16.msrb.mxu3 %v10684_v52 }
 0x347   :  { %6467 = vmatpush.bf16.msrb.mxu0 %v10659_v55 }
 0x348   :  { %6480 = vmatpush.bf16.msrb.mxu1 %v10667_v56  ;;  %6493 = vmatpush.bf16.msrb.mxu2 %v10675_v57 }
 0x34a   :  { %6506 = vmatpush.bf16.msrb.mxu3 %v10683_v24 }
 0x34b   :  { %6468 = vmatpush.bf16.msrb.mxu0 %v10658_v45  ;;  %v5994_v46 = vpop.f32.mrf.mxu0 }
 0x34c   :  { %6481 = vmatpush.bf16.msrb.mxu1 %v10666_v62  ;;  %6494 = vmatpush.bf16.msrb.mxu2 %v10674_v15  ;;  %v5995_v8 = vadd.f32 %v5994_v46, %v5982_v1  ;;  %v10691_v15 = vld [vmem:[%s15895_s4] ss:$0 sm:$0xff] }
 0x34e   :  { %6469 = vmatmul.bf16.vlgmr.msrb.gmra.mxu0 %v6197_v14  ;;  %v6007_v11 = vpop.f32.mrf.mxu1  ;;  %6507 = vmatpush.bf16.msrb.mxu3 %v10682_v35 }
 0x34f   :  { %6482 = vmatmul.bf16.vlgmr.msrb.gmra.mxu1 %v6198_v3  ;;  %6495 = vmatmul.bf16.vlgmr.msrb.gmra.mxu2 %v6199_v19  ;;  %v6008_v18 = vadd.f32 %v6007_v11, %v5995_v8 }
 0x352   :  { %v6020_v13 = vpop.f32.mrf.mxu2 }
 0x353   :  { %v6021_v47 = vadd.f32 %v6020_v13, %v6008_v18  ;;  %v5996_v49 = vpop.f32.mrf.mxu0 }
 0x355   :  { %v6033_v4 = vpop.f32.mrf.mxu3 }
 0x356   :  { %v6009_v23 = vpop.f32.mrf.mxu1  ;;  %v6034_v63 = vadd.f32 %v6033_v4, %v6021_v47 }
 0x35a   :  { %v6022_v53 = vpop.f32.mrf.mxu2 }
 0x35d   :  { %v6035_v54 = vpop.f32.mrf.mxu3 }
 0x36b   :  { %v6046_v9 = vpop.f32.mrf.mxu0 }
 0x36c   :  { %v6047_v6 = vadd.f32 %v6046_v9, %v6034_v63 }
 0x36e   :  { %v6059_v10 = vpop.f32.mrf.mxu1 }
 0x36f   :  { %v6060_v37 = vadd.f32 %v6059_v10, %v6047_v6 }
 0x372   :  { %v6072_v20 = vpop.f32.mrf.mxu2 }
 0x373   :  { %v6048_v29 = vpop.f32.mrf.mxu0  ;;  %v6073_v38 = vadd.f32 %v6072_v20, %v6060_v37 }
 0x375   :  { %v6085_v61 = vpop.f32.mrf.mxu3 }
 0x376   :  { %v6061_v51 = vpop.f32.mrf.mxu1  ;;  %v6086_v22 = vadd.f32 %v6085_v61, %v6073_v38 }
 0x37a   :  { %v6074_v34 = vpop.f32.mrf.mxu2 }
 0x37d   :  { %v6087_v0 = vpop.f32.mrf.mxu3 }
 0x38b   :  { %v6098_v31 = vpop.f32.mrf.mxu0 }
 0x38c   :  { %v6099_v36 = vadd.f32 %v6098_v31, %v6086_v22 }
 0x38e   :  { %v6111_v21 = vpop.f32.mrf.mxu1 }
 0x38f   :  { %v6112_v42 = vadd.f32 %v6111_v21, %v6099_v36 }
 0x392   :  { %v6124_v32 = vpop.f32.mrf.mxu2 }
 0x393   :  { %v6100_v7 = vpop.f32.mrf.mxu0  ;;  %v6125_v2 = vadd.f32 %v6124_v32, %v6112_v42 }
 0x395   :  { %v6137_v5 = vpop.f32.mrf.mxu3 }
 0x396   :  { %v6113_v33 = vpop.f32.mrf.mxu1  ;;  %v6138_v44 = vadd.f32 %v6137_v5, %v6125_v2 }
 0x39a   :  { %v6126_v39 = vpop.f32.mrf.mxu2 }
 0x39d   :  { %v6139_v40 = vpop.f32.mrf.mxu3 }
 0x3ab   :  { %v6150_v50 = vpop.f32.mrf.mxu0 }
 0x3ac   :  { %v6163_v43 = vpop.f32.mrf.mxu1  ;;  %v6151_v60 = vadd.f32 %v6150_v50, %v6138_v44 }
 0x3ae   :  { %v6164_v1 = vadd.f32 %v6163_v43, %v6151_v60 }
 0x3b3   :  { %v6152_v56 = vpop.f32.mrf.mxu0 }
 0x3b4   :  { %v6176_v12 = vpop.f32.mrf.mxu2  ;;  %v6189_v41 = vpop.f32.mrf.mxu3 }
 0x3b5   :  { %v6177_v55 = vadd.f32 %v6176_v12, %v6164_v1  ;;  %v6165_v57 = vpop.f32.mrf.mxu1 }
 0x3b7   :  { %v6190_v16 = vadd.f32 %v6189_v41, %v6177_v55 }
 0x3b9   :  { %v6196_v58 = vmax.f32 %v6190_v16, 0.0 }
 0x3bb   :  { %v6200_v45 = vpack.c.bf16 %v6196_v58, %v6196_v58 }
 0x3bc   :  { %v6178_v59 = vpop.f32.mrf.mxu2  ;;  %v6191_v62 = vpop.f32.mrf.mxu3 }
 0x3bd   :  { %6508 = vmatmul.bf16.vlgmr.msrb.gmra.mxu3 %v6200_v45 }
 0x3cb   :  { %v6470_v17 = vpop.f32.mrf.mxu0 }
 0x3cc   :  { %v6471_v48 = vadd.f32 %v10691_v15, %v6470_v17  ;;  %v6483_v14 = vpop.f32.mrf.mxu1 }
 0x3ce   :  { %v6484_v3 = vadd.f32 %v6483_v14, %v6471_v48 }
 0x3d2   :  { %v6496_v19 = vpop.f32.mrf.mxu2 }
 0x3d3   :  { %v6497_v46 = vadd.f32 %v6496_v19, %v6484_v3  ;;  %v6472_v8 = vpop.f32.mrf.mxu0 }
 0x3d4   :  { %v6485_v11 = vpop.f32.mrf.mxu1 }
 0x3da   :  { %v6498_v18 = vpop.f32.mrf.mxu2 }
 0x440   :  { %v6509_v13 = vpop.f32.mrf.mxu3 }
 0x441   :  { %v6510_v47 = vadd.f32 %v6509_v13, %v6497_v46 }
 0x443   :  { %6513 = vst [vmem:[#allocation2] sm:$0x3] %v6510_v47 }
 0x444   :  { %6524 = dma.vmem_to_hbm [thread:$0]  %s6520_s20, 32, %s6522_s23, [#allocation3]  }
 0x448   :  { %v6511_v4 = vpop.f32.mrf.mxu3 }
 0x449   :  { %10722 = dma.done.wait [#allocation3], 32  }
 0x44a   :  { %10723 = vsyncadd [#allocation3], 4294967264 }
 0x44b   :  { %6529 = vsyncpa [#allocation3], 1 }

</bundles_post_ra>
